<compile_context>
chip_gen: v7x
topology: tpu7x:2x2x1
jax: 0.10.0
libtpu: 0.0.40
codegen_flags: <defaults>
</compile_context>

<pallas_src>
import math

import jax
import jax.numpy as jnp
from jax.experimental import pallas as pl
from jax.experimental.pallas import tpu as pltpu

SELU_ALPHA = 1.6732632423543772848170429916717
SELU_SCALE = 1.0507009873554804934193349852946


def _selu(x):
    return SELU_SCALE * jnp.where(x > 0, x, SELU_ALPHA * (jnp.exp(x) - 1.0))


# ---------------------------------------------------------------------------
# Fused kernel: one-hot embed (folded) -> convs -> SELU -> max-pool -> linear
# ---------------------------------------------------------------------------
def _make_fused_kernel(B_tile, L, F, kernel_sizes):
    def kernel(tok_ref, w_ref, cb_ref, cw_ref, clsb_ref, o_ref):
        # tok_ref : (B_tile*L, 1) int32
        # w_ref   : (V, Ntot) f32      Ntot = sum_k k*F   (embedding folded into conv w)
        # cb_ref  : (1, n_branches*F)  conv biases, concatenated per branch
        # cw_ref  : (n_branches*F, C)  classification weight (in, out)
        # clsb_ref: (1, C)
        # o_ref   : (B_tile, C)
        V, Ntot = w_ref.shape
        BL = B_tile * L

        # --- embedding + all convs as ONE MXU matmul -------------------------
        tok = tok_ref[...]                                              # (BL, 1)
        ids = jax.lax.broadcasted_iota(jnp.int32, (BL, V), 1)
        onehot = (tok == ids).astype(jnp.float32)                       # (BL, V)
        y = jnp.dot(onehot, w_ref[...],
                    preferred_element_type=jnp.float32)                 # (BL, Ntot)
        y3 = y.reshape(B_tile, L, Ntot)                                 # lane dim intact

        cb = cb_ref[...]                                                # (1, nb*F)
        t_idx = jax.lax.broadcasted_iota(jnp.int32, (1, L, F), 1)       # time index

        pooled = []
        off = 0
        for c, k in enumerate(kernel_sizes):
            # shift-after-matmul accumulation over the full L (aligned sublanes)
            acc = jnp.zeros((B_tile, L, F), jnp.float32)
            for j in range(k):
                yj = y3[:, :, off + j * F: off + (j + 1) * F]           # (B_tile, L, F)
                if j:
                    # == jnp.roll(yj, -j, axis=1): acc[:, t] += yj[:, t + j]
                    yj = jnp.concatenate([yj[:, j:, :], yj[:, :j, :]], axis=1)
                acc = acc + yj
            off += k * F

            acc = acc + cb[:, c * F:(c + 1) * F].reshape(1, 1, F)       # conv bias
            acc = _selu(acc)
            # invalid positions (t >= Lo) hold wrapped garbage: mask them out of the max
            Lo = L - k + 1
            acc = jnp.where(t_idx < Lo, acc, -jnp.inf)
            pooled.append(jnp.max(acc, axis=1))                         # (B_tile, F)

        feats = jnp.concatenate(pooled, axis=1)                         # (B_tile, nb*F) lane-dense
        o_ref[...] = (jnp.dot(feats, cw_ref[...],
                              preferred_element_type=jnp.float32)
                      + clsb_ref[...])

    return kernel


# ---------------------------------------------------------------------------
# Full forward (wrapper: weight folding + single pallas_call)
# ---------------------------------------------------------------------------
def deepfam_ablation123_forward(tokens, emb_table, conv_params, cls_w, cls_b,
                                *, batch_tile=None):
    B, L = tokens.shape
    V, E = emb_table.shape
    kernel_sizes = tuple(int(w.shape[0]) for (w, _) in conv_params)
    F = int(conv_params[0][0].shape[-1])
    n_branches = len(conv_params)
    Ntot = sum(kernel_sizes) * F
    D = n_branches * F
    C = int(cls_w.shape[1])

    if batch_tile is None:
        batch_tile = B
    assert B % batch_tile == 0, "batch must be divisible by batch_tile"

    # Fold the word-embedding table into the conv weights and concatenate every
    # (branch, shift) block along the filter axis -> one (V, Ntot) matrix.
    blocks, biases = [], []
    for (w, b) in conv_params:
        k = w.shape[0]
        w_cat = jnp.transpose(w, (1, 0, 2)).reshape(E, k * F)           # (E, k*F)
        blocks.append(emb_table.astype(jnp.float32) @ w_cat)            # (V, k*F)
        biases.append(b.reshape(1, F).astype(jnp.float32))
    W_full = jnp.concatenate(blocks, axis=1)                            # (V, Ntot)
    conv_bias = jnp.concatenate(biases, axis=1)                         # (1, D)

    tokens2d = tokens.reshape(B * L, 1).astype(jnp.int32)

    kernel = _make_fused_kernel(batch_tile, L, F, kernel_sizes)
    grid = (B // batch_tile,)

    # Dropout(p=0.3) is identity in eval mode (inference semantics).
    return pl.pallas_call(
        kernel,
        out_shape=jax.ShapeDtypeStruct((B, C), jnp.float32),
        grid=grid,
        in_specs=[
            pl.BlockSpec((batch_tile * L, 1), lambda i: (i, 0)),
            pl.BlockSpec((V, Ntot), lambda i: (0, 0)),
            pl.BlockSpec((1, D), lambda i: (0, 0)),
            pl.BlockSpec((D, C), lambda i: (0, 0)),
            pl.BlockSpec((1, C), lambda i: (0, 0)),
        ],
        out_specs=pl.BlockSpec((batch_tile, C), lambda i: (i, 0)),
        compiler_params=pltpu.CompilerParams(
            dimension_semantics=("parallel",)),
    )(tokens2d, W_full, conv_bias,
      cls_w.astype(jnp.float32), cls_b.astype(jnp.float32))


# ---------------------------------------------------------------------------
# Pure-JAX reference for correctness check
# ---------------------------------------------------------------------------
def _reference_forward(tokens, emb_table, conv_params, cls_w, cls_b):
    x = jnp.take(emb_table, tokens, axis=0).astype(jnp.float32)         # (B, L, E)
    pooled = []
    for (w, b) in conv_params:
        k, E, F = w.shape
        L = x.shape[1]
        Lo = L - k + 1
        acc = jnp.zeros((x.shape[0], Lo, F), jnp.float32)
        for j in range(k):
            acc = acc + jnp.einsum('ble,ef->blf', x[:, j:j + Lo, :], w[j])
        acc = _selu(acc + b)
        pooled.append(jnp.max(acc, axis=1))
    feats = jnp.concatenate(pooled, axis=1)
    return feats @ cls_w + cls_b


if __name__ == "__main__":
    # Small, module-consistent shapes
    B, L = 8, 32                 # batch, sequence length
    E = 10                       # embedding_dim (word_embedding, dim=10)
    F = 64                       # n_filters
    kernel_sizes = [8, 12]       # two conv branches
    C = 16                       # n_classes
    VOCAB = 27                   # amino-acid vocabulary size (incl. padding)

    key = jax.random.PRNGKey(0)
    k_tok, k_emb, k_cls, *k_convs = jax.random.split(key, 3 + len(kernel_sizes))

    tokens = jax.random.randint(k_tok, (B, L), 0, VOCAB, dtype=jnp.int32)
    emb_table = 0.1 * jax.random.normal(k_emb, (VOCAB, E), dtype=jnp.float32)

    conv_params = []
    for kk, ksz in zip(k_convs, kernel_sizes):
        # SELU-style init: normal(0, sqrt(1/kernel_size)); bias = 0.01
        w = jax.random.normal(kk, (ksz, E, F), dtype=jnp.float32) * math.sqrt(1.0 / ksz)
        b = jnp.full((1, F), 0.01, dtype=jnp.float32)
        conv_params.append((w, b))

    D = F * len(kernel_sizes)
    cls_w = jax.random.normal(k_cls, (D, C), dtype=jnp.float32) * math.sqrt(1.0 / D)
    cls_b = jnp.full((1, C), 0.01, dtype=jnp.float32)

    out = deepfam_ablation123_forward(tokens, emb_table, conv_params, cls_w, cls_b)
    out = jax.block_until_ready(out)

    ref = _reference_forward(tokens, emb_table, conv_params, cls_w, cls_b)
    assert out.shape == (B, C)
    assert jnp.allclose(out, ref, atol=1e-4, rtol=1e-4), "mismatch vs reference"

    print("KERNEL_OK")
</pallas_src>

<mosaic_0001>
module attributes {stable_mosaic.version = 11 : i64} {
  func.func @kernel(%arg0: i32, %arg1: memref<256x1xi32, #tpu.memory_space<vmem>>, %arg2: memref<27x1280xf32, #tpu.memory_space<vmem>>, %arg3: memref<1x128xf32, #tpu.memory_space<vmem>>, %arg4: memref<128x16xf32, #tpu.memory_space<vmem>>, %arg5: memref<1x16xf32, #tpu.memory_space<vmem>>, %arg6: memref<8x16xf32, #tpu.memory_space<vmem>>) attributes {dimension_semantics = [#tpu.dimension_semantics<parallel>], iteration_bounds = array<i64: 1>, scalar_prefetch = 0 : i64, scratch_operands = 0 : i64, tpu.core_type = #tpu.core_type<tc>, window_params = [{transform_indices = @transform_0, window_bounds = array<i64: 256, 1>}, {pipeline_mode = #tpu.pipeline_mode<synchronous>, transform_indices = @transform_1, window_bounds = array<i64: 27, 1280>}, {pipeline_mode = #tpu.pipeline_mode<synchronous>, transform_indices = @transform_2, window_bounds = array<i64: 1, 128>}, {pipeline_mode = #tpu.pipeline_mode<synchronous>, transform_indices = @transform_3, window_bounds = array<i64: 128, 16>}, {pipeline_mode = #tpu.pipeline_mode<synchronous>, transform_indices = @transform_4, window_bounds = array<i64: 1, 16>}, {transform_indices = @transform_5, window_bounds = array<i64: 8, 16>}]} {
    %c0 = arith.constant 0 : index
    %c0_0 = arith.constant 0 : index
    %0 = vector.load %arg1[%c0, %c0_0] : memref<256x1xi32, #tpu.memory_space<vmem>>, vector<256x1xi32>
    %1 = tpu.iota {dimensions = array<i32: 1>} : vector<256x27xi32>
    %2 = vector.broadcast %0 : vector<256x1xi32> to vector<256x27xi32>
    %3 = arith.cmpi eq, %2, %1 : vector<256x27xi32>
    %4 = arith.extui %3 : vector<256x27xi1> to vector<256x27xi32>
    %5 = arith.sitofp %4 : vector<256x27xi32> to vector<256x27xf32>
    %c0_1 = arith.constant 0 : index
    %c0_2 = arith.constant 0 : index
    %6 = vector.load %arg2[%c0_1, %c0_2] : memref<27x1280xf32, #tpu.memory_space<vmem>>, vector<27x1280xf32>
    %cst = arith.constant dense<0.000000e+00> : vector<256x1280xf32>
    %7 = tpu.matmul %5, %6, %cst {dimension_numbers = #tpu.dot_dimension_numbers<[1], [0], [0], [1], [0, 0, 1, 1], [], []>} : vector<256x27xf32>, vector<27x1280xf32>, vector<256x1280xf32> -> vector<256x1280xf32>
    %8 = vector.shape_cast %7 : vector<256x1280xf32> to vector<8x32x1280xf32>
    %c0_3 = arith.constant 0 : index
    %c0_4 = arith.constant 0 : index
    %9 = vector.load %arg3[%c0_3, %c0_4] : memref<1x128xf32, #tpu.memory_space<vmem>>, vector<1x128xf32>
    %10 = tpu.iota {dimensions = array<i32: 1>} : vector<1x32x64xi32>
    %cst_5 = arith.constant 0.000000e+00 : f32
    %11 = vector.broadcast %cst_5 : f32 to vector<8x32x64xf32>
    %12 = vector.extract_strided_slice %8 {offsets = [0, 0, 0], sizes = [8, 32, 64], strides = [1, 1, 1]} : vector<8x32x1280xf32> to vector<8x32x64xf32>
    %13 = arith.addf %11, %12 : vector<8x32x64xf32>
    %14 = vector.extract_strided_slice %8 {offsets = [0, 0, 64], sizes = [8, 32, 64], strides = [1, 1, 1]} : vector<8x32x1280xf32> to vector<8x32x64xf32>
    %15 = vector.extract_strided_slice %14 {offsets = [0, 1, 0], sizes = [8, 31, 64], strides = [1, 1, 1]} : vector<8x32x64xf32> to vector<8x31x64xf32>
    %16 = vector.extract_strided_slice %14 {offsets = [0, 0, 0], sizes = [8, 1, 64], strides = [1, 1, 1]} : vector<8x32x64xf32> to vector<8x1x64xf32>
    %17 = tpu.concatenate %15, %16 in 1 : vector<8x31x64xf32>, vector<8x1x64xf32> -> vector<8x32x64xf32>
    %18 = arith.addf %13, %17 : vector<8x32x64xf32>
    %19 = vector.extract_strided_slice %8 {offsets = [0, 0, 128], sizes = [8, 32, 64], strides = [1, 1, 1]} : vector<8x32x1280xf32> to vector<8x32x64xf32>
    %20 = vector.extract_strided_slice %19 {offsets = [0, 2, 0], sizes = [8, 30, 64], strides = [1, 1, 1]} : vector<8x32x64xf32> to vector<8x30x64xf32>
    %21 = vector.extract_strided_slice %19 {offsets = [0, 0, 0], sizes = [8, 2, 64], strides = [1, 1, 1]} : vector<8x32x64xf32> to vector<8x2x64xf32>
    %22 = tpu.concatenate %20, %21 in 1 : vector<8x30x64xf32>, vector<8x2x64xf32> -> vector<8x32x64xf32>
    %23 = arith.addf %18, %22 : vector<8x32x64xf32>
    %24 = vector.extract_strided_slice %8 {offsets = [0, 0, 192], sizes = [8, 32, 64], strides = [1, 1, 1]} : vector<8x32x1280xf32> to vector<8x32x64xf32>
    %25 = vector.extract_strided_slice %24 {offsets = [0, 3, 0], sizes = [8, 29, 64], strides = [1, 1, 1]} : vector<8x32x64xf32> to vector<8x29x64xf32>
    %26 = vector.extract_strided_slice %24 {offsets = [0, 0, 0], sizes = [8, 3, 64], strides = [1, 1, 1]} : vector<8x32x64xf32> to vector<8x3x64xf32>
    %27 = tpu.concatenate %25, %26 in 1 : vector<8x29x64xf32>, vector<8x3x64xf32> -> vector<8x32x64xf32>
    %28 = arith.addf %23, %27 : vector<8x32x64xf32>
    %29 = vector.extract_strided_slice %8 {offsets = [0, 0, 256], sizes = [8, 32, 64], strides = [1, 1, 1]} : vector<8x32x1280xf32> to vector<8x32x64xf32>
    %30 = vector.extract_strided_slice %29 {offsets = [0, 4, 0], sizes = [8, 28, 64], strides = [1, 1, 1]} : vector<8x32x64xf32> to vector<8x28x64xf32>
    %31 = vector.extract_strided_slice %29 {offsets = [0, 0, 0], sizes = [8, 4, 64], strides = [1, 1, 1]} : vector<8x32x64xf32> to vector<8x4x64xf32>
    %32 = tpu.concatenate %30, %31 in 1 : vector<8x28x64xf32>, vector<8x4x64xf32> -> vector<8x32x64xf32>
    %33 = arith.addf %28, %32 : vector<8x32x64xf32>
    %34 = vector.extract_strided_slice %8 {offsets = [0, 0, 320], sizes = [8, 32, 64], strides = [1, 1, 1]} : vector<8x32x1280xf32> to vector<8x32x64xf32>
    %35 = vector.extract_strided_slice %34 {offsets = [0, 5, 0], sizes = [8, 27, 64], strides = [1, 1, 1]} : vector<8x32x64xf32> to vector<8x27x64xf32>
    %36 = vector.extract_strided_slice %34 {offsets = [0, 0, 0], sizes = [8, 5, 64], strides = [1, 1, 1]} : vector<8x32x64xf32> to vector<8x5x64xf32>
    %37 = tpu.concatenate %35, %36 in 1 : vector<8x27x64xf32>, vector<8x5x64xf32> -> vector<8x32x64xf32>
    %38 = arith.addf %33, %37 : vector<8x32x64xf32>
    %39 = vector.extract_strided_slice %8 {offsets = [0, 0, 384], sizes = [8, 32, 64], strides = [1, 1, 1]} : vector<8x32x1280xf32> to vector<8x32x64xf32>
    %40 = vector.extract_strided_slice %39 {offsets = [0, 6, 0], sizes = [8, 26, 64], strides = [1, 1, 1]} : vector<8x32x64xf32> to vector<8x26x64xf32>
    %41 = vector.extract_strided_slice %39 {offsets = [0, 0, 0], sizes = [8, 6, 64], strides = [1, 1, 1]} : vector<8x32x64xf32> to vector<8x6x64xf32>
    %42 = tpu.concatenate %40, %41 in 1 : vector<8x26x64xf32>, vector<8x6x64xf32> -> vector<8x32x64xf32>
    %43 = arith.addf %38, %42 : vector<8x32x64xf32>
    %44 = vector.extract_strided_slice %8 {offsets = [0, 0, 448], sizes = [8, 32, 64], strides = [1, 1, 1]} : vector<8x32x1280xf32> to vector<8x32x64xf32>
    %45 = vector.extract_strided_slice %44 {offsets = [0, 7, 0], sizes = [8, 25, 64], strides = [1, 1, 1]} : vector<8x32x64xf32> to vector<8x25x64xf32>
    %46 = vector.extract_strided_slice %44 {offsets = [0, 0, 0], sizes = [8, 7, 64], strides = [1, 1, 1]} : vector<8x32x64xf32> to vector<8x7x64xf32>
    %47 = tpu.concatenate %45, %46 in 1 : vector<8x25x64xf32>, vector<8x7x64xf32> -> vector<8x32x64xf32>
    %48 = arith.addf %43, %47 : vector<8x32x64xf32>
    %49 = vector.extract_strided_slice %9 {offsets = [0, 0], sizes = [1, 64], strides = [1, 1]} : vector<1x128xf32> to vector<1x64xf32>
    %50 = vector.shape_cast %49 : vector<1x64xf32> to vector<1x1x64xf32>
    %51 = vector.broadcast %50 : vector<1x1x64xf32> to vector<8x32x64xf32>
    %52 = arith.addf %48, %51 : vector<8x32x64xf32>
    %cst_6 = arith.constant 0.000000e+00 : f32
    %53 = vector.broadcast %cst_6 : f32 to vector<8x32x64xf32>
    %54 = arith.cmpf ogt, %52, %53 : vector<8x32x64xf32>
    %55 = math.exp %52 : vector<8x32x64xf32>
    %cst_7 = arith.constant 1.000000e+00 : f32
    %56 = vector.broadcast %cst_7 : f32 to vector<8x32x64xf32>
    %57 = arith.subf %55, %56 : vector<8x32x64xf32>
    %cst_8 = arith.constant 1.67326319 : f32
    %58 = vector.broadcast %cst_8 : f32 to vector<8x32x64xf32>
    %59 = arith.mulf %58, %57 : vector<8x32x64xf32>
    %60 = arith.select %54, %52, %59 : vector<8x32x64xi1>, vector<8x32x64xf32>
    %cst_9 = arith.constant 1.05070102 : f32
    %61 = vector.broadcast %cst_9 : f32 to vector<8x32x64xf32>
    %62 = arith.mulf %61, %60 : vector<8x32x64xf32>
    %c25_i32 = arith.constant 25 : i32
    %63 = vector.broadcast %c25_i32 : i32 to vector<1x32x64xi32>
    %64 = arith.cmpi slt, %10, %63 : vector<1x32x64xi32>
    %cst_10 = arith.constant 0xFF800000 : f32
    %65 = vector.shape_cast %64 : vector<1x32x64xi1> to vector<1x32x64xi1>
    %66 = vector.broadcast %65 : vector<1x32x64xi1> to vector<8x32x64xi1>
    %67 = vector.broadcast %cst_10 : f32 to vector<8x32x64xf32>
    %68 = arith.select %66, %62, %67 : vector<8x32x64xi1>, vector<8x32x64xf32>
    %cst_11 = arith.constant dense<0xFF800000> : vector<8x64xf32>
    %69 = vector.multi_reduction <maximumf>, %68, %cst_11 [1] : vector<8x32x64xf32> to vector<8x64xf32>
    %cst_12 = arith.constant 0.000000e+00 : f32
    %70 = vector.broadcast %cst_12 : f32 to vector<8x32x64xf32>
    %71 = vector.extract_strided_slice %8 {offsets = [0, 0, 512], sizes = [8, 32, 64], strides = [1, 1, 1]} : vector<8x32x1280xf32> to vector<8x32x64xf32>
    %72 = arith.addf %70, %71 : vector<8x32x64xf32>
    %73 = vector.extract_strided_slice %8 {offsets = [0, 0, 576], sizes = [8, 32, 64], strides = [1, 1, 1]} : vector<8x32x1280xf32> to vector<8x32x64xf32>
    %74 = vector.extract_strided_slice %73 {offsets = [0, 1, 0], sizes = [8, 31, 64], strides = [1, 1, 1]} : vector<8x32x64xf32> to vector<8x31x64xf32>
    %75 = vector.extract_strided_slice %73 {offsets = [0, 0, 0], sizes = [8, 1, 64], strides = [1, 1, 1]} : vector<8x32x64xf32> to vector<8x1x64xf32>
    %76 = tpu.concatenate %74, %75 in 1 : vector<8x31x64xf32>, vector<8x1x64xf32> -> vector<8x32x64xf32>
    %77 = arith.addf %72, %76 : vector<8x32x64xf32>
    %78 = vector.extract_strided_slice %8 {offsets = [0, 0, 640], sizes = [8, 32, 64], strides = [1, 1, 1]} : vector<8x32x1280xf32> to vector<8x32x64xf32>
    %79 = vector.extract_strided_slice %78 {offsets = [0, 2, 0], sizes = [8, 30, 64], strides = [1, 1, 1]} : vector<8x32x64xf32> to vector<8x30x64xf32>
    %80 = vector.extract_strided_slice %78 {offsets = [0, 0, 0], sizes = [8, 2, 64], strides = [1, 1, 1]} : vector<8x32x64xf32> to vector<8x2x64xf32>
    %81 = tpu.concatenate %79, %80 in 1 : vector<8x30x64xf32>, vector<8x2x64xf32> -> vector<8x32x64xf32>
    %82 = arith.addf %77, %81 : vector<8x32x64xf32>
    %83 = vector.extract_strided_slice %8 {offsets = [0, 0, 704], sizes = [8, 32, 64], strides = [1, 1, 1]} : vector<8x32x1280xf32> to vector<8x32x64xf32>
    %84 = vector.extract_strided_slice %83 {offsets = [0, 3, 0], sizes = [8, 29, 64], strides = [1, 1, 1]} : vector<8x32x64xf32> to vector<8x29x64xf32>
    %85 = vector.extract_strided_slice %83 {offsets = [0, 0, 0], sizes = [8, 3, 64], strides = [1, 1, 1]} : vector<8x32x64xf32> to vector<8x3x64xf32>
    %86 = tpu.concatenate %84, %85 in 1 : vector<8x29x64xf32>, vector<8x3x64xf32> -> vector<8x32x64xf32>
    %87 = arith.addf %82, %86 : vector<8x32x64xf32>
    %88 = vector.extract_strided_slice %8 {offsets = [0, 0, 768], sizes = [8, 32, 64], strides = [1, 1, 1]} : vector<8x32x1280xf32> to vector<8x32x64xf32>
    %89 = vector.extract_strided_slice %88 {offsets = [0, 4, 0], sizes = [8, 28, 64], strides = [1, 1, 1]} : vector<8x32x64xf32> to vector<8x28x64xf32>
    %90 = vector.extract_strided_slice %88 {offsets = [0, 0, 0], sizes = [8, 4, 64], strides = [1, 1, 1]} : vector<8x32x64xf32> to vector<8x4x64xf32>
    %91 = tpu.concatenate %89, %90 in 1 : vector<8x28x64xf32>, vector<8x4x64xf32> -> vector<8x32x64xf32>
    %92 = arith.addf %87, %91 : vector<8x32x64xf32>
    %93 = vector.extract_strided_slice %8 {offsets = [0, 0, 832], sizes = [8, 32, 64], strides = [1, 1, 1]} : vector<8x32x1280xf32> to vector<8x32x64xf32>
    %94 = vector.extract_strided_slice %93 {offsets = [0, 5, 0], sizes = [8, 27, 64], strides = [1, 1, 1]} : vector<8x32x64xf32> to vector<8x27x64xf32>
    %95 = vector.extract_strided_slice %93 {offsets = [0, 0, 0], sizes = [8, 5, 64], strides = [1, 1, 1]} : vector<8x32x64xf32> to vector<8x5x64xf32>
    %96 = tpu.concatenate %94, %95 in 1 : vector<8x27x64xf32>, vector<8x5x64xf32> -> vector<8x32x64xf32>
    %97 = arith.addf %92, %96 : vector<8x32x64xf32>
    %98 = vector.extract_strided_slice %8 {offsets = [0, 0, 896], sizes = [8, 32, 64], strides = [1, 1, 1]} : vector<8x32x1280xf32> to vector<8x32x64xf32>
    %99 = vector.extract_strided_slice %98 {offsets = [0, 6, 0], sizes = [8, 26, 64], strides = [1, 1, 1]} : vector<8x32x64xf32> to vector<8x26x64xf32>
    %100 = vector.extract_strided_slice %98 {offsets = [0, 0, 0], sizes = [8, 6, 64], strides = [1, 1, 1]} : vector<8x32x64xf32> to vector<8x6x64xf32>
    %101 = tpu.concatenate %99, %100 in 1 : vector<8x26x64xf32>, vector<8x6x64xf32> -> vector<8x32x64xf32>
    %102 = arith.addf %97, %101 : vector<8x32x64xf32>
    %103 = vector.extract_strided_slice %8 {offsets = [0, 0, 960], sizes = [8, 32, 64], strides = [1, 1, 1]} : vector<8x32x1280xf32> to vector<8x32x64xf32>
    %104 = vector.extract_strided_slice %103 {offsets = [0, 7, 0], sizes = [8, 25, 64], strides = [1, 1, 1]} : vector<8x32x64xf32> to vector<8x25x64xf32>
    %105 = vector.extract_strided_slice %103 {offsets = [0, 0, 0], sizes = [8, 7, 64], strides = [1, 1, 1]} : vector<8x32x64xf32> to vector<8x7x64xf32>
    %106 = tpu.concatenate %104, %105 in 1 : vector<8x25x64xf32>, vector<8x7x64xf32> -> vector<8x32x64xf32>
    %107 = arith.addf %102, %106 : vector<8x32x64xf32>
    %108 = vector.extract_strided_slice %8 {offsets = [0, 0, 1024], sizes = [8, 32, 64], strides = [1, 1, 1]} : vector<8x32x1280xf32> to vector<8x32x64xf32>
    %109 = vector.extract_strided_slice %108 {offsets = [0, 8, 0], sizes = [8, 24, 64], strides = [1, 1, 1]} : vector<8x32x64xf32> to vector<8x24x64xf32>
    %110 = vector.extract_strided_slice %108 {offsets = [0, 0, 0], sizes = [8, 8, 64], strides = [1, 1, 1]} : vector<8x32x64xf32> to vector<8x8x64xf32>
    %111 = tpu.concatenate %109, %110 in 1 : vector<8x24x64xf32>, vector<8x8x64xf32> -> vector<8x32x64xf32>
    %112 = arith.addf %107, %111 : vector<8x32x64xf32>
    %113 = vector.extract_strided_slice %8 {offsets = [0, 0, 1088], sizes = [8, 32, 64], strides = [1, 1, 1]} : vector<8x32x1280xf32> to vector<8x32x64xf32>
    %114 = vector.extract_strided_slice %113 {offsets = [0, 9, 0], sizes = [8, 23, 64], strides = [1, 1, 1]} : vector<8x32x64xf32> to vector<8x23x64xf32>
    %115 = vector.extract_strided_slice %113 {offsets = [0, 0, 0], sizes = [8, 9, 64], strides = [1, 1, 1]} : vector<8x32x64xf32> to vector<8x9x64xf32>
    %116 = tpu.concatenate %114, %115 in 1 : vector<8x23x64xf32>, vector<8x9x64xf32> -> vector<8x32x64xf32>
    %117 = arith.addf %112, %116 : vector<8x32x64xf32>
    %118 = vector.extract_strided_slice %8 {offsets = [0, 0, 1152], sizes = [8, 32, 64], strides = [1, 1, 1]} : vector<8x32x1280xf32> to vector<8x32x64xf32>
    %119 = vector.extract_strided_slice %118 {offsets = [0, 10, 0], sizes = [8, 22, 64], strides = [1, 1, 1]} : vector<8x32x64xf32> to vector<8x22x64xf32>
    %120 = vector.extract_strided_slice %118 {offsets = [0, 0, 0], sizes = [8, 10, 64], strides = [1, 1, 1]} : vector<8x32x64xf32> to vector<8x10x64xf32>
    %121 = tpu.concatenate %119, %120 in 1 : vector<8x22x64xf32>, vector<8x10x64xf32> -> vector<8x32x64xf32>
    %122 = arith.addf %117, %121 : vector<8x32x64xf32>
    %123 = vector.extract_strided_slice %8 {offsets = [0, 0, 1216], sizes = [8, 32, 64], strides = [1, 1, 1]} : vector<8x32x1280xf32> to vector<8x32x64xf32>
    %124 = vector.extract_strided_slice %123 {offsets = [0, 11, 0], sizes = [8, 21, 64], strides = [1, 1, 1]} : vector<8x32x64xf32> to vector<8x21x64xf32>
    %125 = vector.extract_strided_slice %123 {offsets = [0, 0, 0], sizes = [8, 11, 64], strides = [1, 1, 1]} : vector<8x32x64xf32> to vector<8x11x64xf32>
    %126 = tpu.concatenate %124, %125 in 1 : vector<8x21x64xf32>, vector<8x11x64xf32> -> vector<8x32x64xf32>
    %127 = arith.addf %122, %126 : vector<8x32x64xf32>
    %128 = vector.extract_strided_slice %9 {offsets = [0, 64], sizes = [1, 64], strides = [1, 1]} : vector<1x128xf32> to vector<1x64xf32>
    %129 = vector.shape_cast %128 : vector<1x64xf32> to vector<1x1x64xf32>
    %130 = vector.broadcast %129 : vector<1x1x64xf32> to vector<8x32x64xf32>
    %131 = arith.addf %127, %130 : vector<8x32x64xf32>
    %cst_13 = arith.constant 0.000000e+00 : f32
    %132 = vector.broadcast %cst_13 : f32 to vector<8x32x64xf32>
    %133 = arith.cmpf ogt, %131, %132 : vector<8x32x64xf32>
    %134 = math.exp %131 : vector<8x32x64xf32>
    %cst_14 = arith.constant 1.000000e+00 : f32
    %135 = vector.broadcast %cst_14 : f32 to vector<8x32x64xf32>
    %136 = arith.subf %134, %135 : vector<8x32x64xf32>
    %cst_15 = arith.constant 1.67326319 : f32
    %137 = vector.broadcast %cst_15 : f32 to vector<8x32x64xf32>
    %138 = arith.mulf %137, %136 : vector<8x32x64xf32>
    %139 = arith.select %133, %131, %138 : vector<8x32x64xi1>, vector<8x32x64xf32>
    %cst_16 = arith.constant 1.05070102 : f32
    %140 = vector.broadcast %cst_16 : f32 to vector<8x32x64xf32>
    %141 = arith.mulf %140, %139 : vector<8x32x64xf32>
    %c21_i32 = arith.constant 21 : i32
    %142 = vector.broadcast %c21_i32 : i32 to vector<1x32x64xi32>
    %143 = arith.cmpi slt, %10, %142 : vector<1x32x64xi32>
    %cst_17 = arith.constant 0xFF800000 : f32
    %144 = vector.shape_cast %143 : vector<1x32x64xi1> to vector<1x32x64xi1>
    %145 = vector.broadcast %144 : vector<1x32x64xi1> to vector<8x32x64xi1>
    %146 = vector.broadcast %cst_17 : f32 to vector<8x32x64xf32>
    %147 = arith.select %145, %141, %146 : vector<8x32x64xi1>, vector<8x32x64xf32>
    %cst_18 = arith.constant dense<0xFF800000> : vector<8x64xf32>
    %148 = vector.multi_reduction <maximumf>, %147, %cst_18 [1] : vector<8x32x64xf32> to vector<8x64xf32>
    %149 = tpu.concatenate %69, %148 in 1 : vector<8x64xf32>, vector<8x64xf32> -> vector<8x128xf32>
    %c0_19 = arith.constant 0 : index
    %c0_20 = arith.constant 0 : index
    %150 = vector.load %arg4[%c0_19, %c0_20] : memref<128x16xf32, #tpu.memory_space<vmem>>, vector<128x16xf32>
    %cst_21 = arith.constant dense<0.000000e+00> : vector<8x16xf32>
    %151 = tpu.matmul %149, %150, %cst_21 {dimension_numbers = #tpu.dot_dimension_numbers<[1], [0], [0], [1], [0, 0, 1, 1], [], []>} : vector<8x128xf32>, vector<128x16xf32>, vector<8x16xf32> -> vector<8x16xf32>
    %c0_22 = arith.constant 0 : index
    %c0_23 = arith.constant 0 : index
    %152 = vector.load %arg5[%c0_22, %c0_23] : memref<1x16xf32, #tpu.memory_space<vmem>>, vector<1x16xf32>
    %153 = vector.broadcast %152 : vector<1x16xf32> to vector<8x16xf32>
    %154 = arith.addf %151, %153 : vector<8x16xf32>
    %c0_24 = arith.constant 0 : index
    %c0_25 = arith.constant 0 : index
    %155 = vector.load %arg6[%c0_24, %c0_25] : memref<8x16xf32, #tpu.memory_space<vmem>>, vector<8x16xf32>
    tpu.vector_store %arg6[%c0_24, %c0_25], %154 {strides = array<i32>} : memref<8x16xf32, #tpu.memory_space<vmem>>, vector<8x16xf32>,
    return
  }
  func.func @transform_0(%arg0: i32) -> (i32, i32) {
    %c0_i32 = arith.constant 0 : i32
    %c0_i32_0 = arith.constant 0 : i32
    return %arg0, %c0_i32 : i32, i32
  }
  func.func @transform_1(%arg0: i32) -> (i32, i32) {
    %c0_i32 = arith.constant 0 : i32
    %c0_i32_0 = arith.constant 0 : i32
    %c0_i32_1 = arith.constant 0 : i32
    return %c0_i32, %c0_i32_0 : i32, i32
  }
  func.func @transform_2(%arg0: i32) -> (i32, i32) {
    %c0_i32 = arith.constant 0 : i32
    %c0_i32_0 = arith.constant 0 : i32
    %c0_i32_1 = arith.constant 0 : i32
    return %c0_i32, %c0_i32_0 : i32, i32
  }
  func.func @transform_3(%arg0: i32) -> (i32, i32) {
    %c0_i32 = arith.constant 0 : i32
    %c0_i32_0 = arith.constant 0 : i32
    %c0_i32_1 = arith.constant 0 : i32
    return %c0_i32, %c0_i32_0 : i32, i32
  }
  func.func @transform_4(%arg0: i32) -> (i32, i32) {
    %c0_i32 = arith.constant 0 : i32
    %c0_i32_0 = arith.constant 0 : i32
    %c0_i32_1 = arith.constant 0 : i32
    return %c0_i32, %c0_i32_0 : i32, i32
  }
  func.func @transform_5(%arg0: i32) -> (i32, i32) {
    %c0_i32 = arith.constant 0 : i32
    %c0_i32_0 = arith.constant 0 : i32
    return %arg0, %c0_i32 : i32, i32
  }
}

</mosaic_0001>

<bundles_post_ra>
// kernel: tpu_custom_call.1
= control target key start
LH: loop header
LB: loop body
LE: loop exit
PB: predicated region body
PF: predicated region fallthrough
CT: control target
= control target key end

     0   :  { %v6754_v2 = vmov 0   ;;  %v12379_v5 = vmov 0.0   ;;  %vm384_vm0 = vcmask 1042432   ;;  %s12365_s0 = inlined_call_operand.vmem [shape: s32[256,1], index: 0, kind: input, shape index: {}]   ;;  %s12366_s1 = inlined_call_operand.vmem [shape: f32[27,1280], index: 1, kind: input, shape index: {}]   ;;  %s12367_s2 = inlined_call_operand.vmem [shape: f32[1,128], index: 2, kind: input, shape index: {}]   ;;  %s12368_s3 = inlined_call_operand.vmem [shape: f32[128,16], index: 3, kind: input, shape index: {}]   ;;  %s12369_s4 = inlined_call_operand.vmem [shape: f32[1,16], index: 4, kind: input, shape index: {}]   ;;  %s12370_s5 = inlined_call_operand.hbm [shape: f32[8,16], index: 5, kind: output, shape index: {}]  }
   0x1   :  { %v22_v0 = vld [vmem:[%s12365_s0 + $0x8] sm:$0xff]  ;;  %v21_v1 = vld [vmem:[%s12365_s0] sm:$0xff]  ;;  %6615 = vset.pattern.permute.xlu1 %v6754_v2  ;;  %6614 = vset.pattern.permute.xlu0 %v6754_v2  ;;  %v39_v3 = vld [vmem:[%s12365_s0 + $0x90] sm:$0xff] }
   0x2   :  { %59 = vperm.xlu1 %6615, %v22_v0   ;;  %56 = vperm.xlu0 %6614, %v21_v1   ;;  %v38_v4 = vld [vmem:[%s12365_s0 + $0x88] sm:$0xff]  ;;  %v40_v6 = vld [vmem:[%s12365_s0 + $0x98] sm:$0xff]  ;;  %v23_v7 = vld [vmem:[%s12365_s0 + $0x10] sm:$0xff] }
   0x3   :  { %479 = vmatprep.mubr.f32.mxu0 %v12379_v5  ;;  %581 = vmatprep.mubr.f32.mxu1 %v12379_v5  ;;  %v41_v8 = vld [vmem:[%s12365_s0 + $0xa0] sm:$0xff]  ;;  %v24_v9 = vld [vmem:[%s12365_s0 + $0x18] sm:$0xff]  ;;  %v248_v10 = vld [vmem:[%s12366_s1 + $0x8] sm:$0xff] }
   0x4   :  { %v258_v11 = vld [vmem:[%s12366_s1 + $0x58] sm:$0xff]  ;;  %v247_v12 = vld [vmem:[%s12366_s1] sm:$0xff]  ;;  %v257_v13 = vld [vmem:[%s12366_s1 + $0x50] sm:$0xff] }
   0x5   :  { %v6529_v14 = vpack.c.bf16 %v258_v11, %v248_v10  ;;  %v6531_v15 = vpack.c.bf16 %v257_v13, %v247_v12  ;;  %v268_v16 = vld [vmem:[%s12366_s1 + $0xa8] sm:$0xff]  ;;  %v278_v17 = vld [vmem:[%s12366_s1 + $0xf8] sm:$0x7]  ;;  %v267_v19 = vld [vmem:[%s12366_s1 + $0xa0] sm:$0xff] }
   0x6   :  { %110 = vperm.xlu1 %6615, %v39_v3   ;;  %107 = vperm.xlu0 %6614, %v38_v4   ;;  %v6533_v18 = vpack.c.bf16 %v278_v17, %v268_v16  ;;  %v277_v20 = vld [vmem:[%s12366_s1 + $0xf0] sm:$0x7] }
   0xa   :  { %113 = vperm.xlu1 %6615, %v40_v6   ;;  %62 = vperm.xlu0 %6614, %v23_v7  }
   0xb   :  { %10 = vsyncpa [#allocation3], 0  ;;  %vm6756_vm1 = vmmov 1   ;;  %v42_v22 = vld [vmem:[%s12365_s0 + $0xa8] sm:$0xff]  ;;  %v25_v23 = vld [vmem:[%s12365_s0 + $0x20] sm:$0xff]  ;;  %6530 = vmatprep.subr.bf16.mxu0 %v6529_v14  ;;  %6603 = vmatprep.subr.bf16.mxu1 %v6529_v14  ;;  %v6536_v24 = vpack.c.bf16 %v277_v20, %v267_v19  ;;  %v12371_v53 = vlaneseq  ;;  %vm287_vm3 = vcmask 220160  }
   0xc   :  { %vm6842_vm2 = vmpackc.low %vm384_vm0, %vm6756_vm1  ;;  %6532 = vmatpush1.bf16.msra.mxu0 %v6531_v15  ;;  %6605 = vmatpush1.bf16.msra.mxu1 %v6531_v15  ;;  %v43_v25 = vld [vmem:[%s12365_s0 + $0xb0] sm:$0xff]  ;;  %v26_v26 = vld [vmem:[%s12365_s0 + $0x28] sm:$0xff]  ;;  %s6757_s10 = smov 64  }
   0xd   :  { %6535 = vmatprep.subr.msk.bf16.mxu0 %vm6842_vm2, %v6533_v18  ;;  %6604 = vmatprep.subr.msk.bf16.mxu1 %vm6842_vm2, %v6533_v18  ;;  %v44_v27 = vld [vmem:[%s12365_s0 + $0xb8] sm:$0xff]  ;;  %v27_v28 = vld [vmem:[%s12365_s0 + $0x30] sm:$0xff]  ;;  %v45_v29 = vld [vmem:[%s12365_s0 + $0xc0] sm:$0xff]  ;;  %v6939_v54 = vand.u32 127, %v12371_v53 }
   0xe   :  { %116 = vperm.xlu1 %6615, %v41_v8   ;;  %65 = vperm.xlu0 %6614, %v24_v9   ;;  %v28_v30 = vld [vmem:[%s12365_s0 + $0x38] sm:$0xff]  ;;  %v46_v31 = vld [vmem:[%s12365_s0 + $0xc8] sm:$0xff]  ;;  %v29_v32 = vld [vmem:[%s12365_s0 + $0x40] sm:$0xff] }
   0xf   :  { %v47_v33 = vld [vmem:[%s12365_s0 + $0xd0] sm:$0xff]  ;;  %v30_v34 = vld [vmem:[%s12365_s0 + $0x48] sm:$0xff]  ;;  %v48_v35 = vld [vmem:[%s12365_s0 + $0xd8] sm:$0xff] }
  0x10   :  { %6538 = vmatpush1.bf16.msk.msra.mxu0 %vm6842_vm2, %v6536_v24  ;;  %6606 = vmatpush1.bf16.msk.msra.mxu1 %vm6842_vm2, %v6536_v24  ;;  %v31_v36 = vld [vmem:[%s12365_s0 + $0x50] sm:$0xff]  ;;  %v49_v37 = vld [vmem:[%s12365_s0 + $0xe0] sm:$0xff]  ;;  %v32_v38 = vld [vmem:[%s12365_s0 + $0x58] sm:$0xff] }
  0x11   :  { %v50_v39 = vld [vmem:[%s12365_s0 + $0xe8] sm:$0xff]  ;;  %v33_v40 = vld [vmem:[%s12365_s0 + $0x60] sm:$0xff]  ;;  %v51_v41 = vld [vmem:[%s12365_s0 + $0xf0] sm:$0xff] }
  0x12   :  { %119 = vperm.xlu1 %6615, %v42_v22   ;;  %68 = vperm.xlu0 %6614, %v25_v23   ;;  %v34_v42 = vld [vmem:[%s12365_s0 + $0x68] sm:$0xff]  ;;  %v52_v43 = vld [vmem:[%s12365_s0 + $0xf8] sm:$0xff]  ;;  %v35_v44 = vld [vmem:[%s12365_s0 + $0x70] sm:$0xff] }
  0x13   :  { %v250_v45 = vld [vmem:[%s12366_s1 + $0x18] sm:$0xff]  ;;  %v260_v46 = vld [vmem:[%s12366_s1 + $0x68] sm:$0xff]  ;;  %v37_v48 = vld [vmem:[%s12365_s0 + $0x80] sm:$0xff] }
  0x14   :  { %v6539_v47 = vpack.c.bf16 %v260_v46, %v250_v45  ;;  %v36_v49 = vld [vmem:[%s12365_s0 + $0x78] sm:$0xff]  ;;  %v252_v50 = vld [vmem:[%s12366_s1 + $0x28] sm:$0xff]  ;;  %v251_v55 = vld [vmem:[%s12366_s1 + $0x20] sm:$0xff] }
  0x15   :  { %v262_v51 = vld [vmem:[%s12366_s1 + $0x78] sm:$0xff]  ;;  %v261_v56 = vld [vmem:[%s12366_s1 + $0x70] sm:$0xff]  ;;  %v272_v57 = vld [vmem:[%s12366_s1 + $0xc8] sm:$0xff] }
  0x16   :  { %122 = vperm.xlu1 %6615, %v43_v25   ;;  %71 = vperm.xlu0 %6614, %v26_v26   ;;  %v6549_v52 = vpack.c.bf16 %v262_v51, %v252_v50  ;;  %v282_v58 = vld [vmem:[%s12366_s1 + $0x118] sm:$0x7]  ;;  %v6551_v61 = vpack.c.bf16 %v261_v56, %v251_v55  ;;  %v249_v62 = vld [vmem:[%s12366_s1 + $0x10] sm:$0xff]  ;;  %v259_v1 = vld [vmem:[%s12366_s1 + $0x60] sm:$0xff] }
  0x17   :  { %6540 = vmatprep.subr.bf16.mxu1 %v6539_v47  ;;  %v6553_v63 = vpack.c.bf16 %v282_v58, %v272_v57  ;;  %v271_v2 = vld [vmem:[%s12366_s1 + $0xc0] sm:$0xff]  ;;  %v281_v3 = vld [vmem:[%s12366_s1 + $0x110] sm:$0x7]  ;;  %v270_v4 = vld [vmem:[%s12366_s1 + $0xb8] sm:$0xff]  ;;  %v6541_v10 = vpack.c.bf16 %v259_v1, %v249_v62 }
  0x18   :  { %6550 = vmatprep.subr.bf16.mxu0 %v6549_v52  ;;  %v280_v6 = vld [vmem:[%s12366_s1 + $0x108] sm:$0x7]  ;;  %v6556_v11 = vpack.c.bf16 %v281_v3, %v271_v2  ;;  %v269_v14 = vld [vmem:[%s12366_s1 + $0xb0] sm:$0xff]  ;;  %v279_v15 = vld [vmem:[%s12366_s1 + $0x100] sm:$0x7] }
  0x19   :  { %v6543_v13 = vpack.c.bf16 %v280_v6, %v270_v4  ;;  %v6546_v18 = vpack.c.bf16 %v279_v15, %v269_v14  ;;  %v256_v57 = vld [vmem:[%s12366_s1 + $0x48] sm:$0xff]  ;;  %v266_v58 = vld [vmem:[%s12366_s1 + $0x98] sm:$0xff]  ;;  %v6411_v21 = vld [vmem:[%s12367_s2] ss:$0 sm:$0xff] }
  0x1a   :  { %125 = vperm.xlu1 %6615, %v44_v27   ;;  %74 = vperm.xlu0 %6614, %v27_v28  }
  0x1e   :  { %128 = vperm.xlu1 %6615, %v45_v29   ;;  %77 = vperm.xlu0 %6614, %v28_v30  }
  0x22   :  { %131 = vperm.xlu1 %6615, %v46_v31   ;;  %80 = vperm.xlu0 %6614, %v29_v32  }
  0x26   :  { %134 = vperm.xlu1 %6615, %v47_v33   ;;  %83 = vperm.xlu0 %6614, %v30_v34  }
  0x2a   :  { %137 = vperm.xlu1 %6615, %v48_v35   ;;  %86 = vperm.xlu0 %6614, %v31_v36  }
  0x2e   :  { %140 = vperm.xlu1 %6615, %v49_v37   ;;  %89 = vperm.xlu0 %6614, %v32_v38  }
  0x32   :  { %143 = vperm.xlu1 %6615, %v50_v39   ;;  %92 = vperm.xlu0 %6614, %v33_v40  }
  0x36   :  { %146 = vperm.xlu1 %6615, %v51_v41   ;;  %95 = vperm.xlu0 %6614, %v34_v42  }
  0x3a   :  { %149 = vperm.xlu1 %6615, %v52_v43   ;;  %98 = vperm.xlu0 %6614, %v35_v44  }
  0x3e   :  { %104 = vperm.xlu1 %6615, %v37_v48   ;;  %101 = vperm.xlu0 %6614, %v36_v49   ;;  %v254_v48 = vld [vmem:[%s12366_s1 + $0x38] sm:$0xff]  ;;  %v264_v49 = vld [vmem:[%s12366_s1 + $0x88] sm:$0xff] }
  0x3f   :  { %v6559_v50 = vpack.c.bf16 %v264_v49, %v254_v48  ;;  %v286_v48 = vld [vmem:[%s12366_s1 + $0x138] sm:$0x7] }
  0x42   :  { %5651 = vrot.lane.b32.xlu0 %v6411_v21, %s6757_s10 }
  0x81   :  { %v60_v59 = vpop.permute.xlu1 %59  ;;  %v57_v60 = vpop.permute.xlu0 %56 }
  0x82   :  { %vm152_vm4 = vcmp.eq.s32.totalorder %v60_v59, %v6939_v54  ;;  %vm151_vm5 = vcmp.eq.s32.totalorder %v57_v60, %v6939_v54  ;;  %v6569_v59 = vpack.c.bf16 %v266_v58, %v256_v57  ;;  %v285_v57 = vld [vmem:[%s12366_s1 + $0x130] sm:$0x7] }
  0x83   :  { %v6959_v0 = vsel %vm151_vm5, 1.0, %v12379_v5  ;;  %v6979_v7 = vsel %vm152_vm4, 1.0, %v12379_v5 }
  0x84   :  { %6243 = vmatmul.mubr.msk.f32.vlgmr.msra.gmra.mrb[0].mxu0 %vm287_vm3, %v6959_v0 }
  0x85   :  { %v111_v8 = vpop.permute.xlu1 %110  ;;  %v108_v9 = vpop.permute.xlu0 %107  ;;  %485 = vmatprep.mubr.f32.mxu0 %v12379_v5  ;;  %6552 = vmatpush1.bf16.msra.mxu0 %v6551_v61 }
  0x86   :  { %vm168_vm6 = vcmp.eq.s32.totalorder %v108_v9, %v6939_v54  ;;  %6555 = vmatprep.subr.msk.bf16.mxu0 %vm6842_vm2, %v6553_v63  ;;  %vm169_vm7 = vcmp.eq.s32.totalorder %v111_v8, %v6939_v54 }
  0x87   :  { %v6986_v12 = vsel %vm168_vm6, 1.0, %v12379_v5  ;;  %v7005_v19 = vsel %vm169_vm7, 1.0, %v12379_v5 }
  0x88   :  { %6244 = vmatmul.mubr.msk.f32.gmra.mrb[2].mxu0 %vm287_vm3, %v6979_v7  ;;  %6260 = vmatmul.mubr.msk.f32.vlgmr.msra.gmra.mrb[0].mxu1 %vm287_vm3, %v6986_v12 }
  0x89   :  { %v114_v16 = vpop.permute.xlu1 %113  ;;  %v63_v17 = vpop.permute.xlu0 %62  ;;  %491 = vmatprep.mubr.f32.mxu0 %v12379_v5  ;;  %587 = vmatprep.mubr.f32.mxu1 %v12379_v5 }
  0x8a   :  { %vm153_vm8 = vcmp.eq.s32.totalorder %v63_v17, %v6939_v54  ;;  %6542 = vmatpush1.bf16.msra.mxu1 %v6541_v10  ;;  %6558 = vmatpush1.bf16.msk.msra.mxu0 %vm6842_vm2, %v6556_v11  ;;  %vm170_vm9 = vcmp.eq.s32.totalorder %v114_v16, %v6939_v54 }
  0x8b   :  { %v7008_v20 = vsel %vm153_vm8, 1.0, %v12379_v5  ;;  %6545 = vmatprep.subr.msk.bf16.mxu1 %vm6842_vm2, %v6543_v13  ;;  %v7023_v24 = vsel %vm170_vm9, 1.0, %v12379_v5  ;;  %6570 = vmatprep.subr.bf16.mxu0 %v6569_v59 }
  0x8c   :  { %6245 = vmatmul.mubr.msk.f32.gmra.mrb[4].mxu0 %vm287_vm3, %v7008_v20  ;;  %6261 = vmatmul.mubr.msk.f32.gmra.mrb[2].mxu1 %vm287_vm3, %v7005_v19 }
  0x8d   :  { %v117_v22 = vpop.permute.xlu1 %116  ;;  %v66_v23 = vpop.permute.xlu0 %65  ;;  %497 = vmatprep.mubr.f32.mxu0 %v12379_v5  ;;  %593 = vmatprep.mubr.f32.mxu1 %v12379_v5 }
  0x8e   :  { %vm154_vm10 = vcmp.eq.s32.totalorder %v66_v23, %v6939_v54  ;;  %6548 = vmatpush1.bf16.msk.msra.mxu1 %vm6842_vm2, %v6546_v18  ;;  %vm171_vm11 = vcmp.eq.s32.totalorder %v117_v22, %v6939_v54 }
  0x8f   :  { %v7026_v25 = vsel %vm154_vm10, 1.0, %v12379_v5  ;;  %v7037_v28 = vsel %vm171_vm11, 1.0, %v12379_v5  ;;  %6560 = vmatprep.subr.bf16.mxu1 %v6559_v50 }
  0x90   :  { %6246 = vmatmul.mubr.msk.f32.gmra.mrb[6].mxu0 %vm287_vm3, %v7026_v25  ;;  %6262 = vmatmul.mubr.msk.f32.gmra.mrb[4].mxu1 %vm287_vm3, %v7023_v24 }
  0x91   :  { %v120_v26 = vpop.permute.xlu1 %119  ;;  %v69_v27 = vpop.permute.xlu0 %68  ;;  %503 = vmatprep.mubr.f32.mxu0 %v12379_v5  ;;  %599 = vmatprep.mubr.f32.mxu1 %v12379_v5 }
  0x92   :  { %vm155_vm12 = vcmp.eq.s32.totalorder %v69_v27, %v6939_v54  ;;  %vm172_vm13 = vcmp.eq.s32.totalorder %v120_v26, %v6939_v54  ;;  %v253_v27 = vld [vmem:[%s12366_s1 + $0x30] sm:$0xff] }
  0x93   :  { %v7040_v29 = vsel %vm155_vm12, 1.0, %v12379_v5  ;;  %v7051_v32 = vsel %vm172_vm13, 1.0, %v12379_v5 }
  0x94   :  { %6247 = vmatmul.mubr.msk.f32.gmra.mrb[8].mxu0 %vm287_vm3, %v7040_v29  ;;  %6263 = vmatmul.mubr.msk.f32.gmra.mrb[6].mxu1 %vm287_vm3, %v7037_v28 }
  0x95   :  { %v123_v30 = vpop.permute.xlu1 %122  ;;  %v72_v31 = vpop.permute.xlu0 %71  ;;  %509 = vmatprep.mubr.f32.mxu0 %v12379_v5  ;;  %605 = vmatprep.mubr.f32.mxu1 %v12379_v5 }
  0x96   :  { %vm156_vm14 = vcmp.eq.s32.totalorder %v72_v31, %v6939_v54  ;;  %vm173_vm15 = vcmp.eq.s32.totalorder %v123_v30, %v6939_v54  ;;  %v263_v30 = vld [vmem:[%s12366_s1 + $0x80] sm:$0xff]  ;;  %v274_v31 = vld [vmem:[%s12366_s1 + $0xd8] sm:$0xff] }
  0x97   :  { %v7054_v33 = vsel %vm156_vm14, 1.0, %v12379_v5  ;;  %v7065_v36 = vsel %vm173_vm15, 1.0, %v12379_v5 }
  0x98   :  { %6248 = vmatmul.mubr.msk.f32.gmra.mrb[10].mxu0 %vm287_vm3, %v7054_v33  ;;  %6264 = vmatmul.mubr.msk.f32.gmra.mrb[8].mxu1 %vm287_vm3, %v7051_v32 }
  0x99   :  { %v126_v34 = vpop.permute.xlu1 %125  ;;  %v75_v35 = vpop.permute.xlu0 %74  ;;  %515 = vmatprep.mubr.f32.mxu0 %v12379_v5  ;;  %611 = vmatprep.mubr.f32.mxu1 %v12379_v5 }
  0x9a   :  { %vm157_vm1 = vcmp.eq.s32.totalorder %v75_v35, %v6939_v54  ;;  %vm174_vm4 = vcmp.eq.s32.totalorder %v126_v34, %v6939_v54  ;;  %v284_v34 = vld [vmem:[%s12366_s1 + $0x128] sm:$0x7]  ;;  %v6561_v35 = vpack.c.bf16 %v263_v30, %v253_v27 }
  0x9b   :  { %v7068_v37 = vsel %vm157_vm1, 1.0, %v12379_v5  ;;  %v7079_v40 = vsel %vm174_vm4, 1.0, %v12379_v5 }
  0x9c   :  { %6249 = vmatmul.mubr.msk.f32.gmra.mrb[12].mxu0 %vm287_vm3, %v7068_v37  ;;  %6265 = vmatmul.mubr.msk.f32.gmra.mrb[10].mxu1 %vm287_vm3, %v7065_v36 }
  0x9d   :  { %v129_v38 = vpop.permute.xlu1 %128  ;;  %v78_v39 = vpop.permute.xlu0 %77  ;;  %521 = vmatprep.mubr.f32.mxu0 %v12379_v5  ;;  %617 = vmatprep.mubr.f32.mxu1 %v12379_v5 }
  0x9e   :  { %vm158_vm5 = vcmp.eq.s32.totalorder %v78_v39, %v6939_v54  ;;  %vm175_vm6 = vcmp.eq.s32.totalorder %v129_v38, %v6939_v54  ;;  %v265_v39 = vld [vmem:[%s12366_s1 + $0x90] sm:$0xff] }
  0x9f   :  { %v7082_v41 = vsel %vm158_vm5, 1.0, %v12379_v5  ;;  %v7093_v44 = vsel %vm175_vm6, 1.0, %v12379_v5 }
  0xa0   :  { %6250 = vmatmul.mubr.msk.f32.gmra.mrb[14].mxu0 %vm287_vm3, %v7082_v41  ;;  %6266 = vmatmul.mubr.msk.f32.gmra.mrb[12].mxu1 %vm287_vm3, %v7079_v40 }
  0xa1   :  { %v132_v42 = vpop.permute.xlu1 %131  ;;  %v81_v43 = vpop.permute.xlu0 %80  ;;  %527 = vmatprep.mubr.f32.mxu0 %v12379_v5  ;;  %623 = vmatprep.mubr.f32.mxu1 %v12379_v5 }
  0xa2   :  { %vm159_vm7 = vcmp.eq.s32.totalorder %v81_v43, %v6939_v54  ;;  %vm176_vm8 = vcmp.eq.s32.totalorder %v132_v42, %v6939_v54  ;;  %v6563_v42 = vpack.c.bf16 %v284_v34, %v274_v31  ;;  %v273_v43 = vld [vmem:[%s12366_s1 + $0xd0] sm:$0xff] }
  0xa3   :  { %v7096_v45 = vsel %vm159_vm7, 1.0, %v12379_v5  ;;  %v7113_v51 = vsel %vm176_vm8, 1.0, %v12379_v5 }
  0xa4   :  { %6251 = vmatmul.mubr.msk.f32.gmra.mrb[16].mxu0 %vm287_vm3, %v7096_v45  ;;  %6267 = vmatmul.mubr.msk.f32.gmra.mrb[14].mxu1 %vm287_vm3, %v7093_v44 }
  0xa5   :  { %v135_v46 = vpop.permute.xlu1 %134  ;;  %v84_v47 = vpop.permute.xlu0 %83  ;;  %533 = vmatprep.mubr.f32.mxu0 %v12379_v5  ;;  %629 = vmatprep.mubr.f32.mxu1 %v12379_v5 }
  0xa6   :  { %vm160_vm9 = vcmp.eq.s32.totalorder %v84_v47, %v6939_v54  ;;  %vm177_vm10 = vcmp.eq.s32.totalorder %v135_v46, %v6939_v54  ;;  %v283_v46 = vld [vmem:[%s12366_s1 + $0x120] sm:$0x7]  ;;  %v276_v47 = vld [vmem:[%s12366_s1 + $0xe8] sm:$0xff] }
  0xa7   :  { %v7116_v52 = vsel %vm160_vm9, 1.0, %v12379_v5  ;;  %v7133_v60 = vsel %vm177_vm10, 1.0, %v12379_v5  ;;  %v6566_v50 = vpack.c.bf16 %v283_v46, %v273_v43  ;;  %vm2156_vm10 = vcmask 1044480  }
  0xa8   :  { %6252 = vmatmul.mubr.msk.f32.gmra.mrb[18].mxu0 %vm287_vm3, %v7116_v52  ;;  %6268 = vmatmul.mubr.msk.f32.gmra.mrb[16].mxu1 %vm287_vm3, %v7113_v51 }
  0xa9   :  { %v138_v55 = vpop.permute.xlu1 %137  ;;  %v87_v56 = vpop.permute.xlu0 %86  ;;  %539 = vmatprep.mubr.f32.mxu0 %v12379_v5  ;;  %635 = vmatprep.mubr.f32.mxu1 %v12379_v5 }
  0xaa   :  { %vm161_vm11 = vcmp.eq.s32.totalorder %v87_v56, %v6939_v54  ;;  %vm178_vm12 = vcmp.eq.s32.totalorder %v138_v55, %v6939_v54  ;;  %v6573_v55 = vpack.c.bf16 %v286_v48, %v276_v47  ;;  %v275_v56 = vld [vmem:[%s12366_s1 + $0xe0] sm:$0xff] }
  0xab   :  { %v7136_v61 = vsel %vm161_vm11, 1.0, %v12379_v5  ;;  %v7147_v1 = vsel %vm178_vm12, 1.0, %v12379_v5  ;;  %v6576_v58 = vpack.c.bf16 %v285_v57, %v275_v56  ;;  %vm2019_vm11 = vcmask 1045504  }
  0xac   :  { %6253 = vmatmul.mubr.msk.f32.gmra.mrb[20].mxu0 %vm287_vm3, %v7136_v61  ;;  %6269 = vmatmul.mubr.msk.f32.gmra.mrb[18].mxu1 %vm287_vm3, %v7133_v60  ;;  %vm2927_vm12 = vcmask 1040384  }
  0xad   :  { %v141_v62 = vpop.permute.xlu1 %140  ;;  %v90_v63 = vpop.permute.xlu0 %89  ;;  %545 = vmatprep.mubr.f32.mxu0 %v12379_v5  ;;  %641 = vmatprep.mubr.f32.mxu1 %v12379_v5 }
  0xae   :  { %vm162_vm13 = vcmp.eq.s32.totalorder %v90_v63, %v6939_v54  ;;  %vm179_vm14 = vcmp.eq.s32.totalorder %v141_v62, %v6939_v54 }
  0xaf   :  { %v7150_v2 = vsel %vm162_vm13, 1.0, %v12379_v5  ;;  %v7161_v6 = vsel %vm179_vm14, 1.0, %v12379_v5  ;;  %vm2405_vm13 = vcmask 1043456   ;;  %vm2790_vm14 = vcmask 1041408  }
  0xb0   :  { %6254 = vmatmul.mubr.msk.f32.gmra.mrb[22].mxu0 %vm287_vm3, %v7150_v2  ;;  %6270 = vmatmul.mubr.msk.f32.gmra.mrb[20].mxu1 %vm287_vm3, %v7147_v1 }
  0xb1   :  { %v144_v3 = vpop.permute.xlu1 %143  ;;  %v93_v4 = vpop.permute.xlu0 %92  ;;  %551 = vmatprep.mubr.f32.mxu0 %v12379_v5  ;;  %647 = vmatprep.mubr.f32.mxu1 %v12379_v5 }
  0xb2   :  { %vm163_vm15 = vcmp.eq.s32.totalorder %v93_v4, %v6939_v54  ;;  %vm180_vm1 = vcmp.eq.s32.totalorder %v144_v3, %v6939_v54 }
  0xb3   :  { %v7164_v8 = vsel %vm163_vm15, 1.0, %v12379_v5  ;;  %v7175_v11 = vsel %vm180_vm1, 1.0, %v12379_v5 }
  0xb4   :  { %6255 = vmatmul.mubr.msk.f32.gmra.mrb[24].mxu0 %vm287_vm3, %v7164_v8  ;;  %6271 = vmatmul.mubr.msk.f32.gmra.mrb[22].mxu1 %vm287_vm3, %v7161_v6 }
  0xb5   :  { %v147_v9 = vpop.permute.xlu1 %146  ;;  %v96_v10 = vpop.permute.xlu0 %95  ;;  %557 = vmatprep.mubr.f32.mxu0 %v12379_v5  ;;  %653 = vmatprep.mubr.f32.mxu1 %v12379_v5 }
  0xb6   :  { %vm164_vm4 = vcmp.eq.s32.totalorder %v96_v10, %v6939_v54  ;;  %vm181_vm5 = vcmp.eq.s32.totalorder %v147_v9, %v6939_v54 }
  0xb7   :  { %v7178_v13 = vsel %vm164_vm4, 1.0, %v12379_v5  ;;  %v7189_v16 = vsel %vm181_vm5, 1.0, %v12379_v5 }
  0xb8   :  { %6256 = vmatmul.mubr.msk.f32.gmra.mrb[26].mxu0 %vm287_vm3, %v7178_v13  ;;  %6272 = vmatmul.mubr.msk.f32.gmra.mrb[24].mxu1 %vm287_vm3, %v7175_v11 }
  0xb9   :  { %v150_v14 = vpop.permute.xlu1 %149  ;;  %v99_v15 = vpop.permute.xlu0 %98  ;;  %563 = vmatprep.mubr.f32.mxu0 %v12379_v5  ;;  %659 = vmatprep.mubr.f32.mxu1 %v12379_v5 }
  0xba   :  { %vm165_vm6 = vcmp.eq.s32.totalorder %v99_v15, %v6939_v54  ;;  %vm182_vm7 = vcmp.eq.s32.totalorder %v150_v14, %v6939_v54 }
  0xbb   :  { %v7192_v17 = vsel %vm165_vm6, 1.0, %v12379_v5  ;;  %v7203_v23 = vsel %vm182_vm7, 1.0, %v12379_v5 }
  0xbc   :  { %6257 = vmatmul.mubr.msk.f32.gmra.mrb[28].mxu0 %vm287_vm3, %v7192_v17  ;;  %6273 = vmatmul.mubr.msk.f32.gmra.mrb[26].mxu1 %vm287_vm3, %v7189_v16 }
  0xbd   :  { %v105_v18 = vpop.permute.xlu1 %104  ;;  %v102_v22 = vpop.permute.xlu0 %101  ;;  %569 = vmatprep.mubr.f32.mxu0 %v12379_v5  ;;  %665 = vmatprep.mubr.f32.mxu1 %v12379_v5 }
  0xbe   :  { %vm166_vm8 = vcmp.eq.s32.totalorder %v102_v22, %v6939_v54  ;;  %vm167_vm9 = vcmp.eq.s32.totalorder %v105_v18, %v6939_v54  ;;  %v255_v54 = vld [vmem:[%s12366_s1 + $0x40] sm:$0xff] }
  0xbf   :  { %v7206_v26 = vsel %vm166_vm8, 1.0, %v12379_v5  ;;  %v7231_v38 = vsel %vm167_vm9, 1.0, %v12379_v5  ;;  %v6571_v49 = vpack.c.bf16 %v265_v39, %v255_v54 }
  0xc0   :  { %6258 = vmatmul.mubr.msk.f32.gmra.mrb[30].mxu0 %vm287_vm3, %v7206_v26  ;;  %6274 = vmatmul.mubr.msk.f32.gmra.mrb[28].mxu1 %vm287_vm3, %v7203_v23 }
  0xc1   :  { %575 = vmatprep.mubr.f32.mxu0 %v12379_v5  ;;  %736 = vmatprep.mubr.f32.mxu1 %v12379_v5 }
  0xc4   :  { %6259 = vmatmul.mubr.msk.f32.gmra.mrb[32].mxu0 %vm287_vm3, %v7231_v38  ;;  %6277 = vmatmul.mubr.msk.f32.vlgmr.msra.gmra.mrb[30].mxu1 %vm287_vm3, %v6959_v0 }
  0xc5   :  { %742 = vmatprep.mubr.f32.mxu1 %v12379_v5  ;;  %993 = vmatprep.mubr.f32.mxu0 %v12379_v5 }
  0xc6   :  { %6562 = vmatpush1.bf16.msra.mxu1 %v6561_v35 }
  0xc7   :  { %6565 = vmatprep.subr.msk.bf16.mxu1 %vm6842_vm2, %v6563_v42 }
  0xc8   :  { %6278 = vmatmul.mubr.msk.f32.gmra.mrb[32].mxu1 %vm287_vm3, %v6979_v7  ;;  %6311 = vmatmul.mubr.msk.f32.vlgmr.msra.gmra.mrb[34].mxu0 %vm287_vm3, %v6959_v0 }
  0xc9   :  { %748 = vmatprep.mubr.f32.mxu1 %v12379_v5  ;;  %999 = vmatprep.mubr.f32.mxu0 %v12379_v5 }
  0xca   :  { %6572 = vmatpush1.bf16.msra.mxu0 %v6571_v49  ;;  %6568 = vmatpush1.bf16.msk.msra.mxu1 %vm6842_vm2, %v6566_v50 }
  0xcb   :  { %6575 = vmatprep.subr.msk.bf16.mxu0 %vm6842_vm2, %v6573_v55 }
  0xcc   :  { %6279 = vmatmul.mubr.msk.f32.gmra.mrb[34].mxu1 %vm287_vm3, %v7008_v20  ;;  %6312 = vmatmul.mubr.msk.f32.gmra.mrb[36].mxu0 %vm287_vm3, %v6979_v7 }
  0xcd   :  { %754 = vmatprep.mubr.f32.mxu1 %v12379_v5  ;;  %1005 = vmatprep.mubr.f32.mxu0 %v12379_v5 }
  0xce   :  { %6578 = vmatpush1.bf16.msk.msra.mxu0 %vm6842_vm2, %v6576_v58  ;;  %vm1770_vm2 = vcmask 1046528  }
  0xd0   :  { %6280 = vmatmul.mubr.msk.f32.gmra.mrb[36].mxu1 %vm287_vm3, %v7026_v25  ;;  %6313 = vmatmul.mubr.msk.f32.gmra.mrb[38].mxu0 %vm287_vm3, %v7008_v20 }
  0xd1   :  { %760 = vmatprep.mubr.f32.mxu1 %v12379_v5  ;;  %1011 = vmatprep.mubr.f32.mxu0 %v12379_v5 }
  0xd4   :  { %6281 = vmatmul.mubr.msk.f32.gmra.mrb[38].mxu1 %vm287_vm3, %v7040_v29  ;;  %6314 = vmatmul.mubr.msk.f32.gmra.mrb[40].mxu0 %vm287_vm3, %v7026_v25 }
  0xd5   :  { %766 = vmatprep.mubr.f32.mxu1 %v12379_v5  ;;  %1017 = vmatprep.mubr.f32.mxu0 %v12379_v5 }
  0xd8   :  { %6282 = vmatmul.mubr.msk.f32.gmra.mrb[40].mxu1 %vm287_vm3, %v7054_v33  ;;  %6315 = vmatmul.mubr.msk.f32.gmra.mrb[42].mxu0 %vm287_vm3, %v7040_v29 }
  0xd9   :  { %772 = vmatprep.mubr.f32.mxu1 %v12379_v5  ;;  %1023 = vmatprep.mubr.f32.mxu0 %v12379_v5 }
  0xdc   :  { %6283 = vmatmul.mubr.msk.f32.gmra.mrb[42].mxu1 %vm287_vm3, %v7068_v37  ;;  %6316 = vmatmul.mubr.msk.f32.gmra.mrb[44].mxu0 %vm287_vm3, %v7054_v33 }
  0xdd   :  { %778 = vmatprep.mubr.f32.mxu1 %v12379_v5  ;;  %1029 = vmatprep.mubr.f32.mxu0 %v12379_v5 }
  0xe0   :  { %6284 = vmatmul.mubr.msk.f32.gmra.mrb[44].mxu1 %vm287_vm3, %v7082_v41  ;;  %6317 = vmatmul.mubr.msk.f32.gmra.mrb[46].mxu0 %vm287_vm3, %v7068_v37 }
  0xe1   :  { %784 = vmatprep.mubr.f32.mxu1 %v12379_v5  ;;  %1035 = vmatprep.mubr.f32.mxu0 %v12379_v5 }
  0xe4   :  { %6285 = vmatmul.mubr.msk.f32.gmra.mrb[46].mxu1 %vm287_vm3, %v7096_v45  ;;  %6318 = vmatmul.mubr.msk.f32.gmra.mrb[48].mxu0 %vm287_vm3, %v7082_v41 }
  0xe5   :  { %790 = vmatprep.mubr.f32.mxu1 %v12379_v5  ;;  %1041 = vmatprep.mubr.f32.mxu0 %v12379_v5 }
  0xe8   :  { %6286 = vmatmul.mubr.msk.f32.gmra.mrb[48].mxu1 %vm287_vm3, %v7116_v52  ;;  %6319 = vmatmul.mubr.msk.f32.gmra.mrb[50].mxu0 %vm287_vm3, %v7096_v45 }
  0xe9   :  { %796 = vmatprep.mubr.f32.mxu1 %v12379_v5  ;;  %1047 = vmatprep.mubr.f32.mxu0 %v12379_v5 }
  0xec   :  { %6287 = vmatmul.mubr.msk.f32.gmra.mrb[50].mxu1 %vm287_vm3, %v7136_v61  ;;  %6320 = vmatmul.mubr.msk.f32.gmra.mrb[52].mxu0 %vm287_vm3, %v7116_v52 }
  0xed   :  { %802 = vmatprep.mubr.f32.mxu1 %v12379_v5  ;;  %1053 = vmatprep.mubr.f32.mxu0 %v12379_v5 }
  0xf0   :  { %6288 = vmatmul.mubr.msk.f32.gmra.mrb[52].mxu1 %vm287_vm3, %v7150_v2  ;;  %6321 = vmatmul.mubr.msk.f32.gmra.mrb[54].mxu0 %vm287_vm3, %v7136_v61 }
  0xf1   :  { %808 = vmatprep.mubr.f32.mxu1 %v12379_v5  ;;  %1059 = vmatprep.mubr.f32.mxu0 %v12379_v5 }
  0xf4   :  { %6289 = vmatmul.mubr.msk.f32.gmra.mrb[54].mxu1 %vm287_vm3, %v7164_v8  ;;  %6322 = vmatmul.mubr.msk.f32.gmra.mrb[56].mxu0 %vm287_vm3, %v7150_v2 }
  0xf5   :  { %814 = vmatprep.mubr.f32.mxu1 %v12379_v5  ;;  %1065 = vmatprep.mubr.f32.mxu0 %v12379_v5 }
  0xf8   :  { %6290 = vmatmul.mubr.msk.f32.gmra.mrb[56].mxu1 %vm287_vm3, %v7178_v13  ;;  %6323 = vmatmul.mubr.msk.f32.gmra.mrb[58].mxu0 %vm287_vm3, %v7164_v8 }
  0xf9   :  { %820 = vmatprep.mubr.f32.mxu1 %v12379_v5  ;;  %1071 = vmatprep.mubr.f32.mxu0 %v12379_v5 }
  0xfc   :  { %6291 = vmatmul.mubr.msk.f32.gmra.mrb[58].mxu1 %vm287_vm3, %v7192_v17  ;;  %6324 = vmatmul.mubr.msk.f32.gmra.mrb[60].mxu0 %vm287_vm3, %v7178_v13 }
  0xfd   :  { %826 = vmatprep.mubr.f32.mxu1 %v12379_v5  ;;  %1077 = vmatprep.mubr.f32.mxu0 %v12379_v5 }
 0x100   :  { %6292 = vmatmul.mubr.msk.f32.gmra.mrb[60].mxu1 %vm287_vm3, %v7206_v26  ;;  %6325 = vmatmul.mubr.msk.f32.gmra.mrb[62].mxu0 %vm287_vm3, %v7192_v17 }
 0x101   :  { %832 = vmatprep.mubr.f32.mxu1 %v12379_v5  ;;  %1083 = vmatprep.mubr.f32.mxu0 %v12379_v5 }
 0x104   :  { %6293 = vmatmul.mubr.msk.f32.gmra.mrb[62].mxu1 %vm287_vm3, %v7231_v38  ;;  %6326 = vmatmul.mubr.msk.f32.gmra.mrb[64].mxu0 %vm287_vm3, %v7206_v26 }
 0x105   :  { %838 = vmatprep.mubr.f32.mxu1 %v12379_v5  ;;  %1089 = vmatprep.mubr.f32.mxu0 %v12379_v5 }
 0x108   :  { %6294 = vmatmul.mubr.msk.f32.gmra.mrb[64].mxu1 %vm287_vm3, %v6986_v12  ;;  %6327 = vmatmul.mubr.msk.f32.gmra.mrb[66].mxu0 %vm287_vm3, %v7231_v38 }
 0x109   :  { %844 = vmatprep.mubr.f32.mxu1 %v12379_v5  ;;  %1095 = vmatprep.mubr.f32.mxu0 %v12379_v5 }
 0x10c   :  { %6295 = vmatmul.mubr.msk.f32.gmra.mrb[66].mxu1 %vm287_vm3, %v7005_v19  ;;  %6328 = vmatmul.mubr.msk.f32.gmra.mrb[68].mxu0 %vm287_vm3, %v6986_v12 }
 0x10d   :  { %850 = vmatprep.mubr.f32.mxu1 %v12379_v5  ;;  %1101 = vmatprep.mubr.f32.mxu0 %v12379_v5 }
 0x110   :  { %6296 = vmatmul.mubr.msk.f32.gmra.mrb[68].mxu1 %vm287_vm3, %v7023_v24  ;;  %6329 = vmatmul.mubr.msk.f32.gmra.mrb[70].mxu0 %vm287_vm3, %v7005_v19 }
 0x111   :  { %856 = vmatprep.mubr.f32.mxu1 %v12379_v5  ;;  %1107 = vmatprep.mubr.f32.mxu0 %v12379_v5 }
 0x114   :  { %6297 = vmatmul.mubr.msk.f32.gmra.mrb[70].mxu1 %vm287_vm3, %v7037_v28  ;;  %6330 = vmatmul.mubr.msk.f32.gmra.mrb[72].mxu0 %vm287_vm3, %v7023_v24 }
 0x115   :  { %862 = vmatprep.mubr.f32.mxu1 %v12379_v5  ;;  %1113 = vmatprep.mubr.f32.mxu0 %v12379_v5 }
 0x118   :  { %6298 = vmatmul.mubr.msk.f32.gmra.mrb[72].mxu1 %vm287_vm3, %v7051_v32  ;;  %6331 = vmatmul.mubr.msk.f32.gmra.mrb[74].mxu0 %vm287_vm3, %v7037_v28 }
 0x119   :  { %868 = vmatprep.mubr.f32.mxu1 %v12379_v5  ;;  %1119 = vmatprep.mubr.f32.mxu0 %v12379_v5 }
 0x11c   :  { %6299 = vmatmul.mubr.msk.f32.gmra.mrb[74].mxu1 %vm287_vm3, %v7065_v36  ;;  %6332 = vmatmul.mubr.msk.f32.gmra.mrb[76].mxu0 %vm287_vm3, %v7051_v32 }
 0x11d   :  { %874 = vmatprep.mubr.f32.mxu1 %v12379_v5  ;;  %1125 = vmatprep.mubr.f32.mxu0 %v12379_v5 }
 0x120   :  { %6300 = vmatmul.mubr.msk.f32.gmra.mrb[76].mxu1 %vm287_vm3, %v7079_v40  ;;  %6333 = vmatmul.mubr.msk.f32.gmra.mrb[78].mxu0 %vm287_vm3, %v7065_v36 }
 0x121   :  { %880 = vmatprep.mubr.f32.mxu1 %v12379_v5  ;;  %1131 = vmatprep.mubr.f32.mxu0 %v12379_v5 }
 0x124   :  { %6301 = vmatmul.mubr.msk.f32.gmra.mrb[78].mxu1 %vm287_vm3, %v7093_v44  ;;  %6334 = vmatmul.mubr.msk.f32.gmra.mrb[80].mxu0 %vm287_vm3, %v7079_v40 }
 0x125   :  { %886 = vmatprep.mubr.f32.mxu1 %v12379_v5  ;;  %1137 = vmatprep.mubr.f32.mxu0 %v12379_v5 }
 0x128   :  { %6302 = vmatmul.mubr.msk.f32.gmra.mrb[80].mxu1 %vm287_vm3, %v7113_v51  ;;  %6335 = vmatmul.mubr.msk.f32.gmra.mrb[82].mxu0 %vm287_vm3, %v7093_v44 }
 0x129   :  { %892 = vmatprep.mubr.f32.mxu1 %v12379_v5  ;;  %1143 = vmatprep.mubr.f32.mxu0 %v12379_v5 }
 0x12c   :  { %6303 = vmatmul.mubr.msk.f32.gmra.mrb[82].mxu1 %vm287_vm3, %v7133_v60  ;;  %6336 = vmatmul.mubr.msk.f32.gmra.mrb[84].mxu0 %vm287_vm3, %v7113_v51 }
 0x12d   :  { %898 = vmatprep.mubr.f32.mxu1 %v12379_v5  ;;  %1149 = vmatprep.mubr.f32.mxu0 %v12379_v5 }
 0x130   :  { %6304 = vmatmul.mubr.msk.f32.gmra.mrb[84].mxu1 %vm287_vm3, %v7147_v1  ;;  %6337 = vmatmul.mubr.msk.f32.gmra.mrb[86].mxu0 %vm287_vm3, %v7133_v60 }
 0x131   :  { %904 = vmatprep.mubr.f32.mxu1 %v12379_v5  ;;  %1155 = vmatprep.mubr.f32.mxu0 %v12379_v5 }
 0x134   :  { %6305 = vmatmul.mubr.msk.f32.gmra.mrb[86].mxu1 %vm287_vm3, %v7161_v6  ;;  %6338 = vmatmul.mubr.msk.f32.gmra.mrb[88].mxu0 %vm287_vm3, %v7147_v1 }
 0x135   :  { %910 = vmatprep.mubr.f32.mxu1 %v12379_v5  ;;  %1161 = vmatprep.mubr.f32.mxu0 %v12379_v5 }
 0x138   :  { %6306 = vmatmul.mubr.msk.f32.gmra.mrb[88].mxu1 %vm287_vm3, %v7175_v11  ;;  %6339 = vmatmul.mubr.msk.f32.gmra.mrb[90].mxu0 %vm287_vm3, %v7161_v6 }
 0x139   :  { %916 = vmatprep.mubr.f32.mxu1 %v12379_v5  ;;  %1167 = vmatprep.mubr.f32.mxu0 %v12379_v5 }
 0x13c   :  { %6307 = vmatmul.mubr.msk.f32.gmra.mrb[90].mxu1 %vm287_vm3, %v7189_v16  ;;  %6340 = vmatmul.mubr.msk.f32.gmra.mrb[92].mxu0 %vm287_vm3, %v7175_v11 }
 0x13d   :  { %922 = vmatprep.mubr.f32.mxu1 %v12379_v5  ;;  %1173 = vmatprep.mubr.f32.mxu0 %v12379_v5 }
 0x140   :  { %6308 = vmatmul.mubr.msk.f32.gmra.mrb[92].mxu1 %vm287_vm3, %v7203_v23  ;;  %6341 = vmatmul.mubr.msk.f32.gmra.mrb[94].mxu0 %vm287_vm3, %v7189_v16 }
 0x141   :  { %1179 = vmatprep.mubr.f32.mxu0 %v12379_v5  ;;  %1250 = vmatprep.mubr.f32.mxu1 %v12379_v5 }
 0x144   :  { %6342 = vmatmul.mubr.msk.f32.gmra.mrb[96].mxu0 %vm287_vm3, %v7203_v23  ;;  %6345 = vmatmul.mubr.msk.f32.vlgmr.msra.gmra.mrb[94].mxu1 %vm287_vm3, %v6959_v0 }
 0x145   :  { %1256 = vmatprep.mubr.f32.mxu1 %v12379_v5  ;;  %1507 = vmatprep.mubr.f32.mxu0 %v12379_v5 }
 0x148   :  { %6346 = vmatmul.mubr.msk.f32.gmra.mrb[96].mxu1 %vm287_vm3, %v6979_v7  ;;  %6379 = vmatmul.mubr.msk.f32.vlgmr.msra.gmra.mrb[98].mxu0 %vm287_vm3, %v6959_v0 }
 0x149   :  { %1262 = vmatprep.mubr.f32.mxu1 %v12379_v5  ;;  %1513 = vmatprep.mubr.f32.mxu0 %v12379_v5 }
 0x14c   :  { %6347 = vmatmul.mubr.msk.f32.gmra.mrb[98].mxu1 %vm287_vm3, %v7008_v20  ;;  %6380 = vmatmul.mubr.msk.f32.gmra.mrb[100].mxu0 %vm287_vm3, %v6979_v7 }
 0x14d   :  { %1268 = vmatprep.mubr.f32.mxu1 %v12379_v5  ;;  %1519 = vmatprep.mubr.f32.mxu0 %v12379_v5 }
 0x150   :  { %6348 = vmatmul.mubr.msk.f32.gmra.mrb[100].mxu1 %vm287_vm3, %v7026_v25  ;;  %6381 = vmatmul.mubr.msk.f32.gmra.mrb[102].mxu0 %vm287_vm3, %v7008_v20 }
 0x151   :  { %1274 = vmatprep.mubr.f32.mxu1 %v12379_v5  ;;  %1525 = vmatprep.mubr.f32.mxu0 %v12379_v5 }
 0x154   :  { %6349 = vmatmul.mubr.msk.f32.gmra.mrb[102].mxu1 %vm287_vm3, %v7040_v29  ;;  %6382 = vmatmul.mubr.msk.f32.gmra.mrb[104].mxu0 %vm287_vm3, %v7026_v25 }
 0x155   :  { %1280 = vmatprep.mubr.f32.mxu1 %v12379_v5  ;;  %1531 = vmatprep.mubr.f32.mxu0 %v12379_v5 }
 0x157   :  { %v7488_v0 = vpop.f32.mrb[0].mxu0 }
 0x158   :  { %12608 = vst [vmem:[#allocation5_spill] sm:$0xff] %v7488_v0  ;;  %v7490_v7 = vpop.f32.mrb[1].mxu0  ;;  %6350 = vmatmul.mubr.msk.f32.gmra.mrb[104].mxu1 %vm287_vm3, %v7054_v33  ;;  %6383 = vmatmul.mubr.msk.f32.gmra.mrb[106].mxu0 %vm287_vm3, %v7040_v29  ;;  %v1771_v59 = vrot.slane %v7488_v0, 1 }
 0x159   :  { %1286 = vmatprep.mubr.f32.mxu1 %v12379_v5  ;;  %1537 = vmatprep.mubr.f32.mxu0 %v12379_v5  ;;  %v2020_v29 = vrot.slane %v7490_v7, 2  ;;  %v2157_v4 = vrot.slane %v7490_v7, 3 }
 0x15b   :  { %v7498_v20 = vpop.f32.mrb[2].mxu0  ;;  %v7500_v25 = vpop.f32.mrb[0].mxu1 }
 0x15c   :  { %12609 = vst [vmem:[#allocation6_spill] sm:$0xff] %v7498_v20  ;;  %v1772_v62 = vrot.slane %v7498_v20, 1  ;;  %v489_v63 = vpop.f32.mrb[3].mxu0  ;;  %v7504_v3 = vpop.f32.mrb[1].mxu1  ;;  %6351 = vmatmul.mubr.msk.f32.gmra.mrb[106].mxu1 %vm287_vm3, %v7068_v37  ;;  %6384 = vmatmul.mubr.msk.f32.gmra.mrb[108].mxu0 %vm287_vm3, %v7054_v33  ;;  %v12377_v15 = vrot.slane %v7500_v25, 1 }
 0x15d   :  { %v2021_v9 = vrot.slane %v489_v63, 2  ;;  %v2158_v10 = vrot.slane %v489_v63, 3  ;;  %1292 = vmatprep.mubr.f32.mxu1 %v12379_v5  ;;  %1543 = vmatprep.mubr.f32.mxu0 %v12379_v5  ;;  %v12372_v30 = vrot.slane %v7504_v3, 2  ;;  %v12373_v31 = vrot.slane %v7504_v3, 3 }
 0x15e   :  { %v1773_v14 = vsel %vm1770_vm2, %v1771_v59, %v1772_v62 }
 0x15f   :  { %1859 = vrot.lane.b32.xlu0 %v1773_v14, %s6757_s10  ;;  %v7517_v18 = vpop.f32.mrb[4].mxu0  ;;  %v7519_v33 = vpop.f32.mrb[2].mxu1  ;;  %v2159_v22 = vsel %vm2156_vm10, %v2157_v4, %v2158_v10  ;;  %v7525_v27 = vsel %vm2019_vm11, %v2020_v29, %v2021_v9 }
 0x160   :  { %12610 = vst [vmem:[#allocation7_spill] sm:$0xff] %v7517_v18  ;;  %12611 = vst [vmem:[#allocation8_spill] sm:$0xff] %v7519_v33  ;;  %v1774_v34 = vrot.slane %v7517_v18, 1  ;;  %v1802_v35 = vrot.slane %v7519_v33, 1  ;;  %v495_v54 = vpop.f32.mrb[5].mxu0  ;;  %v591_v39 = vpop.f32.mrb[3].mxu1  ;;  %6352 = vmatmul.mubr.msk.f32.gmra.mrb[108].mxu1 %vm287_vm3, %v7082_v41  ;;  %6385 = vmatmul.mubr.msk.f32.gmra.mrb[110].mxu0 %vm287_vm3, %v7068_v37 }
 0x161   :  { %12612 = vst [vmem:[#allocation9_spill] sm:$0xff] %v7525_v27  ;;  %v2023_v42 = vrot.slane %v495_v54, 2  ;;  %v2160_v43 = vrot.slane %v495_v54, 3  ;;  %v2051_v46 = vrot.slane %v591_v39, 2  ;;  %v2188_v47 = vrot.slane %v591_v39, 3  ;;  %1298 = vmatprep.mubr.f32.mxu1 %v12379_v5  ;;  %1549 = vmatprep.mubr.f32.mxu0 %v12379_v5 }
 0x162   :  { %v1803_v48 = vsel %vm1770_vm2, %v12377_v15, %v1802_v35  ;;  %v1775_v49 = vsel %vm1770_vm2, %v1772_v62, %v1774_v34 }
 0x163   :  { %2245 = vrot.lane.b32.xlu0 %v2159_v22, %s6757_s10  ;;  %1893 = vrot.lane.b32.xlu1 %v1803_v48, %s6757_s10  ;;  %v7543_v50 = vpop.f32.mrb[6].mxu0  ;;  %v7545_v37 = vpop.f32.mrb[4].mxu1  ;;  %v2189_v55 = vsel %vm2156_vm10, %v12373_v31, %v2188_v47  ;;  %v2161_v56 = vsel %vm2156_vm10, %v2158_v10, %v2160_v43  ;;  %v7554_v57 = vsel %vm2019_vm11, %v12372_v30, %v2051_v46 }
 0x164   :  { %12613 = vst [vmem:[#allocation10_spill] sm:$0xff] %v7543_v50  ;;  %12614 = vst [vmem:[#allocation11_spill] sm:$0xff] %v7545_v37  ;;  %v1776_v58 = vrot.slane %v7543_v50, 1  ;;  %v12376_v21 = vrot.slane %v7545_v37, 1  ;;  %v501_v62 = vpop.f32.mrb[7].mxu0  ;;  %v7558_v63 = vpop.f32.mrb[5].mxu1  ;;  %6353 = vmatmul.mubr.msk.f32.gmra.mrb[110].mxu1 %vm287_vm3, %v7096_v45  ;;  %6386 = vmatmul.mubr.msk.f32.gmra.mrb[112].mxu0 %vm287_vm3, %v7082_v41  ;;  %v7565_v10 = vsel %vm2019_vm11, %v2021_v9, %v2023_v42 }
 0x165   :  { %12615 = vst [vmem:[#allocation12_spill] sm:$0xff] %v7554_v57  ;;  %12616 = vst [vmem:[#allocation13_spill] sm:$0xff] %v7565_v10  ;;  %v2025_v14 = vrot.slane %v501_v62, 2  ;;  %v2162_v22 = vrot.slane %v501_v62, 3  ;;  %v12374_v54 = vrot.slane %v7558_v63, 2  ;;  %v12375_v39 = vrot.slane %v7558_v63, 3  ;;  %1304 = vmatprep.mubr.f32.mxu1 %v12379_v5  ;;  %1555 = vmatprep.mubr.f32.mxu0 %v12379_v5 }
 0x166   :  { %v1805_v48 = vsel %vm1770_vm2, %v1802_v35, %v12376_v21  ;;  %v1777_v53 = vsel %vm1770_vm2, %v1774_v34, %v1776_v58  ;;  %v7576_v41 = vsel %vm1770_vm2, %v1776_v58, %v1771_v59 }
 0x167   :  { %2279 = vrot.lane.b32.xlu1 %v2189_v55, %s6757_s10  ;;  %1895 = vrot.lane.b32.xlu0 %v1805_v48, %s6757_s10  ;;  %v7580_v9 = vpop.f32.mrb[8].mxu0  ;;  %v7582_v62 = vpop.f32.mrb[6].mxu1  ;;  %v2191_v30 = vsel %vm2156_vm10, %v2188_v47, %v12375_v39  ;;  %v2163_v31 = vsel %vm2156_vm10, %v2160_v43, %v2162_v22  ;;  %v7589_v35 = vsel %vm2156_vm10, %v2162_v22, %v2157_v4 }
 0x168   :  { %12617 = vst [vmem:[#allocation14_spill] sm:$0xff] %v7580_v9  ;;  %12618 = vst [vmem:[#allocation15_spill] sm:$0xff] %v7582_v62  ;;  %v7591_v34 = vpop.f32.mrb[9].mxu0  ;;  %v7593_v59 = vpop.f32.mrb[7].mxu1  ;;  %6354 = vmatmul.mubr.msk.f32.gmra.mrb[112].mxu1 %vm287_vm3, %v7116_v52  ;;  %6387 = vmatmul.mubr.msk.f32.gmra.mrb[114].mxu0 %vm287_vm3, %v7096_v45  ;;  %v7602_v55 = vsel %vm2019_vm11, %v2051_v46, %v12374_v54  ;;  %v7605_v43 = vsel %vm2019_vm11, %v2023_v42, %v2025_v14  ;;  %v12381_v47 = vrot.slane %v7580_v9, 1 }
 0x169   :  { %12619 = vst [vmem:[#allocation16_spill] sm:$0xff] %v7602_v55  ;;  %12620 = vst [vmem:[#allocation17_spill] sm:$0xff] %v7605_v43  ;;  %1310 = vmatprep.mubr.f32.mxu1 %v12379_v5  ;;  %1561 = vmatprep.mubr.f32.mxu0 %v12379_v5  ;;  %v7612_v4 = vsel %vm2019_vm11, %v2025_v14, %v2020_v29  ;;  %v12378_v45 = vrot.slane %v7582_v62, 1  ;;  %v12384_v7 = vrot.slane %v7593_v59, 3 }
 0x16a   :  { %12621 = vst [vmem:[#allocation18_spill] sm:$0xff] %v7612_v4 }
 0x16b   :  { %2281 = vrot.lane.b32.xlu0 %v2191_v30, %s6757_s10  ;;  %v7618_v46 = vpop.f32.mrb[8].mxu1  ;;  %1861 = vrot.lane.b32.xlu1 %v1775_v49, %s6757_s10  ;;  %v7621_v42 = vpop.f32.mrb[10].mxu0 }
 0x16c   :  { %12622 = vst [vmem:[#allocation19_spill] sm:$0xff] %v7618_v46  ;;  %12623 = vst [vmem:[#allocation20_spill] sm:$0xff] %v7621_v42  ;;  %v1807_v29 = vrot.slane %v7618_v46, 1  ;;  %v1779_v14 = vrot.slane %v7621_v42, 1  ;;  %v513_v48 = vpop.f32.mrb[11].mxu0  ;;  %v609_v54 = vpop.f32.mrb[9].mxu1  ;;  %6355 = vmatmul.mubr.msk.f32.gmra.mrb[114].mxu1 %vm287_vm3, %v7136_v61  ;;  %6388 = vmatmul.mubr.msk.f32.gmra.mrb[116].mxu0 %vm287_vm3, %v7116_v52 }
 0x16d   :  { %v2028_v30 = vrot.slane %v513_v48, 2  ;;  %v2165_v49 = vrot.slane %v513_v48, 3  ;;  %v2056_v39 = vrot.slane %v609_v54, 2  ;;  %v2193_v21 = vrot.slane %v609_v54, 3  ;;  %1316 = vmatprep.mubr.f32.mxu1 %v12379_v5  ;;  %1567 = vmatprep.mubr.f32.mxu0 %v12379_v5 }
 0x16e   :  { %v1808_v22 = vsel %vm1770_vm2, %v12378_v45, %v1807_v29  ;;  %v7640_v58 = vsel %vm1770_vm2, %v12381_v47, %v1779_v14  ;;  %v12626_v45 = vrot.slane %v7591_v34, 3  ;;  %v12627_v47 = vrot.slane %v7593_v59, 2 }
 0x16f   :  { %v7642_v52 = vpop.f32.mrb[10].mxu1  ;;  %2247 = vrot.lane.b32.xlu1 %v2161_v56, %s6757_s10  ;;  %1863 = vrot.lane.b32.xlu0 %v1777_v53, %s6757_s10  ;;  %v7646_v54 = vpop.f32.mrb[12].mxu0  ;;  %v7651_v48 = vsel %vm2156_vm10, %v12384_v7, %v2193_v21 }
 0x170   :  { %12624 = vst [vmem:[#allocation21_spill] sm:$0xff] %v7642_v52  ;;  %12625 = vst [vmem:[#allocation22_spill] sm:$0xff] %v7646_v54  ;;  %v7656_v5 = vsel %vm2156_vm10, %v12626_v45, %v2165_v49  ;;  %v7661_v15 = vsel %vm2019_vm11, %v12627_v47, %v2056_v39  ;;  %v1809_v56 = vrot.slane %v7642_v52, 1  ;;  %v1781_v53 = vrot.slane %v7646_v54, 1  ;;  %v519_v42 = vpop.f32.mrb[13].mxu0  ;;  %v615_v46 = vpop.f32.mrb[11].mxu1  ;;  %6356 = vmatmul.mubr.msk.f32.gmra.mrb[116].mxu1 %vm287_vm3, %v7150_v2 }
 0x171   :  { %12628 = vst [vmem:[#allocation23_spill] sm:$0xff] %v7661_v15  ;;  %6389 = vmatmul.mubr.msk.f32.gmra.mrb[118].mxu0 %vm287_vm3, %v7136_v61  ;;  %v12629_v45 = vrot.slane %v7591_v34, 2  ;;  %v2030_v4 = vrot.slane %v519_v42, 2  ;;  %v2167_v47 = vrot.slane %v519_v42, 3  ;;  %v2058_v15 = vrot.slane %v615_v46, 2 }
 0x172   :  { %v2195_v50 = vrot.slane %v615_v46, 3  ;;  %v12631_v52 = vmov 0.0   ;;  %v1810_v54 = vsel %vm1770_vm2, %v1807_v29, %v1809_v56  ;;  %v7678_v43 = vsel %vm1770_vm2, %v1779_v14, %v1781_v53 }
 0x173   :  { %v7672_v7 = vsel %vm2019_vm11, %v12629_v45, %v2028_v30  ;;  %1322 = vmatprep.mubr.f32.mxu1 %v12631_v52  ;;  %1573 = vmatprep.mubr.f32.mxu0 %v12631_v52  ;;  %v7680_v18 = vpop.f32.mrb[12].mxu1  ;;  %v7685_v61 = vpop.f32.mrb[14].mxu0  ;;  %v7691_v42 = vsel %vm2156_vm10, %v2165_v49, %v2167_v47  ;;  %v7694_v29 = vsel %vm2019_vm11, %v2056_v39, %v2058_v15 }
 0x174   :  { %12630 = vst [vmem:[#allocation24_spill] sm:$0xff] %v7672_v7  ;;  %12632 = vst [vmem:[#allocation25_spill] sm:$0xff] %v7680_v18  ;;  %1865 = vrot.lane.b32.xlu1 %v7576_v41, %s6757_s10  ;;  %2249 = vrot.lane.b32.xlu0 %v2163_v31, %s6757_s10  ;;  %v7688_v46 = vsel %vm2156_vm10, %v2193_v21, %v2195_v50  ;;  %v1811_v14 = vrot.slane %v7680_v18, 1  ;;  %v1783_v45 = vrot.slane %v7685_v61, 1  ;;  %v525_v7 = vpop.f32.mrb[15].mxu0  ;;  %v621_v10 = vpop.f32.mrb[13].mxu1 }
 0x175   :  { %12633 = vst [vmem:[#allocation26_spill] sm:$0xff] %v7685_v61  ;;  %12634 = vst [vmem:[#allocation27_spill] sm:$0xff] %v7694_v29  ;;  %6357 = vmatmul.mubr.msk.f32.gmra.mrb[118].mxu1 %vm287_vm3, %v7164_v8  ;;  %6390 = vmatmul.mubr.msk.f32.gmra.mrb[120].mxu0 %vm287_vm3, %v7150_v2  ;;  %v7703_v31 = vsel %vm2019_vm11, %v2028_v30, %v2030_v4  ;;  %v2032_v21 = vrot.slane %v525_v7, 2  ;;  %v2169_v41 = vrot.slane %v525_v7, 3  ;;  %v2060_v49 = vrot.slane %v621_v10, 2 }
 0x176   :  { %12635 = vst [vmem:[#allocation28_spill] sm:$0xff] %v7703_v31  ;;  %v2197_v39 = vrot.slane %v621_v10, 3  ;;  %1328 = vmatprep.mubr.f32.mxu1 %v12631_v52  ;;  %1579 = vmatprep.mubr.f32.mxu0 %v12631_v52  ;;  %v7708_v61 = vsel %vm1770_vm2, %v1809_v56, %v1811_v14  ;;  %v12636_v18 = vrot.slane %v7582_v62, 1  ;;  %v7716_v2 = vsel %vm1770_vm2, %v1781_v53, %v1783_v45 }
 0x177   :  { %v12637_v30 = vrot.slane %v7580_v9, 1  ;;  %v7723_v10 = vpop.f32.mrb[14].mxu1  ;;  %v7728_v56 = vpop.f32.mrb[16].mxu0  ;;  %v12640_v53 = vrot.slane %v7593_v59, 3 }
 0x178   :  { %v7713_v29 = vsel %vm1770_vm2, %v1811_v14, %v12636_v18  ;;  %12638 = vst [vmem:[#allocation29_spill] sm:$0xff] %v7723_v10  ;;  %2251 = vrot.lane.b32.xlu1 %v7589_v35, %s6757_s10  ;;  %1899 = vrot.lane.b32.xlu0 %v1808_v22, %s6757_s10  ;;  %12639 = vst [vmem:[#allocation30_spill] sm:$0xff] %v7728_v56  ;;  %v7731_v18 = vsel %vm2156_vm10, %v2195_v50, %v2197_v39  ;;  %v7743_v31 = vpop.f32.mrb[15].mxu1  ;;  %v12641_v50 = vrot.slane %v7591_v34, 3 }
 0x179   :  { %v7721_v7 = vsel %vm1770_vm2, %v1783_v45, %v12637_v30  ;;  %v7736_v14 = vsel %vm2156_vm10, %v2197_v39, %v12640_v53  ;;  %v7739_v45 = vsel %vm2156_vm10, %v2167_v47, %v2169_v41  ;;  %v7741_v30 = vpop.f32.mrb[17].mxu0  ;;  %6358 = vmatmul.mubr.msk.f32.gmra.mrb[120].mxu1 %vm287_vm3, %v7178_v13  ;;  %6391 = vmatmul.mubr.msk.f32.gmra.mrb[122].mxu0 %vm287_vm3, %v7164_v8  ;;  %v12643_v47 = vrot.slane %v7593_v59, 2 }
 0x17a   :  { %v7752_v35 = vsel %vm2156_vm10, %v2169_v41, %v12641_v50  ;;  %v7755_v22 = vsel %vm2019_vm11, %v2058_v15, %v2060_v49  ;;  %1334 = vmatprep.mubr.f32.mxu1 %v12631_v52  ;;  %1585 = vmatprep.mubr.f32.mxu0 %v12631_v52  ;;  %v7765_v53 = vsel %vm2019_vm11, %v2030_v4, %v2032_v21  ;;  %v12646_v8 = vrot.slane %v7591_v34, 2 }
 0x17b   :  { %12642 = vst [vmem:[#allocation31_spill] sm:$0xff] %v7755_v22  ;;  %v7762_v39 = vsel %vm2019_vm11, %v2060_v49, %v12643_v47  ;;  %12645 = vst [vmem:[#allocation33_spill] sm:$0xff] %v7765_v53  ;;  %v12394_v15 = vrot.slane %v7723_v10, 1  ;;  %v7775_v9 = vpop.f32.mrb[16].mxu1  ;;  %v7780_v59 = vpop.f32.mrb[18].mxu0  ;;  %v12654_v34 = vrot.slane %v7741_v30, 3 }
 0x17c   :  { %12644 = vst [vmem:[#allocation32_spill] sm:$0xff] %v7762_v39  ;;  %v7770_v41 = vsel %vm2019_vm11, %v2032_v21, %v12646_v8  ;;  %12648 = vst [vmem:[#allocation35_spill] sm:$0xff] %v7775_v9  ;;  %1901 = vrot.lane.b32.xlu1 %v1810_v54, %s6757_s10  ;;  %2285 = vrot.lane.b32.xlu0 %v7651_v48, %s6757_s10  ;;  %v1814_v21 = vrot.slane %v7775_v9, 1  ;;  %v1786_v49 = vrot.slane %v7780_v59, 1  ;;  %v537_v47 = vpop.f32.mrb[19].mxu0  ;;  %v633_v8 = vpop.f32.mrb[17].mxu1 }
 0x17d   :  { %12647 = vst [vmem:[#allocation34_spill] sm:$0xff] %v7770_v41  ;;  %12649 = vst [vmem:[#allocation36_spill] sm:$0xff] %v7780_v59  ;;  %6359 = vmatmul.mubr.msk.f32.gmra.mrb[122].mxu1 %vm287_vm3, %v7192_v17  ;;  %6392 = vmatmul.mubr.msk.f32.gmra.mrb[124].mxu0 %vm287_vm3, %v7178_v13  ;;  %v2035_v54 = vrot.slane %v537_v47, 2  ;;  %v2172_v48 = vrot.slane %v537_v47, 3  ;;  %v2063_v22 = vrot.slane %v633_v8, 2  ;;  %v2200_v50 = vrot.slane %v633_v8, 3 }
 0x17e   :  { %1340 = vmatprep.mubr.f32.mxu1 %v12631_v52  ;;  %1591 = vmatprep.mubr.f32.mxu0 %v12631_v52  ;;  %v7796_v4 = vsel %vm1770_vm2, %v12394_v15, %v1814_v21  ;;  %v12650_v59 = vrot.slane %v7728_v56, 1  ;;  %v12653_v8 = vrot.slane %v7743_v31, 3  ;;  %v12655_v41 = vrot.slane %v7743_v31, 2 }
 0x17f   :  { %v7803_v13 = vpop.f32.mrb[18].mxu1  ;;  %v7809_v47 = vpop.f32.mrb[20].mxu0 }
 0x180   :  { %v7801_v9 = vsel %vm1770_vm2, %v12650_v59, %v1786_v49  ;;  %12651 = vst [vmem:[#allocation37_spill] sm:$0xff] %v7803_v13  ;;  %2287 = vrot.lane.b32.xlu1 %v7688_v46, %s6757_s10  ;;  %1867 = vrot.lane.b32.xlu0 %v7640_v58, %s6757_s10  ;;  %12652 = vst [vmem:[#allocation38_spill] sm:$0xff] %v7809_v47  ;;  %v7814_v15 = vsel %vm2156_vm10, %v12653_v8, %v2200_v50  ;;  %v1816_v46 = vrot.slane %v7803_v13, 1  ;;  %v543_v39 = vpop.f32.mrb[21].mxu0  ;;  %v639_v62 = vpop.f32.mrb[19].mxu1 }
 0x181   :  { %v7819_v59 = vsel %vm2156_vm10, %v12654_v34, %v2172_v48  ;;  %v7824_v53 = vsel %vm2019_vm11, %v12655_v41, %v2063_v22  ;;  %v1788_v58 = vrot.slane %v7809_v47, 1  ;;  %6360 = vmatmul.mubr.msk.f32.gmra.mrb[124].mxu1 %vm287_vm3, %v7206_v26  ;;  %6393 = vmatmul.mubr.msk.f32.gmra.mrb[126].mxu0 %vm287_vm3, %v7192_v17  ;;  %v12657_v34 = vrot.slane %v7741_v30, 2 }
 0x182   :  { %12656 = vst [vmem:[#allocation39_spill] sm:$0xff] %v7824_v53  ;;  %v2037_v20 = vrot.slane %v543_v39, 2  ;;  %v2174_v41 = vrot.slane %v543_v39, 3  ;;  %v2065_v53 = vrot.slane %v639_v62, 2  ;;  %v2202_v55 = vrot.slane %v639_v62, 3  ;;  %1346 = vmatprep.mubr.f32.mxu1 %v12631_v52  ;;  %1597 = vmatprep.mubr.f32.mxu0 %v12631_v52 }
 0x183   :  { %v7835_v8 = vsel %vm2019_vm11, %v12657_v34, %v2035_v54  ;;  %v7840_v47 = vsel %vm1770_vm2, %v1814_v21, %v1816_v46  ;;  %v7843_v13 = vsel %vm1770_vm2, %v1786_v49, %v1788_v58  ;;  %v7845_v17 = vpop.f32.mrb[20].mxu1  ;;  %v7851_v39 = vpop.f32.mrb[22].mxu0 }
 0x184   :  { %12658 = vst [vmem:[#allocation40_spill] sm:$0xff] %v7835_v8  ;;  %12659 = vst [vmem:[#allocation41_spill] sm:$0xff] %v7845_v17  ;;  %2253 = vrot.lane.b32.xlu0 %v7656_v5, %s6757_s10  ;;  %1869 = vrot.lane.b32.xlu1 %v7678_v43, %s6757_s10  ;;  %v7854_v62 = vsel %vm2156_vm10, %v2200_v50, %v2202_v55  ;;  %v7857_v34 = vsel %vm2156_vm10, %v2172_v48, %v2174_v41  ;;  %v1818_v49 = vrot.slane %v7845_v17, 1  ;;  %v549_v33 = vpop.f32.mrb[23].mxu0  ;;  %v645_v5 = vpop.f32.mrb[21].mxu1 }
 0x185   :  { %12660 = vst [vmem:[#allocation42_spill] sm:$0xff] %v7851_v39  ;;  %v7860_v21 = vsel %vm2019_vm11, %v2063_v22, %v2065_v53  ;;  %v1790_v8 = vrot.slane %v7851_v39, 1  ;;  %6361 = vmatmul.mubr.msk.f32.gmra.mrb[126].mxu1 %vm287_vm3, %v7231_v38  ;;  %6394 = vmatmul.mubr.msk.f32.gmra.mrb[128].mxu0 %vm287_vm3, %v7206_v26  ;;  %v7869_v43 = vsel %vm2019_vm11, %v2035_v54, %v2037_v20  ;;  %v2039_v50 = vrot.slane %v549_v33, 2 }
 0x186   :  { %12661 = vst [vmem:[#allocation43_spill] sm:$0xff] %v7860_v21  ;;  %12662 = vst [vmem:[#allocation44_spill] sm:$0xff] %v7869_v43  ;;  %v2176_v48 = vrot.slane %v549_v33, 3  ;;  %v2067_v57 = vrot.slane %v645_v5, 2  ;;  %v2204_v22 = vrot.slane %v645_v5, 3  ;;  %1352 = vmatprep.mubr.f32.mxu1 %v12631_v52  ;;  %1603 = vmatprep.mubr.f32.mxu0 %v12631_v52  ;;  %v7874_v39 = vsel %vm1770_vm2, %v1816_v46, %v1818_v49 }
 0x187   :  { %v12663_v17 = vrot.slane %v7723_v10, 1  ;;  %v7882_v26 = vsel %vm1770_vm2, %v1788_v58, %v1790_v8  ;;  %v12664_v54 = vrot.slane %v7728_v56, 1  ;;  %v7889_v5 = vpop.f32.mrb[22].mxu1  ;;  %v7895_v46 = vpop.f32.mrb[24].mxu0  ;;  %v12667_v58 = vrot.slane %v7743_v31, 3 }
 0x188   :  { %12665 = vst [vmem:[#allocation45_spill] sm:$0xff] %v7889_v5  ;;  %1903 = vrot.lane.b32.xlu0 %v7708_v61, %s6757_s10  ;;  %1905 = vrot.lane.b32.xlu1 %v7713_v29, %s6757_s10  ;;  %12666 = vst [vmem:[#allocation46_spill] sm:$0xff] %v7895_v46  ;;  %v7910_v43 = vpop.f32.mrb[23].mxu1  ;;  %v7922_v29 = vsel %vm2019_vm11, %v2065_v53, %v2067_v57  ;;  %v12405_v53 = vrot.slane %v7889_v5, 1 }
 0x189   :  { %v7879_v21 = vsel %vm1770_vm2, %v1818_v49, %v12663_v17  ;;  %v7887_v33 = vsel %vm1770_vm2, %v1790_v8, %v12664_v54  ;;  %v7898_v17 = vsel %vm2156_vm10, %v2202_v55, %v2204_v22  ;;  %v7903_v49 = vsel %vm2156_vm10, %v2204_v22, %v12667_v58  ;;  %v7908_v54 = vpop.f32.mrb[25].mxu0  ;;  %6362 = vmatmul.mubr.msk.f32.gmra.mrb[128].mxu1 %vm287_vm3, %v6986_v12 }
 0x18a   :  { %v7906_v8 = vsel %vm2156_vm10, %v2174_v41, %v2176_v48  ;;  %6395 = vmatmul.mubr.msk.f32.gmra.mrb[130].mxu0 %vm287_vm3, %v7231_v38  ;;  %v12668_v55 = vrot.slane %v7741_v30, 3  ;;  %12669 = vst [vmem:[#allocation47_spill] sm:$0xff] %v7922_v29  ;;  %1358 = vmatprep.mubr.f32.mxu1 %v12631_v52  ;;  %v12670_v41 = vrot.slane %v7743_v31, 2  ;;  %v7932_v58 = vsel %vm2019_vm11, %v2037_v20, %v2039_v50 }
 0x18b   :  { %1609 = vmatprep.mubr.f32.mxu0 %v12631_v52  ;;  %12672 = vst [vmem:[#allocation49_spill] sm:$0xff] %v7932_v58  ;;  %v12673_v38 = vrot.slane %v7741_v30, 2  ;;  %v7942_v56 = vpop.f32.mrb[24].mxu1  ;;  %v7948_v20 = vpop.f32.mrb[26].mxu0 }
 0x18c   :  { %v7919_v61 = vsel %vm2156_vm10, %v2176_v48, %v12668_v55  ;;  %v7929_v22 = vsel %vm2019_vm11, %v2067_v57, %v12670_v41  ;;  %12675 = vst [vmem:[#allocation51_spill] sm:$0xff] %v7942_v56  ;;  %2289 = vrot.lane.b32.xlu0 %v7731_v18, %s6757_s10  ;;  %2255 = vrot.lane.b32.xlu1 %v7691_v42, %s6757_s10  ;;  %12676 = vst [vmem:[#allocation52_spill] sm:$0xff] %v7948_v20  ;;  %v1821_v30 = vrot.slane %v7942_v56, 1  ;;  %v561_v41 = vpop.f32.mrb[27].mxu0 }
 0x18d   :  { %12671 = vst [vmem:[#allocation48_spill] sm:$0xff] %v7929_v22  ;;  %v7937_v48 = vsel %vm2019_vm11, %v2039_v50, %v12673_v38  ;;  %v1793_v50 = vrot.slane %v7948_v20, 1  ;;  %v657_v38 = vpop.f32.mrb[25].mxu1  ;;  %6363 = vmatmul.mubr.msk.f32.gmra.mrb[130].mxu1 %vm287_vm3, %v7005_v19  ;;  %v2042_v18 = vrot.slane %v561_v41, 2  ;;  %v2179_v42 = vrot.slane %v561_v41, 3 }
 0x18e   :  { %12674 = vst [vmem:[#allocation50_spill] sm:$0xff] %v7937_v48  ;;  %6396 = vmatmul.mubr.msk.f32.gmra.mrb[132].mxu0 %vm287_vm3, %v6986_v12  ;;  %v2070_v29 = vrot.slane %v657_v38, 2  ;;  %v2207_v55 = vrot.slane %v657_v38, 3  ;;  %1364 = vmatprep.mubr.f32.mxu1 %v12631_v52  ;;  %v7964_v31 = vsel %vm1770_vm2, %v12405_v53, %v1821_v30  ;;  %v12677_v20 = vrot.slane %v7895_v46, 1 }
 0x18f   :  { %1615 = vmatprep.mubr.f32.mxu0 %v12631_v52  ;;  %v7971_v12 = vpop.f32.mrb[26].mxu1  ;;  %v7977_v41 = vpop.f32.mrb[28].mxu0  ;;  %v12680_v38 = vrot.slane %v7910_v43, 3  ;;  %v12681_v57 = vrot.slane %v7908_v54, 3  ;;  %v12682_v48 = vrot.slane %v7910_v43, 2 }
 0x190   :  { %v7969_v56 = vsel %vm1770_vm2, %v12677_v20, %v1793_v50  ;;  %12678 = vst [vmem:[#allocation53_spill] sm:$0xff] %v7971_v12  ;;  %2291 = vrot.lane.b32.xlu1 %v7736_v14, %s6757_s10  ;;  %1871 = vrot.lane.b32.xlu0 %v7716_v2, %s6757_s10  ;;  %12679 = vst [vmem:[#allocation54_spill] sm:$0xff] %v7977_v41  ;;  %v1823_v14 = vrot.slane %v7971_v12, 1  ;;  %v1795_v2 = vrot.slane %v7977_v41, 1  ;;  %v7996_v22 = vpop.f32.mrb[29].mxu0  ;;  %v663_v10 = vpop.f32.mrb[27].mxu1 }
 0x191   :  { %v7982_v53 = vsel %vm2156_vm10, %v12680_v38, %v2207_v55  ;;  %v7987_v20 = vsel %vm2156_vm10, %v12681_v57, %v2179_v42  ;;  %v7992_v58 = vsel %vm2019_vm11, %v12682_v48, %v2070_v29  ;;  %6364 = vmatmul.mubr.msk.f32.gmra.mrb[132].mxu1 %vm287_vm3, %v7023_v24  ;;  %v12684_v57 = vrot.slane %v7908_v54, 2 }
 0x192   :  { %12683 = vst [vmem:[#allocation55_spill] sm:$0xff] %v7992_v58  ;;  %6397 = vmatmul.mubr.msk.f32.gmra.mrb[134].mxu0 %vm287_vm3, %v7005_v19  ;;  %v2181_v12 = vrot.slane %v7996_v22, 3  ;;  %v2072_v58 = vrot.slane %v663_v10, 2  ;;  %v2209_v41 = vrot.slane %v663_v10, 3  ;;  %1370 = vmatprep.mubr.f32.mxu1 %v12631_v52  ;;  %v8012_v27 = vsel %vm1770_vm2, %v1821_v30, %v1823_v14 }
 0x193   :  { %v8005_v38 = vsel %vm2019_vm11, %v12684_v57, %v2042_v18  ;;  %1621 = vmatprep.mubr.f32.mxu0 %v12631_v52  ;;  %v8015_v19 = vsel %vm1770_vm2, %v1793_v50, %v1795_v2  ;;  %v8017_v0 = vpop.f32.mrb[28].mxu1  ;;  %v8023_v57 = vpop.f32.mrb[30].mxu0 }
 0x194   :  { %12685 = vst [vmem:[#allocation56_spill] sm:$0xff] %v8005_v38  ;;  %12686 = vst [vmem:[#allocation57_spill] sm:$0xff] %v8015_v19  ;;  %1873 = vrot.lane.b32.xlu1 %v7721_v7, %s6757_s10  ;;  %2257 = vrot.lane.b32.xlu0 %v7739_v45, %s6757_s10  ;;  %v8026_v10 = vsel %vm2156_vm10, %v2207_v55, %v2209_v41  ;;  %v8029_v48 = vsel %vm2156_vm10, %v2179_v42, %v2181_v12  ;;  %v1825_v50 = vrot.slane %v8017_v0, 1  ;;  %v573_v19 = vpop.f32.mrb[31].mxu0  ;;  %v669_v7 = vpop.f32.mrb[29].mxu1 }
 0x195   :  { %12687 = vst [vmem:[#allocation58_spill] sm:$0xff] %v8017_v0  ;;  %12688 = vst [vmem:[#allocation59_spill] sm:$0xff] %v8023_v57  ;;  %v8032_v30 = vsel %vm2019_vm11, %v2070_v29, %v2072_v58  ;;  %v1797_v38 = vrot.slane %v8023_v57, 1  ;;  %6365 = vmatmul.mubr.msk.f32.gmra.mrb[134].mxu1 %vm287_vm3, %v7037_v28  ;;  %v12691_v45 = vrot.slane %v7996_v22, 2  ;;  %v2183_v42 = vrot.slane %v573_v19, 3 }
 0x196   :  { %12689 = vst [vmem:[#allocation60_spill] sm:$0xff] %v8029_v48  ;;  %12690 = vst [vmem:[#allocation61_spill] sm:$0xff] %v8032_v30  ;;  %6398 = vmatmul.mubr.msk.f32.gmra.mrb[136].mxu0 %vm287_vm3, %v7023_v24  ;;  %v2074_v29 = vrot.slane %v669_v7, 2  ;;  %v2211_v30 = vrot.slane %v669_v7, 3  ;;  %1376 = vmatprep.mubr.f32.mxu1 %v12631_v52  ;;  %v8048_v57 = vsel %vm1770_vm2, %v1823_v14, %v1825_v50  ;;  %v12693_v0 = vrot.slane %v7889_v5, 1 }
 0x197   :  { %v8043_v55 = vsel %vm2019_vm11, %v2042_v18, %v12691_v45  ;;  %1627 = vmatprep.mubr.f32.mxu0 %v12631_v52  ;;  %v8056_v24 = vsel %vm1770_vm2, %v1795_v2, %v1797_v38  ;;  %v12694_v18 = vrot.slane %v7895_v46, 1  ;;  %v2046_v7 = vrot.slane %v573_v19, 2  ;;  %v8069_v14 = vpop.f32.mrb[32].mxu0 }
 0x198   :  { %12692 = vst [vmem:[#allocation62_spill] sm:$0xff] %v8043_v55  ;;  %v8053_v48 = vsel %vm1770_vm2, %v1825_v50, %v12693_v0  ;;  %v8063_v55 = vpop.f32.mrb[30].mxu1  ;;  %2259 = vrot.lane.b32.xlu1 %v7752_v35, %s6757_s10  ;;  %1907 = vrot.lane.b32.xlu0 %v7796_v4, %s6757_s10  ;;  %12695 = vst [vmem:[#allocation63_spill] sm:$0xff] %v8069_v14  ;;  %v8072_v0 = vsel %vm2156_vm10, %v2209_v41, %v2211_v30  ;;  %v12696_v2 = vrot.slane %v7910_v43, 3 }
 0x199   :  { %v8061_v45 = vsel %vm1770_vm2, %v1797_v38, %v12694_v18  ;;  %v8080_v38 = vsel %vm2156_vm10, %v2181_v12, %v2183_v42  ;;  %v1799_v19 = vrot.slane %v8069_v14, 1  ;;  %v579_v18 = vpop.f32.mrb[33].mxu0  ;;  %v8083_v35 = vpop.f32.mrb[31].mxu1  ;;  %6366 = vmatmul.mubr.msk.f32.gmra.mrb[136].mxu1 %vm287_vm3, %v7051_v32  ;;  %v12698_v4 = vrot.slane %v7908_v54, 3 }
 0x19a   :  { %v8077_v50 = vsel %vm2156_vm10, %v2211_v30, %v12696_v2  ;;  %12697 = vst [vmem:[#allocation64_spill] sm:$0xff] %v8083_v35  ;;  %6399 = vmatmul.mubr.msk.f32.gmra.mrb[138].mxu0 %vm287_vm3, %v7037_v28  ;;  %v2048_v30 = vrot.slane %v579_v18, 2  ;;  %v2185_v12 = vrot.slane %v579_v18, 3  ;;  %1382 = vmatprep.mubr.f32.mxu1 %v12631_v52  ;;  %v12700_v2 = vrot.slane %v7500_v25, 1 }
 0x19b   :  { %v8092_v41 = vsel %vm2156_vm10, %v2183_v42, %v12698_v4  ;;  %1633 = vmatprep.mubr.f32.mxu0 %v12631_v52  ;;  %v12701_v28 = vrot.slane %v7545_v37, 1  ;;  %v8107_v42 = vsel %vm2019_vm11, %v2072_v58, %v2074_v29  ;;  %v12703_v18 = vrot.slane %v7910_v43, 2 }
 0x19c   :  { %12699 = vst [vmem:[#allocation65_spill] sm:$0xff] %v8092_v41  ;;  %v8099_v14 = vsel %vm1770_vm2, %v1799_v19, %v12700_v2  ;;  %12702 = vst [vmem:[#allocation66_spill] sm:$0xff] %v8107_v42  ;;  %v744_v41 = vpop.f32.mrb[32].mxu1  ;;  %1909 = vrot.lane.b32.xlu1 %v7840_v47, %s6757_s10  ;;  %2293 = vrot.lane.b32.xlu0 %v7814_v15, %s6757_s10  ;;  %v8119_v2 = vpop.f32.mrb[34].mxu0  ;;  %v12707_v43 = vrot.slane %v7504_v3, 3 }
 0x19d   :  { %v8104_v46 = vsel %vm1770_vm2, %v12701_v28, %v1799_v19  ;;  %v8112_v4 = vsel %vm2019_vm11, %v2074_v29, %v12703_v18  ;;  %12705 = vst [vmem:[#allocation68_spill] sm:$0xff] %v8119_v2  ;;  %v12706_v19 = vrot.slane %v7558_v63, 3  ;;  %v12709_v28 = vrot.slane %v7996_v22, 2  ;;  %v746_v37 = vpop.f32.mrb[33].mxu1  ;;  %6367 = vmatmul.mubr.msk.f32.gmra.mrb[138].mxu1 %vm287_vm3, %v7065_v36 }
 0x19e   :  { %12704 = vst [vmem:[#allocation67_spill] sm:$0xff] %v8112_v4  ;;  %v8129_v29 = vsel %vm2156_vm10, %v2185_v12, %v12707_v43  ;;  %v2407_v15 = vrot.slane %v744_v41, 4  ;;  %v2543_v5 = vrot.slane %v744_v41, 5  ;;  %v997_v4 = vpop.f32.mrb[35].mxu0  ;;  %6400 = vmatmul.mubr.msk.f32.gmra.mrb[140].mxu0 %vm287_vm3, %v7051_v32  ;;  %v2929_v47 = vrot.slane %v746_v37, 7  ;;  %1388 = vmatprep.mubr.f32.mxu1 %v12631_v52 }
 0x19f   :  { %v8124_v58 = vsel %vm2156_vm10, %v12706_v19, %v2185_v12  ;;  %12708 = vst [vmem:[#allocation69_spill] sm:$0xff] %v8129_v29  ;;  %v8134_v18 = vsel %vm2019_vm11, %v12709_v28, %v2046_v7  ;;  %v12711_v12 = vrot.slane %v7908_v54, 2  ;;  %v2792_v28 = vrot.slane %v746_v37, 6  ;;  %1639 = vmatprep.mubr.f32.mxu0 %v12631_v52 }
 0x1a0   :  { %12710 = vst [vmem:[#allocation70_spill] sm:$0xff] %v8134_v18  ;;  %v12713_v41 = vrot.slane %v8063_v55, 5  ;;  %v12714_v32 = vrot.slane %v8063_v55, 4  ;;  %v12717_v37 = vrot.slane %v7504_v3, 2  ;;  %v3619_v43 = vrot.slane %v8119_v2, 1  ;;  %2295 = vrot.lane.b32.xlu1 %v7854_v62, %s6757_s10  ;;  %1875 = vrot.lane.b32.xlu0 %v7801_v9, %s6757_s10 }
 0x1a1   :  { %v8144_v19 = vsel %vm2019_vm11, %v2046_v7, %v12711_v12  ;;  %v12715_v7 = vrot.slane %v7558_v63, 2  ;;  %v12720_v63 = vrot.slane %v8083_v35, 7  ;;  %v12722_v3 = vrot.slane %v8083_v35, 6  ;;  %6368 = vmatmul.mubr.msk.f32.gmra.mrb[140].mxu1 %vm287_vm3, %v7079_v40 }
 0x1a2   :  { %12712 = vst [vmem:[#allocation71_spill] sm:$0xff] %v8144_v19  ;;  %v8153_v18 = vsel %vm384_vm0, %v12713_v41, %v2543_v5  ;;  %v8158_v54 = vsel %vm2405_vm13, %v12714_v32, %v2407_v15  ;;  %v8168_v22 = vsel %vm2019_vm11, %v2048_v30, %v12717_v37  ;;  %v750_v19 = vpop.f32.mrb[34].mxu1  ;;  %v8175_v41 = vpop.f32.mrb[36].mxu0  ;;  %6401 = vmatmul.mubr.msk.f32.gmra.mrb[142].mxu0 %vm287_vm3, %v7065_v36 }
 0x1a3   :  { %v8163_v12 = vsel %vm2019_vm11, %v12715_v7, %v2048_v30  ;;  %12718 = vst [vmem:[#allocation73_spill] sm:$0xff] %v8168_v22  ;;  %12719 = vst [vmem:[#allocation74_spill] sm:$0xff] %v8175_v41  ;;  %v8180_v32 = vsel %vm2927_vm12, %v12720_v63, %v2929_v47  ;;  %v8185_v30 = vsel %vm2790_vm14, %v12722_v3, %v2792_v28  ;;  %v4003_v7 = vrot.slane %v997_v4, 3  ;;  %v1003_v22 = vpop.f32.mrb[37].mxu0 }
 0x1a4   :  { %12716 = vst [vmem:[#allocation72_spill] sm:$0xff] %v8163_v12  ;;  %12721 = vst [vmem:[#allocation75_spill] sm:$0xff] %v8180_v32  ;;  %v2409_v37 = vrot.slane %v750_v19, 4  ;;  %v2545_v2 = vrot.slane %v750_v19, 5  ;;  %v3620_v62 = vrot.slane %v8175_v41, 1  ;;  %v752_v12 = vpop.f32.mrb[35].mxu1  ;;  %1394 = vmatprep.mubr.f32.mxu1 %v12631_v52  ;;  %1645 = vmatprep.mubr.f32.mxu0 %v12631_v52 }
 0x1a5   :  { %12723 = vst [vmem:[#allocation76_spill] sm:$0xff] %v8185_v30  ;;  %v2794_v9 = vrot.slane %v752_v12, 6  ;;  %v2931_v63 = vrot.slane %v752_v12, 7  ;;  %v3868_v42 = vrot.slane %v1003_v22, 2  ;;  %v4004_v32 = vrot.slane %v1003_v22, 3  ;;  %v756_v29 = vpop.f32.mrb[36].mxu1  ;;  %2261 = vrot.lane.b32.xlu0 %v7819_v59, %s6757_s10  ;;  %1877 = vrot.lane.b32.xlu1 %v7843_v13, %s6757_s10 }
 0x1a6   :  { %v3867_v3 = vrot.slane %v997_v4, 2  ;;  %v8195_v19 = vsel %vm384_vm0, %v2543_v5, %v2545_v2  ;;  %v8198_v41 = vsel %vm1770_vm2, %v3619_v43, %v3620_v62  ;;  %v8201_v30 = vsel %vm2405_vm13, %v2407_v15, %v2409_v37  ;;  %v8207_v36 = vpop.f32.mrb[38].mxu0  ;;  %6369 = vmatmul.mubr.msk.f32.gmra.mrb[142].mxu1 %vm287_vm3, %v7093_v44  ;;  %6402 = vmatmul.mubr.msk.f32.gmra.mrb[144].mxu0 %vm287_vm3, %v7079_v40 }
 0x1a7   :  { %12724 = vst [vmem:[#allocation77_spill] sm:$0xff] %v8198_v41  ;;  %12725 = vst [vmem:[#allocation78_spill] sm:$0xff] %v8207_v36  ;;  %v8210_v4 = vsel %vm2927_vm12, %v2929_v47, %v2931_v63  ;;  %v8213_v5 = vsel %vm2156_vm10, %v4003_v7, %v4004_v32  ;;  %v8216_v22 = vsel %vm2790_vm14, %v2792_v28, %v2794_v9  ;;  %v2411_v15 = vrot.slane %v756_v29, 4  ;;  %v8219_v41 = vpop.f32.mrb[37].mxu1  ;;  %v1009_v59 = vpop.f32.mrb[39].mxu0 }
 0x1a8   :  { %12726 = vst [vmem:[#allocation79_spill] sm:$0xff] %v8213_v5  ;;  %12727 = vst [vmem:[#allocation80_spill] sm:$0xff] %v8216_v22  ;;  %v2547_v43 = vrot.slane %v756_v29, 5  ;;  %v3622_v12 = vrot.slane %v8207_v36, 1  ;;  %v8226_v13 = vsel %vm2019_vm11, %v3867_v3, %v3868_v42  ;;  %v2933_v28 = vrot.slane %v8219_v41, 7  ;;  %1400 = vmatprep.mubr.f32.mxu1 %v12631_v52  ;;  %1651 = vmatprep.mubr.f32.mxu0 %v12631_v52 }
 0x1a9   :  { %12728 = vst [vmem:[#allocation81_spill] sm:$0xff] %v8219_v41  ;;  %12729 = vst [vmem:[#allocation82_spill] sm:$0xff] %v8226_v13  ;;  %v3870_v7 = vrot.slane %v1009_v59, 2  ;;  %v4006_v29 = vrot.slane %v1009_v59, 3  ;;  %v12730_v22 = vrot.slane %v8063_v55, 5  ;;  %v8244_v47 = vsel %vm2405_vm13, %v2409_v37, %v2411_v15  ;;  %v8246_v13 = vpop.f32.mrb[38].mxu1  ;;  %1911 = vrot.lane.b32.xlu0 %v7874_v39, %s6757_s10  ;;  %1913 = vrot.lane.b32.xlu1 %v7879_v21, %s6757_s10 }
 0x1aa   :  { %v8233_v36 = vsel %vm384_vm0, %v2545_v2, %v2547_v43  ;;  %v8241_v3 = vsel %vm1770_vm2, %v3620_v62, %v3622_v12  ;;  %v1013_v2 = vpop.f32.mrb[40].mxu0  ;;  %v8253_v59 = vsel %vm2927_vm12, %v2931_v63, %v2933_v28  ;;  %v12732_v62 = vrot.slane %v8063_v55, 4  ;;  %6370 = vmatmul.mubr.msk.f32.gmra.mrb[144].mxu1 %vm287_vm3, %v7113_v51  ;;  %6403 = vmatmul.mubr.msk.f32.gmra.mrb[146].mxu0 %vm287_vm3, %v7093_v44 }
 0x1ab   :  { %v8238_v40 = vsel %vm384_vm0, %v2547_v43, %v12730_v22  ;;  %12731 = vst [vmem:[#allocation83_spill] sm:$0xff] %v8241_v3  ;;  %v8256_v22 = vsel %vm2156_vm10, %v4004_v32, %v4006_v29  ;;  %v3624_v43 = vrot.slane %v1013_v2, 1  ;;  %v8263_v3 = vpop.f32.mrb[39].mxu1  ;;  %v1015_v5 = vpop.f32.mrb[41].mxu0  ;;  %v12734_v39 = vrot.slane %v8219_v41, 6  ;;  %1406 = vmatprep.mubr.f32.mxu1 %v12631_v52  ;;  %1657 = vmatprep.mubr.f32.mxu0 %v12631_v52 }
 0x1ac   :  { %v8261_v37 = vsel %vm2405_vm13, %v2411_v15, %v12732_v62  ;;  %12733 = vst [vmem:[#allocation84_spill] sm:$0xff] %v8263_v3  ;;  %v3872_v32 = vrot.slane %v1015_v5, 2  ;;  %v4008_v55 = vrot.slane %v1015_v5, 3  ;;  %v8280_v15 = vsel %vm2019_vm11, %v3868_v42, %v3870_v7  ;;  %v768_v62 = vpop.f32.mrb[40].mxu1 }
 0x1ad   :  { %v8272_v21 = vsel %vm2790_vm14, %v2794_v9, %v12734_v39  ;;  %v8277_v63 = vsel %vm1770_vm2, %v3622_v12, %v3624_v43  ;;  %12736 = vst [vmem:[#allocation86_spill] sm:$0xff] %v8280_v15  ;;  %v12737_v2 = vrot.slane %v8083_v35, 7  ;;  %2297 = vrot.lane.b32.xlu0 %v7898_v17, %s6757_s10  ;;  %2263 = vrot.lane.b32.xlu1 %v7857_v34, %s6757_s10  ;;  %v8291_v9 = vpop.f32.mrb[42].mxu0  ;;  %v12420_v12 = vrot.slane %v8246_v13, 4 }
 0x1ae   :  { %12735 = vst [vmem:[#allocation85_spill] sm:$0xff] %v8272_v21  ;;  %12739 = vst [vmem:[#allocation88_spill] sm:$0xff] %v8291_v9  ;;  %v8294_v5 = vsel %vm2156_vm10, %v4006_v29, %v4008_v55  ;;  %v8297_v42 = vsel %vm2019_vm11, %v3870_v7, %v3872_v32  ;;  %v2414_v43 = vrot.slane %v768_v62, 4  ;;  %v2550_v39 = vrot.slane %v768_v62, 5  ;;  %6371 = vmatmul.mubr.msk.f32.gmra.mrb[146].mxu1 %vm287_vm3, %v7133_v60 }
 0x1af   :  { %v8285_v44 = vsel %vm2927_vm12, %v2933_v28, %v12737_v2  ;;  %12740 = vst [vmem:[#allocation89_spill] sm:$0xff] %v8294_v5  ;;  %12741 = vst [vmem:[#allocation90_spill] sm:$0xff] %v8297_v42  ;;  %v2549_v28 = vrot.slane %v8246_v13, 5  ;;  %v770_v2 = vpop.f32.mrb[41].mxu1  ;;  %6404 = vmatmul.mubr.msk.f32.gmra.mrb[148].mxu0 %vm287_vm3, %v7113_v51  ;;  %v12423_v17 = vrot.slane %v8263_v3, 7  ;;  %1412 = vmatprep.mubr.f32.mxu1 %v12631_v52  ;;  %v3626_v51 = vrot.slane %v8291_v9, 1 }
 0x1b0   :  { %12738 = vst [vmem:[#allocation87_spill] sm:$0xff] %v8285_v44  ;;  %v1021_v44 = vpop.f32.mrb[43].mxu0  ;;  %v2799_v7 = vrot.slane %v770_v2, 6  ;;  %v2936_v29 = vrot.slane %v770_v2, 7  ;;  %1663 = vmatprep.mubr.f32.mxu0 %v12631_v52  ;;  %v8315_v55 = vsel %vm2405_vm13, %v12420_v12, %v2414_v43  ;;  %v774_v62 = vpop.f32.mrb[42].mxu1  ;;  %v12744_v41 = vrot.slane %v8263_v3, 6 }
 0x1b1   :  { %v8310_v32 = vsel %vm384_vm0, %v2549_v28, %v2550_v39  ;;  %2299 = vrot.lane.b32.xlu1 %v7903_v49, %s6757_s10  ;;  %1879 = vrot.lane.b32.xlu0 %v7882_v26, %s6757_s10  ;;  %v8322_v2 = vpop.f32.mrb[44].mxu0  ;;  %v4010_v35 = vrot.slane %v1021_v44, 3  ;;  %v2416_v9 = vrot.slane %v774_v62, 4  ;;  %v2552_v42 = vrot.slane %v774_v62, 5  ;;  %v8335_v15 = vpop.f32.mrb[43].mxu1 }
 0x1b2   :  { %12742 = vst [vmem:[#allocation91_spill] sm:$0xff] %v8322_v2  ;;  %v8327_v34 = vsel %vm2927_vm12, %v12423_v17, %v2936_v29  ;;  %v8332_v12 = vsel %vm2790_vm14, %v12744_v41, %v2799_v7  ;;  %v3627_v49 = vrot.slane %v8322_v2, 1  ;;  %12746 = vst [vmem:[#allocation94_spill] sm:$0xff] %v8335_v15  ;;  %v1027_v26 = vpop.f32.mrb[45].mxu0  ;;  %6372 = vmatmul.mubr.msk.f32.gmra.mrb[148].mxu1 %vm287_vm3, %v7147_v1  ;;  %v12425_v17 = vrot.slane %v8335_v15, 6 }
 0x1b3   :  { %12743 = vst [vmem:[#allocation92_spill] sm:$0xff] %v8327_v34  ;;  %12745 = vst [vmem:[#allocation93_spill] sm:$0xff] %v8332_v12  ;;  %6405 = vmatmul.mubr.msk.f32.gmra.mrb[150].mxu0 %vm287_vm3, %v7133_v60  ;;  %v2938_v21 = vrot.slane %v8335_v15, 7  ;;  %v3875_v41 = vrot.slane %v1027_v26, 2  ;;  %v4011_v12 = vrot.slane %v1027_v26, 3  ;;  %1418 = vmatprep.mubr.f32.mxu1 %v12631_v52  ;;  %v3874_v62 = vrot.slane %v1021_v44, 2 }
 0x1b4   :  { %1669 = vmatprep.mubr.f32.mxu0 %v12631_v52  ;;  %v8346_v2 = vsel %vm384_vm0, %v2550_v39, %v2552_v42  ;;  %v8349_v34 = vsel %vm1770_vm2, %v3626_v51, %v3627_v49  ;;  %v8352_v5 = vsel %vm2405_vm13, %v2414_v43, %v2416_v9  ;;  %v780_v60 = vpop.f32.mrb[44].mxu1  ;;  %v8358_v26 = vpop.f32.mrb[46].mxu0  ;;  %v8369_v43 = vsel %vm2790_vm14, %v2799_v7, %v12425_v17 }
 0x1b5   :  { %12747 = vst [vmem:[#allocation95_spill] sm:$0xff] %v8349_v34  ;;  %12748 = vst [vmem:[#allocation96_spill] sm:$0xff] %v8352_v5  ;;  %1881 = vrot.lane.b32.xlu1 %v7887_v33, %s6757_s10  ;;  %2265 = vrot.lane.b32.xlu0 %v7906_v8, %s6757_s10  ;;  %v8361_v44 = vsel %vm2927_vm12, %v2936_v29, %v2938_v21  ;;  %v8364_v39 = vsel %vm2156_vm10, %v4010_v35, %v4011_v12  ;;  %v2418_v51 = vrot.slane %v780_v60, 4  ;;  %v8372_v5 = vpop.f32.mrb[45].mxu1  ;;  %v1033_v8 = vpop.f32.mrb[47].mxu0 }
 0x1b6   :  { %12749 = vst [vmem:[#allocation97_spill] sm:$0xff] %v8358_v26  ;;  %12750 = vst [vmem:[#allocation98_spill] sm:$0xff] %v8369_v43  ;;  %v2554_v34 = vrot.slane %v780_v60, 5  ;;  %v3629_v33 = vrot.slane %v8358_v26, 1  ;;  %6373 = vmatmul.mubr.msk.f32.gmra.mrb[150].mxu1 %vm287_vm3, %v7161_v6  ;;  %v8379_v35 = vsel %vm2019_vm11, %v3874_v62, %v3875_v41  ;;  %v2940_v29 = vrot.slane %v8372_v5, 7 }
 0x1b7   :  { %12751 = vst [vmem:[#allocation99_spill] sm:$0xff] %v8372_v5  ;;  %6406 = vmatmul.mubr.msk.f32.gmra.mrb[152].mxu0 %vm287_vm3, %v7147_v1  ;;  %12752 = vst [vmem:[#allocation100_spill] sm:$0xff] %v8379_v35  ;;  %v3877_v7 = vrot.slane %v1033_v8, 2  ;;  %v4013_v17 = vrot.slane %v1033_v8, 3  ;;  %1424 = vmatprep.mubr.f32.mxu1 %v12631_v52  ;;  %v12753_v1 = vrot.slane %v8246_v13, 4  ;;  %v8398_v35 = vpop.f32.mrb[46].mxu1 }
 0x1b8   :  { %1675 = vmatprep.mubr.f32.mxu0 %v12631_v52  ;;  %v8385_v60 = vsel %vm384_vm0, %v2554_v34, %v2549_v28  ;;  %v8388_v15 = vsel %vm384_vm0, %v2552_v42, %v2554_v34  ;;  %v8391_v26 = vsel %vm1770_vm2, %v3627_v49, %v3629_v33  ;;  %v1037_v28 = vpop.f32.mrb[48].mxu0  ;;  %v8408_v34 = vsel %vm2405_vm13, %v2416_v9, %v2418_v51  ;;  %v8413_v8 = vpop.f32.mrb[47].mxu1 }
 0x1b9   :  { %v8396_v62 = vsel %vm2405_vm13, %v2418_v51, %v12753_v1  ;;  %2267 = vrot.lane.b32.xlu1 %v7919_v61, %s6757_s10  ;;  %1915 = vrot.lane.b32.xlu0 %v7964_v31, %s6757_s10  ;;  %v8405_v42 = vsel %vm2156_vm10, %v4011_v12, %v4013_v17  ;;  %v8411_v13 = vsel %vm2019_vm11, %v3875_v41, %v3877_v7  ;;  %v3631_v49 = vrot.slane %v1037_v28, 1  ;;  %v1039_v1 = vpop.f32.mrb[49].mxu0 }
 0x1ba   :  { %12754 = vst [vmem:[#allocation101_spill] sm:$0xff] %v8411_v13  ;;  %12755 = vst [vmem:[#allocation102_spill] sm:$0xff] %v8413_v8  ;;  %6374 = vmatmul.mubr.msk.f32.gmra.mrb[152].mxu1 %vm287_vm3, %v7175_v11  ;;  %v8420_v61 = vsel %vm2927_vm12, %v2938_v21, %v2940_v29  ;;  %v3879_v31 = vrot.slane %v1039_v1, 2  ;;  %v4015_v12 = vrot.slane %v1039_v1, 3  ;;  %v12757_v41 = vrot.slane %v8263_v3, 7 }
 0x1bb   :  { %6407 = vmatmul.mubr.msk.f32.gmra.mrb[154].mxu0 %vm287_vm3, %v7161_v6  ;;  %12756 = vst [vmem:[#allocation103_spill] sm:$0xff] %v8420_v61  ;;  %1430 = vmatprep.mubr.f32.mxu1 %v12631_v52  ;;  %v8425_v9 = vsel %vm1770_vm2, %v3629_v33, %v3631_v49  ;;  %v792_v28 = vpop.f32.mrb[48].mxu1  ;;  %v8436_v6 = vpop.f32.mrb[50].mxu0  ;;  %v12429_v49 = vrot.slane %v8398_v35, 4  ;;  %v12765_v3 = vrot.slane %v8413_v8, 6 }
 0x1bc   :  { %1681 = vmatprep.mubr.f32.mxu0 %v12631_v52  ;;  %v8430_v51 = vsel %vm2927_vm12, %v2940_v29, %v12757_v41  ;;  %12759 = vst [vmem:[#allocation105_spill] sm:$0xff] %v8436_v6  ;;  %v8439_v21 = vsel %vm2156_vm10, %v4013_v17, %v4015_v12  ;;  %v8442_v33 = vsel %vm2019_vm11, %v3877_v7, %v3879_v31  ;;  %v2556_v29 = vrot.slane %v8398_v35, 5  ;;  %v1045_v61 = vpop.f32.mrb[51].mxu0 }
 0x1bd   :  { %12758 = vst [vmem:[#allocation104_spill] sm:$0xff] %v8430_v51  ;;  %1917 = vrot.lane.b32.xlu1 %v8012_v27, %s6757_s10  ;;  %2301 = vrot.lane.b32.xlu0 %v7982_v53, %s6757_s10  ;;  %12760 = vst [vmem:[#allocation106_spill] sm:$0xff] %v8442_v33  ;;  %v2421_v1 = vrot.slane %v792_v28, 4  ;;  %v2557_v41 = vrot.slane %v792_v28, 5  ;;  %v794_v51 = vpop.f32.mrb[49].mxu1  ;;  %v12431_v53 = vrot.slane %v8413_v8, 7 }
 0x1be   :  { %6375 = vmatmul.mubr.msk.f32.gmra.mrb[154].mxu1 %vm287_vm3, %v7189_v16  ;;  %v2806_v17 = vrot.slane %v794_v51, 6  ;;  %v2943_v7 = vrot.slane %v794_v51, 7 }
 0x1bf   :  { %6408 = vmatmul.mubr.msk.f32.gmra.mrb[156].mxu0 %vm287_vm3, %v7175_v11  ;;  %1436 = vmatprep.mubr.f32.mxu1 %v12631_v52  ;;  %v8455_v31 = vsel %vm384_vm0, %v2556_v29, %v2557_v41  ;;  %v8460_v12 = vsel %vm2405_vm13, %v12429_v49, %v2421_v1  ;;  %v3633_v11 = vrot.slane %v8436_v6, 1  ;;  %v798_v28 = vpop.f32.mrb[50].mxu1  ;;  %v8467_v51 = vpop.f32.mrb[52].mxu0  ;;  %v4017_v6 = vrot.slane %v1045_v61, 3 }
 0x1c0   :  { %1687 = vmatprep.mubr.f32.mxu0 %v12631_v52  ;;  %12761 = vst [vmem:[#allocation107_spill] sm:$0xff] %v8455_v31  ;;  %12762 = vst [vmem:[#allocation108_spill] sm:$0xff] %v8460_v12  ;;  %v8472_v27 = vsel %vm2927_vm12, %v12431_v53, %v2943_v7  ;;  %v8477_v49 = vsel %vm2790_vm14, %v12765_v3, %v2806_v17  ;;  %v2423_v33 = vrot.slane %v798_v28, 4  ;;  %v2559_v13 = vrot.slane %v798_v28, 5  ;;  %v8480_v43 = vpop.f32.mrb[51].mxu1 }
 0x1c1   :  { %2303 = vrot.lane.b32.xlu1 %v8026_v10, %s6757_s10  ;;  %1883 = vrot.lane.b32.xlu0 %v7969_v56, %s6757_s10  ;;  %12763 = vst [vmem:[#allocation109_spill] sm:$0xff] %v8467_v51  ;;  %12764 = vst [vmem:[#allocation110_spill] sm:$0xff] %v8472_v27  ;;  %v3634_v10 = vrot.slane %v8467_v51, 1  ;;  %v1051_v56 = vpop.f32.mrb[53].mxu0  ;;  %v12437_v53 = vrot.slane %v8480_v43, 6  ;;  %v2945_v5 = vrot.slane %v8480_v43, 7 }
 0x1c2   :  { %12766 = vst [vmem:[#allocation111_spill] sm:$0xff] %v8477_v49  ;;  %12767 = vst [vmem:[#allocation112_spill] sm:$0xff] %v8480_v43  ;;  %6376 = vmatmul.mubr.msk.f32.gmra.mrb[156].mxu1 %vm287_vm3, %v7203_v23  ;;  %v3882_v3 = vrot.slane %v1051_v56, 2  ;;  %v4018_v49 = vrot.slane %v1051_v56, 3  ;;  %v3881_v28 = vrot.slane %v1045_v61, 2  ;;  %v8490_v51 = vsel %vm384_vm0, %v2557_v41, %v2559_v13 }
 0x1c3   :  { %6409 = vmatmul.mubr.msk.f32.gmra.mrb[158].mxu0 %vm287_vm3, %v7189_v16  ;;  %v8493_v12 = vsel %vm1770_vm2, %v3633_v11, %v3634_v10  ;;  %v8496_v27 = vsel %vm2405_vm13, %v2421_v1, %v2423_v33  ;;  %v804_v31 = vpop.f32.mrb[52].mxu1  ;;  %v12769_v16 = vld [vmem:[#allocation57_spill] sm:$0xff]  ;;  %v8502_v56 = vpop.f32.mrb[54].mxu0  ;;  %v8505_v61 = vsel %vm2927_vm12, %v2943_v7, %v2945_v5  ;;  %v8513_v1 = vsel %vm2790_vm14, %v2806_v17, %v12437_v53 }
 0x1c4   :  { %1693 = vmatprep.mubr.f32.mxu0 %v12631_v52  ;;  %12768 = vst [vmem:[#allocation113_spill] sm:$0xff] %v8496_v27  ;;  %12770 = vst [vmem:[#allocation57_spill] sm:$0xff] %v8502_v56  ;;  %v8508_v41 = vsel %vm2156_vm10, %v4017_v6, %v4018_v49  ;;  %v2425_v11 = vrot.slane %v804_v31, 4  ;;  %v2561_v52 = vrot.slane %v804_v31, 5  ;;  %v8516_v27 = vpop.f32.mrb[53].mxu1  ;;  %v8521_v7 = vsel %vm2019_vm11, %v3881_v28, %v3882_v3 }
 0x1c5   :  { %2269 = vrot.lane.b32.xlu0 %v7987_v20, %s6757_s10  ;;  %1885 = vrot.lane.b32.xlu1 %v12769_v16, %s6757_s10  ;;  %12771 = vst [vmem:[#allocation114_spill] sm:$0xff] %v8508_v41  ;;  %12772 = vst [vmem:[#allocation115_spill] sm:$0xff] %v8513_v1  ;;  %v3636_v20 = vrot.slane %v8502_v56, 1  ;;  %v1057_v16 = vpop.f32.mrb[55].mxu0  ;;  %v2947_v6 = vrot.slane %v8516_v27, 7 }
 0x1c6   :  { %12773 = vst [vmem:[#allocation116_spill] sm:$0xff] %v8516_v27  ;;  %12774 = vst [vmem:[#allocation117_spill] sm:$0xff] %v8521_v7  ;;  %v3884_v41 = vrot.slane %v1057_v16, 2  ;;  %v4020_v43 = vrot.slane %v1057_v16, 3  ;;  %v8525_v17 = vsel %vm384_vm0, %v2559_v13, %v2561_v52  ;;  %v8531_v53 = vsel %vm384_vm0, %v2561_v52, %v2556_v29  ;;  %v8558_v27 = vpop.permute.xlu0 %5651 }
 0x1c7   :  { %6410 = vmatmul.mubr.msk.f32.gmra.mrb[160].mxu0 %vm287_vm3, %v7203_v23  ;;  %v8528_v31 = vsel %vm1770_vm2, %v3634_v10, %v3636_v20  ;;  %v8534_v56 = vsel %vm2405_vm13, %v2423_v33, %v2425_v11  ;;  %v8536_v23 = vpop.f32.mrb[54].mxu1  ;;  %v1061_v28 = vpop.f32.mrb[56].mxu0  ;;  %v12776_v10 = vrot.slane %v8398_v35, 4  ;;  %12781 = vst [vmem:[#allocation123_spill] sm:$0xff] %v8558_v27  ;;  %v12783_v35 = vrot.slane %v8413_v8, 7 }
 0x1c8   :  { %12775 = vst [vmem:[#allocation118_spill] sm:$0xff] %v8534_v56  ;;  %v8543_v13 = vsel %vm2156_vm10, %v4018_v49, %v4020_v43  ;;  %v8551_v33 = vsel %vm2019_vm11, %v3882_v3, %v3884_v41  ;;  %v3638_v29 = vrot.slane %v1061_v28, 1  ;;  %v8553_v16 = vpop.f32.mrb[55].mxu1  ;;  %v1063_v7 = vpop.f32.mrb[57].mxu0  ;;  %v12785_v28 = vld [vmem:[#allocation60_spill] sm:$0xff]  ;;  %vm3450_vm3 = vcmask 523264  }
 0x1c9   :  { %1919 = vrot.lane.b32.xlu0 %v8048_v57, %s6757_s10  ;;  %1921 = vrot.lane.b32.xlu1 %v8053_v48, %s6757_s10  ;;  %v8548_v52 = vsel %vm2405_vm13, %v2425_v11, %v12776_v10  ;;  %12778 = vst [vmem:[#allocation120_spill] sm:$0xff] %v8551_v33  ;;  %12779 = vst [vmem:[#allocation121_spill] sm:$0xff] %v8553_v16  ;;  %v8556_v57 = vsel %vm2927_vm12, %v2945_v5, %v2947_v6  ;;  %v3886_v48 = vrot.slane %v1063_v7, 2 }
 0x1ca   :  { %12777 = vst [vmem:[#allocation119_spill] sm:$0xff] %v8548_v52  ;;  %12780 = vst [vmem:[#allocation122_spill] sm:$0xff] %v8556_v57  ;;  %v4022_v1 = vrot.slane %v1063_v7, 3  ;;  %v8561_v49 = vsel %vm1770_vm2, %v3636_v20, %v3638_v29  ;;  %v8566_v11 = vsel %vm2927_vm12, %v2947_v6, %v12783_v35  ;;  %v2427_v10 = vrot.slane %v8536_v23, 4 }
 0x1cb   :  { %12782 = vst [vmem:[#allocation124_spill] sm:$0xff] %v8561_v49  ;;  %12784 = vst [vmem:[#allocation125_spill] sm:$0xff] %v8566_v11  ;;  %v816_v3 = vpop.f32.mrb[56].mxu1  ;;  %v8572_v5 = vpop.f32.mrb[58].mxu0  ;;  %v8578_v20 = vsel %vm2019_vm11, %v3884_v41, %v3886_v48  ;;  %v2563_v6 = vrot.slane %v8536_v23, 5  ;;  %v12448_v57 = vrot.slane %v8553_v16, 7 }
 0x1cc   :  { %12786 = vst [vmem:[#allocation60_spill] sm:$0xff] %v8572_v5  ;;  %v8575_v7 = vsel %vm2156_vm10, %v4020_v43, %v4022_v1  ;;  %12788 = vst [vmem:[#allocation127_spill] sm:$0xff] %v8578_v20  ;;  %v2428_v29 = vrot.slane %v816_v3, 4  ;;  %v2564_v35 = vrot.slane %v816_v3, 5  ;;  %v8582_v11 = vpop.f32.mrb[57].mxu1  ;;  %v3640_v41 = vrot.slane %v8572_v5, 1 }
 0x1cd   :  { %2305 = vrot.lane.b32.xlu0 %v8072_v0, %s6757_s10  ;;  %2271 = vrot.lane.b32.xlu1 %v12785_v28, %s6757_s10  ;;  %12787 = vst [vmem:[#allocation126_spill] sm:$0xff] %v8575_v7  ;;  %12789 = vst [vmem:[#allocation128_spill] sm:$0xff] %v8582_v11  ;;  %v1069_v0 = vpop.f32.mrb[59].mxu0  ;;  %v2950_v28 = vrot.slane %v8582_v11, 7  ;;  %v12794_v16 = vld [vmem:[#allocation5_spill] sm:$0xff] }
 0x1ce   :  { %v8587_v27 = vsel %vm384_vm0, %v2563_v6, %v2564_v35  ;;  %v8590_v43 = vsel %vm2405_vm13, %v2427_v10, %v2428_v29  ;;  %v3888_v3 = vrot.slane %v1069_v0, 2  ;;  %v4024_v11 = vrot.slane %v1069_v0, 3 }
 0x1cf   :  { %12790 = vst [vmem:[#allocation129_spill] sm:$0xff] %v8590_v43  ;;  %v8593_v1 = vpop.f32.mrb[58].mxu1  ;;  %v8599_v23 = vpop.f32.mrb[60].mxu0  ;;  %v8604_v48 = vsel %vm2927_vm12, %v12448_v57, %v2950_v28 }
 0x1d0   :  { %12791 = vst [vmem:[#allocation130_spill] sm:$0xff] %v8599_v23  ;;  %12792 = vst [vmem:[#allocation131_spill] sm:$0xff] %v8604_v48  ;;  %v2430_v8 = vrot.slane %v8593_v1, 4  ;;  %v2566_v5 = vrot.slane %v8593_v1, 5  ;;  %v3641_v20 = vrot.slane %v8599_v23, 1  ;;  %v8609_v33 = vpop.f32.mrb[59].mxu1 }
 0x1d1   :  { %2307 = vrot.lane.b32.xlu1 %v8077_v50, %s6757_s10  ;;  %1887 = vrot.lane.b32.xlu0 %v8056_v24, %s6757_s10  ;;  %12793 = vst [vmem:[#allocation132_spill] sm:$0xff] %v8609_v33  ;;  %v1075_v50 = vpop.f32.mrb[61].mxu0  ;;  %v12450_v24 = vrot.slane %v8609_v33, 7  ;;  %v1860_v7 = vpop.permute.xlu0 %1859 }
 0x1d2   :  { %v3889_v43 = vrot.slane %v1075_v50, 2  ;;  %v4025_v52 = vrot.slane %v1075_v50, 3  ;;  %v1955_v56 = vadd.f32 %v1860_v7, %v12794_v16  ;;  %v8614_v57 = vsel %vm384_vm0, %v2564_v35, %v2566_v5 }
 0x1d3   :  { %12795 = vst [vmem:[#allocation5_spill] sm:$0xff] %v8614_v57  ;;  %v8617_v48 = vsel %vm1770_vm2, %v3640_v41, %v3641_v20  ;;  %v8620_v1 = vsel %vm2405_vm13, %v2428_v29, %v2430_v8  ;;  %v828_v23 = vpop.f32.mrb[60].mxu1  ;;  %v8626_v0 = vpop.f32.mrb[62].mxu0  ;;  %v8637_v29 = vsel %vm2927_vm12, %v2950_v28, %v12450_v24 }
 0x1d4   :  { %12796 = vst [vmem:[#allocation133_spill] sm:$0xff] %v8617_v48  ;;  %12797 = vst [vmem:[#allocation134_spill] sm:$0xff] %v8620_v1  ;;  %v8629_v16 = vsel %vm2156_vm10, %v4024_v11, %v4025_v52  ;;  %v8632_v7 = vsel %vm2019_vm11, %v3888_v3, %v3889_v43  ;;  %v2432_v35 = vrot.slane %v828_v23, 4  ;;  %v2568_v41 = vrot.slane %v828_v23, 5  ;;  %v8640_v50 = vpop.f32.mrb[61].mxu1  ;;  %v12803_v1 = vld [vmem:[#allocation9_spill] sm:$0xff] }
 0x1d5   :  { %1889 = vrot.lane.b32.xlu1 %v8061_v45, %s6757_s10  ;;  %2273 = vrot.lane.b32.xlu0 %v8080_v38, %s6757_s10  ;;  %12798 = vst [vmem:[#allocation135_spill] sm:$0xff] %v8626_v0  ;;  %12799 = vst [vmem:[#allocation136_spill] sm:$0xff] %v8629_v16  ;;  %v3643_v45 = vrot.slane %v8626_v0, 1  ;;  %v1081_v38 = vpop.f32.mrb[63].mxu0  ;;  %v2124_v48 = vadd.f32 %v12803_v1, %v1955_v56  ;;  %v1894_v11 = vpop.permute.xlu1 %1893 }
 0x1d6   :  { %12800 = vst [vmem:[#allocation137_spill] sm:$0xff] %v8632_v7  ;;  %12801 = vst [vmem:[#allocation138_spill] sm:$0xff] %v8637_v29  ;;  %v4027_v57 = vrot.slane %v1081_v38, 3  ;;  %v2246_v16 = vpop.permute.xlu0 %2245  ;;  %v1972_v3 = vadd.f32 %v1894_v11, %v7500_v25  ;;  %v8645_v49 = vsel %vm384_vm0, %v2568_v41, %v2563_v6  ;;  %v8648_v28 = vsel %vm384_vm0, %v2566_v5, %v2568_v41  ;;  %v12805_v29 = vld [vmem:[#allocation65_spill] sm:$0xff]  ;;  %v12810_v41 = vld [vmem:[#allocation12_spill] sm:$0xff] }
 0x1d7   :  { %12802 = vst [vmem:[#allocation139_spill] sm:$0xff] %v8640_v50  ;;  %v2341_v7 = vadd.f32 %v2246_v16, %v2124_v48  ;;  %12804 = vst [vmem:[#allocation9_spill] sm:$0xff] %v8648_v28  ;;  %v3891_v23 = vrot.slane %v1081_v38, 2  ;;  %v8650_v24 = vpop.f32.mrb[62].mxu1  ;;  %v1085_v56 = vpop.f32.mrb[64].mxu0  ;;  %v8660_v25 = vsel %vm1770_vm2, %v3641_v20, %v3643_v45  ;;  %v8663_v6 = vsel %vm2405_vm13, %v2432_v35, %v2427_v10  ;;  %v12811_v20 = vld [vmem:[#allocation8_spill] sm:$0xff] }
 0x1d8   :  { %v8657_v1 = vsel %vm2156_vm10, %v4025_v52, %v4027_v57  ;;  %12807 = vst [vmem:[#allocation140_spill] sm:$0xff] %v8660_v25  ;;  %12808 = vst [vmem:[#allocation141_spill] sm:$0xff] %v8663_v6  ;;  %v3645_v5 = vrot.slane %v1085_v56, 1  ;;  %v8665_v48 = vpop.f32.mrb[63].mxu1  ;;  %v1087_v16 = vpop.f32.mrb[65].mxu0  ;;  %v8668_v38 = vadd.f32 %v12810_v41, %v1972_v3 }
 0x1d9   :  { %2275 = vrot.lane.b32.xlu1 %v12805_v29, %s6757_s10  ;;  %1891 = vrot.lane.b32.xlu0 %v8099_v14, %s6757_s10  ;;  %12806 = vst [vmem:[#allocation65_spill] sm:$0xff] %v8657_v1  ;;  %12809 = vst [vmem:[#allocation142_spill] sm:$0xff] %v8665_v48  ;;  %v4029_v14 = vrot.slane %v1087_v16, 3  ;;  %v8671_v11 = vpop.permute.xlu1 %2279  ;;  %v8679_v56 = vadd.f32 %v8158_v54, %v2341_v7  ;;  %v3893_v6 = vrot.slane %v1087_v16, 2  ;;  %v2570_v54 = vrot.slane %v8650_v24, 5  ;;  %v12824_v29 = vld [vmem:[#allocation69_spill] sm:$0xff] }
 0x1da   :  { %v1896_v52 = vpop.permute.xlu0 %1895  ;;  %v8676_v10 = vsel %vm1770_vm2, %v3643_v45, %v3645_v5  ;;  %v8694_v45 = vsel %vm2019_vm11, %v3889_v43, %v3891_v23 }
 0x1db   :  { %v1973_v25 = vadd.f32 %v1896_v52, %v12811_v20  ;;  %12812 = vst [vmem:[#allocation12_spill] sm:$0xff] %v8676_v10  ;;  %12813 = vst [vmem:[#allocation8_spill] sm:$0xff] %v8679_v56  ;;  %v840_v1 = vpop.f32.mrb[64].mxu1  ;;  %v8685_v3 = vpop.f32.mrb[66].mxu0  ;;  %v8688_v41 = vsel %vm2156_vm10, %v4027_v57, %v4029_v14  ;;  %v8691_v52 = vsel %vm2405_vm13, %v2430_v8, %v2432_v35  ;;  %v12819_v20 = vld [vmem:[#allocation16_spill] sm:$0xff]  ;;  %v12820_v35 = vld [vmem:[#allocation6_spill] sm:$0xff] }
 0x1dc   :  { %12814 = vst [vmem:[#allocation143_spill] sm:$0xff] %v8685_v3  ;;  %12815 = vst [vmem:[#allocation144_spill] sm:$0xff] %v8688_v41  ;;  %v2435_v7 = vrot.slane %v840_v1, 4  ;;  %v2571_v5 = vrot.slane %v840_v1, 5  ;;  %v8697_v16 = vpop.f32.mrb[65].mxu1  ;;  %v12822_v1 = vrot.slane %v8650_v24, 4 }
 0x1dd   :  { %1897 = vrot.lane.b32.xlu1 %v8104_v46, %s6757_s10  ;;  %2630 = vrot.lane.b32.xlu0 %v8153_v18, %s6757_s10  ;;  %12816 = vst [vmem:[#allocation145_spill] sm:$0xff] %v8691_v52  ;;  %12817 = vst [vmem:[#allocation146_spill] sm:$0xff] %v8694_v45  ;;  %v1093_v46 = vpop.f32.mrb[67].mxu0  ;;  %v8700_v18 = vadd.f32 %v12819_v20, %v1973_v25  ;;  %v1862_v14 = vpop.permute.xlu1 %1861  ;;  %v3647_v25 = vrot.slane %v8685_v3, 1  ;;  %v12830_v3 = vrot.slane %v8640_v50, 7  ;;  %v12831_v56 = vrot.slane %v8609_v33, 7 }
 0x1de   :  { %12818 = vst [vmem:[#allocation147_spill] sm:$0xff] %v8697_v16  ;;  %v8704_v8 = vpop.permute.xlu0 %2281  ;;  %v1956_v43 = vadd.f32 %v1862_v14, %v12820_v35  ;;  %v8708_v0 = vsel %vm384_vm0, %v2570_v54, %v2571_v5  ;;  %v8713_v45 = vsel %vm2405_vm13, %v12822_v1, %v2435_v7  ;;  %v8725_v14 = vsel %vm2019_vm11, %v3891_v23, %v3893_v6 }
 0x1df   :  { %12821 = vst [vmem:[#allocation16_spill] sm:$0xff] %v8708_v0  ;;  %12823 = vst [vmem:[#allocation6_spill] sm:$0xff] %v8713_v45  ;;  %v8716_v20 = vpop.f32.mrb[66].mxu1  ;;  %v8722_v57 = vpop.f32.mrb[68].mxu0  ;;  %v12827_v35 = vrot.slane %v8697_v16, 7  ;;  %v12828_v1 = vrot.slane %v8665_v48, 7 }
 0x1e0   :  { %12825 = vst [vmem:[#allocation69_spill] sm:$0xff] %v8722_v57  ;;  %12826 = vst [vmem:[#allocation148_spill] sm:$0xff] %v8725_v14  ;;  %v2573_v52 = vrot.slane %v8716_v20, 5  ;;  %v3648_v23 = vrot.slane %v8722_v57, 1  ;;  %v8744_v6 = vpop.f32.mrb[67].mxu1  ;;  %v8746_v14 = vpop.f32.mrb[69].mxu0 }
 0x1e1   :  { %2283 = vrot.lane.b32.xlu1 %v8124_v58, %s6757_s10  ;;  %2277 = vrot.lane.b32.xlu0 %v12824_v29, %s6757_s10  ;;  %v8732_v45 = vsel %vm2927_vm12, %v12828_v1, %v12827_v35  ;;  %v8739_v58 = vsel %vm2927_vm12, %v12831_v56, %v12830_v3  ;;  %12833 = vst [vmem:[#allocation151_spill] sm:$0xff] %v8744_v6  ;;  %v12834_v48 = vld [vmem:[#allocation13_spill] sm:$0xff]  ;;  %v3895_v1 = vrot.slane %v1093_v46, 2  ;;  %v12460_v50 = vrot.slane %v8746_v14, 2  ;;  %v2248_v56 = vpop.permute.xlu1 %2247  ;;  %v12835_v29 = vld [vmem:[#allocation7_spill] sm:$0xff] }
 0x1e2   :  { %12829 = vst [vmem:[#allocation149_spill] sm:$0xff] %v8732_v45  ;;  %12832 = vst [vmem:[#allocation150_spill] sm:$0xff] %v8739_v58  ;;  %v2125_v35 = vadd.f32 %v12834_v48, %v1956_v43  ;;  %v4031_v45 = vrot.slane %v1093_v46, 3  ;;  %v4032_v33 = vrot.slane %v8746_v14, 3  ;;  %v1864_v3 = vpop.permute.xlu0 %1863  ;;  %v8753_v0 = vsel %vm1770_vm2, %v3647_v25, %v3648_v23  ;;  %v12838_v48 = vld [vmem:[#allocation75_spill] sm:$0xff] }
 0x1e3   :  { %v1957_v41 = vadd.f32 %v1864_v3, %v12835_v29  ;;  %12836 = vst [vmem:[#allocation13_spill] sm:$0xff] %v8753_v0  ;;  %v8756_v57 = vsel %vm384_vm0, %v2571_v5, %v2573_v52  ;;  %v8758_v10 = vpop.f32.mrb[68].mxu1  ;;  %v8764_v46 = vpop.f32.mrb[70].mxu0  ;;  %v12841_v29 = vrot.slane %v8716_v20, 4  ;;  %v8775_v5 = vsel %vm2019_vm11, %v3895_v1, %v12460_v50 }
 0x1e4   :  { %v2342_v58 = vadd.f32 %v2248_v56, %v2125_v35  ;;  %12837 = vst [vmem:[#allocation7_spill] sm:$0xff] %v8756_v57  ;;  %12839 = vst [vmem:[#allocation75_spill] sm:$0xff] %v8764_v46  ;;  %v8767_v43 = vsel %vm2156_vm10, %v4031_v45, %v4032_v33  ;;  %v2575_v35 = vrot.slane %v8758_v10, 5  ;;  %v8779_v56 = vpop.f32.mrb[69].mxu1  ;;  %v8781_v3 = vpop.f32.mrb[71].mxu0 }
 0x1e5   :  { %2632 = vrot.lane.b32.xlu1 %v8195_v19, %s6757_s10  ;;  %3016 = vrot.lane.b32.xlu0 %v12838_v48, %s6757_s10  ;;  %12840 = vst [vmem:[#allocation152_spill] sm:$0xff] %v8767_v43  ;;  %v2438_v25 = vsel %vm2405_vm13, %v2435_v7, %v12841_v29  ;;  %12842 = vst [vmem:[#allocation153_spill] sm:$0xff] %v8775_v5  ;;  %v3650_v19 = vrot.slane %v8764_v46, 1  ;;  %v12844_v48 = vld [vmem:[#allocation17_spill] sm:$0xff]  ;;  %v4034_v43 = vrot.slane %v8781_v3, 3  ;;  %v12845_v7 = vld [vmem:[#allocation10_spill] sm:$0xff] }
 0x1e6   :  { %12843 = vst [vmem:[#allocation154_spill] sm:$0xff] %v8779_v56  ;;  %v2126_v45 = vadd.f32 %v12844_v48, %v1957_v41  ;;  %v1866_v57 = vpop.permute.xlu1 %1865  ;;  %v2250_v0 = vpop.permute.xlu0 %2249  ;;  %v8787_v1 = vsel %vm384_vm0, %v2575_v35, %v2570_v54  ;;  %v8790_v50 = vsel %vm384_vm0, %v2573_v52, %v2575_v35  ;;  %v2439_v46 = vrot.slane %v8758_v10, 4  ;;  %v12850_v48 = vld [vmem:[#allocation18_spill] sm:$0xff] }
 0x1e7   :  { %v1958_v29 = vadd.f32 %v1866_v57, %v12845_v7  ;;  %v8793_v5 = vpop.f32.mrb[70].mxu1  ;;  %v1109_v41 = vpop.f32.mrb[72].mxu0  ;;  %v8800_v57 = vsel %vm1770_vm2, %v3648_v23, %v3650_v19  ;;  %v8806_v52 = vadd.f32 %v8201_v30, %v2342_v58 }
 0x1e8   :  { %v2343_v28 = vadd.f32 %v2250_v0, %v2126_v45  ;;  %12846 = vst [vmem:[#allocation17_spill] sm:$0xff] %v8793_v5  ;;  %v8803_v0 = vsel %vm2156_vm10, %v4032_v33, %v4034_v43  ;;  %v3652_v54 = vrot.slane %v1109_v41, 1  ;;  %v8808_v10 = vpop.f32.mrb[71].mxu1  ;;  %v8810_v35 = vpop.f32.mrb[73].mxu0  ;;  %v12851_v33 = vld [vmem:[#allocation15_spill] sm:$0xff] }
 0x1e9   :  { %3018 = vrot.lane.b32.xlu1 %v8210_v4, %s6757_s10  ;;  %2634 = vrot.lane.b32.xlu0 %v8233_v36, %s6757_s10  ;;  %12847 = vst [vmem:[#allocation10_spill] sm:$0xff] %v8803_v0  ;;  %12848 = vst [vmem:[#allocation155_spill] sm:$0xff] %v8806_v52  ;;  %v2127_v4 = vadd.f32 %v12850_v48, %v1958_v29  ;;  %v2358_v36 = vadd.f32 %v8671_v11, %v8668_v38  ;;  %v4036_v45 = vrot.slane %v8810_v35, 3  ;;  %v12853_v38 = vld [vmem:[#allocation77_spill] sm:$0xff] }
 0x1ea   :  { %12849 = vst [vmem:[#allocation156_spill] sm:$0xff] %v8808_v10  ;;  %v2252_v23 = vpop.permute.xlu1 %2251  ;;  %v1900_v7 = vpop.permute.xlu0 %1899  ;;  %v8818_v30 = vsel %vm1770_vm2, %v3650_v19, %v3652_v54  ;;  %v8821_v58 = vadd.f32 %v8244_v47, %v2343_v28  ;;  %v12856_v47 = vrot.slane %v8650_v24, 4  ;;  %v12464_v54 = vrot.slane %v8793_v5, 5  ;;  %v12860_v24 = vld [vmem:[#allocation19_spill] sm:$0xff] }
 0x1eb   :  { %v2344_v56 = vadd.f32 %v2252_v23, %v2127_v4  ;;  %v1975_v0 = vadd.f32 %v1900_v7, %v12851_v33  ;;  %v8824_v10 = vpop.f32.mrb[72].mxu1  ;;  %v8830_v11 = vpop.f32.mrb[74].mxu0  ;;  %v8833_v29 = vsel %vm2156_vm10, %v4034_v43, %v4036_v45  ;;  %v8835_v19 = vadd.f32 %v2438_v25, %v2358_v36  ;;  %v12859_v7 = vld [vmem:[#allocation23_spill] sm:$0xff] }
 0x1ec   :  { %12852 = vst [vmem:[#allocation18_spill] sm:$0xff] %v8821_v58  ;;  %12854 = vst [vmem:[#allocation15_spill] sm:$0xff] %v8830_v11  ;;  %v8840_v28 = vsel %vm2405_vm13, %v2439_v46, %v12856_v47  ;;  %v2442_v48 = vrot.slane %v8824_v10, 4  ;;  %v8845_v4 = vpop.f32.mrb[73].mxu1  ;;  %v8847_v23 = vpop.f32.mrb[75].mxu0  ;;  %v12465_v25 = vrot.slane %v8793_v5, 4 }
 0x1ed   :  { %2636 = vrot.lane.b32.xlu1 %v8238_v40, %s6757_s10  ;;  %3707 = vrot.lane.b32.xlu0 %v12853_v38, %s6757_s10  ;;  %12855 = vst [vmem:[#allocation77_spill] sm:$0xff] %v8835_v19  ;;  %12857 = vst [vmem:[#allocation157_spill] sm:$0xff] %v8840_v28  ;;  %v2578_v40 = vrot.slane %v8824_v10, 5  ;;  %v2144_v43 = vadd.f32 %v12859_v7, %v1975_v0  ;;  %v8858_v10 = vadd.f32 %v8261_v37, %v2344_v56  ;;  %v12862_v0 = vld [vmem:[#allocation79_spill] sm:$0xff] }
 0x1ee   :  { %12858 = vst [vmem:[#allocation158_spill] sm:$0xff] %v8845_v4  ;;  %v1902_v36 = vpop.permute.xlu1 %1901  ;;  %v2286_v45 = vpop.permute.xlu0 %2285  ;;  %v3654_v56 = vrot.slane %v8830_v11, 1  ;;  %v3900_v11 = vrot.slane %v8810_v35, 2 }
 0x1ef   :  { %v1976_v33 = vadd.f32 %v1902_v36, %v12860_v24  ;;  %v2361_v38 = vadd.f32 %v2286_v45, %v2144_v43  ;;  %v8855_v47 = vsel %vm384_vm0, %v12464_v54, %v2578_v40  ;;  %12861 = vst [vmem:[#allocation23_spill] sm:$0xff] %v8858_v10  ;;  %v8860_v41 = vpop.f32.mrb[74].mxu1  ;;  %v8866_v7 = vpop.f32.mrb[76].mxu0  ;;  %v12864_v43 = vrot.slane %v8716_v20, 4 }
 0x1f0   :  { %12863 = vst [vmem:[#allocation19_spill] sm:$0xff] %v8866_v7  ;;  %v12865_v45 = vrot.slane %v8781_v3, 2  ;;  %v12866_v24 = vrot.slane %v8746_v14, 2  ;;  %v3655_v54 = vrot.slane %v8866_v7, 1  ;;  %v8884_v20 = vpop.f32.mrb[75].mxu1  ;;  %v2359_v14 = vadd.f32 %v8704_v8, %v8700_v18  ;;  %v12873_v18 = vld [vmem:[#allocation83_spill] sm:$0xff] }
 0x1f1   :  { %3020 = vrot.lane.b32.xlu0 %v8253_v59, %s6757_s10  ;;  %4091 = vrot.lane.b32.xlu1 %v12862_v0, %s6757_s10  ;;  %v2440_v36 = vsel %vm2405_vm13, %v12864_v43, %v2439_v46  ;;  %v2443_v59 = vsel %vm2405_vm13, %v12465_v25, %v2442_v48  ;;  %v2580_v0 = vrot.slane %v8860_v41, 5  ;;  %12868 = vst [vmem:[#allocation159_spill] sm:$0xff] %v8884_v20  ;;  %v8886_v46 = vpop.f32.mrb[77].mxu0  ;;  %v12869_v43 = vld [vmem:[#allocation27_spill] sm:$0xff] }
 0x1f2   :  { %v8876_v37 = vsel %vm2019_vm11, %v12866_v24, %v12865_v45  ;;  %v2145_v19 = vadd.f32 %v12869_v43, %v1976_v33  ;;  %v4038_v45 = vrot.slane %v8847_v23, 3  ;;  %v4039_v24 = vrot.slane %v8886_v46, 3  ;;  %v2288_v25 = vpop.permute.xlu1 %2287  ;;  %v1868_v10 = vpop.permute.xlu0 %1867 }
 0x1f3   :  { %12867 = vst [vmem:[#allocation79_spill] sm:$0xff] %v8876_v37  ;;  %v12870_v37 = vld [vmem:[#allocation14_spill] sm:$0xff]  ;;  %v8896_v7 = vsel %vm384_vm0, %v2578_v40, %v2580_v0  ;;  %v8899_v20 = vsel %vm1770_vm2, %v3654_v56, %v3655_v54  ;;  %v2444_v33 = vrot.slane %v8860_v41, 4  ;;  %v8902_v43 = vpop.f32.mrb[76].mxu1  ;;  %v8908_v8 = vpop.f32.mrb[78].mxu0  ;;  %v8913_v40 = vadd.f32 %v2440_v36, %v2359_v14 }
 0x1f4   :  { %v1959_v4 = vadd.f32 %v1868_v10, %v12870_v37  ;;  %12871 = vst [vmem:[#allocation27_spill] sm:$0xff] %v8899_v20  ;;  %12872 = vst [vmem:[#allocation14_spill] sm:$0xff] %v8902_v43  ;;  %v8911_v35 = vsel %vm2156_vm10, %v4038_v45, %v4039_v24  ;;  %v8915_v10 = vadd.f32 %v2443_v59, %v2361_v38  ;;  %v12470_v37 = vrot.slane %v8902_v43, 5  ;;  %v8919_v56 = vpop.f32.mrb[77].mxu1  ;;  %v8921_v58 = vpop.f32.mrb[79].mxu0 }
 0x1f5   :  { %3709 = vrot.lane.b32.xlu1 %v12873_v18, %s6757_s10  ;;  %4093 = vrot.lane.b32.xlu0 %v8256_v22, %s6757_s10  ;;  %12874 = vst [vmem:[#allocation83_spill] sm:$0xff] %v8908_v8  ;;  %12875 = vst [vmem:[#allocation160_spill] sm:$0xff] %v8911_v35  ;;  %v3657_v41 = vrot.slane %v8908_v8, 1  ;;  %v12879_v18 = vld [vmem:[#allocation24_spill] sm:$0xff]  ;;  %v2362_v22 = vadd.f32 %v2288_v25, %v2145_v19  ;;  %v4041_v28 = vrot.slane %v8921_v58, 3  ;;  %v12887_v8 = vld [vmem:[#allocation21_spill] sm:$0xff] }
 0x1f6   :  { %12876 = vst [vmem:[#allocation161_spill] sm:$0xff] %v8913_v40  ;;  %12877 = vst [vmem:[#allocation162_spill] sm:$0xff] %v8915_v10  ;;  %v2128_v20 = vadd.f32 %v12879_v18, %v1959_v4  ;;  %v1870_v52 = vpop.permute.xlu1 %1869  ;;  %v2254_v45 = vpop.permute.xlu0 %2253  ;;  %v12880_v35 = vld [vmem:[#allocation20_spill] sm:$0xff]  ;;  %v8932_v59 = vsel %vm384_vm0, %v2580_v0, %v12470_v37  ;;  %v12882_v4 = vrot.slane %v8781_v3, 2  ;;  %v12886_v10 = vld [vmem:[#allocation25_spill] sm:$0xff] }
 0x1f7   :  { %12878 = vst [vmem:[#allocation163_spill] sm:$0xff] %v8919_v56  ;;  %v1960_v36 = vadd.f32 %v1870_v52, %v12880_v35  ;;  %v8927_v38 = vsel %vm1770_vm2, %v3655_v54, %v3657_v41  ;;  %v8935_v40 = vpop.f32.mrb[78].mxu1  ;;  %v1133_v52 = vpop.f32.mrb[80].mxu0  ;;  %v8942_v19 = vsel %vm2156_vm10, %v4039_v24, %v4041_v28  ;;  %v2445_v54 = vsel %vm2405_vm13, %v2442_v48, %v2444_v33  ;;  %v12915_v56 = vld [vmem:[#allocation26_spill] sm:$0xff] }
 0x1f8   :  { %v2345_v14 = vadd.f32 %v2254_v45, %v2128_v20  ;;  %12881 = vst [vmem:[#allocation24_spill] sm:$0xff] %v8935_v40  ;;  %v8948_v25 = vsel %vm2019_vm11, %v12882_v4, %v3900_v11  ;;  %v3659_v0 = vrot.slane %v1133_v52, 1  ;;  %v8950_v20 = vpop.f32.mrb[79].mxu1  ;;  %v8952_v35 = vpop.f32.mrb[81].mxu0  ;;  %v3905_v4 = vrot.slane %v8921_v58, 2 }
 0x1f9   :  { %2640 = vrot.lane.b32.xlu1 %v8346_v2, %s6757_s10  ;;  %2638 = vrot.lane.b32.xlu0 %v8310_v32, %s6757_s10  ;;  %12883 = vst [vmem:[#allocation20_spill] sm:$0xff] %v8948_v25  ;;  %12884 = vst [vmem:[#allocation164_spill] sm:$0xff] %v8950_v20  ;;  %v12885_v2 = vld [vmem:[#allocation28_spill] sm:$0xff]  ;;  %v3903_v32 = vrot.slane %v8886_v46, 2  ;;  %v4043_v45 = vrot.slane %v8952_v35, 3  ;;  %v12472_v58 = vrot.slane %v8935_v40, 5 }
 0x1fa   :  { %v2129_v18 = vadd.f32 %v12885_v2, %v1960_v36  ;;  %v1906_v24 = vpop.permute.xlu1 %1905  ;;  %v1904_v37 = vpop.permute.xlu0 %1903  ;;  %v8960_v11 = vsel %vm1770_vm2, %v3657_v41, %v3659_v0  ;;  %v8963_v52 = vadd.f32 %v8315_v55, %v2345_v14  ;;  %v12891_v55 = vrot.slane %v8902_v43, 4  ;;  %v12893_v14 = vld [vmem:[#allocation31_spill] sm:$0xff] }
 0x1fb   :  { %v1978_v48 = vadd.f32 %v1906_v24, %v12886_v10  ;;  %v1977_v3 = vadd.f32 %v1904_v37, %v12887_v8  ;;  %v8966_v25 = vpop.f32.mrb[80].mxu1  ;;  %v8972_v46 = vpop.f32.mrb[82].mxu0  ;;  %v8975_v8 = vsel %vm2156_vm10, %v4041_v28, %v4043_v45  ;;  %v8977_v10 = vadd.f32 %v2445_v54, %v2362_v22 }
 0x1fc   :  { %12888 = vst [vmem:[#allocation28_spill] sm:$0xff] %v8963_v52  ;;  %12889 = vst [vmem:[#allocation25_spill] sm:$0xff] %v8972_v46  ;;  %v2447_v37 = vsel %vm2405_vm13, %v2444_v33, %v12891_v55  ;;  %v2449_v41 = vrot.slane %v8966_v25, 4  ;;  %v8985_v36 = vpop.f32.mrb[81].mxu1  ;;  %v3902_v28 = vrot.slane %v8847_v23, 2  ;;  %v12473_v22 = vrot.slane %v8935_v40, 4 }
 0x1fd   :  { %3026 = vrot.lane.b32.xlu1 %v8361_v44, %s6757_s10  ;;  %3711 = vrot.lane.b32.xlu0 %v8277_v63, %s6757_s10  ;;  %12890 = vst [vmem:[#allocation21_spill] sm:$0xff] %v8977_v10  ;;  %v2585_v44 = vrot.slane %v8966_v25, 5  ;;  %12892 = vst [vmem:[#allocation165_spill] sm:$0xff] %v8985_v36  ;;  %v1141_v63 = vpop.f32.mrb[83].mxu0  ;;  %v2146_v0 = vadd.f32 %v12893_v14, %v1977_v3  ;;  %v12894_v33 = vld [vmem:[#allocation32_spill] sm:$0xff]  ;;  %v3907_v10 = vrot.slane %v8952_v35, 2 }
 0x1fe   :  { %v2256_v54 = vpop.permute.xlu1 %2255  ;;  %v2290_v2 = vpop.permute.xlu0 %2289  ;;  %v8991_v55 = vadd.f32 %v12894_v33, %v1978_v48  ;;  %v12897_v23 = vld [vmem:[#allocation89_spill] sm:$0xff]  ;;  %v9008_v48 = vsel %vm2019_vm11, %v3903_v32, %v3905_v4  ;;  %v9011_v3 = vsel %vm2019_vm11, %v3902_v28, %v3903_v32  ;;  %v9016_v35 = vsel %vm2405_vm13, %v12473_v22, %v2449_v41  ;;  %v12902_v33 = vld [vmem:[#allocation96_spill] sm:$0xff]  ;;  %v12905_v22 = vld [vmem:[#allocation22_spill] sm:$0xff] }
 0x1ff   :  { %v2346_v45 = vadd.f32 %v2256_v54, %v2129_v18  ;;  %v2363_v24 = vadd.f32 %v2290_v2, %v2146_v0  ;;  %v8996_v25 = vsel %vm384_vm0, %v12472_v58, %v2585_v44  ;;  %v8999_v52 = vpop.f32.mrb[82].mxu1  ;;  %v9005_v18 = vpop.f32.mrb[84].mxu0  ;;  %12899 = vst [vmem:[#allocation166_spill] sm:$0xff] %v9008_v48  ;;  %12900 = vst [vmem:[#allocation167_spill] sm:$0xff] %v9011_v3  ;;  %v3661_v14 = vrot.slane %v8972_v46, 1 }
 0x200   :  { %12895 = vst [vmem:[#allocation31_spill] sm:$0xff] %v8991_v55  ;;  %12896 = vst [vmem:[#allocation32_spill] sm:$0xff] %v8999_v52  ;;  %v3662_v0 = vrot.slane %v9005_v18, 1  ;;  %v9021_v54 = vpop.f32.mrb[83].mxu1  ;;  %v1147_v2 = vpop.f32.mrb[85].mxu0  ;;  %v4045_v58 = vrot.slane %v1141_v63, 3 }
 0x201   :  { %2644 = vrot.lane.b32.xlu1 %v8385_v60, %s6757_s10  ;;  %4095 = vrot.lane.b32.xlu0 %v12897_v23, %s6757_s10  ;;  %12898 = vst [vmem:[#allocation89_spill] sm:$0xff] %v9005_v18  ;;  %v12477_v60 = vrot.slane %v8999_v52, 5  ;;  %12901 = vst [vmem:[#allocation168_spill] sm:$0xff] %v9021_v54  ;;  %v9024_v23 = vadd.f32 %v12902_v33, %v2346_v45  ;;  %v4046_v32 = vrot.slane %v1147_v2, 3  ;;  %v3910_v3 = vrot.slane %v1147_v2, 2  ;;  %v12908_v33 = vld [vmem:[#allocation92_spill] sm:$0xff] }
 0x202   :  { %v9026_v28 = vpop.permute.xlu1 %2291  ;;  %v1872_v48 = vpop.permute.xlu0 %1871  ;;  %v9030_v46 = vsel %vm1770_vm2, %v3661_v14, %v3662_v0  ;;  %v3909_v14 = vrot.slane %v1141_v63, 2 }
 0x203   :  { %12903 = vst [vmem:[#allocation96_spill] sm:$0xff] %v9024_v23  ;;  %12904 = vst [vmem:[#allocation169_spill] sm:$0xff] %v9026_v28  ;;  %v1961_v55 = vadd.f32 %v1872_v48, %v12905_v22  ;;  %v9035_v18 = vsel %vm384_vm0, %v2585_v44, %v12477_v60  ;;  %v9038_v45 = vpop.f32.mrb[84].mxu1  ;;  %v9044_v2 = vpop.f32.mrb[86].mxu0  ;;  %v9047_v22 = vsel %vm2156_vm10, %v4045_v58, %v4046_v32 }
 0x204   :  { %12906 = vst [vmem:[#allocation22_spill] sm:$0xff] %v9035_v18  ;;  %12907 = vst [vmem:[#allocation170_spill] sm:$0xff] %v9038_v45  ;;  %v9049_v48 = vadd.f32 %v2447_v37, %v2363_v24  ;;  %v9052_v44 = vsel %vm2019_vm11, %v3905_v4, %v3907_v10  ;;  %v3664_v60 = vrot.slane %v9044_v2, 1  ;;  %v9055_v54 = vpop.f32.mrb[85].mxu1  ;;  %v1153_v28 = vpop.f32.mrb[87].mxu0  ;;  %v9063_v4 = vsel %vm2019_vm11, %v3909_v14, %v3910_v3 }
 0x205   :  { %3024 = vrot.lane.b32.xlu0 %v12908_v33, %s6757_s10  ;;  %4099 = vrot.lane.b32.xlu1 %v8364_v39, %s6757_s10  ;;  %12909 = vst [vmem:[#allocation92_spill] sm:$0xff] %v9044_v2  ;;  %12910 = vst [vmem:[#allocation171_spill] sm:$0xff] %v9047_v22  ;;  %v12914_v33 = vld [vmem:[#allocation33_spill] sm:$0xff]  ;;  %v3912_v23 = vrot.slane %v1153_v28, 2  ;;  %v4048_v39 = vrot.slane %v1153_v28, 3 }
 0x206   :  { %12911 = vst [vmem:[#allocation172_spill] sm:$0xff] %v9049_v48  ;;  %12912 = vst [vmem:[#allocation173_spill] sm:$0xff] %v9052_v44  ;;  %v2130_v18 = vadd.f32 %v12914_v33, %v1961_v55  ;;  %v1874_v36 = vpop.permute.xlu1 %1873  ;;  %v2258_v20 = vpop.permute.xlu0 %2257  ;;  %v9060_v37 = vsel %vm1770_vm2, %v3662_v0, %v3664_v60 }
 0x207   :  { %12913 = vst [vmem:[#allocation174_spill] sm:$0xff] %v9055_v54  ;;  %v1962_v58 = vadd.f32 %v1874_v36, %v12915_v56  ;;  %12916 = vst [vmem:[#allocation33_spill] sm:$0xff] %v9063_v4  ;;  %v9065_v10 = vpop.f32.mrb[86].mxu1  ;;  %v1157_v63 = vpop.f32.mrb[88].mxu0  ;;  %v9072_v24 = vsel %vm2156_vm10, %v4046_v32, %v4048_v39  ;;  %v12918_v56 = vrot.slane %v8999_v52, 4  ;;  %v9080_v36 = vsel %vm2019_vm11, %v3910_v3, %v3912_v23  ;;  %v12922_v4 = vld [vmem:[#allocation29_spill] sm:$0xff] }
 0x208   :  { %v2347_v22 = vadd.f32 %v2258_v20, %v2130_v18  ;;  %12917 = vst [vmem:[#allocation26_spill] sm:$0xff] %v9065_v10  ;;  %12919 = vst [vmem:[#allocation175_spill] sm:$0xff] %v9080_v36  ;;  %v3666_v55 = vrot.slane %v1157_v63, 1  ;;  %v9082_v18 = vpop.f32.mrb[87].mxu1  ;;  %v1159_v0 = vpop.f32.mrb[89].mxu0 }
 0x209   :  { %2642 = vrot.lane.b32.xlu0 %v8388_v15, %s6757_s10  ;;  %3717 = vrot.lane.b32.xlu1 %v8391_v26, %s6757_s10  ;;  %v9077_v20 = vsel %vm2405_vm13, %v2449_v41, %v12918_v56  ;;  %12920 = vst [vmem:[#allocation176_spill] sm:$0xff] %v9082_v18  ;;  %v12921_v15 = vld [vmem:[#allocation34_spill] sm:$0xff]  ;;  %v3914_v14 = vrot.slane %v1159_v0, 2  ;;  %v4050_v33 = vrot.slane %v1159_v0, 3 }
 0x20a   :  { %v2131_v28 = vadd.f32 %v12921_v15, %v1962_v58  ;;  %v2260_v32 = vpop.permute.xlu1 %2259  ;;  %v1908_v48 = vpop.permute.xlu0 %1907  ;;  %v9088_v41 = vsel %vm1770_vm2, %v3664_v60, %v3666_v55  ;;  %v9091_v3 = vadd.f32 %v8408_v34, %v2347_v22  ;;  %v12924_v58 = vld [vmem:[#allocation95_spill] sm:$0xff]  ;;  %v12927_v34 = vrot.slane %v8793_v5, 5 }
 0x20b   :  { %v1979_v44 = vadd.f32 %v1908_v48, %v12922_v4  ;;  %v9094_v56 = vpop.f32.mrb[88].mxu1  ;;  %v9100_v0 = vpop.f32.mrb[90].mxu0  ;;  %v9103_v48 = vsel %vm2156_vm10, %v4048_v39, %v4050_v33  ;;  %v9106_v60 = vsel %vm2019_vm11, %v3912_v23, %v3914_v14  ;;  %v12928_v22 = vrot.slane %v8902_v43, 5  ;;  %v12932_v14 = vld [vmem:[#allocation35_spill] sm:$0xff] }
 0x20c   :  { %v2348_v2 = vadd.f32 %v2260_v32, %v2131_v28  ;;  %12923 = vst [vmem:[#allocation34_spill] sm:$0xff] %v9091_v3  ;;  %12925 = vst [vmem:[#allocation29_spill] sm:$0xff] %v9100_v0  ;;  %v2456_v55 = vrot.slane %v9094_v56, 4  ;;  %v9116_v15 = vpop.f32.mrb[89].mxu1  ;;  %v12931_v28 = vld [vmem:[#allocation39_spill] sm:$0xff]  ;;  %v12482_v39 = vrot.slane %v9065_v10, 4 }
 0x20d   :  { %3715 = vrot.lane.b32.xlu0 %v12924_v58, %s6757_s10  ;;  %3719 = vrot.lane.b32.xlu1 %v8425_v9, %s6757_s10  ;;  %12926 = vst [vmem:[#allocation95_spill] sm:$0xff] %v9106_v60  ;;  %v9113_v4 = vsel %vm384_vm0, %v12928_v22, %v12927_v34  ;;  %12930 = vst [vmem:[#allocation178_spill] sm:$0xff] %v9116_v15  ;;  %v1165_v9 = vpop.f32.mrb[91].mxu0  ;;  %v2148_v32 = vadd.f32 %v12931_v28, %v1979_v44  ;;  %v3668_v34 = vrot.slane %v9100_v0, 1  ;;  %v13262_v15 = vld [vmem:[#allocation106_spill] sm:$0xff] }
 0x20e   :  { %12929 = vst [vmem:[#allocation177_spill] sm:$0xff] %v9113_v4  ;;  %v1910_v33 = vpop.permute.xlu1 %1909  ;;  %v2294_v58 = vpop.permute.xlu0 %2293  ;;  %v9123_v3 = vadd.f32 %v8396_v62, %v2348_v2  ;;  %v9137_v28 = vsel %vm2405_vm13, %v12482_v39, %v2456_v55  ;;  %v12936_v62 = vrot.slane %v9038_v45, 5  ;;  %v12937_v2 = vrot.slane %v8999_v52, 5  ;;  %v12944_v52 = vld [vmem:[#allocation30_spill] sm:$0xff] }
 0x20f   :  { %v1980_v26 = vadd.f32 %v1910_v33, %v12932_v14  ;;  %v2365_v63 = vadd.f32 %v2294_v58, %v2148_v32  ;;  %v9126_v22 = vpop.f32.mrb[90].mxu1  ;;  %v9132_v44 = vpop.f32.mrb[92].mxu0  ;;  %v12939_v33 = vrot.slane %v8744_v6, 7  ;;  %v3916_v5 = vrot.slane %v1165_v9, 2 }
 0x210   :  { %12933 = vst [vmem:[#allocation39_spill] sm:$0xff] %v9123_v3  ;;  %12934 = vst [vmem:[#allocation35_spill] sm:$0xff] %v9126_v22  ;;  %v9144_v32 = vsel %vm384_vm0, %v12937_v2, %v12936_v62  ;;  %v2594_v14 = vrot.slane %v9126_v22, 5  ;;  %v3669_v39 = vrot.slane %v9132_v44, 1  ;;  %v9156_v23 = vpop.f32.mrb[91].mxu1  ;;  %v1171_v4 = vpop.f32.mrb[93].mxu0 }
 0x211   :  { %4101 = vrot.lane.b32.xlu0 %v8405_v42, %s6757_s10  ;;  %4103 = vrot.lane.b32.xlu1 %v8439_v21, %s6757_s10  ;;  %12935 = vst [vmem:[#allocation179_spill] sm:$0xff] %v9132_v44  ;;  %12938 = vst [vmem:[#allocation180_spill] sm:$0xff] %v9144_v32  ;;  %v12940_v42 = vrot.slane %v8697_v16, 7  ;;  %v12943_v3 = vld [vmem:[#allocation43_spill] sm:$0xff]  ;;  %v4052_v62 = vrot.slane %v1165_v9, 3  ;;  %v4053_v2 = vrot.slane %v1171_v4, 3 }
 0x212   :  { %12942 = vst [vmem:[#allocation182_spill] sm:$0xff] %v9156_v23  ;;  %v2149_v0 = vadd.f32 %v12943_v3, %v1980_v26  ;;  %v2296_v32 = vpop.permute.xlu1 %2295  ;;  %v1876_v36 = vpop.permute.xlu0 %1875  ;;  %v9166_v58 = vsel %vm1770_vm2, %v3668_v34, %v3669_v39  ;;  %v12948_v26 = vld [vmem:[#allocation107_spill] sm:$0xff] }
 0x213   :  { %v9151_v21 = vsel %vm2927_vm12, %v12940_v42, %v12939_v33  ;;  %v1963_v43 = vadd.f32 %v1876_v36, %v12944_v52  ;;  %v12945_v33 = vrot.slane %v9094_v56, 5  ;;  %12946 = vst [vmem:[#allocation43_spill] sm:$0xff] %v9166_v58  ;;  %v9168_v44 = vpop.f32.mrb[92].mxu1  ;;  %v9174_v3 = vpop.f32.mrb[94].mxu0  ;;  %v9177_v52 = vsel %vm2156_vm10, %v4052_v62, %v4053_v2  ;;  %v12955_v58 = vld [vmem:[#allocation36_spill] sm:$0xff] }
 0x214   :  { %12941 = vst [vmem:[#allocation181_spill] sm:$0xff] %v9151_v21  ;;  %v2366_v60 = vadd.f32 %v2296_v32, %v2149_v0  ;;  %v3917_v21 = vrot.slane %v1171_v4, 2  ;;  %12947 = vst [vmem:[#allocation30_spill] sm:$0xff] %v9168_v44  ;;  %v9180_v36 = vadd.f32 %v9016_v35, %v2365_v63  ;;  %v12952_v0 = vrot.slane %v9126_v22, 4  ;;  %v9188_v32 = vpop.f32.mrb[93].mxu1  ;;  %v12958_v22 = vld [vmem:[#allocation110_spill] sm:$0xff] }
 0x215   :  { %v9163_v42 = vsel %vm384_vm0, %v12945_v33, %v2594_v14  ;;  %2646 = vrot.lane.b32.xlu0 %v12948_v26, %s6757_s10  ;;  %2648 = vrot.lane.b32.xlu1 %v8490_v51, %s6757_s10  ;;  %12949 = vst [vmem:[#allocation107_spill] sm:$0xff] %v9174_v3  ;;  %12950 = vst [vmem:[#allocation183_spill] sm:$0xff] %v9177_v52  ;;  %v3671_v34 = vrot.slane %v9174_v3, 1  ;;  %v1177_v33 = vpop.f32.mrb[95].mxu0  ;;  %v12954_v26 = vld [vmem:[#allocation40_spill] sm:$0xff] }
 0x216   :  { %12951 = vst [vmem:[#allocation184_spill] sm:$0xff] %v9180_v36  ;;  %v9185_v4 = vsel %vm2405_vm13, %v2456_v55, %v12952_v0  ;;  %12953 = vst [vmem:[#allocation185_spill] sm:$0xff] %v9188_v32  ;;  %v2132_v51 = vadd.f32 %v12954_v26, %v1963_v43  ;;  %v3919_v23 = vrot.slane %v1177_v33, 2  ;;  %v4055_v18 = vrot.slane %v1177_v33, 3  ;;  %v12962_v33 = vld [vmem:[#allocation44_spill] sm:$0xff]  ;;  %v12964_v32 = vld [vmem:[#allocation37_spill] sm:$0xff] }
 0x217   :  { %v1878_v62 = vpop.permute.xlu1 %1877  ;;  %v2262_v52 = vpop.permute.xlu0 %2261  ;;  %v9193_v36 = vsel %vm1770_vm2, %v3669_v39, %v3671_v34  ;;  %v9196_v55 = vadd.f32 %v9077_v20, %v2366_v60  ;;  %v9210_v39 = vsel %vm2019_vm11, %v3916_v5, %v3917_v21 }
 0x218   :  { %v1964_v35 = vadd.f32 %v1878_v62, %v12955_v58  ;;  %v2349_v63 = vadd.f32 %v2262_v52, %v2132_v51  ;;  %12956 = vst [vmem:[#allocation40_spill] sm:$0xff] %v9193_v36  ;;  %v1252_v3 = vpop.f32.mrb[94].mxu1  ;;  %v1181_v43 = vpop.f32.mrb[96].mxu0  ;;  %v9204_v9 = vsel %vm2156_vm10, %v4053_v2, %v4055_v18  ;;  %v9207_v58 = vsel %vm2019_vm11, %v3917_v21, %v3919_v23 }
 0x219   :  { %12957 = vst [vmem:[#allocation36_spill] sm:$0xff] %v9196_v55  ;;  %3032 = vrot.lane.b32.xlu0 %v12958_v22, %s6757_s10  ;;  %3034 = vrot.lane.b32.xlu1 %v8505_v61, %s6757_s10  ;;  %12959 = vst [vmem:[#allocation110_spill] sm:$0xff] %v9204_v9  ;;  %v3673_v20 = vrot.slane %v1181_v43, 1  ;;  %v1183_v60 = vpop.f32.mrb[97].mxu0  ;;  %v1254_v52 = vpop.f32.mrb[95].mxu1  ;;  %v12963_v61 = vld [vmem:[#allocation41_spill] sm:$0xff] }
 0x21a   :  { %12960 = vst [vmem:[#allocation186_spill] sm:$0xff] %v9207_v58  ;;  %12961 = vst [vmem:[#allocation187_spill] sm:$0xff] %v9210_v39  ;;  %v2133_v26 = vadd.f32 %v12962_v33, %v1964_v35  ;;  %v3921_v51 = vrot.slane %v1183_v60, 2  ;;  %v4057_v22 = vrot.slane %v1183_v60, 3  ;;  %v12966_v58 = vld [vmem:[#allocation108_spill] sm:$0xff]  ;;  %v4251_v5 = vrot.slane %v1252_v3, 4 }
 0x21b   :  { %v1914_v62 = vpop.permute.xlu1 %1913  ;;  %v1912_v0 = vpop.permute.xlu0 %1911  ;;  %v9216_v9 = vsel %vm1770_vm2, %v3671_v34, %v3673_v20  ;;  %v9219_v36 = vadd.f32 %v12966_v58, %v2349_v63  ;;  %v12970_v34 = vrot.slane %v9168_v44, 5  ;;  %v12975_v39 = vld [vmem:[#allocation48_spill] sm:$0xff]  ;;  %v12995_v44 = vld [vmem:[#allocation49_spill] sm:$0xff] }
 0x21c   :  { %v1982_v55 = vadd.f32 %v1914_v62, %v12963_v61  ;;  %v1981_v2 = vadd.f32 %v1912_v0, %v12964_v32  ;;  %12965 = vst [vmem:[#allocation44_spill] sm:$0xff] %v9216_v9  ;;  %v1258_v21 = vpop.f32.mrb[96].mxu1  ;;  %v9225_v35 = vpop.f32.mrb[98].mxu0  ;;  %v9228_v43 = vsel %vm2156_vm10, %v4055_v18, %v4057_v22  ;;  %v9231_v32 = vsel %vm2019_vm11, %v3919_v23, %v3921_v51 }
 0x21d   :  { %12967 = vst [vmem:[#allocation41_spill] sm:$0xff] %v9219_v36  ;;  %2650 = vrot.lane.b32.xlu1 %v8525_v17, %s6757_s10  ;;  %3723 = vrot.lane.b32.xlu0 %v8493_v12, %s6757_s10  ;;  %12968 = vst [vmem:[#allocation37_spill] sm:$0xff] %v9228_v43  ;;  %v9236_v63 = vsel %vm384_vm0, %v2594_v14, %v12970_v34  ;;  %v4387_v0 = vrot.slane %v1252_v3, 5  ;;  %v4252_v58 = vrot.slane %v1258_v21, 4  ;;  %v4388_v20 = vrot.slane %v1258_v21, 5  ;;  %v1260_v17 = vpop.f32.mrb[97].mxu1 }
 0x21e   :  { %12969 = vst [vmem:[#allocation108_spill] sm:$0xff] %v9231_v32  ;;  %12971 = vst [vmem:[#allocation188_spill] sm:$0xff] %v9236_v63  ;;  %v9238_v60 = vpop.f32.mrb[99].mxu0  ;;  %v12972_v12 = vld [vmem:[#allocation47_spill] sm:$0xff]  ;;  %v4635_v62 = vrot.slane %v1254_v52, 6  ;;  %v4771_v18 = vrot.slane %v1254_v52, 7  ;;  %v9246_v14 = vadd.f32 %v12975_v39, %v1982_v55 }
 0x21f   :  { %v9241_v33 = vadd.f32 %v12972_v12, %v1981_v2  ;;  %v4636_v22 = vrot.slane %v1260_v17, 6  ;;  %v4772_v61 = vrot.slane %v1260_v17, 7  ;;  %v2264_v23 = vpop.permute.xlu1 %2263  ;;  %v9243_v51 = vpop.permute.xlu0 %2297  ;;  %v9249_v3 = vsel %vm384_vm0, %v4387_v0, %v4388_v20  ;;  %v12981_v17 = vld [vmem:[#allocation113_spill] sm:$0xff]  ;;  %v12984_v63 = vld [vmem:[#allocation38_spill] sm:$0xff] }
 0x220   :  { %12974 = vst [vmem:[#allocation189_spill] sm:$0xff] %v9243_v51  ;;  %v2350_v32 = vadd.f32 %v2264_v23, %v2133_v26  ;;  %12976 = vst [vmem:[#allocation48_spill] sm:$0xff] %v9246_v14  ;;  %v9251_v21 = vpop.f32.mrb[98].mxu1  ;;  %v9255_v2 = vpop.f32.mrb[100].mxu0  ;;  %v9263_v26 = vsel %vm2405_vm13, %v4251_v5, %v4252_v58 }
 0x221   :  { %12973 = vst [vmem:[#allocation47_spill] sm:$0xff] %v9241_v33  ;;  %12977 = vst [vmem:[#allocation190_spill] sm:$0xff] %v9249_v3  ;;  %3725 = vrot.lane.b32.xlu1 %v8528_v31, %s6757_s10  ;;  %2652 = vrot.lane.b32.xlu0 %v8531_v53, %s6757_s10  ;;  %v9260_v52 = vsel %vm2927_vm12, %v4771_v18, %v4772_v61  ;;  %v9266_v55 = vsel %vm2790_vm14, %v4635_v62, %v4636_v22  ;;  %v12493_v39 = vrot.slane %v9251_v21, 4  ;;  %v9270_v0 = vpop.f32.mrb[99].mxu1  ;;  %v1517_v31 = vpop.f32.mrb[101].mxu0  ;;  %v13030_v3 = vld [vmem:[#allocation9_spill] sm:$0xff] }
 0x222   :  { %12978 = vst [vmem:[#allocation191_spill] sm:$0xff] %v9255_v2  ;;  %12979 = vst [vmem:[#allocation192_spill] sm:$0xff] %v9260_v52  ;;  %v4390_v34 = vrot.slane %v9251_v21, 5  ;;  %v9273_v12 = vadd.f32 %v12981_v17, %v2350_v32  ;;  %v4774_v18 = vrot.slane %v9270_v0, 7  ;;  %v5043_v32 = vrot.slane %v9255_v2, 1 }
 0x223   :  { %12980 = vst [vmem:[#allocation193_spill] sm:$0xff] %v9266_v55  ;;  %v9277_v23 = vpop.permute.xlu1 %2299  ;;  %v1880_v5 = vpop.permute.xlu0 %1879  ;;  %v9286_v14 = vsel %vm2405_vm13, %v4252_v58, %v12493_v39  ;;  %v12993_v39 = vrot.slane %v9038_v45, 5  ;;  %v13259_v45 = vld [vmem:[#allocation100_spill] sm:$0xff] }
 0x224   :  { %12982 = vst [vmem:[#allocation113_spill] sm:$0xff] %v9273_v12  ;;  %12983 = vst [vmem:[#allocation194_spill] sm:$0xff] %v9277_v23  ;;  %v1965_v62 = vadd.f32 %v1880_v5, %v12984_v63  ;;  %v9281_v55 = vsel %vm384_vm0, %v4388_v20, %v4390_v34  ;;  %v9289_v17 = vpop.f32.mrb[100].mxu1  ;;  %v9293_v53 = vpop.f32.mrb[102].mxu0  ;;  %v12988_v23 = vld [vmem:[#allocation114_spill] sm:$0xff]  ;;  %v9298_v63 = vsel %vm2927_vm12, %v4772_v61, %v4774_v18  ;;  %v12990_v20 = vrot.slane %v9270_v0, 6 }
 0x225   :  { %12985 = vst [vmem:[#allocation38_spill] sm:$0xff] %v9281_v55  ;;  %12986 = vst [vmem:[#allocation195_spill] sm:$0xff] %v9286_v14  ;;  %4109 = vrot.lane.b32.xlu1 %v8543_v13, %s6757_s10  ;;  %4107 = vrot.lane.b32.xlu0 %v12988_v23, %s6757_s10  ;;  %v12992_v5 = vrot.slane %v8935_v40, 5  ;;  %v5291_v13 = vrot.slane %v1517_v31, 2  ;;  %v4392_v51 = vrot.slane %v9289_v17, 5  ;;  %v5044_v23 = vrot.slane %v9293_v53, 1 }
 0x226   :  { %12987 = vst [vmem:[#allocation196_spill] sm:$0xff] %v9293_v53  ;;  %12989 = vst [vmem:[#allocation114_spill] sm:$0xff] %v9298_v63  ;;  %v9303_v58 = vsel %vm2790_vm14, %v4636_v22, %v12990_v20  ;;  %v9314_v33 = vpop.f32.mrb[101].mxu1  ;;  %v9316_v61 = vpop.f32.mrb[103].mxu0  ;;  %v2134_v63 = vadd.f32 %v12995_v44, %v1965_v62  ;;  %v5435_v22 = vrot.slane %v1517_v31, 3  ;;  %v13000_v31 = vld [vmem:[#allocation124_spill] sm:$0xff] }
 0x227   :  { %12991 = vst [vmem:[#allocation197_spill] sm:$0xff] %v9303_v58  ;;  %v9310_v2 = vsel %vm384_vm0, %v12993_v39, %v12992_v5  ;;  %v4776_v20 = vrot.slane %v9314_v33, 7  ;;  %v12499_v58 = vrot.slane %v9316_v61, 2  ;;  %v5436_v40 = vrot.slane %v9316_v61, 3  ;;  %v1882_v39 = vpop.permute.xlu1 %1881  ;;  %v2266_v5 = vpop.permute.xlu0 %2265  ;;  %v13057_v14 = vld [vmem:[#allocation16_spill] sm:$0xff] }
 0x228   :  { %12994 = vst [vmem:[#allocation198_spill] sm:$0xff] %v9310_v2  ;;  %v12996_v2 = vld [vmem:[#allocation42_spill] sm:$0xff]  ;;  %v2351_v52 = vadd.f32 %v2266_v5, %v2134_v63  ;;  %v9324_v53 = vsel %vm1770_vm2, %v5043_v32, %v5044_v23  ;;  %v9327_v36 = vsel %vm384_vm0, %v4390_v34, %v4392_v51  ;;  %v1276_v12 = vpop.f32.mrb[102].mxu1  ;;  %v9331_v44 = vpop.f32.mrb[104].mxu0  ;;  %v5099_v5 = vrot.slane %v9225_v35, 1 }
 0x229   :  { %v1966_v55 = vadd.f32 %v1882_v39, %v12996_v2  ;;  %12997 = vst [vmem:[#allocation49_spill] sm:$0xff] %v9324_v53  ;;  %12998 = vst [vmem:[#allocation42_spill] sm:$0xff] %v9327_v36  ;;  %2654 = vrot.lane.b32.xlu1 %v8587_v27, %s6757_s10  ;;  %3727 = vrot.lane.b32.xlu0 %v13000_v31, %s6757_s10  ;;  %v9336_v62 = vsel %vm2156_vm10, %v5435_v22, %v5436_v40  ;;  %v5046_v34 = vrot.slane %v9331_v44, 1  ;;  %v9347_v32 = vpop.f32.mrb[103].mxu1  ;;  %v9349_v27 = vpop.f32.mrb[105].mxu0  ;;  %v13004_v63 = vld [vmem:[#allocation50_spill] sm:$0xff] }
 0x22a   :  { %12999 = vst [vmem:[#allocation199_spill] sm:$0xff] %v9331_v44  ;;  %13001 = vst [vmem:[#allocation124_spill] sm:$0xff] %v9336_v62  ;;  %v9339_v2 = vsel %vm2927_vm12, %v4774_v18, %v4776_v20  ;;  %v9344_v51 = vsel %vm2019_vm11, %v5291_v13, %v12499_v58  ;;  %v5483_v22 = vrot.slane %v9238_v60, 3  ;;  %v5438_v18 = vrot.slane %v9349_v27, 3  ;;  %v13005_v36 = vld [vmem:[#allocation45_spill] sm:$0xff]  ;;  %v13006_v58 = vld [vmem:[#allocation118_spill] sm:$0xff] }
 0x22b   :  { %13002 = vst [vmem:[#allocation200_spill] sm:$0xff] %v9339_v2  ;;  %13003 = vst [vmem:[#allocation201_spill] sm:$0xff] %v9344_v51  ;;  %v2135_v39 = vadd.f32 %v13004_v63, %v1966_v55  ;;  %v2268_v20 = vpop.permute.xlu1 %2267  ;;  %v1916_v31 = vpop.permute.xlu0 %1915  ;;  %v9357_v51 = vadd.f32 %v13006_v58, %v2351_v52  ;;  %v9360_v44 = vsel %vm1770_vm2, %v5044_v23, %v5046_v34  ;;  %v4256_v62 = vrot.slane %v9289_v17, 4  ;;  %v13009_v35 = vld [vmem:[#allocation126_spill] sm:$0xff]  ;;  %v13010_v53 = vld [vmem:[#allocation5_spill] sm:$0xff] }
 0x22c   :  { %v1983_v13 = vadd.f32 %v1916_v31, %v13005_v36  ;;  %13008 = vst [vmem:[#allocation45_spill] sm:$0xff] %v9360_v44  ;;  %v9363_v55 = vpop.f32.mrb[104].mxu1  ;;  %v9367_v63 = vpop.f32.mrb[106].mxu0  ;;  %v9372_v36 = vsel %vm1770_vm2, %v5046_v34, %v5099_v5  ;;  %v9375_v52 = vsel %vm2156_vm10, %v5436_v40, %v5438_v18  ;;  %v9378_v58 = vsel %vm2156_vm10, %v5438_v18, %v5483_v22 }
 0x22d   :  { %v2352_v2 = vadd.f32 %v2268_v20, %v2135_v39  ;;  %13007 = vst [vmem:[#allocation50_spill] sm:$0xff] %v9357_v51  ;;  %4111 = vrot.lane.b32.xlu1 %v13009_v35, %s6757_s10  ;;  %2656 = vrot.lane.b32.xlu0 %v13010_v53, %s6757_s10  ;;  %13011 = vst [vmem:[#allocation118_spill] sm:$0xff] %v9372_v36  ;;  %v4394_v17 = vrot.slane %v1276_v12, 5  ;;  %v4395_v39 = vrot.slane %v9363_v55, 5  ;;  %v9382_v20 = vpop.f32.mrb[105].mxu1  ;;  %v9384_v31 = vpop.f32.mrb[107].mxu0 }
 0x22e   :  { %13012 = vst [vmem:[#allocation126_spill] sm:$0xff] %v9375_v52  ;;  %13013 = vst [vmem:[#allocation5_spill] sm:$0xff] %v9378_v58  ;;  %v13014_v35 = vld [vmem:[#allocation55_spill] sm:$0xff]  ;;  %v4640_v34 = vrot.slane %v9314_v33, 6  ;;  %v4258_v5 = vrot.slane %v1276_v12, 4  ;;  %v4778_v40 = vrot.slane %v9347_v32, 7 }
 0x22f   :  { %v2152_v53 = vadd.f32 %v13014_v35, %v1983_v13  ;;  %v4779_v51 = vrot.slane %v9382_v20, 7  ;;  %v1918_v22 = vpop.permute.xlu1 %1917  ;;  %v2302_v18 = vpop.permute.xlu0 %2301  ;;  %v13015_v58 = vld [vmem:[#allocation51_spill] sm:$0xff]  ;;  %v9395_v43 = vsel %vm384_vm0, %v4394_v17, %v4395_v39  ;;  %v13019_v33 = vld [vmem:[#allocation133_spill] sm:$0xff]  ;;  %v13024_v17 = vrot.slane %v9363_v55, 4 }
 0x230   :  { %v1984_v52 = vadd.f32 %v1918_v22, %v13015_v58  ;;  %v13016_v36 = vld [vmem:[#allocation119_spill] sm:$0xff]  ;;  %13018 = vst [vmem:[#allocation51_spill] sm:$0xff] %v9395_v43  ;;  %v9398_v35 = vpop.f32.mrb[106].mxu1  ;;  %v9402_v12 = vpop.f32.mrb[108].mxu0 }
 0x231   :  { %v2369_v23 = vadd.f32 %v2302_v18, %v2152_v53  ;;  %v9392_v44 = vadd.f32 %v13016_v36, %v2352_v2  ;;  %3731 = vrot.lane.b32.xlu1 %v13019_v33, %s6757_s10  ;;  %13020 = vst [vmem:[#allocation119_spill] sm:$0xff] %v9402_v12  ;;  %2660 = vrot.lane.b32.xlu0 %v8645_v49, %s6757_s10  ;;  %v13022_v2 = vrot.slane %v9251_v21, 4  ;;  %v4397_v22 = vrot.slane %v9398_v35, 5  ;;  %v9420_v18 = vpop.f32.mrb[107].mxu1  ;;  %v9422_v33 = vpop.f32.mrb[109].mxu0  ;;  %v13026_v49 = vld [vmem:[#allocation61_spill] sm:$0xff] }
 0x232   :  { %v9407_v58 = vsel %vm2927_vm12, %v4778_v40, %v4779_v51  ;;  %v9417_v53 = vsel %vm2405_vm13, %v4258_v5, %v13024_v17  ;;  %v2153_v13 = vadd.f32 %v13026_v49, %v1984_v52  ;;  %v4642_v40 = vrot.slane %v9347_v32, 6  ;;  %v13032_v32 = vld [vmem:[#allocation136_spill] sm:$0xff] }
 0x233   :  { %13017 = vst [vmem:[#allocation55_spill] sm:$0xff] %v9392_v44  ;;  %13021 = vst [vmem:[#allocation133_spill] sm:$0xff] %v9407_v58  ;;  %v9412_v36 = vsel %vm2405_vm13, %v13022_v2, %v4256_v62  ;;  %v4781_v21 = vrot.slane %v9420_v18, 7  ;;  %v2304_v44 = vpop.permute.xlu1 %2303  ;;  %v1884_v62 = vpop.permute.xlu0 %1883  ;;  %v13027_v58 = vld [vmem:[#allocation46_spill] sm:$0xff]  ;;  %v9429_v5 = vsel %vm384_vm0, %v4395_v39, %v4397_v22  ;;  %v9432_v17 = vadd.f32 %v9137_v28, %v2369_v23 }
 0x234   :  { %13023 = vst [vmem:[#allocation202_spill] sm:$0xff] %v9412_v36  ;;  %13025 = vst [vmem:[#allocation203_spill] sm:$0xff] %v9417_v53  ;;  %v2370_v2 = vadd.f32 %v2304_v44, %v2153_v13  ;;  %v1967_v43 = vadd.f32 %v1884_v62, %v13027_v58  ;;  %v9434_v53 = vpop.f32.mrb[108].mxu1  ;;  %v9438_v52 = vpop.f32.mrb[110].mxu0  ;;  %v13034_v13 = vrot.slane %v9270_v0, 6  ;;  %v13036_v28 = vrot.slane %v9382_v20, 6 }
 0x235   :  { %13028 = vst [vmem:[#allocation61_spill] sm:$0xff] %v9429_v5  ;;  %13029 = vst [vmem:[#allocation46_spill] sm:$0xff] %v9432_v17  ;;  %2658 = vrot.lane.b32.xlu1 %v13030_v3, %s6757_s10  ;;  %4115 = vrot.lane.b32.xlu0 %v13032_v32, %s6757_s10  ;;  %v9443_v44 = vsel %vm2927_vm12, %v4779_v51, %v4781_v21  ;;  %v5048_v3 = vrot.slane %v9402_v12, 1  ;;  %v4399_v58 = vrot.slane %v9434_v53, 5  ;;  %v5049_v49 = vrot.slane %v9438_v52, 1  ;;  %v9458_v62 = vpop.f32.mrb[109].mxu1 }
 0x236   :  { %13031 = vst [vmem:[#allocation9_spill] sm:$0xff] %v9438_v52  ;;  %13033 = vst [vmem:[#allocation136_spill] sm:$0xff] %v9443_v44  ;;  %v9448_v39 = vsel %vm2790_vm14, %v13034_v13, %v4640_v34  ;;  %v9453_v23 = vsel %vm2790_vm14, %v4642_v40, %v13036_v28  ;;  %v9460_v51 = vpop.f32.mrb[111].mxu0  ;;  %v13039_v32 = vld [vmem:[#allocation56_spill] sm:$0xff]  ;;  %v5440_v34 = vrot.slane %v9422_v33, 3  ;;  %v4783_v13 = vrot.slane %v9458_v62, 7 }
 0x237   :  { %13035 = vst [vmem:[#allocation204_spill] sm:$0xff] %v9448_v39  ;;  %13037 = vst [vmem:[#allocation205_spill] sm:$0xff] %v9453_v23  ;;  %v2136_v0 = vadd.f32 %v13039_v32, %v1967_v43  ;;  %v5441_v17 = vrot.slane %v9460_v51, 3  ;;  %v1886_v40 = vpop.permute.xlu1 %1885  ;;  %v2270_v28 = vpop.permute.xlu0 %2269  ;;  %v13040_v23 = vld [vmem:[#allocation52_spill] sm:$0xff]  ;;  %v9468_v44 = vsel %vm384_vm0, %v4397_v22, %v4399_v58  ;;  %v9471_v52 = vsel %vm1770_vm2, %v5048_v3, %v5049_v49  ;;  %v13043_v43 = vld [vmem:[#allocation65_spill] sm:$0xff] }
 0x238   :  { %13038 = vst [vmem:[#allocation206_spill] sm:$0xff] %v9460_v51  ;;  %v1968_v12 = vadd.f32 %v1886_v40, %v13040_v23  ;;  %13041 = vst [vmem:[#allocation56_spill] sm:$0xff] %v9468_v44  ;;  %v9473_v5 = vpop.f32.mrb[110].mxu1  ;;  %v9477_v32 = vpop.f32.mrb[112].mxu0  ;;  %v13045_v36 = vld [vmem:[#allocation140_spill] sm:$0xff]  ;;  %v9482_v9 = vsel %vm2927_vm12, %v4781_v21, %v4783_v13  ;;  %v9488_v22 = vadd.f32 %v9185_v4, %v2370_v2  ;;  %v5101_v3 = vrot.slane %v9367_v63, 1 }
 0x239   :  { %v2353_v39 = vadd.f32 %v2270_v28, %v2136_v0  ;;  %13042 = vst [vmem:[#allocation52_spill] sm:$0xff] %v9471_v52  ;;  %4117 = vrot.lane.b32.xlu1 %v13043_v43, %s6757_s10  ;;  %13044 = vst [vmem:[#allocation65_spill] sm:$0xff] %v9477_v32  ;;  %3733 = vrot.lane.b32.xlu0 %v13045_v36, %s6757_s10  ;;  %v9485_v23 = vsel %vm2156_vm10, %v5440_v34, %v5441_v17  ;;  %v5051_v58 = vrot.slane %v9477_v32, 1  ;;  %v9492_v0 = vpop.f32.mrb[111].mxu1  ;;  %v9494_v40 = vpop.f32.mrb[113].mxu0  ;;  %v13050_v28 = vld [vmem:[#allocation62_spill] sm:$0xff] }
 0x23a   :  { %13046 = vst [vmem:[#allocation140_spill] sm:$0xff] %v9482_v9  ;;  %13047 = vst [vmem:[#allocation207_spill] sm:$0xff] %v9485_v23  ;;  %v2137_v43 = vadd.f32 %v13050_v28, %v1968_v12  ;;  %v5485_v36 = vrot.slane %v9384_v31, 3  ;;  %v4263_v21 = vrot.slane %v9434_v53, 4  ;;  %v5443_v34 = vrot.slane %v9494_v40, 3  ;;  %v13051_v4 = vld [vmem:[#allocation58_spill] sm:$0xff] }
 0x23b   :  { %13048 = vst [vmem:[#allocation208_spill] sm:$0xff] %v9488_v22  ;;  %13049 = vst [vmem:[#allocation209_spill] sm:$0xff] %v9494_v40  ;;  %v1922_v13 = vpop.permute.xlu1 %1921  ;;  %v1920_v23 = vpop.permute.xlu0 %1919  ;;  %v13052_v22 = vld [vmem:[#allocation53_spill] sm:$0xff]  ;;  %v9506_v9 = vsel %vm1770_vm2, %v5051_v58, %v5101_v3  ;;  %v4647_v12 = vrot.slane %v9458_v62, 6  ;;  %v13056_v53 = vld [vmem:[#allocation12_spill] sm:$0xff]  ;;  %v4401_v62 = vrot.slane %v9473_v5, 5 }
 0x23c   :  { %v1986_v2 = vadd.f32 %v1922_v13, %v13051_v4  ;;  %v1985_v63 = vadd.f32 %v1920_v23, %v13052_v22  ;;  %v13053_v52 = vld [vmem:[#allocation129_spill] sm:$0xff]  ;;  %13055 = vst [vmem:[#allocation58_spill] sm:$0xff] %v9506_v9  ;;  %v9509_v28 = vpop.f32.mrb[112].mxu1  ;;  %v9513_v44 = vpop.f32.mrb[114].mxu0  ;;  %v9518_v23 = vsel %vm2156_vm10, %v5443_v34, %v5485_v36  ;;  %v13062_v4 = vld [vmem:[#allocation66_spill] sm:$0xff]  ;;  %v13069_v36 = vld [vmem:[#allocation144_spill] sm:$0xff] }
 0x23d   :  { %v9503_v32 = vadd.f32 %v13053_v52, %v2353_v39  ;;  %3735 = vrot.lane.b32.xlu1 %v13056_v53, %s6757_s10  ;;  %2662 = vrot.lane.b32.xlu0 %v13057_v14, %s6757_s10  ;;  %13058 = vst [vmem:[#allocation53_spill] sm:$0xff] %v9518_v23  ;;  %v9521_v52 = vsel %vm1770_vm2, %v5049_v49, %v5051_v58  ;;  %v4402_v22 = vrot.slane %v9509_v28, 5  ;;  %v9528_v3 = vpop.f32.mrb[113].mxu1  ;;  %v9530_v13 = vpop.f32.mrb[115].mxu0  ;;  %v4261_v14 = vrot.slane %v9398_v35, 4  ;;  %v13076_v35 = vld [vmem:[#allocation134_spill] sm:$0xff] }
 0x23e   :  { %13059 = vst [vmem:[#allocation129_spill] sm:$0xff] %v9521_v52  ;;  %v9524_v39 = vsel %vm2156_vm10, %v5441_v17, %v5443_v34  ;;  %13061 = vst [vmem:[#allocation16_spill] sm:$0xff] %v9530_v13  ;;  %v9533_v53 = vadd.f32 %v13062_v4, %v1985_v63  ;;  %v4785_v49 = vrot.slane %v9492_v0, 7  ;;  %v4786_v17 = vrot.slane %v9528_v3, 7  ;;  %v13065_v52 = vld [vmem:[#allocation67_spill] sm:$0xff] }
 0x23f   :  { %13054 = vst [vmem:[#allocation62_spill] sm:$0xff] %v9503_v32  ;;  %13060 = vst [vmem:[#allocation12_spill] sm:$0xff] %v9524_v39  ;;  %v2272_v58 = vpop.permute.xlu1 %2271  ;;  %v9539_v34 = vpop.permute.xlu0 %2305  ;;  %v5294_v32 = vrot.slane %v9349_v27, 2  ;;  %v9543_v23 = vadd.f32 %v13065_v52, %v1986_v2  ;;  %v9546_v63 = vsel %vm384_vm0, %v4401_v62, %v4402_v22  ;;  %v13074_v2 = vrot.slane %v9420_v18, 6 }
 0x240   :  { %13063 = vst [vmem:[#allocation66_spill] sm:$0xff] %v9533_v53  ;;  %13064 = vst [vmem:[#allocation210_spill] sm:$0xff] %v9539_v34  ;;  %v2354_v39 = vadd.f32 %v2272_v58, %v2137_v43  ;;  %v9549_v4 = vpop.f32.mrb[114].mxu1  ;;  %v9553_v53 = vpop.f32.mrb[116].mxu0  ;;  %v13071_v34 = vld [vmem:[#allocation13_spill] sm:$0xff]  ;;  %v9558_v27 = vsel %vm2927_vm12, %v4785_v49, %v4786_v17  ;;  %v9561_v43 = vsel %vm2405_vm13, %v4261_v14, %v4263_v21  ;;  %v5363_v49 = vrot.slane %v9238_v60, 2 }
 0x241   :  { %13066 = vst [vmem:[#allocation67_spill] sm:$0xff] %v9543_v23  ;;  %13067 = vst [vmem:[#allocation211_spill] sm:$0xff] %v9546_v63  ;;  %4119 = vrot.lane.b32.xlu1 %v13069_v36, %s6757_s10  ;;  %3739 = vrot.lane.b32.xlu0 %v13071_v34, %s6757_s10  ;;  %v9566_v52 = vsel %vm2790_vm14, %v13074_v2, %v4647_v12  ;;  %v4404_v62 = vrot.slane %v9549_v4, 5  ;;  %v9569_v58 = vpop.f32.mrb[115].mxu1  ;;  %v9571_v36 = vpop.f32.mrb[117].mxu0  ;;  %v5296_v34 = vrot.slane %v9422_v33, 2 }
 0x242   :  { %13068 = vst [vmem:[#allocation212_spill] sm:$0xff] %v9549_v4  ;;  %13070 = vst [vmem:[#allocation144_spill] sm:$0xff] %v9553_v53  ;;  %v9574_v23 = vadd.f32 %v13076_v35, %v2354_v39  ;;  %v4788_v21 = vrot.slane %v9569_v58, 7  ;;  %v13079_v12 = vld [vmem:[#allocation54_spill] sm:$0xff]  ;;  %v13081_v9 = vrot.slane %v9316_v61, 2  ;;  %v13083_v60 = vld [vmem:[#allocation7_spill] sm:$0xff] }
 0x243   :  { %13072 = vst [vmem:[#allocation13_spill] sm:$0xff] %v9558_v27  ;;  %13073 = vst [vmem:[#allocation213_spill] sm:$0xff] %v9561_v43  ;;  %v9579_v27 = vpop.permute.xlu1 %2307  ;;  %v1888_v63 = vpop.permute.xlu0 %1887  ;;  %v13087_v61 = vrot.slane %v9460_v51, 2  ;;  %v5053_v35 = vrot.slane %v9553_v53, 1 }
 0x244   :  { %13075 = vst [vmem:[#allocation214_spill] sm:$0xff] %v9566_v52  ;;  %13077 = vst [vmem:[#allocation134_spill] sm:$0xff] %v9574_v23  ;;  %v1969_v2 = vadd.f32 %v1888_v63, %v13079_v12  ;;  %v9583_v52 = vsel %vm384_vm0, %v4402_v22, %v4404_v62  ;;  %v9588_v43 = vsel %vm2019_vm11, %v13081_v9, %v5294_v32  ;;  %v9590_v39 = vpop.f32.mrb[116].mxu1  ;;  %v9594_v33 = vpop.f32.mrb[118].mxu0 }
 0x245   :  { %13078 = vst [vmem:[#allocation215_spill] sm:$0xff] %v9579_v27  ;;  %13080 = vst [vmem:[#allocation54_spill] sm:$0xff] %v9583_v52  ;;  %2664 = vrot.lane.b32.xlu1 %v13083_v60, %s6757_s10  ;;  %2668 = vrot.lane.b32.xlu0 %v8787_v1, %s6757_s10  ;;  %v9599_v63 = vsel %vm2927_vm12, %v4786_v17, %v4788_v21  ;;  %v9602_v22 = vsel %vm2019_vm11, %v5294_v32, %v5363_v49  ;;  %v4406_v12 = vrot.slane %v9590_v39, 5  ;;  %v9612_v23 = vpop.f32.mrb[117].mxu1  ;;  %v9614_v1 = vpop.f32.mrb[119].mxu0  ;;  %v13089_v17 = vld [vmem:[#allocation70_spill] sm:$0xff] }
 0x246   :  { %13082 = vst [vmem:[#allocation216_spill] sm:$0xff] %v9588_v43  ;;  %13084 = vst [vmem:[#allocation7_spill] sm:$0xff] %v9594_v33  ;;  %v9607_v9 = vsel %vm2019_vm11, %v5296_v34, %v13087_v61  ;;  %v5054_v60 = vrot.slane %v9594_v33, 1  ;;  %v2138_v43 = vadd.f32 %v13089_v17, %v1969_v2  ;;  %v5445_v32 = vrot.slane %v9571_v36, 3  ;;  %v13094_v17 = vld [vmem:[#allocation152_spill] sm:$0xff] }
 0x247   :  { %13085 = vst [vmem:[#allocation217_spill] sm:$0xff] %v9599_v63  ;;  %13086 = vst [vmem:[#allocation218_spill] sm:$0xff] %v9602_v22  ;;  %v4790_v49 = vrot.slane %v9612_v23, 7  ;;  %v5446_v22 = vrot.slane %v9614_v1, 3  ;;  %v1890_v34 = vpop.permute.xlu1 %1889  ;;  %v2274_v61 = vpop.permute.xlu0 %2273  ;;  %v9622_v63 = vsel %vm384_vm0, %v4404_v62, %v4406_v12  ;;  %v13097_v62 = vrot.slane %v9363_v55, 4 }
 0x248   :  { %13088 = vst [vmem:[#allocation219_spill] sm:$0xff] %v9607_v9  ;;  %v13090_v9 = vld [vmem:[#allocation59_spill] sm:$0xff]  ;;  %v2355_v27 = vadd.f32 %v2274_v61, %v2138_v43  ;;  %13091 = vst [vmem:[#allocation70_spill] sm:$0xff] %v9622_v63  ;;  %v9625_v33 = vsel %vm1770_vm2, %v5053_v35, %v5054_v60  ;;  %v9627_v52 = vpop.f32.mrb[118].mxu1  ;;  %v9631_v2 = vpop.f32.mrb[120].mxu0 }
 0x249   :  { %v1970_v53 = vadd.f32 %v1890_v34, %v13090_v9  ;;  %13092 = vst [vmem:[#allocation59_spill] sm:$0xff] %v9625_v33  ;;  %2666 = vrot.lane.b32.xlu1 %v8790_v50, %s6757_s10  ;;  %13093 = vst [vmem:[#allocation220_spill] sm:$0xff] %v9631_v2  ;;  %4123 = vrot.lane.b32.xlu0 %v13094_v17, %s6757_s10  ;;  %v9636_v51 = vsel %vm2927_vm12, %v4788_v21, %v4790_v49  ;;  %v5056_v35 = vrot.slane %v9631_v2, 1  ;;  %v9647_v12 = vpop.f32.mrb[119].mxu1  ;;  %v9649_v50 = vpop.f32.mrb[121].mxu0  ;;  %v13100_v34 = vld [vmem:[#allocation71_spill] sm:$0xff] }
 0x24a   :  { %13095 = vst [vmem:[#allocation152_spill] sm:$0xff] %v9636_v51  ;;  %v9639_v43 = vsel %vm2156_vm10, %v5445_v32, %v5446_v22  ;;  %v9644_v9 = vsel %vm2405_vm13, %v13097_v62, %v4261_v14  ;;  %13099 = vst [vmem:[#allocation223_spill] sm:$0xff] %v9647_v12  ;;  %v5103_v17 = vrot.slane %v9513_v44, 1  ;;  %v5487_v21 = vrot.slane %v9530_v13, 3  ;;  %v13101_v33 = vld [vmem:[#allocation63_spill] sm:$0xff]  ;;  %v13102_v62 = vld [vmem:[#allocation145_spill] sm:$0xff] }
 0x24b   :  { %13096 = vst [vmem:[#allocation221_spill] sm:$0xff] %v9639_v43  ;;  %13098 = vst [vmem:[#allocation222_spill] sm:$0xff] %v9644_v9  ;;  %v2139_v61 = vadd.f32 %v13100_v34, %v1970_v53  ;;  %v5448_v32 = vrot.slane %v9649_v50, 3  ;;  %v2276_v49 = vpop.permute.xlu1 %2275  ;;  %v1892_v43 = vpop.permute.xlu0 %1891  ;;  %v9657_v51 = vadd.f32 %v13102_v62, %v2355_v27  ;;  %v9660_v2 = vsel %vm1770_vm2, %v5054_v60, %v5056_v35  ;;  %v13111_v63 = vld [vmem:[#allocation11_spill] sm:$0xff] }
 0x24c   :  { %v1971_v14 = vadd.f32 %v1892_v43, %v13101_v33  ;;  %13104 = vst [vmem:[#allocation63_spill] sm:$0xff] %v9660_v2  ;;  %v9663_v53 = vpop.f32.mrb[120].mxu1  ;;  %v9667_v44 = vpop.f32.mrb[122].mxu0  ;;  %v9672_v33 = vsel %vm1770_vm2, %v5056_v35, %v5103_v17  ;;  %v4408_v43 = vrot.slane %v9627_v52, 5  ;;  %v4266_v35 = vrot.slane %v9509_v28, 4  ;;  %v13117_v28 = vld [vmem:[#allocation10_spill] sm:$0xff] }
 0x24d   :  { %v2356_v55 = vadd.f32 %v2276_v49, %v2139_v61  ;;  %13103 = vst [vmem:[#allocation71_spill] sm:$0xff] %v9657_v51  ;;  %3741 = vrot.lane.b32.xlu1 %v8800_v57, %s6757_s10  ;;  %3743 = vrot.lane.b32.xlu0 %v8818_v30, %s6757_s10  ;;  %13105 = vst [vmem:[#allocation145_spill] sm:$0xff] %v9672_v33  ;;  %v9675_v27 = vsel %vm2156_vm10, %v5446_v22, %v5448_v32  ;;  %v4409_v34 = vrot.slane %v9663_v53, 5  ;;  %v9682_v61 = vpop.f32.mrb[121].mxu1  ;;  %v9684_v57 = vpop.f32.mrb[123].mxu0  ;;  %v13110_v49 = vld [vmem:[#allocation73_spill] sm:$0xff] }
 0x24e   :  { %13106 = vst [vmem:[#allocation224_spill] sm:$0xff] %v9675_v27  ;;  %v9678_v60 = vsel %vm2156_vm10, %v5448_v32, %v5487_v21  ;;  %13108 = vst [vmem:[#allocation226_spill] sm:$0xff] %v9682_v61  ;;  %v2140_v62 = vadd.f32 %v13110_v49, %v1971_v14  ;;  %v5365_v30 = vrot.slane %v9384_v31, 2  ;;  %v4792_v22 = vrot.slane %v9647_v12, 7  ;;  %v13113_v33 = vld [vmem:[#allocation141_spill] sm:$0xff] }
 0x24f   :  { %13107 = vst [vmem:[#allocation225_spill] sm:$0xff] %v9678_v60  ;;  %13109 = vst [vmem:[#allocation227_spill] sm:$0xff] %v9684_v57  ;;  %v4793_v17 = vrot.slane %v9682_v61, 7  ;;  %v1898_v21 = vpop.permute.xlu1 %1897  ;;  %v2631_v32 = vpop.permute.xlu0 %2630  ;;  %v13112_v60 = vld [vmem:[#allocation8_spill] sm:$0xff]  ;;  %v9694_v2 = vadd.f32 %v13113_v33, %v2356_v55  ;;  %v9697_v9 = vsel %vm384_vm0, %v4408_v43, %v4409_v34  ;;  %v13120_v55 = vrot.slane %v9420_v18, 6 }
 0x250   :  { %v1974_v51 = vadd.f32 %v1898_v21, %v13111_v63  ;;  %v2726_v27 = vadd.f32 %v2631_v32, %v13112_v60  ;;  %13115 = vst [vmem:[#allocation11_spill] sm:$0xff] %v9697_v9  ;;  %v9700_v14 = vpop.f32.mrb[122].mxu1  ;;  %v9704_v49 = vpop.f32.mrb[124].mxu0  ;;  %v13121_v33 = vrot.slane %v9382_v20, 6  ;;  %v13123_v43 = vrot.slane %v9494_v40, 2  ;;  %v13141_v40 = vld [vmem:[#allocation157_spill] sm:$0xff] }
 0x251   :  { %13114 = vst [vmem:[#allocation73_spill] sm:$0xff] %v9694_v2  ;;  %13116 = vst [vmem:[#allocation8_spill] sm:$0xff] %v9700_v14  ;;  %4125 = vrot.lane.b32.xlu1 %v13117_v28, %s6757_s10  ;;  %2670 = vrot.lane.b32.xlu0 %v8855_v47, %s6757_s10  ;;  %v9709_v63 = vsel %vm2927_vm12, %v4792_v22, %v4793_v17  ;;  %v4411_v32 = vrot.slane %v9700_v14, 5  ;;  %v9724_v28 = vpop.f32.mrb[123].mxu1  ;;  %v9726_v47 = vpop.f32.mrb[125].mxu0  ;;  %v13127_v22 = vld [vmem:[#allocation72_spill] sm:$0xff] }
 0x252   :  { %13118 = vst [vmem:[#allocation141_spill] sm:$0xff] %v9704_v49  ;;  %13119 = vst [vmem:[#allocation10_spill] sm:$0xff] %v9709_v63  ;;  %v9716_v60 = vsel %vm2790_vm14, %v13121_v33, %v13120_v55  ;;  %v9721_v21 = vsel %vm2019_vm11, %v13123_v43, %v5365_v30  ;;  %v2143_v31 = vadd.f32 %v13127_v22, %v1974_v51  ;;  %v4265_v18 = vrot.slane %v9473_v5, 4  ;;  %v13128_v63 = vld [vmem:[#allocation76_spill] sm:$0xff] }
 0x253   :  { %13122 = vst [vmem:[#allocation228_spill] sm:$0xff] %v9716_v60  ;;  %13124 = vst [vmem:[#allocation229_spill] sm:$0xff] %v9721_v21  ;;  %v4795_v20 = vrot.slane %v9724_v28, 7  ;;  %v2284_v2 = vpop.permute.xlu1 %2283  ;;  %v2278_v55 = vpop.permute.xlu0 %2277  ;;  %v2895_v9 = vadd.f32 %v13128_v63, %v2726_v27  ;;  %v9733_v30 = vsel %vm384_vm0, %v4409_v34, %v4411_v32  ;;  %v5058_v34 = vrot.slane %v9704_v49, 1  ;;  %v13140_v49 = vld [vmem:[#allocation155_spill] sm:$0xff] }
 0x254   :  { %13125 = vst [vmem:[#allocation230_spill] sm:$0xff] %v9724_v28  ;;  %13126 = vst [vmem:[#allocation231_spill] sm:$0xff] %v9726_v47  ;;  %v2360_v33 = vadd.f32 %v2284_v2, %v2143_v31  ;;  %v2357_v60 = vadd.f32 %v2278_v55, %v2140_v62  ;;  %v9735_v43 = vpop.f32.mrb[124].mxu1  ;;  %v9739_v21 = vpop.f32.mrb[126].mxu0  ;;  %v9747_v51 = vsel %vm2405_vm13, %v4265_v18, %v4266_v35  ;;  %v13134_v2 = vrot.slane %v9549_v4, 4 }
 0x255   :  { %13129 = vst [vmem:[#allocation72_spill] sm:$0xff] %v9733_v30  ;;  %13130 = vst [vmem:[#allocation76_spill] sm:$0xff] %v9735_v43  ;;  %2672 = vrot.lane.b32.xlu1 %v8896_v7, %s6757_s10  ;;  %4127 = vrot.lane.b32.xlu0 %v8833_v29, %s6757_s10  ;;  %v9744_v5 = vsel %vm2927_vm12, %v4793_v17, %v4795_v20  ;;  %v4413_v7 = vrot.slane %v9735_v43, 5  ;;  %v5059_v62 = vrot.slane %v9739_v21, 1  ;;  %v9757_v31 = vpop.f32.mrb[125].mxu1  ;;  %v9759_v29 = vpop.f32.mrb[127].mxu0 }
 0x256   :  { %13131 = vst [vmem:[#allocation232_spill] sm:$0xff] %v9739_v21  ;;  %13132 = vst [vmem:[#allocation233_spill] sm:$0xff] %v9744_v5  ;;  %v9752_v27 = vsel %vm2405_vm13, %v4266_v35, %v13134_v2  ;;  %v13138_v17 = vld [vmem:[#allocation6_spill] sm:$0xff]  ;;  %v5450_v22 = vrot.slane %v9726_v47, 3  ;;  %v4797_v18 = vrot.slane %v9757_v31, 7  ;;  %v12512_v35 = vrot.slane %v9759_v29, 3 }
 0x257   :  { %13133 = vst [vmem:[#allocation234_spill] sm:$0xff] %v9747_v51  ;;  %13135 = vst [vmem:[#allocation235_spill] sm:$0xff] %v9752_v27  ;;  %v9762_v63 = vadd.f32 %v13138_v17, %v2357_v60  ;;  %v2633_v55 = vpop.permute.xlu1 %2632  ;;  %v3017_v2 = vpop.permute.xlu0 %3016  ;;  %v9769_v21 = vadd.f32 %v13141_v40, %v2360_v33  ;;  %v9772_v4 = vsel %vm1770_vm2, %v5058_v34, %v5059_v62  ;;  %v13145_v60 = vld [vmem:[#allocation27_spill] sm:$0xff]  ;;  %v9796_v33 = vld [vmem:[%s12367_s2] ss:$0 sm:$0xff] }
 0x258   :  { %13136 = vst [vmem:[#allocation236_spill] sm:$0xff] %v9757_v31  ;;  %13137 = vst [vmem:[#allocation237_spill] sm:$0xff] %v9759_v29  ;;  %v2727_v5 = vadd.f32 %v2633_v55, %v13140_v49  ;;  %v3112_v30 = vadd.f32 %v3017_v2, %v2895_v9  ;;  %v9774_v27 = vpop.f32.mrb[126].mxu1  ;;  %v9778_v17 = vpop.f32.mrb[128].mxu0  ;;  %v9785_v9 = vsel %vm2156_vm10, %v5450_v22, %v12512_v35  ;;  %v13152_v35 = vld [vmem:[#allocation80_spill] sm:$0xff] }
 0x259   :  { %13139 = vst [vmem:[#allocation6_spill] sm:$0xff] %v9762_v63  ;;  %13142 = vst [vmem:[#allocation155_spill] sm:$0xff] %v9769_v21  ;;  %3747 = vrot.lane.b32.xlu1 %v13145_v60, %s6757_s10  ;;  %3749 = vrot.lane.b32.xlu0 %v8927_v38, %s6757_s10  ;;  %v9788_v40 = vsel %vm384_vm0, %v4411_v32, %v4413_v7  ;;  %v9791_v49 = vsel %vm2927_vm12, %v4795_v20, %v4797_v18  ;;  %v5061_v38 = vrot.slane %v9778_v17, 1  ;;  %v9802_v55 = vpop.f32.mrb[127].mxu1  ;;  %v9804_v22 = vpop.f32.mrb[129].mxu0 }
 0x25a   :  { %13143 = vst [vmem:[#allocation157_spill] sm:$0xff] %v9772_v4  ;;  %13144 = vst [vmem:[#allocation238_spill] sm:$0xff] %v9774_v27  ;;  %v9799_v34 = vadd.f32 %v9796_v33, %v3112_v30  ;;  %v5105_v32 = vrot.slane %v9667_v44, 1  ;;  %v5489_v7 = vrot.slane %v9684_v57, 3  ;;  %v5453_v20 = vrot.slane %v9804_v22, 3  ;;  %v13153_v30 = vld [vmem:[#allocation18_spill] sm:$0xff] }
 0x25b   :  { %13146 = vst [vmem:[#allocation27_spill] sm:$0xff] %v9778_v17  ;;  %13147 = vst [vmem:[#allocation239_spill] sm:$0xff] %v9785_v9  ;;  %v3019_v18 = vpop.permute.xlu1 %3018  ;;  %v2635_v2 = vpop.permute.xlu0 %2634  ;;  %v2896_v21 = vadd.f32 %v13152_v35, %v2727_v5 }
 0x25c   :  { %13148 = vst [vmem:[#allocation240_spill] sm:$0xff] %v9788_v40  ;;  %13149 = vst [vmem:[#allocation241_spill] sm:$0xff] %v9791_v49  ;;  %v3214_v60 = vmul.f32 1.442695, %v9799_v34  ;;  %v2728_v63 = vadd.f32 %v2635_v2, %v13153_v30  ;;  %v9812_v49 = vpop.f32.mrb[128].mxu1  ;;  %v9821_v44 = vsel %vm2156_vm10, %v5453_v20, %v5489_v7  ;;  %v9824_v40 = vsel %vm1770_vm2, %v5059_v62, %v5061_v38 }
 0x25d   :  { %13150 = vst [vmem:[#allocation242_spill] sm:$0xff] %v9802_v55  ;;  %13151 = vst [vmem:[#allocation243_spill] sm:$0xff] %v9804_v22  ;;  %2674 = vrot.lane.b32.xlu1 %v8932_v59, %s6757_s10  ;;  %v9816_v17 = vpop.f32.mrb[130].mxu0  ;;  %4133 = vrot.lane.b32.xlu0 %v8942_v19, %s6757_s10  ;;  %v9827_v5 = vsel %vm1770_vm2, %v5061_v38, %v5105_v32  ;;  %v3113_v35 = vadd.f32 %v3019_v18, %v2896_v21  ;;  %v4416_v2 = vrot.slane %v9812_v49, 5  ;;  %v9830_v30 = vpop.f32.mrb[129].mxu1 }
 0x25e   :  { %13154 = vst [vmem:[#allocation80_spill] sm:$0xff] %v9812_v49  ;;  %13155 = vst [vmem:[#allocation18_spill] sm:$0xff] %v9821_v44  ;;  %6616 = vpow2.f32 %v3214_v60  ;;  %v9832_v59 = vpop.f32.mrb[131].mxu0  ;;  %v4415_v19 = vrot.slane %v9774_v27, 5  ;;  %v4799_v7 = vrot.slane %v9802_v55, 7  ;;  %v4800_v62 = vrot.slane %v9830_v30, 7 }
 0x25f   :  { %13156 = vst [vmem:[#allocation244_spill] sm:$0xff] %v9824_v40  ;;  %13157 = vst [vmem:[#allocation245_spill] sm:$0xff] %v9827_v5  ;;  %v9838_v40 = vpop.permute.xlu1 %2636  ;;  %v3708_v38 = vpop.permute.xlu0 %3707  ;;  %v9843_v5 = vadd.f32 %v9796_v33, %v3113_v35  ;;  %v13164_v44 = vld [vmem:[#allocation68_spill] sm:$0xff]  ;;  %v13169_v60 = vld [vmem:[#allocation85_spill] sm:$0xff]  ;;  %vm3182_vm15 = vcmp.gt.f32.partialorder %v9799_v34, 0.0 }
 0x260   :  { %13158 = vst [vmem:[#allocation246_spill] sm:$0xff] %v9830_v30  ;;  %13159 = vst [vmem:[#allocation247_spill] sm:$0xff] %v9832_v59  ;;  %v3803_v51 = vadd.f32 %v3708_v38, %v13164_v44  ;;  %v9847_v9 = vpop.f32.mrb[130].mxu1  ;;  %v13167_v49 = vld [vmem:[#allocation160_spill] sm:$0xff]  ;;  %v9857_v18 = vsel %vm384_vm0, %v4415_v19, %v4416_v2  ;;  %v9860_v35 = vsel %vm2927_vm12, %v4799_v7, %v4800_v62 }
 0x261   :  { %13161 = vst [vmem:[#allocation248_spill] sm:$0xff] %v9838_v40  ;;  %13166 = vst [vmem:[#allocation68_spill] sm:$0xff] %v9847_v9  ;;  %4131 = vrot.lane.b32.xlu1 %v13167_v49, %s6757_s10  ;;  %v9851_v30 = vpop.f32.mrb[132].mxu0  ;;  %2678 = vrot.lane.b32.xlu0 %v8996_v25, %s6757_s10  ;;  %v2897_v40 = vadd.f32 %v13169_v60, %v2728_v63  ;;  %v3216_v59 = vmul.f32 1.442695, %v9843_v5  ;;  %v4418_v49 = vrot.slane %v9847_v9, 5 }
 0x262   :  { %13168 = vst [vmem:[#allocation160_spill] sm:$0xff] %v9851_v30  ;;  %13170 = vst [vmem:[#allocation85_spill] sm:$0xff] %v9857_v18  ;;  %v9866_v21 = vpop.f32.mrb[131].mxu1  ;;  %v9871_v60 = vpop.f32.mrb[133].mxu0  ;;  %v13179_v9 = vrot.slane %v9759_v29, 3  ;;  %v13218_v29 = vld [vmem:[#allocation78_spill] sm:$0xff] }
 0x263   :  { %13171 = vst [vmem:[#allocation249_spill] sm:$0xff] %v9860_v35  ;;  %13174 = vst [vmem:[#allocation250_spill] sm:$0xff] %v9866_v21  ;;  %v4802_v19 = vrot.slane %v9866_v21, 7  ;;  %v9873_v7 = vpop.permute.xlu1 %4091  ;;  %v13177_v35 = vld [vmem:[#allocation82_spill] sm:$0xff]  ;;  %6618 = vpow2.f32 %v3216_v59  ;;  %v3021_v4 = vpop.permute.xlu0 %3020  ;;  %v9896_v59 = vsel %vm384_vm0, %v4416_v2, %v4418_v49  ;;  %vm3183_vm1 = vcmp.gt.f32.partialorder %v9843_v5, 0.0 }
 0x264   :  { %13176 = vst [vmem:[#allocation251_spill] sm:$0xff] %v9871_v60  ;;  %v9876_v38 = vadd.f32 %v13177_v35, %v3803_v51  ;;  %v9883_v25 = vsel %vm2156_vm10, %v13179_v9, %v5453_v20  ;;  %v3114_v21 = vadd.f32 %v3021_v4, %v2897_v40  ;;  %v9887_v55 = vpop.f32.mrb[132].mxu1  ;;  %13184 = vst [vmem:[#allocation254_spill] sm:$0xff] %v9896_v59  ;;  %v5063_v9 = vrot.slane %v9851_v30, 1  ;;  %v13189_v59 = vld [vmem:[#allocation74_spill] sm:$0xff] }
 0x265   :  { %13180 = vst [vmem:[#allocation82_spill] sm:$0xff] %v9883_v25  ;;  %13182 = vst [vmem:[#allocation252_spill] sm:$0xff] %v9887_v55  ;;  %3751 = vrot.lane.b32.xlu1 %v8960_v11, %s6757_s10  ;;  %v9891_v51 = vpop.f32.mrb[134].mxu0  ;;  %3755 = vrot.lane.b32.xlu0 %v9030_v46, %s6757_s10  ;;  %v4420_v20 = vrot.slane %v9887_v55, 5  ;;  %v9901_v4 = vpop.f32.mrb[133].mxu1  ;;  %v9906_v11 = vsel %vm2927_vm12, %v4800_v62, %v4802_v19 }
 0x266   :  { %13183 = vst [vmem:[#allocation253_spill] sm:$0xff] %v9891_v51  ;;  %13185 = vst [vmem:[#allocation255_spill] sm:$0xff] %v9901_v4  ;;  %v9903_v40 = vpop.f32.mrb[135].mxu0  ;;  %v9911_v2 = vadd.f32 %v9796_v33, %v3114_v21  ;;  %v4804_v32 = vrot.slane %v9901_v4, 7  ;;  %v13191_v44 = vrot.slane %v9891_v51, 1 }
 0x267   :  { %13186 = vst [vmem:[#allocation256_spill] sm:$0xff] %v9903_v40  ;;  %13187 = vst [vmem:[#allocation257_spill] sm:$0xff] %v9906_v11  ;;  %v3710_v63 = vpop.permute.xlu1 %3709  ;;  %v9916_v6 = vpop.permute.xlu0 %4093  ;;  %v9919_v62 = vsel %vm384_vm0, %v4418_v49, %v4420_v20  ;;  %v13196_v49 = vld [vmem:[#allocation171_spill] sm:$0xff]  ;;  %v5456_v27 = vrot.slane %v9903_v40, 3 }
 0x268   :  { %v6617_v30 = vpop.eup %6616  ;;  %v3804_v25 = vadd.f32 %v3710_v63, %v13189_v59  ;;  %13190 = vst [vmem:[#allocation74_spill] sm:$0xff] %v9919_v62  ;;  %v9924_v46 = vsel %vm1770_vm2, %v5063_v9, %v13191_v44  ;;  %v3218_v16 = vmul.f32 1.442695, %v9911_v2  ;;  %v9928_v4 = vpop.f32.mrb[134].mxu1  ;;  %v9937_v59 = vsel %vm2927_vm12, %v4802_v19, %v4804_v32 }
 0x269   :  { %13192 = vst [vmem:[#allocation258_spill] sm:$0xff] %v9924_v46  ;;  %v6412_v18 = vadd.f32 -1.0, %v6617_v30  ;;  %13194 = vst [vmem:[#allocation259_spill] sm:$0xff] %v9928_v4  ;;  %4135 = vrot.lane.b32.xlu1 %v8975_v8, %s6757_s10  ;;  %v9932_v63 = vpop.f32.mrb[136].mxu0  ;;  %4139 = vrot.lane.b32.xlu0 %v13196_v49, %s6757_s10  ;;  %v13199_v30 = vld [vmem:[#allocation86_spill] sm:$0xff]  ;;  %v9943_v46 = vpop.f32.mrb[135].mxu1 }
 0x26a   :  { %13195 = vst [vmem:[#allocation260_spill] sm:$0xff] %v9932_v63  ;;  %13197 = vst [vmem:[#allocation171_spill] sm:$0xff] %v9937_v59  ;;  %v3972_v11 = vadd.f32 %v13199_v30, %v3804_v25  ;;  %v9945_v62 = vpop.f32.mrb[137].mxu0  ;;  %v5107_v49 = vrot.slane %v9816_v17, 1  ;;  %6620 = vpow2.f32 %v3218_v16  ;;  %v13204_v30 = vld [vmem:[#allocation96_spill] sm:$0xff]  ;;  %v13207_v16 = vld [vmem:[#allocation22_spill] sm:$0xff] }
 0x26b   :  { %13200 = vst [vmem:[#allocation86_spill] sm:$0xff] %v9943_v46  ;;  %13201 = vst [vmem:[#allocation261_spill] sm:$0xff] %v9945_v62  ;;  %v3310_v22 = vmul.f32 1.6732632, %v6412_v18  ;;  %v2641_v32 = vpop.permute.xlu1 %2640  ;;  %v2639_v21 = vpop.permute.xlu0 %2638  ;;  %v13205_v8 = vld [vmem:[#allocation28_spill] sm:$0xff]  ;;  %v13209_v44 = vrot.slane %v9932_v63, 1 }
 0x26c   :  { %v2731_v35 = vadd.f32 %v2641_v32, %v13204_v30  ;;  %v2730_v9 = vadd.f32 %v2639_v21, %v13205_v8  ;;  %v9956_v18 = vpop.f32.mrb[136].mxu1  ;;  %v4187_v8 = vadd.f32 %v9873_v7, %v9876_v38  ;;  %v13216_v38 = vrot.slane %v9065_v10, 5  ;;  %v13263_v25 = vld [vmem:[#allocation202_spill] sm:$0xff] }
 0x26d   :  { %13206 = vst [vmem:[#allocation96_spill] sm:$0xff] %v9956_v18  ;;  %2680 = vrot.lane.b32.xlu1 %v13207_v16, %s6757_s10  ;;  %v9960_v17 = vpop.f32.mrb[138].mxu0  ;;  %3759 = vrot.lane.b32.xlu0 %v9088_v41, %s6757_s10  ;;  %v9967_v32 = vsel %vm1770_vm2, %v13209_v44, %v5107_v49  ;;  %v6619_v30 = vpop.eup %6618  ;;  %v3342_v55 = vsel %vm3182_vm15, %v9799_v34, %v3310_v22  ;;  %v13214_v44 = vld [vmem:[#allocation98_spill] sm:$0xff]  ;;  %v13217_v34 = vld [vmem:[#allocation93_spill] sm:$0xff]  ;;  %vm3184_vm4 = vcmp.gt.f32.partialorder %v9911_v2, 0.0 }
 0x26e   :  { %13208 = vst [vmem:[#allocation28_spill] sm:$0xff] %v9960_v17  ;;  %13210 = vst [vmem:[#allocation22_spill] sm:$0xff] %v9967_v32  ;;  %v9974_v16 = vpop.f32.mrb[137].mxu1  ;;  %v6413_v41 = vadd.f32 -1.0, %v6619_v30  ;;  %v9978_v19 = vpop.f32.mrb[139].mxu0  ;;  %v2900_v49 = vadd.f32 %v13214_v44, %v2731_v35  ;;  %v13215_v17 = vrot.slane %v9094_v56, 5  ;;  %v2899_v22 = vadd.f32 %v13217_v34, %v2730_v9 }
 0x26f   :  { %13212 = vst [vmem:[#allocation262_spill] sm:$0xff] %v9974_v16  ;;  %13213 = vst [vmem:[#allocation263_spill] sm:$0xff] %v9978_v19  ;;  %v3027_v32 = vpop.permute.xlu1 %3026  ;;  %v3712_v59 = vpop.permute.xlu0 %3711  ;;  %v13221_v56 = vrot.slane %v9945_v62, 3  ;;  %v4188_v9 = vadd.f32 %v9916_v6, %v3972_v11 }
 0x270   :  { %v2593_v7 = vsel %vm384_vm0, %v13216_v38, %v13215_v17  ;;  %v3311_v30 = vmul.f32 1.6732632, %v6413_v41  ;;  %v3117_v40 = vadd.f32 %v3027_v32, %v2900_v49  ;;  %v3805_v19 = vadd.f32 %v3712_v59, %v13218_v29  ;;  %v9990_v46 = vpop.f32.mrb[138].mxu1 }
 0x271   :  { %13219 = vst [vmem:[#allocation98_spill] sm:$0xff] %v9990_v46  ;;  %3757 = vrot.lane.b32.xlu1 %v9060_v37, %s6757_s10  ;;  %v9994_v35 = vpop.f32.mrb[140].mxu0  ;;  %2686 = vrot.lane.b32.xlu0 %v2593_v7, %s6757_s10  ;;  %v10000_v44 = vsel %vm2156_vm10, %v5456_v27, %v13221_v56  ;;  %v3374_v17 = vmul.f32 1.050701, %v3342_v55  ;;  %v10004_v29 = vpop.f32.mrb[139].mxu1  ;;  %v10009_v37 = vadd.f32 %v9263_v26, %v4187_v8  ;;  %v5455_v49 = vrot.slane %v9871_v60, 3 }
 0x272   :  { %13220 = vst [vmem:[#allocation93_spill] sm:$0xff] %v9994_v35  ;;  %13222 = vst [vmem:[#allocation78_spill] sm:$0xff] %v10000_v44  ;;  %v10006_v59 = vpop.f32.mrb[141].mxu0  ;;  %v3343_v41 = vsel %vm3183_vm1, %v9843_v5, %v3311_v30  ;;  %v10015_v38 = vadd.f32 %v9796_v33, %v3117_v40  ;;  %v13226_v30 = vld [vmem:[#allocation90_spill] sm:$0xff] }
 0x273   :  { %13223 = vst [vmem:[#allocation264_spill] sm:$0xff] %v10006_v59  ;;  %13224 = vst [vmem:[#allocation265_spill] sm:$0xff] %v10009_v37  ;;  %v10017_v7 = vpop.permute.xlu1 %2644  ;;  %v3375_v56 = vmul.f32 1.050701, %v3343_v41  ;;  %v10022_v26 = vpop.permute.xlu0 %4095  ;;  %v10027_v32 = vadd.f32 %v13226_v30, %v3805_v19  ;;  %v10038_v6 = vsel %vm2156_vm10, %v5455_v49, %v5456_v27  ;;  %v3451_v41 = vsel %vm3450_vm3, %v3374_v17, -inf }
 0x274   :  { %13225 = vst [vmem:[#allocation266_spill] sm:$0xff] %v10017_v7  ;;  %v6621_v8 = vpop.eup %6620  ;;  %v3224_v21 = vmul.f32 1.442695, %v10015_v38  ;;  %v10029_v40 = vpop.f32.mrb[140].mxu1  ;;  %13229 = vst [vmem:[#allocation268_spill] sm:$0xff] %v10038_v6  ;;  %v4423_v7 = vrot.slane %v9956_v18, 5 }
 0x275   :  { %13227 = vst [vmem:[#allocation90_spill] sm:$0xff] %v10029_v40  ;;  %4141 = vrot.lane.b32.xlu1 %v9072_v24, %s6757_s10  ;;  %v10033_v55 = vpop.f32.mrb[142].mxu0  ;;  %4143 = vrot.lane.b32.xlu0 %v9103_v48, %s6757_s10  ;;  %v3452_v19 = vsel %vm3450_vm3, %v3375_v56, -inf  ;;  %v6414_v30 = vadd.f32 -1.0, %v6621_v8  ;;  %v10043_v20 = vpop.f32.mrb[141].mxu1  ;;  %v13247_v18 = vrot.slane %v10004_v29, 7 }
 0x276   :  { %13228 = vst [vmem:[#allocation267_spill] sm:$0xff] %v10033_v55  ;;  %13230 = vst [vmem:[#allocation269_spill] sm:$0xff] %v10043_v20  ;;  %v10045_v34 = vpop.f32.mrb[143].mxu0  ;;  %v3453_v5 = vmax.f32 %v3451_v41, %v3452_v19  ;;  %6622 = vpow2.f32 %v3224_v21  ;;  %v13233_v21 = vld [vmem:[#allocation40_spill] sm:$0xff]  ;;  %v13234_v19 = vrot.slane %v9990_v46, 5  ;;  %vm3187_vm5 = vcmp.gt.f32.partialorder %v10015_v38, 0.0 }
 0x277   :  { %v10049_v48 = vpop.permute.xlu1 %4099  ;;  %v3312_v56 = vmul.f32 1.6732632, %v6414_v30  ;;  %v3025_v8 = vpop.permute.xlu0 %3024  ;;  %v13236_v30 = vld [vmem:[#allocation195_spill] sm:$0xff] }
 0x278   :  { %v3116_v11 = vadd.f32 %v3025_v8, %v2899_v22  ;;  %v10066_v24 = vsel %vm384_vm0, %v4423_v7, %v13234_v19  ;;  %v10069_v49 = vadd.f32 %v13236_v30, %v4188_v9  ;;  %v13295_v47 = vld [vmem:[#allocation263_spill] sm:$0xff] }
 0x279   :  { %v10055_v6 = vpop.f32.mrb[142].mxu1  ;;  %2688 = vrot.lane.b32.xlu1 %v9163_v42, %s6757_s10  ;;  %v10059_v41 = vpop.f32.mrb[144].mxu0  ;;  %3765 = vrot.lane.b32.xlu0 %v13233_v21, %s6757_s10  ;;  %13235 = vst [vmem:[#allocation40_spill] sm:$0xff] %v10066_v24  ;;  %v3344_v17 = vsel %vm3184_vm4, %v9911_v2, %v3312_v56  ;;  %v4422_v42 = vrot.slane %v9928_v4, 5  ;;  %v13239_v2 = vld [vmem:[#allocation91_spill] sm:$0xff]  ;;  %v13329_v61 = vrot.slane %v13295_v47, 3 }
 0x27a   :  { %13231 = vst [vmem:[#allocation270_spill] sm:$0xff] %v10055_v6  ;;  %13232 = vst [vmem:[#allocation271_spill] sm:$0xff] %v10059_v41  ;;  %v10075_v27 = vpop.f32.mrb[143].mxu1  ;;  %v10077_v37 = vpop.f32.mrb[145].mxu0  ;;  %v3376_v24 = vmul.f32 1.050701, %v3344_v17  ;;  %v10082_v9 = vadd.f32 %v9796_v33, %v3116_v11 }
 0x27b   :  { %13237 = vst [vmem:[#allocation195_spill] sm:$0xff] %v10069_v49  ;;  %13238 = vst [vmem:[#allocation272_spill] sm:$0xff] %v10075_v27  ;;  %v3718_v30 = vpop.permute.xlu1 %3717  ;;  %v10087_v49 = vpop.permute.xlu0 %2642  ;;  %v10090_v44 = vsel %vm384_vm0, %v4422_v42, %v4423_v7  ;;  %v13242_v4 = vld [vmem:[#allocation43_spill] sm:$0xff]  ;;  %v13245_v7 = vld [vmem:[#allocation97_spill] sm:$0xff] }
 0x27c   :  { %v3808_v56 = vadd.f32 %v3718_v30, %v13239_v2  ;;  %13240 = vst [vmem:[#allocation91_spill] sm:$0xff] %v10087_v49  ;;  %13241 = vst [vmem:[#allocation273_spill] sm:$0xff] %v10090_v44  ;;  %v3454_v21 = vsel %vm3450_vm3, %v3376_v24, -inf  ;;  %v3222_v17 = vmul.f32 1.442695, %v10082_v9  ;;  %v13243_v30 = vld [vmem:[#allocation110_spill] sm:$0xff]  ;;  %v4189_v2 = vadd.f32 %v10022_v26, %v10027_v32 }
 0x27d   :  { %v10095_v11 = vpop.f32.mrb[144].mxu1  ;;  %3763 = vrot.lane.b32.xlu1 %v13242_v4, %s6757_s10  ;;  %v10099_v22 = vpop.f32.mrb[146].mxu0  ;;  %4149 = vrot.lane.b32.xlu0 %v13243_v30, %s6757_s10  ;;  %v10105_v42 = vmax.f32 %v3453_v5, %v3454_v21  ;;  %v4807_v24 = vrot.slane %v9974_v16, 7  ;;  %v5460_v49 = vrot.slane %v10006_v59, 3  ;;  %v13249_v59 = vld [vmem:[#allocation88_spill] sm:$0xff]  ;;  %v13250_v32 = vld [vmem:[#allocation183_spill] sm:$0xff] }
 0x27e   :  { %v10108_v19 = vpop.f32.mrb[145].mxu1  ;;  %v10110_v8 = vpop.f32.mrb[147].mxu0  ;;  %6624 = vpow2.f32 %v3222_v17  ;;  %v10165_v57 = vadd.f32 %v13263_v25, %v4189_v2  ;;  %v13271_v25 = vrot.slane %v10095_v11, 5  ;;  %vm3186_vm6 = vcmp.gt.f32.partialorder %v10082_v9, 0.0 }
 0x27f   :  { %13244 = vst [vmem:[#allocation43_spill] sm:$0xff] %v10105_v42  ;;  %v3720_v30 = vpop.permute.xlu1 %3719  ;;  %v3716_v21 = vpop.permute.xlu0 %3715  ;;  %v13246_v42 = vld [vmem:[#allocation101_spill] sm:$0xff]  ;;  %v10124_v60 = vsel %vm2927_vm12, %v4807_v24, %v13247_v18  ;;  %v13254_v18 = vrot.slane %v9891_v51, 1 }
 0x280   :  { %v3809_v5 = vadd.f32 %v3720_v30, %v13245_v7  ;;  %v10119_v16 = vadd.f32 %v13246_v42, %v3808_v56  ;;  %13248 = vst [vmem:[#allocation110_spill] sm:$0xff] %v10124_v60  ;;  %v6623_v44 = vpop.eup %6622  ;;  %v3807_v17 = vadd.f32 %v3716_v21, %v13249_v59  ;;  %v13252_v56 = vld [vmem:[#allocation44_spill] sm:$0xff]  ;;  %v13253_v7 = vrot.slane %v9932_v63, 1  ;;  %13264 = vst [vmem:[#allocation183_spill] sm:$0xff] %v10165_v57  ;;  %v13274_v51 = vld [vmem:[#allocation169_spill] sm:$0xff] }
 0x281   :  { %v10128_v10 = vpop.f32.mrb[146].mxu1  ;;  %4147 = vrot.lane.b32.xlu1 %v13250_v32, %s6757_s10  ;;  %3767 = vrot.lane.b32.xlu0 %v13252_v56, %s6757_s10  ;;  %v13256_v30 = vrot.slane %v10045_v34, 3  ;;  %v6417_v60 = vadd.f32 -1.0, %v6623_v44  ;;  %v13269_v32 = vld [vmem:[#allocation37_spill] sm:$0xff] }
 0x282   :  { %v10132_v26 = vpop.f32.mrb[148].mxu0  ;;  %v10141_v42 = vsel %vm1770_vm2, %v13254_v18, %v13253_v7  ;;  %v10151_v56 = vpop.f32.mrb[147].mxu1  ;;  %v13258_v7 = vld [vmem:[#allocation86_spill] sm:$0xff]  ;;  %v3977_v4 = vadd.f32 %v13262_v15, %v3809_v5  ;;  %v13273_v5 = vld [vmem:[#allocation31_spill] sm:$0xff]  ;;  %v13282_v57 = vld [vmem:[#allocation113_spill] sm:$0xff] }
 0x283   :  { %13251 = vst [vmem:[#allocation97_spill] sm:$0xff] %v10132_v26  ;;  %13255 = vst [vmem:[#allocation101_spill] sm:$0xff] %v10141_v42  ;;  %v10146_v59 = vsel %vm2156_vm10, %v5460_v49, %v13256_v30  ;;  %v10153_v63 = vpop.f32.mrb[149].mxu0  ;;  %v4806_v18 = vrot.slane %v13258_v7, 7  ;;  %v4429_v42 = vrot.slane %v10055_v6, 5  ;;  %v3975_v49 = vadd.f32 %v13259_v45, %v3807_v17  ;;  %v4104_v30 = vpop.permute.xlu1 %4103  ;;  %v13267_v45 = vld [vmem:[#allocation190_spill] sm:$0xff] }
 0x284   :  { %13257 = vst [vmem:[#allocation88_spill] sm:$0xff] %v10146_v59  ;;  %v10162_v44 = vpop.permute.xlu0 %4101  ;;  %v10187_v21 = vadd.f32 %v13274_v51, %v13273_v5  ;;  %v3315_v43 = vmul.f32 1.6732632, %v6417_v60  ;;  %v4427_v51 = vrot.slane %v10029_v40, 5  ;;  %v4193_v5 = vadd.f32 %v4104_v30, %v3977_v4  ;;  %v13286_v40 = vld [vmem:[#allocation38_spill] sm:$0xff]  ;;  %v13297_v30 = vld [vmem:[#allocation111_spill] sm:$0xff] }
 0x285   :  { %v10169_v31 = vpop.f32.mrb[148].mxu1  ;;  %4475 = vrot.lane.b32.xlu1 %v13267_v45, %s6757_s10  ;;  %4151 = vrot.lane.b32.xlu0 %v13269_v32, %s6757_s10  ;;  %v10178_v15 = vsel %vm2927_vm12, %v4806_v18, %v4807_v24  ;;  %v10183_v2 = vsel %vm384_vm0, %v4429_v42, %v13271_v25  ;;  %v4191_v60 = vadd.f32 %v10049_v48, %v3975_v49  ;;  %v13283_v45 = vld [vmem:[#allocation41_spill] sm:$0xff]  ;;  %v13289_v48 = vrot.slane %v10059_v41, 1 }
 0x286   :  { %13266 = vst [vmem:[#allocation44_spill] sm:$0xff] %v10169_v31  ;;  %v10173_v17 = vpop.f32.mrb[150].mxu0  ;;  %13270 = vst [vmem:[#allocation106_spill] sm:$0xff] %v10178_v15  ;;  %v10191_v54 = vpop.f32.mrb[149].mxu1  ;;  %v13281_v15 = vld [vmem:[#allocation247_spill] sm:$0xff]  ;;  %v13290_v49 = vrot.slane %v10033_v55, 1 }
 0x287   :  { %13268 = vst [vmem:[#allocation100_spill] sm:$0xff] %v10173_v17  ;;  %13272 = vst [vmem:[#allocation202_spill] sm:$0xff] %v10183_v2  ;;  %v10193_v32 = vpop.f32.mrb[151].mxu0  ;;  %v5491_v28 = vrot.slane %v13281_v15, 3  ;;  %v2649_v25 = vpop.permute.xlu1 %2648  ;;  %v13284_v15 = vld [vmem:[#allocation192_spill] sm:$0xff] }
 0x288   :  { %13275 = vst [vmem:[#allocation190_spill] sm:$0xff] %v10187_v21  ;;  %13278 = vst [vmem:[#allocation37_spill] sm:$0xff] %v10191_v54  ;;  %v2735_v2 = vadd.f32 %v2649_v25, %v13282_v57  ;;  %v2647_v6 = vpop.permute.xlu0 %2646  ;;  %v6625_v21 = vpop.eup %6624  ;;  %v13287_v57 = vrot.slane %v9945_v62, 3  ;;  %v13296_v25 = vld [vmem:[#allocation115_spill] sm:$0xff] }
 0x289   :  { %13279 = vst [vmem:[#allocation31_spill] sm:$0xff] %v10193_v32  ;;  %v2734_v18 = vadd.f32 %v2647_v6, %v13283_v45  ;;  %v10204_v24 = vpop.f32.mrb[150].mxu1  ;;  %4859 = vrot.lane.b32.xlu1 %v13284_v15, %s6757_s10  ;;  %4477 = vrot.lane.b32.xlu0 %v13286_v40, %s6757_s10  ;;  %v10222_v6 = vsel %vm1770_vm2, %v13290_v49, %v13289_v48  ;;  %v6416_v7 = vadd.f32 -1.0, %v6625_v21  ;;  %v4813_v48 = vrot.slane %v10075_v27, 7  ;;  %v13303_v27 = vld [vmem:[#allocation114_spill] sm:$0xff] }
 0x28a   :  { %v10208_v42 = vpop.f32.mrb[152].mxu0  ;;  %v10215_v4 = vsel %vm2156_vm10, %v13287_v57, %v5491_v28  ;;  %13291 = vst [vmem:[#allocation41_spill] sm:$0xff] %v10222_v6  ;;  %v3347_v40 = vsel %vm3187_vm5, %v10015_v38, %v3315_v43  ;;  %v10229_v62 = vpop.f32.mrb[151].mxu1  ;;  %v13294_v57 = vld [vmem:[#allocation28_spill] sm:$0xff]  ;;  %v2904_v6 = vadd.f32 %v13296_v25, %v2735_v2  ;;  %v13298_v38 = vld [vmem:[#allocation203_spill] sm:$0xff] }
 0x28b   :  { %13285 = vst [vmem:[#allocation169_spill] sm:$0xff] %v10208_v42  ;;  %13288 = vst [vmem:[#allocation113_spill] sm:$0xff] %v10215_v4  ;;  %v10231_v28 = vpop.f32.mrb[153].mxu0  ;;  %v3035_v49 = vpop.permute.xlu1 %3034  ;;  %v3314_v45 = vmul.f32 1.6732632, %v6416_v7  ;;  %v2903_v15 = vadd.f32 %v13297_v30, %v2734_v18  ;;  %v10240_v21 = vadd.f32 %v13298_v38, %v4191_v60  ;;  %v13301_v4 = vld [vmem:[#allocation49_spill] sm:$0xff] }
 0x28c   :  { %v3033_v43 = vpop.permute.xlu0 %3032  ;;  %v3379_v14 = vmul.f32 1.050701, %v3347_v40  ;;  %v13304_v7 = vrot.slane %v9990_v46, 5  ;;  %v13306_v18 = vrot.slane %v10108_v19, 7  ;;  %v13308_v30 = vld [vmem:[#allocation213_spill] sm:$0xff] }
 0x28d   :  { %13299 = vst [vmem:[#allocation192_spill] sm:$0xff] %v10240_v21  ;;  %v10242_v13 = vpop.f32.mrb[152].mxu1  ;;  %5139 = vrot.lane.b32.xlu1 %v13301_v4, %s6757_s10  ;;  %4861 = vrot.lane.b32.xlu0 %v13303_v27, %s6757_s10  ;;  %v10261_v25 = vadd.f32 %v13308_v30, %v4193_v5  ;;  %v3346_v40 = vsel %vm3186_vm6, %v10082_v9, %v3314_v45  ;;  %v13314_v5 = vld [vmem:[#allocation124_spill] sm:$0xff] }
 0x28e   :  { %13300 = vst [vmem:[#allocation38_spill] sm:$0xff] %v10242_v13  ;;  %v10246_v59 = vpop.f32.mrb[154].mxu0  ;;  %v10253_v2 = vsel %vm384_vm0, %v13304_v7, %v4427_v51  ;;  %v10258_v60 = vsel %vm2927_vm12, %v4813_v48, %v13306_v18  ;;  %v3121_v27 = vadd.f32 %v3035_v49, %v2904_v6  ;;  %v3120_v38 = vadd.f32 %v3033_v43, %v2903_v15  ;;  %v10267_v21 = vpop.f32.mrb[153].mxu1  ;;  %v13317_v43 = vld [vmem:[#allocation105_spill] sm:$0xff] }
 0x28f   :  { %13302 = vst [vmem:[#allocation28_spill] sm:$0xff] %v10246_v59  ;;  %13305 = vst [vmem:[#allocation263_spill] sm:$0xff] %v10253_v2  ;;  %v10269_v51 = vpop.f32.mrb[155].mxu0  ;;  %v4811_v7 = vrot.slane %v10043_v20, 7  ;;  %v3378_v2 = vmul.f32 1.050701, %v3346_v40  ;;  %v10274_v18 = vpop.permute.xlu1 %2650 }
 0x290   :  { %13307 = vst [vmem:[#allocation115_spill] sm:$0xff] %v10258_v60  ;;  %13309 = vst [vmem:[#allocation111_spill] sm:$0xff] %v10261_v25  ;;  %v10279_v9 = vadd.f32 %v9796_v33, %v3121_v27  ;;  %v10282_v6 = vadd.f32 %v9796_v33, %v3120_v38  ;;  %v3724_v45 = vpop.permute.xlu0 %3723  ;;  %v10285_v15 = vsel %vm3450_vm3, %v3379_v14, -inf  ;;  %v13316_v33 = vld [vmem:[#allocation42_spill] sm:$0xff]  ;;  %v13332_v20 = vrot.slane %v10033_v55, 1 }
 0x291   :  { %13310 = vst [vmem:[#allocation203_spill] sm:$0xff] %v10269_v51  ;;  %13311 = vst [vmem:[#allocation49_spill] sm:$0xff] %v10274_v18  ;;  %v10288_v49 = vsel %vm3450_vm3, %v3378_v2, -inf  ;;  %v10292_v30 = vpop.f32.mrb[154].mxu1  ;;  %5523 = vrot.lane.b32.xlu1 %v13314_v5, %s6757_s10  ;;  %4479 = vrot.lane.b32.xlu0 %v13316_v33, %s6757_s10  ;;  %v3811_v4 = vadd.f32 %v3724_v45, %v13317_v43  ;;  %v4192_v5 = vadd.f32 %v10162_v44, %v10119_v16  ;;  %v13320_v44 = vld [vmem:[#allocation109_spill] sm:$0xff] }
 0x292   :  { %13312 = vst [vmem:[#allocation114_spill] sm:$0xff] %v10285_v15  ;;  %13313 = vst [vmem:[#allocation213_spill] sm:$0xff] %v10288_v49  ;;  %v10296_v27 = vpop.f32.mrb[156].mxu0  ;;  %v3232_v38 = vmul.f32 1.442695, %v10279_v9  ;;  %v10305_v40 = vpop.f32.mrb[155].mxu1 }
 0x293   :  { %13315 = vst [vmem:[#allocation124_spill] sm:$0xff] %v10296_v27  ;;  %v10307_v48 = vpop.f32.mrb[157].mxu0  ;;  %v4434_v18 = vrot.slane %v10169_v31, 5  ;;  %v3230_v25 = vmul.f32 1.442695, %v10282_v6  ;;  %v3726_v14 = vpop.permute.xlu1 %3725  ;;  %v4818_v2 = vrot.slane %v10191_v54, 7 }
 0x294   :  { %13318 = vst [vmem:[#allocation42_spill] sm:$0xff] %v10307_v48  ;;  %v5466_v15 = vrot.slane %v10193_v32, 3  ;;  %6626 = vpow2.f32 %v3232_v38  ;;  %v10317_v43 = vpop.permute.xlu0 %2652  ;;  %v3812_v60 = vadd.f32 %v3726_v14, %v13320_v44  ;;  %v13321_v31 = vld [vmem:[#allocation51_spill] sm:$0xff]  ;;  %v13323_v32 = vld [vmem:[#allocation200_spill] sm:$0xff]  ;;  %v4437_v45 = vrot.slane %v10242_v13, 5  ;;  %v13325_v14 = vld [vmem:[#allocation117_spill] sm:$0xff] }
 0x295   :  { %13319 = vst [vmem:[#allocation105_spill] sm:$0xff] %v10317_v43  ;;  %6628 = vpow2.f32 %v3230_v25  ;;  %v10322_v33 = vpop.f32.mrb[156].mxu1  ;;  %4483 = vrot.lane.b32.xlu1 %v13321_v31, %s6757_s10  ;;  %4863 = vrot.lane.b32.xlu0 %v13323_v32, %s6757_s10  ;;  %v3979_v44 = vadd.f32 %v13325_v14, %v3811_v4  ;;  %v13326_v38 = vld [vmem:[#allocation120_spill] sm:$0xff]  ;;  %v13327_v49 = vrot.slane %v10004_v29, 7  ;;  %v13330_v4 = vrot.slane %v10077_v37, 3  ;;  %v13337_v31 = vld [vmem:[#allocation45_spill] sm:$0xff] }
 0x296   :  { %v10326_v54 = vpop.f32.mrb[158].mxu0  ;;  %v10333_v16 = vpop.f32.mrb[157].mxu1  ;;  %v3980_v12 = vadd.f32 %v13326_v38, %v3812_v60  ;;  %v13333_v43 = vrot.slane %v9994_v35, 1  ;;  %v13340_v35 = vrot.slane %v13294_v57, 1  ;;  %vm3191_vm7 = vcmp.gt.f32.partialorder %v10279_v9, 0.0 }
 0x297   :  { %13322 = vst [vmem:[#allocation109_spill] sm:$0xff] %v10326_v54  ;;  %v10335_v25 = vpop.f32.mrb[159].mxu0  ;;  %v4110_v46 = vpop.permute.xlu1 %4109  ;;  %v10346_v59 = vsel %vm2927_vm12, %v13327_v49, %v4811_v7  ;;  %v10353_v14 = vsel %vm2156_vm10, %v13330_v4, %v13329_v61  ;;  %v13335_v7 = vld [vmem:[#allocation133_spill] sm:$0xff]  ;;  %v13338_v61 = vrot.slane %v10128_v10, 5  ;;  %vm3190_vm8 = vcmp.gt.f32.partialorder %v10282_v6, 0.0 }
 0x298   :  { %13324 = vst [vmem:[#allocation51_spill] sm:$0xff] %v10335_v25  ;;  %v4108_v13 = vpop.permute.xlu0 %4107  ;;  %13328 = vst [vmem:[#allocation200_spill] sm:$0xff] %v10346_v59  ;;  %v10360_v32 = vsel %vm1770_vm2, %v13333_v43, %v13332_v20  ;;  %v13341_v20 = vrot.slane %v10059_v41, 1  ;;  %v4825_v57 = vrot.slane %v10333_v16, 7  ;;  %v13355_v55 = vrot.slane %v10128_v10, 5 }
 0x299   :  { %13331 = vst [vmem:[#allocation117_spill] sm:$0xff] %v10353_v14  ;;  %13334 = vst [vmem:[#allocation120_spill] sm:$0xff] %v10360_v32  ;;  %v4195_v38 = vadd.f32 %v4108_v13, %v3979_v44  ;;  %4867 = vrot.lane.b32.xlu1 %v13335_v7, %s6757_s10  ;;  %5141 = vrot.lane.b32.xlu0 %v13337_v31, %s6757_s10  ;;  %v10372_v4 = vsel %vm384_vm0, %v13338_v61, %v4434_v18  ;;  %v4441_v13 = vrot.slane %v10322_v33, 5  ;;  %v13346_v18 = vld [vmem:[#allocation222_spill] sm:$0xff] }
 0x29a   :  { %v10365_v49 = vpop.f32.mrb[160].mxu0  ;;  %13339 = vst [vmem:[#allocation45_spill] sm:$0xff] %v10372_v4  ;;  %v10379_v43 = vsel %vm1770_vm2, %v13341_v20, %v13340_v35  ;;  %v4196_v44 = vadd.f32 %v4110_v46, %v3980_v12  ;;  %v13344_v31 = vrot.slane %v10151_v56, 7  ;;  %v10391_v61 = vadd.f32 %v13346_v18, %v4192_v5  ;;  %v13363_v18 = vld [vmem:[#allocation57_spill] sm:$0xff]  ;;  %v13538_v4 = vld [vmem:[#allocation168_spill] sm:$0xff] }
 0x29b   :  { %13336 = vst [vmem:[#allocation133_spill] sm:$0xff] %v10365_v49  ;;  %13342 = vst [vmem:[#allocation274_spill] sm:$0xff] %v10379_v43  ;;  %v10383_v7 = vpop.f32.mrb[161].mxu0  ;;  %v5079_v35 = vrot.slane %v10326_v54, 1  ;;  %v10396_v20 = vpop.permute.xlu1 %2654  ;;  %v13349_v12 = vrot.slane %v10077_v37, 3  ;;  %v13350_v46 = vrot.slane %v10045_v34, 3 }
 0x29c   :  { %13343 = vst [vmem:[#allocation275_spill] sm:$0xff] %v10383_v7  ;;  %v10388_v60 = vsel %vm2927_vm12, %v13344_v31, %v4818_v2  ;;  %13347 = vst [vmem:[#allocation222_spill] sm:$0xff] %v10391_v61  ;;  %v13352_v2 = vrot.slane %v10173_v17, 1  ;;  %v13353_v5 = vrot.slane %v10132_v26, 1  ;;  %v3728_v54 = vpop.permute.xlu0 %3727  ;;  %v13356_v61 = vrot.slane %v10095_v11, 5  ;;  %v13361_v26 = vld [vmem:[#allocation234_spill] sm:$0xff] }
 0x29d   :  { %13345 = vst [vmem:[#allocation276_spill] sm:$0xff] %v10388_v60  ;;  %13348 = vst [vmem:[#allocation277_spill] sm:$0xff] %v10396_v20  ;;  %v10403_v41 = vsel %vm2156_vm10, %v13350_v46, %v13349_v12  ;;  %v13358_v12 = vrot.slane %v10099_v22, 1  ;;  %v13359_v46 = vrot.slane %v10208_v42, 1  ;;  %v13364_v43 = vld [vmem:[#allocation56_spill] sm:$0xff]  ;;  %v13366_v22 = vrot.slane %v10151_v56, 7 }
 0x29e   :  { %13351 = vst [vmem:[#allocation278_spill] sm:$0xff] %v10403_v41  ;;  %v10410_v31 = vsel %vm1770_vm2, %v13353_v5, %v13352_v2  ;;  %v10418_v60 = vsel %vm384_vm0, %v13356_v61, %v13355_v55  ;;  %v10428_v2 = vadd.f32 %v13361_v26, %v4195_v38  ;;  %v5081_v5 = vrot.slane %v10365_v49, 1  ;;  %4487 = vrot.lane.b32.xlu1 %v13364_v43, %s6757_s10  ;;  %v13365_v55 = vld [vmem:[#allocation118_spill] sm:$0xff] }
 0x29f   :  { %13354 = vst [vmem:[#allocation279_spill] sm:$0xff] %v10410_v31  ;;  %13357 = vst [vmem:[#allocation280_spill] sm:$0xff] %v10418_v60  ;;  %v10425_v41 = vsel %vm1770_vm2, %v13359_v46, %v13358_v12  ;;  %v3813_v31 = vadd.f32 %v3728_v54, %v13363_v18  ;;  %5143 = vrot.lane.b32.xlu0 %v13365_v55, %s6757_s10  ;;  %v13367_v61 = vrot.slane %v10108_v19, 7  ;;  %v13369_v26 = vrot.slane %v10231_v28, 3  ;;  %v6627_v46 = vpop.eup %6626  ;;  %v13371_v54 = vld [vmem:[#allocation235_spill] sm:$0xff] }
 0x2a0   :  { %13360 = vst [vmem:[#allocation281_spill] sm:$0xff] %v10425_v41  ;;  %13362 = vst [vmem:[#allocation234_spill] sm:$0xff] %v10428_v2  ;;  %v10449_v18 = vadd.f32 %v13371_v54, %v4196_v44  ;;  %v13373_v43 = vrot.slane %v10153_v63, 3  ;;  %v13375_v49 = vrot.slane %v10292_v30, 5  ;;  %v6421_v44 = vadd.f32 -1.0, %v6627_v46  ;;  %v4112_v54 = vpop.permute.xlu1 %4111 }
 0x2a1   :  { %v10441_v12 = vsel %vm2927_vm12, %v13367_v61, %v13366_v22  ;;  %v10446_v38 = vsel %vm2156_vm10, %v5466_v15, %v13369_v26  ;;  %v13377_v22 = vrot.slane %v9569_v58, 6  ;;  %v13378_v61 = vrot.slane %v9528_v3, 6  ;;  %v13391_v3 = vld [vmem:[#allocation212_spill] sm:$0xff] }
 0x2a2   :  { %13368 = vst [vmem:[#allocation57_spill] sm:$0xff] %v10441_v12  ;;  %13370 = vst [vmem:[#allocation56_spill] sm:$0xff] %v10446_v38  ;;  %v10454_v55 = vsel %vm2156_vm10, %v13373_v43, %v5466_v15  ;;  %v10459_v2 = vsel %vm384_vm0, %v4437_v45, %v13375_v49  ;;  %v6629_v38 = vpop.eup %6628  ;;  %v13382_v43 = vrot.slane %v9492_v0, 6  ;;  %v13384_v49 = vrot.slane %v10204_v24, 5 }
 0x2a3   :  { %13372 = vst [vmem:[#allocation118_spill] sm:$0xff] %v10449_v18  ;;  %13374 = vst [vmem:[#allocation235_spill] sm:$0xff] %v10454_v55  ;;  %v10466_v26 = vsel %vm2790_vm14, %v13378_v61, %v13377_v22  ;;  %v13380_v18 = vld [vmem:[#allocation127_spill] sm:$0xff]  ;;  %v13381_v15 = vmov %v13378_v61  ;;  %v6420_v41 = vadd.f32 -1.0, %v6629_v38  ;;  %v10481_v22 = vpop.permute.xlu0 %2656  ;;  %v13387_v46 = vrot.slane %v10305_v40, 7 }
 0x2a4   :  { %13376 = vst [vmem:[#allocation282_spill] sm:$0xff] %v10459_v2  ;;  %13379 = vst [vmem:[#allocation283_spill] sm:$0xff] %v10466_v26  ;;  %v3981_v12 = vadd.f32 %v13380_v18, %v3813_v31  ;;  %v10474_v55 = vsel %vm2790_vm14, %v13382_v43, %v13381_v15  ;;  %v10479_v2 = vsel %vm384_vm0, %v13384_v49, %v4437_v45  ;;  %v13388_v61 = vrot.slane %v10267_v21, 7  ;;  %v13393_v43 = vld [vmem:[#allocation209_spill] sm:$0xff]  ;;  %v13395_v45 = vld [vmem:[#allocation206_spill] sm:$0xff] }
 0x2a5   :  { %13383 = vst [vmem:[#allocation127_spill] sm:$0xff] %v10474_v55  ;;  %13385 = vst [vmem:[#allocation284_spill] sm:$0xff] %v10479_v2  ;;  %v13390_v0 = vrot.slane %v9590_v39, 4  ;;  %v13392_v18 = vrot.slane %v13391_v3, 4  ;;  %v13394_v26 = vrot.slane %v13393_v43, 2  ;;  %v13396_v49 = vrot.slane %v13395_v45, 2 }
 0x2a6   :  { %13386 = vst [vmem:[#allocation285_spill] sm:$0xff] %v10481_v22  ;;  %v10488_v31 = vsel %vm2927_vm12, %v13388_v61, %v13387_v46  ;;  %v3319_v2 = vmul.f32 1.6732632, %v6421_v44  ;;  %v5473_v55 = vrot.slane %v10383_v7, 3  ;;  %v4197_v60 = vadd.f32 %v4112_v54, %v3981_v12  ;;  %v13398_v46 = vld [vmem:[#allocation140_spill] sm:$0xff]  ;;  %v13399_v39 = vld [vmem:[#allocation126_spill] sm:$0xff] }
 0x2a7   :  { %13389 = vst [vmem:[#allocation286_spill] sm:$0xff] %v10488_v31  ;;  %v4271_v15 = vsel %vm2405_vm13, %v13392_v18, %v13390_v0  ;;  %v10500_v38 = vsel %vm2019_vm11, %v13396_v49, %v13394_v26  ;;  %4871 = vrot.lane.b32.xlu1 %v13398_v46, %s6757_s10  ;;  %5525 = vrot.lane.b32.xlu0 %v13399_v39, %s6757_s10  ;;  %v13400_v61 = vrot.slane %v10208_v42, 1  ;;  %v13401_v0 = vrot.slane %v10173_v17, 1  ;;  %v13534_v22 = vld [vmem:[#allocation142_spill] sm:$0xff] }
 0x2a8   :  { %13397 = vst [vmem:[#allocation212_spill] sm:$0xff] %v10500_v38  ;;  %v3318_v18 = vmul.f32 1.6732632, %v6420_v41  ;;  %v13403_v26 = vrot.slane %v10292_v30, 5  ;;  %v13405_v12 = vrot.slane %v9612_v23, 6  ;;  %v13406_v54 = vrot.slane %v9569_v58, 6 }
 0x2a9   :  { %v10512_v3 = vsel %vm1770_vm2, %v13401_v0, %v13400_v61  ;;  %v13408_v45 = vrot.slane %v10267_v21, 7  ;;  %v13409_v49 = vrot.slane %v10229_v62, 7  ;;  %v3351_v41 = vsel %vm3191_vm7, %v10279_v9, %v3319_v2  ;;  %v13417_v2 = vld [vmem:[#allocation60_spill] sm:$0xff] }
 0x2aa   :  { %13402 = vst [vmem:[#allocation209_spill] sm:$0xff] %v10512_v3  ;;  %v10517_v44 = vsel %vm384_vm0, %v13403_v26, %v4441_v13  ;;  %v10524_v43 = vsel %vm2790_vm14, %v13406_v54, %v13405_v12  ;;  %v3732_v13 = vpop.permute.xlu1 %3731  ;;  %v10536_v39 = vadd.f32 %v4271_v15, %v4197_v60  ;;  %v13412_v23 = vrot.slane %v10305_v40, 7  ;;  %v10554_v15 = vpop.permute.xlu0 %2660  ;;  %v13529_v3 = vld [vmem:[#allocation154_spill] sm:$0xff] }
 0x2ab   :  { %13404 = vst [vmem:[#allocation206_spill] sm:$0xff] %v10517_v44  ;;  %13407 = vst [vmem:[#allocation140_spill] sm:$0xff] %v10524_v43  ;;  %v10531_v46 = vsel %vm2927_vm12, %v13409_v49, %v13408_v45  ;;  %v13414_v61 = vrot.slane %v9614_v1, 2  ;;  %v13415_v0 = vrot.slane %v9571_v36, 2  ;;  %v3383_v12 = vmul.f32 1.050701, %v3351_v41 }
 0x2ac   :  { %13410 = vst [vmem:[#allocation126_spill] sm:$0xff] %v10531_v46  ;;  %13411 = vst [vmem:[#allocation287_spill] sm:$0xff] %v10536_v39  ;;  %v10541_v58 = vsel %vm2927_vm12, %v13412_v23, %v4825_v57  ;;  %v3350_v9 = vsel %vm3190_vm8, %v10282_v6, %v3318_v18  ;;  %v3815_v60 = vadd.f32 %v3732_v13, %v13417_v2  ;;  %v13419_v54 = vrot.slane %v10110_v8, 3  ;;  %v13422_v41 = vld [vmem:[#allocation52_spill] sm:$0xff]  ;;  %v13423_v23 = vld [vmem:[#allocation5_spill] sm:$0xff] }
 0x2ad   :  { %13413 = vst [vmem:[#allocation288_spill] sm:$0xff] %v10541_v58  ;;  %v10548_v26 = vsel %vm2019_vm11, %v13415_v0, %v13414_v61  ;;  %13418 = vst [vmem:[#allocation60_spill] sm:$0xff] %v10554_v15  ;;  %v13420_v57 = vrot.slane %v10231_v28, 3  ;;  %v3382_v36 = vmul.f32 1.050701, %v3350_v9  ;;  %v5497_v49 = vrot.slane %v10269_v51, 3  ;;  %5147 = vrot.lane.b32.xlu1 %v13422_v41, %s6757_s10  ;;  %5527 = vrot.lane.b32.xlu0 %v13423_v23, %s6757_s10 }
 0x2ae   :  { %13416 = vst [vmem:[#allocation289_spill] sm:$0xff] %v10548_v26  ;;  %v13424_v6 = vrot.slane %v10335_v25, 3  ;;  %v13425_v18 = vrot.slane %v10307_v48, 3  ;;  %v13427_v61 = vrot.slane %v9663_v53, 4  ;;  %v13428_v0 = vrot.slane %v9627_v52, 4  ;;  %v13493_v26 = vld [vmem:[#allocation243_spill] sm:$0xff] }
 0x2af   :  { %v10561_v45 = vsel %vm2156_vm10, %v13420_v57, %v13419_v54  ;;  %v10581_v2 = vsel %vm3450_vm3, %v3383_v12, -inf  ;;  %v13430_v54 = vld [vmem:[#allocation137_spill] sm:$0xff]  ;;  %v13431_v41 = vrot.slane %v10296_v27, 1  ;;  %v10590_v17 = vsel %vm1770_vm2, %v5079_v35, %v5081_v5  ;;  %v13520_v46 = vld [vmem:[#allocation139_spill] sm:$0xff]  ;;  %v13603_v48 = vld [vmem:[#allocation116_spill] sm:$0xff] }
 0x2b0   :  { %13421 = vst [vmem:[#allocation290_spill] sm:$0xff] %v10561_v45  ;;  %v10573_v13 = vsel %vm2156_vm10, %v13425_v18, %v13424_v6  ;;  %v4274_v9 = vsel %vm2405_vm13, %v13428_v0, %v13427_v61  ;;  %13429 = vst [vmem:[#allocation5_spill] sm:$0xff] %v10581_v2  ;;  %v3983_v57 = vadd.f32 %v13430_v54, %v3815_v60  ;;  %v10593_v6 = vsel %vm3450_vm3, %v3382_v36, -inf  ;;  %v10595_v18 = vpop.permute.xlu1 %2658  ;;  %v13439_v60 = vld [vmem:[#allocation226_spill] sm:$0xff]  ;;  %v13441_v54 = vld [vmem:[#allocation223_spill] sm:$0xff] }
 0x2b1   :  { %13426 = vst [vmem:[#allocation52_spill] sm:$0xff] %v10573_v13  ;;  %v10587_v23 = vsel %vm1770_vm2, %v13431_v41, %v5079_v35  ;;  %13433 = vst [vmem:[#allocation291_spill] sm:$0xff] %v10590_v17  ;;  %v13436_v52 = vrot.slane %v9649_v50, 2  ;;  %v13437_v12 = vrot.slane %v9614_v1, 2  ;;  %v13440_v0 = vrot.slane %v13439_v60, 6  ;;  %v13444_v35 = vld [vmem:[#allocation28_spill] sm:$0xff]  ;;  %v4116_v13 = vpop.permute.xlu0 %4115 }
 0x2b2   :  { %13432 = vst [vmem:[#allocation137_spill] sm:$0xff] %v10587_v23  ;;  %13434 = vst [vmem:[#allocation292_spill] sm:$0xff] %v10593_v6  ;;  %v13442_v41 = vrot.slane %v13441_v54, 6  ;;  %v13445_v42 = vrot.slane %v13444_v35, 1  ;;  %v13447_v17 = vld [vmem:[#allocation255_spill] sm:$0xff]  ;;  %v13451_v54 = vrot.slane %v9649_v50, 2 }
 0x2b3   :  { %13435 = vst [vmem:[#allocation293_spill] sm:$0xff] %v10595_v18  ;;  %v10602_v61 = vsel %vm2019_vm11, %v13437_v12, %v13436_v52  ;;  %v4668_v23 = vrot.slane %v13447_v17, 6  ;;  %v10620_v52 = vsel %vm2156_vm10, %v5473_v55, %v5497_v49  ;;  %v13449_v12 = vld [vmem:[#allocation16_spill] sm:$0xff]  ;;  %v13455_v17 = vld [vmem:[#allocation61_spill] sm:$0xff]  ;;  %v13456_v1 = vrot.slane %v10335_v25, 3  ;;  %v13466_v6 = vld [vmem:[#allocation230_spill] sm:$0xff] }
 0x2b4   :  { %13438 = vst [vmem:[#allocation294_spill] sm:$0xff] %v10602_v61  ;;  %v10609_v27 = vsel %vm2790_vm14, %v13442_v41, %v13440_v0  ;;  %v10614_v36 = vsel %vm1770_vm2, %v5081_v5, %v13445_v42  ;;  %13448 = vst [vmem:[#allocation28_spill] sm:$0xff] %v10620_v52  ;;  %v13450_v61 = vrot.slane %v13449_v12, 2  ;;  %v13453_v41 = vld [vmem:[#allocation250_spill] sm:$0xff]  ;;  %v4199_v42 = vadd.f32 %v4116_v13, %v3983_v57  ;;  %v13454_v5 = vld [vmem:[#allocation207_spill] sm:$0xff] }
 0x2b5   :  { %13443 = vst [vmem:[#allocation226_spill] sm:$0xff] %v10609_v27  ;;  %13446 = vst [vmem:[#allocation223_spill] sm:$0xff] %v10614_v36  ;;  %5531 = vrot.lane.b32.xlu1 %v13454_v5, %s6757_s10  ;;  %4485 = vrot.lane.b32.xlu0 %v13455_v17, %s6757_s10  ;;  %v10637_v49 = vsel %vm2156_vm10, %v13456_v1, %v5473_v55  ;;  %v13458_v12 = vld [vmem:[#allocation8_spill] sm:$0xff]  ;;  %v13460_v50 = vrot.slane %v9663_v53, 4  ;;  %v13463_v13 = vld [vmem:[#allocation231_spill] sm:$0xff]  ;;  %v13467_v17 = vrot.slane %v13466_v6, 6 }
 0x2b6   :  { %v10627_v0 = vsel %vm2019_vm11, %v13451_v54, %v13450_v61  ;;  %13457 = vst [vmem:[#allocation16_spill] sm:$0xff] %v10637_v49  ;;  %v13459_v2 = vrot.slane %v13458_v12, 4  ;;  %v13461_v54 = vld [vmem:[#allocation237_spill] sm:$0xff]  ;;  %v13464_v57 = vrot.slane %v13463_v13, 2  ;;  %v13468_v52 = vrot.slane %v13439_v60, 6  ;;  %v13470_v1 = vld [vmem:[#allocation80_spill] sm:$0xff] }
 0x2b7   :  { %13452 = vst [vmem:[#allocation255_spill] sm:$0xff] %v10627_v0  ;;  %v13462_v35 = vrot.slane %v13461_v54, 2  ;;  %v13471_v49 = vrot.slane %v13470_v1, 4  ;;  %v13472_v36 = vld [vmem:[#allocation238_spill] sm:$0xff]  ;;  %v13476_v13 = vrot.slane %v13458_v12, 4  ;;  %v13487_v12 = vld [vmem:[#allocation252_spill] sm:$0xff] }
 0x2b8   :  { %v4276_v61 = vsel %vm2405_vm13, %v13460_v50, %v13459_v2  ;;  %v10656_v55 = vsel %vm2790_vm14, %v13468_v52, %v13467_v17  ;;  %v13473_v53 = vrot.slane %v13472_v36, 4  ;;  %v13474_v50 = vld [vmem:[#allocation76_spill] sm:$0xff]  ;;  %v13478_v60 = vld [vmem:[#allocation246_spill] sm:$0xff]  ;;  %v13530_v39 = vrot.slane %v13529_v3, 7  ;;  %v13531_v15 = vld [vmem:[#allocation151_spill] sm:$0xff] }
 0x2b9   :  { %v10649_v5 = vsel %vm2019_vm11, %v13464_v57, %v13462_v35  ;;  %13469 = vst [vmem:[#allocation207_spill] sm:$0xff] %v10656_v55  ;;  %v13475_v27 = vrot.slane %v13474_v50, 4  ;;  %v4118_v57 = vpop.permute.xlu1 %4117  ;;  %v13479_v0 = vrot.slane %v13478_v60, 6  ;;  %v13480_v52 = vld [vmem:[#allocation242_spill] sm:$0xff]  ;;  %v13483_v36 = vld [vmem:[#allocation236_spill] sm:$0xff]  ;;  %v13488_v50 = vrot.slane %v13487_v12, 4 }
 0x2ba   :  { %13465 = vst [vmem:[#allocation250_spill] sm:$0xff] %v10649_v5  ;;  %v10663_v2 = vsel %vm2405_vm13, %v13473_v53, %v13471_v49  ;;  %v10670_v5 = vadd.f32 %v4274_v9, %v4199_v42  ;;  %v13481_v17 = vrot.slane %v13480_v52, 6  ;;  %v13484_v45 = vrot.slane %v13483_v36, 6  ;;  %v3734_v42 = vpop.permute.xlu0 %3733  ;;  %v13525_v18 = vld [vmem:[#allocation164_spill] sm:$0xff] }
 0x2bb   :  { %v4278_v35 = vsel %vm2405_vm13, %v13476_v13, %v13475_v27  ;;  %v13485_v49 = vrot.slane %v13466_v6, 6  ;;  %v13489_v27 = vld [vmem:[#allocation68_spill] sm:$0xff]  ;;  %v13496_v6 = vrot.slane %v13453_v41, 6  ;;  %v13526_v43 = vrot.slane %v13525_v18, 7 }
 0x2bc   :  { %13477 = vst [vmem:[#allocation61_spill] sm:$0xff] %v10670_v5  ;;  %v10677_v55 = vsel %vm2790_vm14, %v13481_v17, %v13479_v0  ;;  %v13490_v13 = vrot.slane %v13489_v27, 4  ;;  %v13491_v5 = vld [vmem:[#allocation227_spill] sm:$0xff]  ;;  %v13494_v0 = vrot.slane %v13493_v26, 2  ;;  %v13509_v26 = vld [vmem:[#allocation136_spill] sm:$0xff]  ;;  %v13532_v31 = vrot.slane %v13531_v15, 7 }
 0x2bd   :  { %13482 = vst [vmem:[#allocation8_spill] sm:$0xff] %v10677_v55  ;;  %v10684_v53 = vsel %vm2790_vm14, %v13485_v49, %v13484_v45  ;;  %v13492_v52 = vrot.slane %v13491_v5, 2  ;;  %v10703_v45 = vsel %vm2790_vm14, %v13496_v6, %v4668_v23  ;;  %v13499_v49 = vrot.slane %v13461_v54, 2  ;;  %v13503_v5 = vld [vmem:[#allocation158_spill] sm:$0xff]  ;;  %4869 = vrot.lane.b32.xlu0 %v13509_v26, %s6757_s10  ;;  %v13605_v25 = vld [vmem:[#allocation112_spill] sm:$0xff] }
 0x2be   :  { %13486 = vst [vmem:[#allocation237_spill] sm:$0xff] %v10684_v53  ;;  %v10691_v9 = vsel %vm2405_vm13, %v13490_v13, %v13488_v50  ;;  %13497 = vst [vmem:[#allocation230_spill] sm:$0xff] %v10703_v45  ;;  %v13498_v36 = vmov %v13494_v0  ;;  %v13501_v50 = vld [vmem:[#allocation159_spill] sm:$0xff]  ;;  %v13504_v53 = vrot.slane %v13503_v5, 7  ;;  %v13508_v23 = vld [vmem:[#allocation58_spill] sm:$0xff]  ;;  %v13510_v54 = vrot.slane %v13489_v27, 4 }
 0x2bf   :  { %v10698_v17 = vsel %vm2019_vm11, %v13494_v0, %v13492_v52  ;;  %v10710_v12 = vsel %vm2019_vm11, %v13499_v49, %v13498_v36  ;;  %v13502_v13 = vrot.slane %v13501_v50, 7  ;;  %v13506_v52 = vld [vmem:[#allocation176_spill] sm:$0xff]  ;;  %5151 = vrot.lane.b32.xlu1 %v13508_v23, %s6757_s10  ;;  %v13511_v6 = vrot.slane %v13470_v1, 4  ;;  %v13517_v23 = vld [vmem:[#allocation185_spill] sm:$0xff] }
 0x2c0   :  { %13495 = vst [vmem:[#allocation231_spill] sm:$0xff] %v10698_v17  ;;  %13500 = vst [vmem:[#allocation80_spill] sm:$0xff] %v10710_v12  ;;  %v2977_v0 = vrot.slane %v13506_v52, 7  ;;  %v13507_v17 = vld [vmem:[#allocation130_spill] sm:$0xff]  ;;  %v13513_v49 = vld [vmem:[#allocation156_spill] sm:$0xff]  ;;  %v2982_v45 = vrot.slane %v13517_v23, 7  ;;  %v10761_v38 = vsel %vm2927_vm12, %v13532_v31, %v13530_v39  ;;  %v10779_v31 = vpop.permute.xlu0 %2662 }
 0x2c1   :  { %v10717_v55 = vsel %vm2927_vm12, %v13504_v53, %v13502_v13  ;;  %v3816_v58 = vadd.f32 %v3734_v42, %v13507_v17  ;;  %v10730_v36 = vsel %vm2405_vm13, %v13511_v6, %v13510_v54  ;;  %v13514_v13 = vrot.slane %v13513_v49, 7  ;;  %v13516_v42 = vld [vmem:[#allocation182_spill] sm:$0xff]  ;;  %v13518_v12 = vld [vmem:[#allocation121_spill] sm:$0xff]  ;;  %13533 = vst [vmem:[#allocation252_spill] sm:$0xff] %v10761_v38  ;;  %13542 = vst [vmem:[#allocation243_spill] sm:$0xff] %v10779_v31 }
 0x2c2   :  { %13505 = vst [vmem:[#allocation238_spill] sm:$0xff] %v10717_v55  ;;  %13512 = vst [vmem:[#allocation76_spill] sm:$0xff] %v10730_v36  ;;  %v2980_v17 = vrot.slane %v13516_v42, 7  ;;  %v13519_v26 = vrot.slane %v13518_v12, 7  ;;  %v13521_v27 = vrot.slane %v13520_v46, 7  ;;  %v13523_v54 = vld [vmem:[#allocation165_spill] sm:$0xff] }
 0x2c3   :  { %v10737_v55 = vsel %vm2927_vm12, %v13514_v13, %v13504_v53  ;;  %v13524_v6 = vrot.slane %v13523_v54, 7  ;;  %v13528_v53 = vld [vmem:[#allocation146_spill] sm:$0xff] }
 0x2c4   :  { %13515 = vst [vmem:[#allocation246_spill] sm:$0xff] %v10737_v55  ;;  %v10746_v1 = vsel %vm2927_vm12, %v13521_v27, %v13519_v26  ;;  %v3984_v13 = vadd.f32 %v13528_v53, %v3816_v58  ;;  %v3736_v55 = vpop.permute.xlu1 %3735  ;;  %v13535_v26 = vrot.slane %v13534_v22, 7  ;;  %v13536_v27 = vmov %v13530_v39  ;;  %v13543_v39 = vld [vmem:[#allocation178_spill] sm:$0xff]  ;;  %v13552_v53 = vld [vmem:[#allocation189_spill] sm:$0xff] }
 0x2c5   :  { %13522 = vst [vmem:[#allocation242_spill] sm:$0xff] %v10746_v1  ;;  %v10753_v44 = vsel %vm2927_vm12, %v13526_v43, %v13524_v6  ;;  %v13539_v43 = vrot.slane %v13538_v4, 7  ;;  %v13544_v38 = vrot.slane %v13543_v39, 7 }
 0x2c6   :  { %13527 = vst [vmem:[#allocation236_spill] sm:$0xff] %v10753_v44  ;;  %v10768_v1 = vsel %vm2927_vm12, %v13536_v27, %v13535_v26  ;;  %v13541_v44 = vld [vmem:[#allocation135_spill] sm:$0xff] }
 0x2c7   :  { %13537 = vst [vmem:[#allocation68_spill] sm:$0xff] %v10768_v1  ;;  %v10775_v58 = vsel %vm2927_vm12, %v13524_v6, %v13539_v43  ;;  %v3817_v32 = vadd.f32 %v3736_v55, %v13541_v44  ;;  %v10784_v14 = vsel %vm2927_vm12, %v2977_v0, %v13544_v38  ;;  %v13546_v26 = vld [vmem:[#allocation163_spill] sm:$0xff]  ;;  %v13548_v1 = vrot.slane %v13501_v50, 7  ;;  %v13550_v43 = vld [vmem:[#allocation30_spill] sm:$0xff]  ;;  %v13553_v44 = vld [vmem:[#allocation53_spill] sm:$0xff] }
 0x2c8   :  { %13540 = vst [vmem:[#allocation227_spill] sm:$0xff] %v10775_v58  ;;  %13545 = vst [vmem:[#allocation159_spill] sm:$0xff] %v10784_v14  ;;  %v13547_v27 = vrot.slane %v13546_v26, 7  ;;  %v2460_v6 = vrot.slane %v13550_v43, 4  ;;  %v13551_v58 = vld [vmem:[#allocation47_spill] sm:$0xff]  ;;  %5535 = vrot.lane.b32.xlu1 %v13553_v44, %s6757_s10  ;;  %v4200_v38 = vadd.f32 %v4118_v57, %v3984_v13  ;;  %v13555_v14 = vrot.slane %v13513_v49, 7  ;;  %v4120_v7 = vpop.permute.xlu1 %4119 }
 0x2c9   :  { %v2367_v36 = vadd.f32 %v13552_v53, %v13551_v58  ;;  %v13554_v55 = vld [vmem:[#allocation211_spill] sm:$0xff]  ;;  %v13560_v43 = vld [vmem:[#allocation148_spill] sm:$0xff]  ;;  %v13561_v58 = vrot.slane %v13543_v39, 7  ;;  %v13563_v44 = vrot.slane %v13525_v18, 7  ;;  %v13564_v57 = vld [vmem:[#allocation174_spill] sm:$0xff] }
 0x2ca   :  { %v10791_v59 = vsel %vm2927_vm12, %v13548_v1, %v13547_v27  ;;  %4491 = vrot.lane.b32.xlu0 %v13554_v55, %s6757_s10  ;;  %v13556_v31 = vmov %v13547_v27  ;;  %v13558_v1 = vld [vmem:[#allocation48_spill] sm:$0xff]  ;;  %v13559_v27 = vld [vmem:[#allocation194_spill] sm:$0xff]  ;;  %v3985_v51 = vadd.f32 %v13560_v43, %v3817_v32  ;;  %v13565_v13 = vrot.slane %v13564_v57, 7 }
 0x2cb   :  { %13549 = vst [vmem:[#allocation158_spill] sm:$0xff] %v10791_v59  ;;  %v10805_v20 = vsel %vm2927_vm12, %v13556_v31, %v13555_v14  ;;  %v2368_v59 = vadd.f32 %v13559_v27, %v13558_v1  ;;  %v10813_v53 = vsel %vm2927_vm12, %v13561_v58, %v2980_v17  ;;  %v10822_v14 = vadd.f32 %v4276_v61, %v4200_v38 }
 0x2cc   :  { %13557 = vst [vmem:[#allocation176_spill] sm:$0xff] %v10805_v20  ;;  %13562 = vst [vmem:[#allocation130_spill] sm:$0xff] %v10813_v53  ;;  %v10820_v55 = vsel %vm2927_vm12, %v13565_v13, %v13563_v44  ;;  %v13568_v31 = vmov %v13565_v13  ;;  %v13569_v1 = vrot.slane %v13538_v4, 7  ;;  %v10832_v43 = vsel %vm2927_vm12, %v2982_v45, %v2977_v0  ;;  %v3740_v53 = vpop.permute.xlu0 %3739  ;;  %v13573_v44 = vld [vmem:[#allocation128_spill] sm:$0xff]  ;;  %v13582_v0 = vld [vmem:[#allocation17_spill] sm:$0xff] }
 0x2cd   :  { %13566 = vst [vmem:[#allocation58_spill] sm:$0xff] %v10820_v55  ;;  %13567 = vst [vmem:[#allocation136_spill] sm:$0xff] %v10822_v14  ;;  %v10835_v27 = vsel %vm2927_vm12, %v2980_v17, %v2982_v45  ;;  %v4201_v58 = vadd.f32 %v4120_v7, %v3985_v51  ;;  %v13574_v13 = vrot.slane %v13573_v44, 6  ;;  %v13575_v61 = vrot.slane %v13518_v12, 6  ;;  %v13577_v55 = vld [vmem:[#allocation99_spill] sm:$0xff]  ;;  %v13579_v14 = vld [vmem:[#allocation94_spill] sm:$0xff] }
 0x2ce   :  { %v10829_v32 = vsel %vm2927_vm12, %v13569_v1, %v13568_v31  ;;  %13571 = vst [vmem:[#allocation182_spill] sm:$0xff] %v10832_v43  ;;  %13572 = vst [vmem:[#allocation185_spill] sm:$0xff] %v10835_v27  ;;  %v13578_v20 = vrot.slane %v13577_v55, 6  ;;  %v13580_v31 = vrot.slane %v13579_v14, 6  ;;  %v13583_v43 = vrot.slane %v13582_v0, 4  ;;  %v13584_v45 = vld [vmem:[#allocation14_spill] sm:$0xff] }
 0x2cf   :  { %13570 = vst [vmem:[#allocation156_spill] sm:$0xff] %v10829_v32  ;;  %v10842_v38 = vsel %vm2790_vm14, %v13575_v61, %v13574_v13  ;;  %v13585_v17 = vrot.slane %v13584_v45, 4  ;;  %v2841_v7 = vrot.slane %v13543_v39, 6  ;;  %v13586_v27 = vld [vmem:[#allocation143_spill] sm:$0xff]  ;;  %v13587_v13 = vld [vmem:[#allocation54_spill] sm:$0xff]  ;;  %v13588_v61 = vld [vmem:[#allocation129_spill] sm:$0xff] }
 0x2d0   :  { %13576 = vst [vmem:[#allocation121_spill] sm:$0xff] %v10842_v38  ;;  %v10849_v1 = vsel %vm2790_vm14, %v13580_v31, %v13578_v20  ;;  %v3819_v32 = vadd.f32 %v3740_v53, %v13586_v27  ;;  %4493 = vrot.lane.b32.xlu1 %v13587_v13, %s6757_s10  ;;  %5149 = vrot.lane.b32.xlu0 %v13588_v61, %s6757_s10  ;;  %v13589_v14 = vld [vmem:[#allocation190_spill] sm:$0xff]  ;;  %v13591_v20 = vld [vmem:[#allocation132_spill] sm:$0xff]  ;;  %v13593_v0 = vrot.slane %v13573_v44, 6  ;;  %v13597_v27 = vld [vmem:[#allocation81_spill] sm:$0xff]  ;;  %v13604_v44 = vrot.slane %v13603_v48, 6 }
 0x2d1   :  { %13581 = vst [vmem:[#allocation139_spill] sm:$0xff] %v10849_v1  ;;  %v2507_v51 = vsel %vm2405_vm13, %v13585_v17, %v13583_v43  ;;  %v13592_v31 = vrot.slane %v13591_v20, 6  ;;  %v10872_v43 = vadd.f32 %v4278_v35, %v4201_v58  ;;  %v13595_v39 = vld [vmem:[#allocation64_spill] sm:$0xff]  ;;  %v13598_v17 = vrot.slane %v13597_v27, 6  ;;  %v13599_v61 = vld [vmem:[#allocation170_spill] sm:$0xff]  ;;  %v10893_v58 = vpop.permute.xlu1 %2664 }
 0x2d2   :  { %v10863_v38 = vadd.f32 %v2507_v51, %v13589_v14  ;;  %v13596_v53 = vrot.slane %v13595_v39, 6  ;;  %v13600_v1 = vrot.slane %v13599_v61, 4  ;;  %v13601_v51 = vld [vmem:[#allocation32_spill] sm:$0xff]  ;;  %13607 = vst [vmem:[#allocation146_spill] sm:$0xff] %v10893_v58  ;;  %v10913_v58 = vpop.permute.xlu0 %2668 }
 0x2d3   :  { %v10870_v45 = vsel %vm2790_vm14, %v13593_v0, %v13592_v31  ;;  %13594 = vst [vmem:[#allocation164_spill] sm:$0xff] %v10872_v43  ;;  %v13602_v14 = vrot.slane %v13601_v51, 4  ;;  %v13606_v31 = vrot.slane %v13605_v25, 6  ;;  %v13608_v0 = vld [vmem:[#allocation153_spill] sm:$0xff]  ;;  %v13612_v43 = vrot.slane %v13577_v55, 6 }
 0x2d4   :  { %13590 = vst [vmem:[#allocation165_spill] sm:$0xff] %v10863_v38  ;;  %v10879_v13 = vsel %vm2790_vm14, %v13598_v17, %v13596_v53  ;;  %v3987_v39 = vadd.f32 %v13608_v0, %v3819_v32  ;;  %v13610_v53 = vld [vmem:[#allocation84_spill] sm:$0xff]  ;;  %v13618_v32 = vrot.slane %v13534_v22, 6 }
 0x2d5   :  { %v2454_v38 = vsel %vm2405_vm13, %v13602_v14, %v13600_v1  ;;  %v10891_v35 = vsel %vm2790_vm14, %v13606_v31, %v13604_v44  ;;  %v13611_v17 = vrot.slane %v13610_v53, 6  ;;  %v13613_v1 = vrot.slane %v13531_v15, 6  ;;  %v13614_v14 = vld [vmem:[#allocation147_spill] sm:$0xff]  ;;  %v13621_v53 = vld [vmem:[#allocation24_spill] sm:$0xff] }
 0x2d6   :  { %v10896_v27 = vadd.f32 %v2454_v38, %v2367_v36  ;;  %v13615_v25 = vrot.slane %v13614_v14, 6  ;;  %v2843_v31 = vrot.slane %v13516_v42, 6  ;;  %v13619_v38 = vld [vmem:[#allocation35_spill] sm:$0xff] }
 0x2d7   :  { %v10903_v51 = vsel %vm2790_vm14, %v13612_v43, %v13611_v17  ;;  %v13620_v43 = vrot.slane %v13619_v38, 4  ;;  %v13622_v17 = vrot.slane %v13621_v53, 4  ;;  %v13628_v38 = vrot.slane %v13520_v46, 6 }
 0x2d8   :  { %13609 = vst [vmem:[#allocation154_spill] sm:$0xff] %v10896_v27  ;;  %v10910_v44 = vsel %vm2790_vm14, %v13615_v25, %v13613_v1  ;;  %v13617_v36 = vmov %v13615_v25  ;;  %v13623_v1 = vrot.slane %v13599_v61, 4  ;;  %v2845_v25 = vrot.slane %v13517_v23, 6  ;;  %v13624_v27 = vld [vmem:[#allocation256_spill] sm:$0xff] }
 0x2d9   :  { %13616 = vst [vmem:[#allocation151_spill] sm:$0xff] %v10910_v44  ;;  %v10920_v55 = vsel %vm2790_vm14, %v13618_v32, %v13617_v36  ;;  %v10925_v0 = vsel %vm2405_vm13, %v13620_v43, %v2460_v6  ;;  %v5312_v14 = vrot.slane %v13624_v27, 2  ;;  %v13625_v44 = vld [vmem:[#allocation217_spill] sm:$0xff]  ;;  %v13629_v43 = vrot.slane %v13591_v20, 6 }
 0x2da   :  { %v2508_v42 = vsel %vm2405_vm13, %v13623_v1, %v13622_v17  ;;  %4877 = vrot.lane.b32.xlu1 %v13625_v44, %s6757_s10  ;;  %v13626_v36 = vld [vmem:[#allocation13_spill] sm:$0xff]  ;;  %v13630_v53 = vrot.slane %v13453_v41, 6  ;;  %v13631_v23 = vrot.slane %v13478_v60, 6  ;;  %v13633_v44 = vld [vmem:[#allocation102_spill] sm:$0xff]  ;;  %v13635_v1 = vrot.slane %v13603_v48, 6 }
 0x2db   :  { %4875 = vrot.lane.b32.xlu0 %v13626_v36, %s6757_s10  ;;  %v10938_v32 = vadd.f32 %v2508_v42, %v2368_v59  ;;  %v10945_v61 = vsel %vm2790_vm14, %v13629_v43, %v13628_v38  ;;  %v13634_v17 = vrot.slane %v13633_v44, 6  ;;  %v13636_v42 = vrot.slane %v13501_v50, 6  ;;  %v10975_v43 = vpop.permute.xlu1 %2666  ;;  %v13642_v44 = vld [vmem:[#allocation26_spill] sm:$0xff] }
 0x2dc   :  { %v10952_v27 = vsel %vm2790_vm14, %v13631_v23, %v13630_v53  ;;  %v13637_v20 = vrot.slane %v13503_v5, 6  ;;  %v13639_v60 = vrot.slane %v13513_v49, 6  ;;  %v13640_v48 = vrot.slane %v13518_v12, 6 }
 0x2dd   :  { %13627 = vst [vmem:[#allocation142_spill] sm:$0xff] %v10938_v32  ;;  %13632 = vst [vmem:[#allocation168_spill] sm:$0xff] %v10952_v27  ;;  %v10959_v59 = vsel %vm2790_vm14, %v13635_v1, %v13634_v17  ;;  %v13641_v53 = vrot.slane %v13520_v46, 6  ;;  %v13643_v17 = vrot.slane %v13642_v44, 4  ;;  %v13644_v5 = vrot.slane %v13523_v54, 6  ;;  %v13703_v27 = vld [vmem:[#allocation19_spill] sm:$0xff] }
 0x2de   :  { %v10966_v36 = vsel %vm2790_vm14, %v13637_v20, %v13636_v42  ;;  %v13638_v41 = vmov %v13637_v20  ;;  %v13645_v42 = vrot.slane %v13525_v18, 6  ;;  %v13648_v12 = vrot.slane %v13531_v15, 6 }
 0x2df   :  { %v10973_v38 = vsel %vm2790_vm14, %v13639_v60, %v13638_v41  ;;  %v10982_v23 = vsel %vm2790_vm14, %v13641_v53, %v13640_v48  ;;  %v10987_v1 = vsel %vm2405_vm13, %v2460_v6, %v13643_v17  ;;  %v13647_v41 = vrot.slane %v13529_v3, 6  ;;  %v13649_v60 = vld [vmem:[#allocation251_spill] sm:$0xff]  ;;  %v4124_v53 = vpop.permute.xlu0 %4123  ;;  %v13658_v3 = vld [vmem:[#allocation70_spill] sm:$0xff] }
 0x2e0   :  { %v10994_v20 = vsel %vm2790_vm14, %v13645_v42, %v13644_v5  ;;  %v5311_v48 = vrot.slane %v13649_v60, 2  ;;  %v13650_v6 = vrot.slane %v13534_v22, 6  ;;  %v13652_v5 = vrot.slane %v13538_v4, 6  ;;  %4495 = vrot.lane.b32.xlu1 %v13658_v3, %s6757_s10 }
 0x2e1   :  { %13646 = vst [vmem:[#allocation135_spill] sm:$0xff] %v10994_v20  ;;  %v11001_v46 = vsel %vm2790_vm14, %v13648_v12, %v13647_v41  ;;  %v13651_v17 = vmov %v13647_v41  ;;  %v13653_v42 = vrot.slane %v13523_v54, 6  ;;  %v13655_v15 = vrot.slane %v13506_v52, 6  ;;  %v13657_v12 = vld [vmem:[#allocation261_spill] sm:$0xff] }
 0x2e2   :  { %v11009_v32 = vsel %vm2790_vm14, %v13651_v17, %v13650_v6  ;;  %v5314_v60 = vrot.slane %v13657_v12, 2  ;;  %v4203_v22 = vadd.f32 %v4124_v53, %v3987_v39  ;;  %v13659_v6 = vld [vmem:[#allocation12_spill] sm:$0xff]  ;;  %v13660_v17 = vrot.slane %v13546_v26, 6 }
 0x2e3   :  { %v11016_v44 = vsel %vm2790_vm14, %v13653_v42, %v13652_v5  ;;  %v11021_v41 = vsel %vm2790_vm14, %v13655_v15, %v2841_v7  ;;  %5533 = vrot.lane.b32.xlu0 %v13659_v6, %s6757_s10  ;;  %v13661_v54 = vrot.slane %v13501_v50, 6  ;;  %v13663_v42 = vrot.slane %v13513_v49, 6 }
 0x2e4   :  { %13654 = vst [vmem:[#allocation178_spill] sm:$0xff] %v11016_v44  ;;  %13656 = vst [vmem:[#allocation163_spill] sm:$0xff] %v11021_v41  ;;  %v13664_v15 = vmov %v13660_v17  ;;  %v11043_v39 = vsel %vm2019_vm11, %v5311_v48, %v5312_v14  ;;  %v11046_v53 = vsel %vm2790_vm14, %v2841_v7, %v2843_v31  ;;  %v13668_v3 = vrot.slane %v13525_v18, 6  ;;  %v13699_v41 = vld [vmem:[#allocation66_spill] sm:$0xff] }
 0x2e5   :  { %v11033_v5 = vsel %vm2790_vm14, %v13661_v54, %v13660_v17  ;;  %v11040_v12 = vsel %vm2790_vm14, %v13664_v15, %v13663_v42  ;;  %13666 = vst [vmem:[#allocation53_spill] sm:$0xff] %v11043_v39  ;;  %13667 = vst [vmem:[#allocation211_spill] sm:$0xff] %v11046_v53  ;;  %v13669_v50 = vrot.slane %v13564_v57, 6  ;;  %v13672_v26 = vrot.slane %v13538_v4, 6  ;;  %v3742_v54 = vpop.permute.xlu1 %3741  ;;  %v13677_v15 = vld [vmem:[#allocation247_spill] sm:$0xff]  ;;  %v13678_v57 = vld [vmem:[#allocation69_spill] sm:$0xff]  ;;  %v3744_v4 = vpop.permute.xlu0 %3743 }
 0x2e6   :  { %13662 = vst [vmem:[#allocation47_spill] sm:$0xff] %v11033_v5  ;;  %13665 = vst [vmem:[#allocation189_spill] sm:$0xff] %v11040_v12  ;;  %v11063_v48 = vadd.f32 %v10663_v2, %v4203_v22  ;;  %v13674_v7 = vrot.slane %v13506_v52, 6  ;;  %v11071_v42 = vsel %vm2790_vm14, %v2843_v31, %v2845_v25  ;;  %v13681_v2 = vld [vmem:[#allocation152_spill] sm:$0xff]  ;;  %v13682_v52 = vld [vmem:[#allocation59_spill] sm:$0xff] }
 0x2e7   :  { %v11053_v6 = vsel %vm2790_vm14, %v13669_v50, %v13668_v3  ;;  %v13671_v49 = vmov %v13669_v50  ;;  %13676 = vst [vmem:[#allocation174_spill] sm:$0xff] %v11071_v42  ;;  %v5371_v3 = vrot.slane %v13677_v15, 2  ;;  %v3820_v50 = vadd.f32 %v3742_v54, %v13678_v57  ;;  %4879 = vrot.lane.b32.xlu1 %v13681_v2, %s6757_s10  ;;  %5155 = vrot.lane.b32.xlu0 %v13682_v52, %s6757_s10  ;;  %v13683_v22 = vld [vmem:[#allocation262_spill] sm:$0xff]  ;;  %v13695_v53 = vld [vmem:[#allocation145_spill] sm:$0xff]  ;;  %v13790_v5 = vld [vmem:[#allocation195_spill] sm:$0xff] }
 0x2e8   :  { %13670 = vst [vmem:[#allocation48_spill] sm:$0xff] %v11053_v6  ;;  %v11060_v17 = vsel %vm2790_vm14, %v13672_v26, %v13671_v49  ;;  %v11068_v18 = vsel %vm2790_vm14, %v2845_v25, %v13674_v7  ;;  %v13679_v6 = vld [vmem:[#allocation96_spill] sm:$0xff]  ;;  %v13680_v26 = vld [vmem:[#allocation75_spill] sm:$0xff]  ;;  %v4671_v7 = vrot.slane %v13683_v22, 6  ;;  %v11086_v25 = vsel %vm2019_vm11, %v5312_v14, %v5314_v60  ;;  %v13689_v2 = vld [vmem:[#allocation86_spill] sm:$0xff] }
 0x2e9   :  { %13673 = vst [vmem:[#allocation194_spill] sm:$0xff] %v11060_v17  ;;  %13675 = vst [vmem:[#allocation148_spill] sm:$0xff] %v11068_v18  ;;  %v4287_v49 = vrot.slane %v13679_v6, 4  ;;  %v3821_v17 = vadd.f32 %v3744_v4, %v13680_v26  ;;  %v13684_v18 = vld [vmem:[#allocation79_spill] sm:$0xff]  ;;  %v11089_v54 = vsel %vm2019_vm11, %v5314_v60, %v5371_v3  ;;  %v11092_v57 = vpop.permute.xlu1 %4125  ;;  %v13688_v4 = vld [vmem:[#allocation20_spill] sm:$0xff]  ;;  %v4670_v42 = vrot.slane %v13689_v2, 6  ;;  %v11096_v52 = vpop.permute.xlu0 %2670 }
 0x2ea   :  { %v11083_v31 = vadd.f32 %v13684_v18, %v3820_v50  ;;  %13685 = vst [vmem:[#allocation128_spill] sm:$0xff] %v11086_v25  ;;  %13686 = vst [vmem:[#allocation99_spill] sm:$0xff] %v11089_v54  ;;  %v13687_v6 = vld [vmem:[#allocation259_spill] sm:$0xff]  ;;  %v13690_v22 = vld [vmem:[#allocation98_spill] sm:$0xff]  ;;  %v4673_v3 = vrot.slane %v10004_v29, 6 }
 0x2eb   :  { %v4286_v15 = vrot.slane %v13687_v6, 4  ;;  %v3989_v26 = vadd.f32 %v13688_v4, %v3821_v17  ;;  %v4289_v12 = vrot.slane %v13690_v22, 4  ;;  %v13691_v18 = vld [vmem:[#allocation63_spill] sm:$0xff]  ;;  %v13692_v14 = vld [vmem:[#allocation221_spill] sm:$0xff]  ;;  %v11108_v50 = vsel %vm2790_vm14, %v4670_v42, %v4671_v7  ;;  %v13694_v4 = vld [vmem:[#allocation90_spill] sm:$0xff] }
 0x2ec   :  { %5157 = vrot.lane.b32.xlu1 %v13691_v18, %s6757_s10  ;;  %5539 = vrot.lane.b32.xlu0 %v13692_v14, %s6757_s10  ;;  %13693 = vst [vmem:[#allocation94_spill] sm:$0xff] %v11108_v50  ;;  %v4291_v2 = vrot.slane %v13694_v4, 4  ;;  %v13696_v18 = vld [vmem:[#allocation11_spill] sm:$0xff]  ;;  %v13697_v14 = vld [vmem:[#allocation269_spill] sm:$0xff]  ;;  %v5317_v42 = vrot.slane %v10045_v34, 2  ;;  %v11123_v25 = vsel %vm2790_vm14, %v4671_v7, %v4673_v3  ;;  %v13700_v50 = vld [vmem:[#allocation210_spill] sm:$0xff] }
 0x2ed   :  { %v11104_v60 = vsel %vm2405_vm13, %v4286_v15, %v4287_v49  ;;  %v11110_v17 = vpop.permute.xlu1 %2672  ;;  %v4128_v6 = vpop.permute.xlu0 %4127  ;;  %v11118_v15 = vsel %vm2405_vm13, %v4287_v49, %v4289_v12  ;;  %v4675_v29 = vrot.slane %v13697_v14, 6  ;;  %13698 = vst [vmem:[#allocation17_spill] sm:$0xff] %v11123_v25  ;;  %v2371_v4 = vadd.f32 %v13700_v50, %v13699_v41  ;;  %v13704_v14 = vld [vmem:[#allocation224_spill] sm:$0xff]  ;;  %v13705_v34 = vld [vmem:[#allocation10_spill] sm:$0xff] }
 0x2ee   :  { %v4205_v22 = vadd.f32 %v4128_v6, %v3989_v26  ;;  %v11138_v7 = vsel %vm2405_vm13, %v4289_v12, %v4291_v2  ;;  %v5319_v41 = vrot.slane %v10077_v37, 2  ;;  %v5373_v37 = vrot.slane %v13295_v47, 2  ;;  %v13715_v2 = vld [vmem:[#allocation157_spill] sm:$0xff] }
 0x2ef   :  { %v11158_v12 = vadd.f32 %v10925_v0, %v2371_v4  ;;  %v13718_v4 = vld [vmem:[#allocation270_spill] sm:$0xff] }
 0x2f0   :  { %5159 = vrot.lane.b32.xlu1 %v13695_v53, %s6757_s10  ;;  %4499 = vrot.lane.b32.xlu0 %v13696_v18, %s6757_s10  ;;  %v11128_v6 = vadd.f32 %v10691_v9, %v4205_v22  ;;  %v13701_v53 = vld [vmem:[#allocation264_spill] sm:$0xff]  ;;  %v13702_v18 = vld [vmem:[#allocation15_spill] sm:$0xff]  ;;  %v11145_v22 = vsel %vm2790_vm14, %v4673_v3, %v4675_v29  ;;  %v4294_v3 = vrot.slane %v10095_v11, 4  ;;  %v4678_v29 = vrot.slane %v10108_v19, 6 }
 0x2f1   :  { %v3748_v26 = vpop.permute.xlu1 %3747  ;;  %v5316_v44 = vrot.slane %v13701_v53, 2  ;;  %v3750_v49 = vpop.permute.xlu0 %3749  ;;  %v13706_v9 = vld [vmem:[#allocation167_spill] sm:$0xff]  ;;  %13707 = vst [vmem:[#allocation14_spill] sm:$0xff] %v11145_v22  ;;  %13713 = vst [vmem:[#allocation129_spill] sm:$0xff] %v11158_v12  ;;  %v11173_v0 = vsel %vm2019_vm11, %v5317_v42, %v5319_v41  ;;  %v4293_v47 = vrot.slane %v13718_v4, 4  ;;  %v13722_v19 = vld [vmem:[#allocation72_spill] sm:$0xff] }
 0x2f2   :  { %v3823_v54 = vadd.f32 %v3748_v26, %v13702_v18  ;;  %v3824_v20 = vadd.f32 %v3750_v49, %v13703_v27  ;;  %v13709_v27 = vld [vmem:[#allocation67_spill] sm:$0xff]  ;;  %13717 = vst [vmem:[#allocation132_spill] sm:$0xff] %v11173_v0  ;;  %v13727_v12 = vld [vmem:[#allocation25_spill] sm:$0xff] }
 0x2f3   :  { %v11148_v26 = vsel %vm2019_vm11, %v5316_v44, %v5317_v42  ;;  %v13710_v53 = vld [vmem:[#allocation215_spill] sm:$0xff]  ;;  %v13714_v44 = vld [vmem:[#allocation225_spill] sm:$0xff]  ;;  %v11190_v42 = vsel %vm2405_vm13, %v4293_v47, %v4294_v3 }
 0x2f4   :  { %5541 = vrot.lane.b32.xlu1 %v13704_v14, %s6757_s10  ;;  %4883 = vrot.lane.b32.xlu0 %v13705_v34, %s6757_s10  ;;  %v11142_v50 = vadd.f32 %v13706_v9, %v3823_v54  ;;  %13708 = vst [vmem:[#allocation143_spill] sm:$0xff] %v11148_v26  ;;  %v2372_v18 = vadd.f32 %v13710_v53, %v13709_v27  ;;  %v13712_v14 = vld [vmem:[#allocation166_spill] sm:$0xff]  ;;  %v13720_v27 = vld [vmem:[#allocation272_spill] sm:$0xff]  ;;  %v13731_v26 = vld [vmem:[#allocation31_spill] sm:$0xff] }
 0x2f5   :  { %v11152_v49 = vpop.permute.xlu1 %2674  ;;  %v11155_v34 = vadd.f32 %v13712_v14, %v3824_v20  ;;  %v11161_v54 = vpop.permute.xlu0 %4133  ;;  %v11170_v20 = vsel %vm2019_vm11, %v5319_v41, %v5373_v37  ;;  %v4677_v53 = vrot.slane %v13720_v27, 6  ;;  %v13723_v37 = vld [vmem:[#allocation239_spill] sm:$0xff]  ;;  %v4680_v41 = vrot.slane %v10151_v56, 6  ;;  %v13730_v56 = vld [vmem:[#allocation37_spill] sm:$0xff] }
 0x2f6   :  { %13711 = vst [vmem:[#allocation54_spill] sm:$0xff] %v11152_v49  ;;  %13716 = vst [vmem:[#allocation190_spill] sm:$0xff] %v11170_v20  ;;  %v11179_v11 = vadd.f32 %v10987_v1, %v2372_v18  ;;  %v5322_v22 = vrot.slane %v13731_v26, 2  ;;  %v13732_v0 = vld [vmem:[#allocation173_spill] sm:$0xff] }
 0x2f7   :  { %v11194_v1 = vsel %vm2790_vm14, %v4677_v53, %v4678_v29  ;;  %v4682_v53 = vrot.slane %v13730_v56, 6  ;;  %v13736_v26 = vld [vmem:[#allocation249_spill] sm:$0xff]  ;;  %v5375_v56 = vrot.slane %v10110_v8, 2  ;;  %v4300_v8 = vrot.slane %v10204_v24, 4 }
 0x2f8   :  { %5543 = vrot.lane.b32.xlu1 %v13714_v44, %s6757_s10  ;;  %5163 = vrot.lane.b32.xlu0 %v13715_v2, %s6757_s10  ;;  %13719 = vst [vmem:[#allocation64_spill] sm:$0xff] %v11179_v11  ;;  %v4296_v44 = vrot.slane %v10128_v10, 4  ;;  %13724 = vst [vmem:[#allocation170_spill] sm:$0xff] %v11194_v1  ;;  %v13725_v2 = vld [vmem:[#allocation83_spill] sm:$0xff]  ;;  %v13726_v11 = vld [vmem:[#allocation44_spill] sm:$0xff] }
 0x2f9   :  { %v11176_v9 = vpop.permute.xlu1 %4131  ;;  %v11182_v14 = vpop.permute.xlu0 %2678  ;;  %v4298_v10 = vrot.slane %v13726_v11, 4  ;;  %v11212_v11 = vsel %vm2790_vm14, %v4678_v29, %v4680_v41  ;;  %v5324_v29 = vrot.slane %v10231_v28, 2  ;;  %v13741_v1 = vld [vmem:[#allocation92_spill] sm:$0xff]  ;;  %v13743_v28 = vld [vmem:[#allocation18_spill] sm:$0xff] }
 0x2fa   :  { %13721 = vst [vmem:[#allocation81_spill] sm:$0xff] %v11182_v14  ;;  %v11204_v47 = vsel %vm2405_vm13, %v4294_v3, %v4296_v44  ;;  %13733 = vst [vmem:[#allocation32_spill] sm:$0xff] %v11212_v11  ;;  %v13735_v3 = vld [vmem:[#allocation240_spill] sm:$0xff] }
 0x2fc   :  { %4501 = vrot.lane.b32.xlu1 %v13722_v19, %s6757_s10  ;;  %5547 = vrot.lane.b32.xlu0 %v13723_v37, %s6757_s10  ;;  %v13728_v19 = vld [vmem:[#allocation233_spill] sm:$0xff] }
 0x2fd   :  { %v3752_v18 = vpop.permute.xlu1 %3751  ;;  %v3756_v27 = vpop.permute.xlu0 %3755  ;;  %v13729_v37 = vld [vmem:[#allocation85_spill] sm:$0xff] }
 0x2fe   :  { %v3825_v4 = vadd.f32 %v3752_v18, %v13725_v2  ;;  %v3827_v20 = vadd.f32 %v3756_v27, %v13727_v12  ;;  %v13734_v2 = vld [vmem:[#allocation33_spill] sm:$0xff] }
 0x300   :  { %4885 = vrot.lane.b32.xlu1 %v13728_v19, %s6757_s10  ;;  %4507 = vrot.lane.b32.xlu0 %v13729_v37, %s6757_s10  ;;  %v11209_v18 = vadd.f32 %v13732_v0, %v3825_v4  ;;  %v11217_v27 = vadd.f32 %v13734_v2, %v3827_v20  ;;  %v5321_v19 = vrot.slane %v10153_v63, 2  ;;  %v11227_v0 = vsel %vm2405_vm13, %v4296_v44, %v4298_v10  ;;  %v13742_v44 = vld [vmem:[#allocation241_spill] sm:$0xff] }
 0x301   :  { %v11214_v12 = vpop.permute.xlu1 %4135  ;;  %v11220_v37 = vpop.permute.xlu0 %4139  ;;  %v11231_v4 = vsel %vm2790_vm14, %v4680_v41, %v4682_v53  ;;  %v4685_v41 = vrot.slane %v10267_v21, 6  ;;  %v11247_v10 = vsel %vm2019_vm11, %v5322_v22, %v5324_v29  ;;  %v11250_v53 = vsel %vm2019_vm11, %v5324_v29, %v5375_v56  ;;  %v13750_v29 = vld [vmem:[#allocation74_spill] sm:$0xff] }
 0x302   :  { %13737 = vst [vmem:[#allocation116_spill] sm:$0xff] %v11231_v4  ;;  %v11234_v20 = vsel %vm2019_vm11, %v5321_v19, %v5322_v22  ;;  %13744 = vst [vmem:[#allocation84_spill] sm:$0xff] %v11247_v10  ;;  %v4303_v21 = vrot.slane %v10292_v30, 4  ;;  %v13749_v22 = vld [vmem:[#allocation244_spill] sm:$0xff]  ;;  %v4687_v56 = vrot.slane %v10305_v40, 6 }
 0x303   :  { %13738 = vst [vmem:[#allocation112_spill] sm:$0xff] %v11234_v20  ;;  %13745 = vst [vmem:[#allocation147_spill] sm:$0xff] %v11250_v53  ;;  %v13758_v10 = vld [vmem:[#allocation248_spill] sm:$0xff]  ;;  %v13760_v53 = vld [vmem:[#allocation42_spill] sm:$0xff] }
 0x304   :  { %4503 = vrot.lane.b32.xlu1 %v13735_v3, %s6757_s10  ;;  %4891 = vrot.lane.b32.xlu0 %v13736_v26, %s6757_s10  ;;  %v13740_v3 = vld [vmem:[#allocation38_spill] sm:$0xff] }
 0x305   :  { %v11236_v63 = vpop.permute.xlu1 %2680  ;;  %v3760_v2 = vpop.permute.xlu0 %3759  ;;  %v4301_v11 = vrot.slane %v13740_v3, 4  ;;  %v13746_v3 = vld [vmem:[#allocation95_spill] sm:$0xff] }
 0x306   :  { %13739 = vst [vmem:[#allocation153_spill] sm:$0xff] %v11236_v63  ;;  %v3829_v26 = vadd.f32 %v3760_v2, %v13741_v1  ;;  %v4684_v1 = vrot.slane %v10229_v62, 6  ;;  %v13747_v2 = vld [vmem:[#allocation89_spill] sm:$0xff] }
 0x307   :  { %v11266_v24 = vsel %vm2405_vm13, %v4300_v8, %v4301_v11  ;;  %v13754_v8 = vld [vmem:[#allocation171_spill] sm:$0xff]  ;;  %v11285_v40 = vsel %vm2405_vm13, %v4301_v11, %v4303_v21  ;;  %v13762_v11 = vld [vmem:[#allocation82_spill] sm:$0xff]  ;;  %v13770_v63 = vld [vmem:[#allocation29_spill] sm:$0xff] }
 0x308   :  { %4887 = vrot.lane.b32.xlu1 %v13742_v44, %s6757_s10  ;;  %5551 = vrot.lane.b32.xlu0 %v13743_v28, %s6757_s10  ;;  %v11254_v20 = vadd.f32 %v13746_v3, %v3829_v26  ;;  %v13751_v26 = vld [vmem:[#allocation175_spill] sm:$0xff]  ;;  %v11273_v62 = vsel %vm2790_vm14, %v4684_v1, %v4685_v41  ;;  %v4305_v3 = vrot.slane %v10322_v33, 4 }
 0x309   :  { %v3758_v19 = vpop.permute.xlu1 %3757  ;;  %v11258_v4 = vpop.permute.xlu0 %2686  ;;  %13752 = vst [vmem:[#allocation24_spill] sm:$0xff] %v11273_v62 }
 0x30a   :  { %v3828_v44 = vadd.f32 %v3758_v19, %v13747_v2  ;;  %13748 = vst [vmem:[#allocation35_spill] sm:$0xff] %v11258_v4  ;;  %v13753_v2 = vld [vmem:[#allocation245_spill] sm:$0xff]  ;;  %v13761_v4 = vld [vmem:[#allocation179_spill] sm:$0xff] }
 0x30c   :  { %5165 = vrot.lane.b32.xlu1 %v13749_v22, %s6757_s10  ;;  %4511 = vrot.lane.b32.xlu0 %v13750_v29, %s6757_s10  ;;  %v11270_v28 = vadd.f32 %v13751_v26, %v3828_v44  ;;  %v4689_v44 = vrot.slane %v10333_v16, 6  ;;  %v13755_v22 = vld [vmem:[#allocation51_spill] sm:$0xff]  ;;  %v11290_v29 = vsel %vm2790_vm14, %v4685_v41, %v4687_v56  ;;  %v13763_v16 = vld [vmem:[#allocation258_spill] sm:$0xff] }
 0x30d   :  { %v11275_v19 = vpop.permute.xlu1 %4141  ;;  %v11277_v30 = vpop.permute.xlu0 %4143  ;;  %v5327_v1 = vrot.slane %v13755_v22, 2  ;;  %13756 = vst [vmem:[#allocation256_spill] sm:$0xff] %v11290_v29  ;;  %v13757_v26 = vld [vmem:[#allocation23_spill] sm:$0xff]  ;;  %v11303_v22 = vsel %vm2405_vm13, %v4303_v21, %v4305_v3 }
 0x30e   :  { %v2729_v62 = vadd.f32 %v13758_v10, %v13757_v26  ;;  %v13764_v41 = vld [vmem:[#allocation275_spill] sm:$0xff]  ;;  %v11307_v10 = vsel %vm2790_vm14, %v4687_v56, %v4689_v44  ;;  %v13772_v56 = vld [vmem:[#allocation22_spill] sm:$0xff] }
 0x30f   :  { %v5329_v29 = vrot.slane %v13764_v41, 2  ;;  %13765 = vst [vmem:[#allocation13_spill] sm:$0xff] %v11307_v10  ;;  %v13771_v41 = vld [vmem:[#allocation254_spill] sm:$0xff]  ;;  %v13773_v44 = vld [vmem:[#allocation187_spill] sm:$0xff] }
 0x310   :  { %5167 = vrot.lane.b32.xlu1 %v13753_v2, %s6757_s10  ;;  %4895 = vrot.lane.b32.xlu0 %v13754_v8, %s6757_s10  ;;  %v5326_v2 = vrot.slane %v13760_v53, 2 }
 0x311   :  { %v11294_v33 = vpop.permute.xlu1 %2688  ;;  %v3766_v25 = vpop.permute.xlu0 %3765 }
 0x312   :  { %13759 = vst [vmem:[#allocation217_spill] sm:$0xff] %v11294_v33  ;;  %v3832_v8 = vadd.f32 %v3766_v25, %v13761_v4  ;;  %v11310_v26 = vsel %vm2019_vm11, %v5326_v2, %v5327_v1  ;;  %v13767_v33 = vld [vmem:[#allocation186_spill] sm:$0xff]  ;;  %v11316_v4 = vadd.f32 %v10879_v13, %v2729_v62  ;;  %v11333_v13 = vsel %vm2019_vm11, %v5327_v1, %v5329_v29  ;;  %v13782_v1 = vld [vmem:[#allocation265_spill] sm:$0xff] }
 0x313   :  { %13766 = vst [vmem:[#allocation102_spill] sm:$0xff] %v11310_v26  ;;  %13775 = vst [vmem:[#allocation70_spill] sm:$0xff] %v11333_v13  ;;  %v13779_v26 = vld [vmem:[#allocation257_spill] sm:$0xff]  ;;  %v4204_v13 = vadd.f32 %v11092_v57, %v11083_v31  ;;  %v13792_v57 = vld [vmem:[#allocation110_spill] sm:$0xff] }
 0x314   :  { %5549 = vrot.lane.b32.xlu1 %v13762_v11, %s6757_s10  ;;  %5171 = vrot.lane.b32.xlu0 %v13763_v16, %s6757_s10  ;;  %v11313_v25 = vadd.f32 %v13767_v33, %v3832_v8  ;;  %13768 = vst [vmem:[#allocation251_spill] sm:$0xff] %v11316_v4  ;;  %v13769_v11 = vld [vmem:[#allocation203_spill] sm:$0xff]  ;;  %v13776_v8 = vld [vmem:[#allocation34_spill] sm:$0xff]  ;;  %v13791_v31 = vld [vmem:[#allocation273_spill] sm:$0xff] }
 0x315   :  { %v3764_v53 = vpop.permute.xlu1 %3763  ;;  %v5377_v16 = vrot.slane %v13769_v11, 2  ;;  %v11320_v3 = vpop.permute.xlu0 %4149  ;;  %v13778_v4 = vld [vmem:[#allocation107_spill] sm:$0xff] }
 0x316   :  { %v3831_v21 = vadd.f32 %v3764_v53, %v13770_v63  ;;  %v13777_v53 = vld [vmem:[#allocation91_spill] sm:$0xff] }
 0x317   :  { %v11330_v33 = vsel %vm2019_vm11, %v5329_v29, %v5377_v16  ;;  %v2732_v11 = vadd.f32 %v13777_v53, %v13776_v8  ;;  %v13781_v16 = vld [vmem:[#allocation108_spill] sm:$0xff]  ;;  %v13787_v53 = vld [vmem:[#allocation193_spill] sm:$0xff] }
 0x318   :  { %4509 = vrot.lane.b32.xlu1 %v13771_v41, %s6757_s10  ;;  %5175 = vrot.lane.b32.xlu0 %v13772_v56, %s6757_s10  ;;  %v11327_v2 = vadd.f32 %v13773_v44, %v3831_v21  ;;  %13774 = vst [vmem:[#allocation261_spill] sm:$0xff] %v11330_v33  ;;  %v13780_v21 = vld [vmem:[#allocation78_spill] sm:$0xff]  ;;  %v13783_v8 = vld [vmem:[#allocation268_spill] sm:$0xff] }
 0x319   :  { %v11335_v62 = vpop.permute.xlu1 %4147  ;;  %v3768_v63 = vpop.permute.xlu0 %3767 }
 0x31a   :  { %v3833_v41 = vadd.f32 %v3768_v63, %v13778_v4  ;;  %v13784_v4 = vld [vmem:[#allocation40_spill] sm:$0xff] }
 0x31c   :  { %4893 = vrot.lane.b32.xlu1 %v13779_v26, %s6757_s10  ;;  %5557 = vrot.lane.b32.xlu0 %v13780_v21, %s6757_s10  ;;  %v11345_v44 = vadd.f32 %v13781_v16, %v3833_v41  ;;  %v13785_v26 = vld [vmem:[#allocation139_spill] sm:$0xff] }
 0x31d   :  { %v4476_v56 = vpop.permute.xlu1 %4475  ;;  %v11348_v33 = vpop.permute.xlu0 %4151  ;;  %v11357_v63 = vadd.f32 %v13785_v26, %v2732_v11  ;;  %v13794_v11 = vld [vmem:[#allocation191_spill] sm:$0xff] }
 0x31e   :  { %v4571_v29 = vadd.f32 %v4476_v56, %v13782_v1  ;;  %v13788_v56 = vld [vmem:[#allocation62_spill] sm:$0xff]  ;;  %v13789_v1 = vld [vmem:[#allocation277_spill] sm:$0xff] }
 0x31f   :  { %13786 = vst [vmem:[#allocation12_spill] sm:$0xff] %v11357_v63  ;;  %v2738_v39 = vadd.f32 %v13789_v1, %v13788_v56  ;;  %v13797_v63 = vld [vmem:[#allocation197_spill] sm:$0xff] }
 0x320   :  { %5555 = vrot.lane.b32.xlu1 %v13783_v8, %s6757_s10  ;;  %4517 = vrot.lane.b32.xlu0 %v13784_v4, %s6757_s10  ;;  %v4739_v21 = vadd.f32 %v13787_v53, %v4571_v29  ;;  %v13793_v8 = vld [vmem:[#allocation76_spill] sm:$0xff]  ;;  %v13795_v29 = vld [vmem:[#allocation39_spill] sm:$0xff]  ;;  %v13796_v53 = vld [vmem:[#allocation266_spill] sm:$0xff] }
 0x321   :  { %v4860_v41 = vpop.permute.xlu1 %4859  ;;  %v4478_v10 = vpop.permute.xlu0 %4477  ;;  %v11368_v4 = vadd.f32 %v13793_v8, %v4204_v13  ;;  %v4207_v8 = vadd.f32 %v11176_v9, %v11142_v50 }
 0x322   :  { %v4955_v16 = vadd.f32 %v4860_v41, %v4739_v21  ;;  %v4572_v14 = vadd.f32 %v4478_v10, %v13790_v5  ;;  %v2733_v21 = vadd.f32 %v13796_v53, %v13795_v29  ;;  %v13798_v10 = vld [vmem:[#allocation101_spill] sm:$0xff] }
 0x324   :  { %4515 = vrot.lane.b32.xlu1 %v13791_v31, %s6757_s10  ;;  %4901 = vrot.lane.b32.xlu0 %v13792_v57, %s6757_s10  ;;  %v4987_v26 = vadd.f32 %v4955_v16, %v13794_v11  ;;  %v4740_v49 = vadd.f32 %v13797_v63, %v4572_v14  ;;  %v13799_v31 = vld [vmem:[#allocation88_spill] sm:$0xff]  ;;  %v13800_v57 = vld [vmem:[#allocation121_spill] sm:$0xff]  ;;  %v4208_v16 = vadd.f32 %v11161_v54, %v11155_v34  ;;  %v13805_v34 = vld [vmem:[#allocation202_spill] sm:$0xff] }
 0x325   :  { %v5140_v41 = vpop.permute.xlu1 %5139  ;;  %v4862_v1 = vpop.permute.xlu0 %4861  ;;  %v11379_v13 = vadd.f32 %v13800_v57, %v2738_v39  ;;  %v13801_v11 = vld [vmem:[#allocation201_spill] sm:$0xff]  ;;  %v11388_v29 = vadd.f32 %v10903_v51, %v2733_v21  ;;  %v13804_v39 = vld [vmem:[#allocation106_spill] sm:$0xff]  ;;  %v11399_v54 = vadd.f32 %v11104_v60, %v4207_v8  ;;  %v13807_v21 = vld [vmem:[#allocation123_spill] sm:$0xff] }
 0x326   :  { %v5235_v56 = vadd.f32 %v5140_v41, %v4987_v26  ;;  %v4956_v5 = vadd.f32 %v4862_v1, %v4740_v49  ;;  %v13802_v26 = vld [vmem:[#allocation196_spill] sm:$0xff]  ;;  %v13803_v1 = vld [vmem:[#allocation183_spill] sm:$0xff]  ;;  %v11396_v50 = vadd.f32 %v11118_v15, %v4208_v16  ;;  %v13811_v15 = vld [vmem:[#allocation205_spill] sm:$0xff] }
 0x327   :  { %v13812_v8 = vld [vmem:[#allocation199_spill] sm:$0xff] }
 0x328   :  { %5173 = vrot.lane.b32.xlu1 %v13798_v10, %s6757_s10  ;;  %5563 = vrot.lane.b32.xlu0 %v13799_v31, %s6757_s10  ;;  %v5403_v14 = vadd.f32 %v13801_v11, %v5235_v56  ;;  %v4988_v49 = vadd.f32 %v4956_v5, %v13802_v26  ;;  %v13806_v56 = vld [vmem:[#allocation204_spill] sm:$0xff]  ;;  %v13810_v26 = vld [vmem:[#allocation41_spill] sm:$0xff] }
 0x329   :  { %v5524_v63 = vpop.permute.xlu1 %5523  ;;  %v4480_v41 = vpop.permute.xlu0 %4479  ;;  %v13808_v31 = vld [vmem:[#allocation192_spill] sm:$0xff] }
 0x32a   :  { %v5619_v53 = vadd.f32 %v5524_v63, %v5403_v14  ;;  %v4573_v10 = vadd.f32 %v4480_v41, %v13803_v1  ;;  %v13809_v63 = vld [vmem:[#allocation113_spill] sm:$0xff]  ;;  %v4211_v1 = vadd.f32 %v11220_v37, %v11217_v27 }
 0x32c   :  { %4899 = vrot.lane.b32.xlu1 %v13804_v39, %s6757_s10  ;;  %4523 = vrot.lane.b32.xlu0 %v13805_v34, %s6757_s10  ;;  %v4741_v51 = vadd.f32 %v13806_v56, %v4573_v10  ;;  %v11403_v5 = vadd.f32 %v13807_v21, %v5619_v53  ;;  %v13814_v56 = vld [vmem:[#allocation115_spill] sm:$0xff]  ;;  %v11423_v37 = vadd.f32 %v11190_v42, %v4211_v1  ;;  %v13823_v42 = vld [vmem:[#allocation45_spill] sm:$0xff] }
 0x32d   :  { %v4484_v9 = vpop.permute.xlu1 %4483  ;;  %v4864_v11 = vpop.permute.xlu0 %4863 }
 0x32e   :  { %v4575_v57 = vadd.f32 %v4484_v9, %v13808_v31  ;;  %v4957_v14 = vadd.f32 %v4864_v11, %v4741_v51  ;;  %v5718_v53 = vmul.f32 1.442695, %v11403_v5  ;;  %v13813_v9 = vld [vmem:[#allocation263_spill] sm:$0xff]  ;;  %v13816_v11 = vld [vmem:[#allocation216_spill] sm:$0xff]  ;;  %vm5686_vm9 = vcmp.gt.f32.partialorder %v11403_v5, 0.0 }
 0x32f   :  { %v13815_v51 = vld [vmem:[#allocation119_spill] sm:$0xff] }
 0x330   :  { %5559 = vrot.lane.b32.xlu1 %v13809_v63, %s6757_s10  ;;  %5181 = vrot.lane.b32.xlu0 %v13810_v26, %s6757_s10  ;;  %v4743_v16 = vadd.f32 %v13811_v15, %v4575_v57  ;;  %v4989_v41 = vadd.f32 %v4957_v14, %v13812_v8  ;;  %6630 = vpow2.f32 %v5718_v53  ;;  %v13817_v14 = vld [vmem:[#allocation111_spill] sm:$0xff] }
 0x331   :  { %v4868_v60 = vpop.permute.xlu1 %4867  ;;  %v5142_v39 = vpop.permute.xlu0 %5141 }
 0x332   :  { %v4959_v10 = vadd.f32 %v4868_v60, %v4743_v16  ;;  %v5236_v34 = vadd.f32 %v5142_v39, %v4988_v49  ;;  %v13818_v49 = vld [vmem:[#allocation200_spill] sm:$0xff]  ;;  %v13819_v16 = vld [vmem:[#allocation117_spill] sm:$0xff]  ;;  %v13820_v60 = vld [vmem:[#allocation214_spill] sm:$0xff] }
 0x333   :  { %v13821_v39 = vld [vmem:[#allocation218_spill] sm:$0xff] }
 0x334   :  { %4519 = vrot.lane.b32.xlu1 %v13813_v9, %s6757_s10  ;;  %4907 = vrot.lane.b32.xlu0 %v13814_v56, %s6757_s10  ;;  %v4991_v31 = vadd.f32 %v4959_v10, %v13815_v51  ;;  %v5404_v63 = vadd.f32 %v13816_v11, %v5236_v34  ;;  %v13822_v51 = vld [vmem:[#allocation120_spill] sm:$0xff] }
 0x335   :  { %v4488_v57 = vpop.permute.xlu1 %4487  ;;  %v5144_v27 = vpop.permute.xlu0 %5143 }
 0x336   :  { %v4577_v26 = vadd.f32 %v4488_v57, %v13817_v14  ;;  %v5237_v15 = vadd.f32 %v5144_v27, %v4989_v41  ;;  %v13824_v41 = vld [vmem:[#allocation65_spill] sm:$0xff]  ;;  %v13825_v27 = vld [vmem:[#allocation134_spill] sm:$0xff] }
 0x338   :  { %4903 = vrot.lane.b32.xlu1 %v13818_v49, %s6757_s10  ;;  %5567 = vrot.lane.b32.xlu0 %v13819_v16, %s6757_s10  ;;  %v4745_v8 = vadd.f32 %v13820_v60, %v4577_v26  ;;  %v5405_v9 = vadd.f32 %v13821_v39, %v5237_v15  ;;  %v13826_v49 = vld [vmem:[#allocation285_spill] sm:$0xff]  ;;  %v13827_v60 = vld [vmem:[#allocation274_spill] sm:$0xff]  ;;  %v4209_v39 = vadd.f32 %v11214_v12, %v11209_v18  ;;  %v13834_v18 = vld [vmem:[#allocation279_spill] sm:$0xff] }
 0x339   :  { %v4872_v10 = vpop.permute.xlu1 %4871  ;;  %v5526_v53 = vpop.permute.xlu0 %5525  ;;  %v2739_v15 = vadd.f32 %v13826_v49, %v13825_v27  ;;  %v13832_v27 = vld [vmem:[#allocation222_spill] sm:$0xff] }
 0x33a   :  { %v4961_v34 = vadd.f32 %v4872_v10, %v4745_v8  ;;  %v5620_v56 = vadd.f32 %v5526_v53, %v5404_v63  ;;  %v13828_v8 = vld [vmem:[#allocation276_spill] sm:$0xff]  ;;  %v6631_v10 = vpop.eup %6630 }
 0x33b   :  { %v11461_v12 = vadd.f32 %v10870_v45, %v2739_v15 }
 0x33c   :  { %5179 = vrot.lane.b32.xlu1 %v13822_v51, %s6757_s10  ;;  %4527 = vrot.lane.b32.xlu0 %v13823_v42, %s6757_s10  ;;  %v4993_v1 = vadd.f32 %v4961_v34, %v13824_v41  ;;  %v11437_v57 = vadd.f32 %v13807_v21, %v5620_v56  ;;  %v13829_v34 = vld [vmem:[#allocation219_spill] sm:$0xff]  ;;  %v13831_v56 = vld [vmem:[#allocation49_spill] sm:$0xff] }
 0x33d   :  { %v5148_v11 = vpop.permute.xlu1 %5147  ;;  %v5528_v26 = vpop.permute.xlu0 %5527 }
 0x33e   :  { %v5239_v14 = vadd.f32 %v5148_v11, %v4991_v31  ;;  %v5720_v16 = vmul.f32 1.442695, %v11437_v57  ;;  %v5621_v63 = vadd.f32 %v5528_v26, %v5405_v9  ;;  %v13830_v31 = vld [vmem:[#allocation50_spill] sm:$0xff]  ;;  %v6444_v11 = vadd.f32 -1.0, %v6631_v10 }
 0x33f   :  { %v2736_v51 = vadd.f32 %v13831_v56, %v13830_v31  ;;  %v13837_v31 = vld [vmem:[#allocation228_spill] sm:$0xff]  ;;  %vm5687_vm2 = vcmp.gt.f32.partialorder %v11437_v57, 0.0 }
 0x340   :  { %5183 = vrot.lane.b32.xlu1 %v13827_v60, %s6757_s10  ;;  %4911 = vrot.lane.b32.xlu0 %v13828_v8, %s6757_s10  ;;  %v5407_v53 = vadd.f32 %v13829_v34, %v5239_v14  ;;  %6632 = vpow2.f32 %v5720_v16  ;;  %v11452_v42 = vadd.f32 %v13807_v21, %v5621_v63  ;;  %v13833_v60 = vld [vmem:[#allocation278_spill] sm:$0xff]  ;;  %v4213_v14 = vadd.f32 %v11277_v30, %v11254_v20  ;;  %v13835_v63 = vld [vmem:[#allocation55_spill] sm:$0xff]  ;;  %v13836_v8 = vld [vmem:[#allocation105_spill] sm:$0xff] }
 0x341   :  { %v5532_v9 = vpop.permute.xlu1 %5531  ;;  %v4486_v41 = vpop.permute.xlu0 %4485  ;;  %v11466_v16 = vadd.f32 %v11138_v7, %v4209_v39  ;;  %v2737_v10 = vadd.f32 %v13836_v8, %v13835_v63  ;;  %v5814_v45 = vmul.f32 1.6732632, %v6444_v11  ;;  %v13838_v20 = vld [vmem:[#allocation280_spill] sm:$0xff]  ;;  %v13839_v7 = vld [vmem:[#allocation281_spill] sm:$0xff] }
 0x342   :  { %v5722_v26 = vmul.f32 1.442695, %v11452_v42  ;;  %v4576_v49 = vadd.f32 %v4486_v41, %v13832_v27  ;;  %v11472_v41 = vadd.f32 %v10891_v35, %v2736_v51  ;;  %v5623_v15 = vadd.f32 %v5532_v9, %v5407_v53  ;;  %v13840_v30 = vld [vmem:[#allocation229_spill] sm:$0xff] }
 0x343   :  { %v11487_v53 = vadd.f32 %v10959_v59, %v2737_v10  ;;  %vm5688_vm11 = vcmp.gt.f32.partialorder %v11452_v42, 0.0 }
 0x344   :  { %5565 = vrot.lane.b32.xlu1 %v13833_v60, %s6757_s10  ;;  %5187 = vrot.lane.b32.xlu0 %v13834_v18, %s6757_s10  ;;  %6634 = vpow2.f32 %v5722_v26  ;;  %v4744_v56 = vadd.f32 %v13837_v31, %v4576_v49  ;;  %v11480_v26 = vadd.f32 %v11227_v0, %v4213_v14  ;;  %v13841_v49 = vlaneseq  ;;  %v13844_v0 = vld [vmem:[#allocation234_spill] sm:$0xff] }
 0x345   :  { %v5152_v34 = vpop.permute.xlu1 %5151  ;;  %v4870_v60 = vpop.permute.xlu0 %4869  ;;  %13843 = vst [vmem:[#allocation247_spill] sm:$0xff] %v11487_v53  ;;  %v11492_v31 = vadd.f32 %v13807_v21, %v5623_v15 }
 0x346   :  { %v5241_v27 = vadd.f32 %v5152_v34, %v4993_v1  ;;  %v4960_v18 = vadd.f32 %v4870_v60, %v4744_v56  ;;  %v11483_v63 = vshrl.u32 %v13841_v49, 7  ;;  %v13842_v1 = vld [vmem:[#allocation9_spill] sm:$0xff]  ;;  %v5846_v34 = vsel %vm5686_vm9, %v11403_v5, %v5814_v45  ;;  %v13847_v5 = vld [vmem:[#allocation127_spill] sm:$0xff] }
 0x347   :  { %v13845_v56 = vld [vmem:[#allocation57_spill] sm:$0xff]  ;;  %v5878_v15 = vmul.f32 1.050701, %v5846_v34  ;;  %vm5690_vm13 = vcmp.gt.f32.partialorder %v11492_v31, 0.0 }
 0x348   :  { %4525 = vrot.lane.b32.xlu1 %v13838_v20, %s6757_s10  ;;  %5191 = vrot.lane.b32.xlu0 %v13839_v7, %s6757_s10  ;;  %v5409_v39 = vadd.f32 %v13840_v30, %v5241_v27  ;;  %v4992_v51 = vadd.f32 %v4960_v18, %v13842_v1  ;;  %v13846_v27 = vld [vmem:[#allocation56_spill] sm:$0xff]  ;;  %v11503_v60 = vadd.s32 16, %v11483_v63  ;;  %v13848_v30 = vld [vmem:[#allocation118_spill] sm:$0xff]  ;;  %v5726_v1 = vmul.f32 1.442695, %v11492_v31 }
 0x349   :  { %v5536_v35 = vpop.permute.xlu1 %5535  ;;  %v4492_v11 = vpop.permute.xlu0 %4491 }
 0x34a   :  { %v5625_v9 = vadd.f32 %v5536_v35, %v5409_v39  ;;  %v6633_v8 = vpop.eup %6632  ;;  %v4579_v14 = vadd.f32 %v4492_v11, %v13844_v0  ;;  %v13849_v11 = vld [vmem:[#allocation235_spill] sm:$0xff]  ;;  %vm5912_vm10 = vcmp.lt.s32.totalorder %v11503_v60, 21 }
 0x34b   :  { %v6445_v59 = vadd.f32 -1.0, %v6633_v8  ;;  %v13850_v8 = vld [vmem:[#allocation282_spill] sm:$0xff] }
 0x34c   :  { %4909 = vrot.lane.b32.xlu1 %v13845_v56, %s6757_s10  ;;  %5573 = vrot.lane.b32.xlu0 %v13846_v27, %s6757_s10  ;;  %v11500_v10 = vadd.f32 %v13807_v21, %v5625_v9  ;;  %v4747_v45 = vadd.f32 %v13847_v5, %v4579_v14  ;;  %v13851_v14 = vld [vmem:[#allocation283_spill] sm:$0xff] }
 0x34d   :  { %v4494_v18 = vpop.permute.xlu1 %4493  ;;  %v5815_v20 = vmul.f32 1.6732632, %v6445_v59  ;;  %v5150_v49 = vpop.permute.xlu0 %5149 }
 0x34e   :  { %v5730_v7 = vmul.f32 1.442695, %v11500_v10  ;;  %v4580_v39 = vadd.f32 %v4494_v18, %v13848_v30  ;;  %v6635_v35 = vpop.eup %6634  ;;  %v5240_v9 = vadd.f32 %v5150_v49, %v4992_v51  ;;  %v13852_v18 = vld [vmem:[#allocation212_spill] sm:$0xff]  ;;  %v5954_v30 = vsel %vm3450_vm3, %v5878_v15, -inf }
 0x34f   :  { %v5847_v34 = vsel %vm5687_vm2, %v11437_v57, %v5815_v20  ;;  %v6446_v0 = vadd.f32 -1.0, %v6635_v35  ;;  %v13853_v20 = vld [vmem:[#allocation284_spill] sm:$0xff]  ;;  %v4212_v35 = vadd.f32 %v11275_v19, %v11270_v28  ;;  %vm5692_vm12 = vcmp.gt.f32.partialorder %v11500_v10, 0.0 }
 0x350   :  { %5571 = vrot.lane.b32.xlu1 %v13849_v11, %s6757_s10  ;;  %4533 = vrot.lane.b32.xlu0 %v13850_v8, %s6757_s10  ;;  %v4748_v56 = vadd.f32 %v13851_v14, %v4580_v39  ;;  %v5879_v27 = vmul.f32 1.050701, %v5847_v34  ;;  %v5408_v5 = vadd.f32 %v13852_v18, %v5240_v9  ;;  %6636 = vpow2.f32 %v5730_v7  ;;  %v13854_v39 = vld [vmem:[#allocation286_spill] sm:$0xff]  ;;  %v13855_v9 = vld [vmem:[#allocation7_spill] sm:$0xff]  ;;  %v13856_v34 = vld [vmem:[#allocation73_spill] sm:$0xff] }
 0x351   :  { %v4878_v59 = vpop.permute.xlu1 %4877  ;;  %v5816_v51 = vmul.f32 1.6732632, %v6446_v0  ;;  %v4876_v11 = vpop.permute.xlu0 %4875  ;;  %6638 = vpow2.f32 %v5726_v1  ;;  %v13857_v0 = vld [vmem:[#allocation60_spill] sm:$0xff]  ;;  %v4215_v18 = vadd.f32 %v11335_v62, %v11327_v2  ;;  %v13863_v2 = vld [vmem:[#allocation71_spill] sm:$0xff]  ;;  %v13864_v62 = vld [vmem:[#allocation293_spill] sm:$0xff]  ;;  %vm6066_vm2 = vcmask 1041409  }
 0x352   :  { %v4964_v49 = vadd.f32 %v4878_v59, %v4748_v56  ;;  %v5955_v53 = vsel %vm3450_vm3, %v5879_v27, -inf  ;;  %v4963_v57 = vadd.f32 %v4876_v11, %v4747_v45  ;;  %v2741_v14 = vadd.f32 %v13857_v0, %v13856_v34  ;;  %v13858_v45 = vld [vmem:[#allocation144_spill] sm:$0xff]  ;;  %v13859_v11 = vld [vmem:[#allocation287_spill] sm:$0xff] }
 0x353   :  { %v5956_v15 = vmax.f32 %v5954_v30, %v5955_v53  ;;  %v5848_v7 = vsel %vm5688_vm11, %v11452_v42, %v5816_v51  ;;  %v4216_v59 = vadd.f32 %v11320_v3, %v11313_v25  ;;  %v13860_v30 = vld [vmem:[#allocation209_spill] sm:$0xff]  ;;  %v13861_v51 = vld [vmem:[#allocation206_spill] sm:$0xff]  ;;  %v11546_v3 = vadd.f32 %v11204_v47, %v4212_v35 }
 0x354   :  { %4531 = vrot.lane.b32.xlu1 %v13853_v20, %s6757_s10  ;;  %4917 = vrot.lane.b32.xlu0 %v13854_v39, %s6757_s10  ;;  %v4996_v8 = vadd.f32 %v4964_v49, %v13855_v9  ;;  %v5880_v56 = vmul.f32 1.050701, %v5848_v7  ;;  %v4995_v27 = vadd.f32 %v4963_v57, %v13858_v45  ;;  %v13862_v57 = vld [vmem:[#allocation140_spill] sm:$0xff]  ;;  %v2740_v20 = vadd.f32 %v13864_v62, %v13863_v2  ;;  %v13872_v2 = vld [vmem:[#allocation6_spill] sm:$0xff]  ;;  %v13873_v62 = vld [vmem:[#allocation243_spill] sm:$0xff] }
 0x355   :  { %v4496_v1 = vpop.permute.xlu1 %4495  ;;  %v5534_v19 = vpop.permute.xlu0 %5533  ;;  %v11556_v9 = vadd.f32 %v10982_v23, %v2741_v14  ;;  %v11562_v47 = vadd.f32 %v11266_v24, %v4215_v18  ;;  %v13867_v23 = vld [vmem:[#allocation220_spill] sm:$0xff]  ;;  %vm6068_vm11 = vcmask 1042434  }
 0x356   :  { %v4581_v28 = vadd.f32 %v4496_v1, %v13859_v11  ;;  %v5924_v42 = vsel %vm5912_vm10, %v5880_v56, -inf  ;;  %v5624_v53 = vadd.f32 %v5534_v19, %v5408_v5  ;;  %v11559_v56 = vadd.f32 %v11285_v40, %v4216_v59  ;;  %v13866_v1 = vld [vmem:[#allocation288_spill] sm:$0xff]  ;;  %v13868_v59 = vld [vmem:[#allocation289_spill] sm:$0xff] }
 0x357   :  { %v5957_v49 = vsel %vm3450_vm3, %v5924_v42, -inf  ;;  %v11571_v40 = vadd.f32 %v10945_v61, %v2740_v20 }
 0x358   :  { %5189 = vrot.lane.b32.xlu1 %v13860_v30, %s6757_s10  ;;  %4535 = vrot.lane.b32.xlu0 %v13861_v51, %s6757_s10  ;;  %v4749_v25 = vadd.f32 %v13862_v57, %v4581_v28  ;;  %v11550_v39 = vmax.f32 %v5956_v15, %v5957_v49  ;;  %v11553_v5 = vadd.f32 %v13807_v21, %v5624_v53  ;;  %v13865_v15 = vld [vmem:[#allocation126_spill] sm:$0xff]  ;;  %v13870_v51 = vld [vmem:[#allocation52_spill] sm:$0xff] }
 0x359   :  { %v4880_v7 = vpop.permute.xlu1 %4879  ;;  %v5156_v0 = vpop.permute.xlu0 %5155  ;;  %v13869_v30 = vld [vmem:[#allocation290_spill] sm:$0xff] }
 0x35a   :  { %v4965_v34 = vadd.f32 %v4880_v7, %v4749_v25  ;;  %v5728_v35 = vmul.f32 1.442695, %v11553_v5  ;;  %v6637_v45 = vpop.eup %6636  ;;  %v5243_v11 = vadd.f32 %v5156_v0, %v4995_v27  ;;  %v13871_v57 = vld [vmem:[#allocation294_spill] sm:$0xff]  ;;  %v2742_v7 = vadd.f32 %v13873_v62, %v13872_v2 }
 0x35b   :  { %v6639_v28 = vpop.eup %6638  ;;  %v6450_v53 = vadd.f32 -1.0, %v6637_v45  ;;  %v13875_v45 = vld [vmem:[#allocation137_spill] sm:$0xff]  ;;  %v13882_v62 = vld [vmem:[#allocation146_spill] sm:$0xff]  ;;  %vm5691_vm14 = vcmp.gt.f32.partialorder %v11553_v5, 0.0 }
 0x35c   :  { %4915 = vrot.lane.b32.xlu1 %v13865_v15, %s6757_s10  ;;  %4919 = vrot.lane.b32.xlu0 %v13866_v1, %s6757_s10  ;;  %v4997_v14 = vadd.f32 %v4965_v34, %v13867_v23  ;;  %6640 = vpow2.f32 %v5728_v35  ;;  %v5411_v18 = vadd.f32 %v13868_v59, %v5243_v11  ;;  %v6448_v27 = vadd.f32 -1.0, %v6639_v28  ;;  %v13874_v15 = vld [vmem:[#allocation61_spill] sm:$0xff]  ;;  %v13876_v11 = vld [vmem:[#allocation291_spill] sm:$0xff] }
 0x35d   :  { %v5820_v35 = vmul.f32 1.6732632, %v6450_v53 }
 0x35e   :  { %v5158_v19 = vpop.permute.xlu1 %5157  ;;  %v5540_v42 = vpop.permute.xlu0 %5539  ;;  %v5818_v23 = vmul.f32 1.6732632, %v6448_v27 }
 0x35f   :  { %v5244_v24 = vadd.f32 %v5158_v19, %v4996_v8  ;;  %v5627_v49 = vadd.f32 %v5540_v42, %v5411_v18  ;;  %v4217_v8 = vadd.f32 %v11348_v33, %v11345_v44  ;;  %v13877_v19 = vld [vmem:[#allocation255_spill] sm:$0xff]  ;;  %v13878_v44 = vld [vmem:[#allocation226_spill] sm:$0xff] }
 0x360   :  { %5575 = vrot.lane.b32.xlu1 %v13869_v30, %s6757_s10  ;;  %5579 = vrot.lane.b32.xlu0 %v13870_v51, %s6757_s10  ;;  %v5852_v51 = vsel %vm5692_vm12, %v11500_v10, %v5820_v35  ;;  %vm6070_vm12 = vcmask 1043459  }
 0x361   :  { %v5412_v25 = vadd.f32 %v13871_v57, %v5244_v24  ;;  %v11584_v20 = vadd.f32 %v13807_v21, %v5627_v49  ;;  %v11599_v53 = vadd.f32 %v11303_v22, %v4217_v8  ;;  %v13879_v49 = vld [vmem:[#allocation223_spill] sm:$0xff]  ;;  %v5850_v57 = vsel %vm5690_vm13, %v11492_v31, %v5818_v23  ;;  %v13881_v22 = vld [vmem:[#allocation77_spill] sm:$0xff] }
 0x362   :  { %v5160_v61 = vpop.permute.xlu1 %5159  ;;  %v4500_v0 = vpop.permute.xlu0 %4499  ;;  %v5884_v35 = vmul.f32 1.050701, %v5852_v51  ;;  %v5882_v31 = vmul.f32 1.050701, %v5850_v57  ;;  %v13889_v51 = vld [vmem:[#allocation151_spill] sm:$0xff] }
 0x363   :  { %v5245_v34 = vadd.f32 %v5160_v61, %v4997_v14  ;;  %v4583_v1 = vadd.f32 %v4500_v0, %v13874_v15  ;;  %v5734_v28 = vmul.f32 1.442695, %v11584_v20  ;;  %v11595_v14 = vadd.f32 %v10920_v55, %v2742_v7  ;;  %v13880_v55 = vld [vmem:[#allocation28_spill] sm:$0xff]  ;;  %v13883_v61 = vld [vmem:[#allocation155_spill] sm:$0xff] }
 0x364   :  { %5195 = vrot.lane.b32.xlu1 %v13875_v45, %s6757_s10  ;;  %5197 = vrot.lane.b32.xlu0 %v13876_v11, %s6757_s10  ;;  %v2743_v7 = vadd.f32 %v13882_v62, %v13881_v22  ;;  %v2745_v8 = vadd.f32 %v10913_v58, %v13883_v61  ;;  %v13887_v58 = vld [vmem:[#allocation161_spill] sm:$0xff]  ;;  %v5967_v22 = vsel %vm3450_vm3, %v5882_v31, -inf  ;;  %vm5694_vm15 = vcmp.gt.f32.partialorder %v11584_v20, 0.0 }
 0x365   :  { %v5413_v24 = vadd.f32 %v13877_v19, %v5245_v34  ;;  %v4751_v59 = vadd.f32 %v13878_v44, %v4583_v1  ;;  %6642 = vpow2.f32 %v5734_v28  ;;  %v13884_v34 = vld [vmem:[#allocation141_spill] sm:$0xff]  ;;  %v13885_v28 = vld [vmem:[#allocation16_spill] sm:$0xff]  ;;  %v13886_v19 = vld [vmem:[#allocation131_spill] sm:$0xff] }
 0x366   :  { %v5542_v33 = vpop.permute.xlu1 %5541  ;;  %v4884_v42 = vpop.permute.xlu0 %4883 }
 0x367   :  { %v5628_v18 = vadd.f32 %v5542_v33, %v5412_v25  ;;  %v6641_v30 = vpop.eup %6640  ;;  %v4967_v27 = vadd.f32 %v4884_v42, %v4751_v59  ;;  %v2744_v33 = vadd.f32 %v10975_v43, %v13887_v58  ;;  %v13888_v42 = vld [vmem:[#allocation250_spill] sm:$0xff] }
 0x368   :  { %5199 = vrot.lane.b32.xlu1 %v13879_v49, %s6757_s10  ;;  %5583 = vrot.lane.b32.xlu0 %v13880_v55, %s6757_s10  ;;  %v6449_v2 = vadd.f32 -1.0, %v6641_v30  ;;  %v11633_v49 = vadd.f32 %v11009_v32, %v2745_v8  ;;  %v5928_v55 = vsel %vm5912_vm10, %v5884_v35, -inf  ;;  %v13894_v58 = vld [vmem:[#allocation138_spill] sm:$0xff] }
 0x369   :  { %v11609_v25 = vadd.f32 %v13807_v21, %v5628_v18  ;;  %v4999_v0 = vadd.f32 %v4967_v27, %v13884_v34  ;;  %v11630_v27 = vadd.f32 %v13889_v51, %v2743_v7  ;;  %v13892_v7 = vld [vmem:[#allocation177_spill] sm:$0xff]  ;;  %v13893_v34 = vld [vmem:[#allocation207_spill] sm:$0xff]  ;;  %v5970_v35 = vsel %vm3450_vm3, %v5928_v55, -inf }
 0x36a   :  { %v5544_v10 = vpop.permute.xlu1 %5543  ;;  %v5819_v15 = vmul.f32 1.6732632, %v6449_v2  ;;  %v5164_v11 = vpop.permute.xlu0 %5163 }
 0x36b   :  { %v5736_v1 = vmul.f32 1.442695, %v11609_v25  ;;  %v5629_v45 = vadd.f32 %v5544_v10, %v5413_v24  ;;  %v5247_v23 = vadd.f32 %v5164_v11, %v4999_v0  ;;  %v13891_v10 = vld [vmem:[#allocation103_spill] sm:$0xff]  ;;  %vm5695_vm1 = vcmp.gt.f32.partialorder %v11609_v25, 0.0 }
 0x36c   :  { %5581 = vrot.lane.b32.xlu1 %v13885_v28, %s6757_s10  ;;  %3040 = vrot.lane.b32.xlu0 %v13886_v19, %s6757_s10  ;;  %v5851_v44 = vsel %vm5691_vm14, %v11553_v5, %v5819_v15  ;;  %v13890_v5 = vld [vmem:[#allocation136_spill] sm:$0xff]  ;;  %vm6072_vm14 = vcmask 1044484  }
 0x36d   :  { %6644 = vpow2.f32 %v5736_v1  ;;  %v11626_v59 = vadd.f32 %v13807_v21, %v5629_v45  ;;  %v5883_v24 = vmul.f32 1.050701, %v5851_v44  ;;  %v5415_v30 = vadd.f32 %v13888_v42, %v5247_v23  ;;  %v13895_v44 = vld [vmem:[#allocation87_spill] sm:$0xff]  ;;  %v13897_v42 = vld [vmem:[#allocation162_spill] sm:$0xff] }
 0x36e   :  { %v4502_v18 = vpop.permute.xlu1 %4501  ;;  %v5548_v2 = vpop.permute.xlu0 %5547  ;;  %v11648_v45 = vadd.f32 %v11001_v46, %v2744_v33  ;;  %v13898_v33 = vld [vmem:[#allocation8_spill] sm:$0xff] }
 0x36f   :  { %v5738_v43 = vmul.f32 1.442695, %v11626_v59  ;;  %v4584_v57 = vadd.f32 %v4502_v18, %v13890_v5  ;;  %v5968_v62 = vsel %vm3450_vm3, %v5883_v24, -inf  ;;  %v5631_v61 = vadd.f32 %v5548_v2, %v5415_v30  ;;  %v6643_v32 = vpop.eup %6642  ;;  %v13896_v24 = vld [vmem:[#allocation232_spill] sm:$0xff] }
 0x370   :  { %3028 = vrot.lane.b32.xlu1 %v13891_v10, %s6757_s10  ;;  %2676 = vrot.lane.b32.xlu0 %v13892_v7, %s6757_s10  ;;  %v5969_v8 = vmax.f32 %v5967_v22, %v5968_v62  ;;  %v6452_v15 = vadd.f32 -1.0, %v6643_v32  ;;  %v2746_v30 = vadd.f32 %v11096_v52, %v13897_v42  ;;  %v13900_v62 = vld [vmem:[#allocation180_spill] sm:$0xff]  ;;  %v13901_v10 = vld [vmem:[#allocation122_spill] sm:$0xff]  ;;  %v13902_v52 = vld [vmem:[#allocation237_spill] sm:$0xff]  ;;  %vm5696_vm4 = vcmp.gt.f32.partialorder %v11626_v59, 0.0 }
 0x371   :  { %6646 = vpow2.f32 %v5738_v43  ;;  %v4752_v0 = vadd.f32 %v13893_v34, %v4584_v57  ;;  %v13899_v43 = vld [vmem:[#allocation164_spill] sm:$0xff]  ;;  %v13903_v32 = vld [vmem:[#allocation21_spill] sm:$0xff]  ;;  %v13907_v42 = vld [vmem:[#allocation27_spill] sm:$0xff] }
 0x372   :  { %v4886_v1 = vpop.permute.xlu1 %4885  ;;  %v11650_v11 = vmax.f32 %v5969_v8, %v5970_v35  ;;  %v4508_v23 = vpop.permute.xlu0 %4507  ;;  %v5822_v28 = vmul.f32 1.6732632, %v6452_v15  ;;  %v2747_v8 = vadd.f32 %v11110_v17, %v13903_v32  ;;  %v13904_v35 = vld [vmem:[#allocation160_spill] sm:$0xff]  ;;  %v13912_v32 = vld [vmem:[#allocation54_spill] sm:$0xff] }
 0x373   :  { %v4968_v31 = vadd.f32 %v4886_v1, %v4752_v0  ;;  %v4587_v19 = vadd.f32 %v4508_v23, %v11063_v48  ;;  %v11673_v1 = vadd.f32 %v10973_v38, %v2746_v30  ;;  %v13905_v17 = vld [vmem:[#allocation104_spill] sm:$0xff] }
 0x374   :  { %3042 = vrot.lane.b32.xlu1 %v13894_v58, %s6757_s10  ;;  %3022 = vrot.lane.b32.xlu0 %v13895_v44, %s6757_s10  ;;  %v5854_v57 = vsel %vm5694_vm15, %v11584_v20, %v5822_v28  ;;  %v11678_v44 = vadd.f32 %v13807_v21, %v5631_v61 }
 0x375   :  { %v5000_v18 = vadd.f32 %v4968_v31, %v13896_v24  ;;  %v4755_v51 = vadd.f32 %v13898_v33, %v4587_v19  ;;  %v5886_v31 = vmul.f32 1.050701, %v5854_v57  ;;  %v13906_v24 = vld [vmem:[#allocation181_spill] sm:$0xff] }
 0x376   :  { %v4504_v46 = vpop.permute.xlu1 %4503  ;;  %v4892_v48 = vpop.permute.xlu0 %4891  ;;  %v5742_v57 = vmul.f32 1.442695, %v11678_v44 }
 0x377   :  { %v6645_v55 = vpop.eup %6644  ;;  %v4585_v5 = vadd.f32 %v4504_v46, %v13899_v43  ;;  %v4971_v22 = vadd.f32 %v4892_v48, %v4755_v51  ;;  %v11686_v51 = vadd.f32 %v10966_v36, %v2747_v8  ;;  %v13909_v36 = vld [vmem:[#allocation188_spill] sm:$0xff] }
 0x378   :  { %v6453_v2 = vadd.f32 -1.0, %v6645_v55  ;;  %2682 = vrot.lane.b32.xlu1 %v13900_v62, %s6757_s10  ;;  %3036 = vrot.lane.b32.xlu0 %v13901_v10, %s6757_s10  ;;  %v13910_v10 = vld [vmem:[#allocation80_spill] sm:$0xff]  ;;  %6648 = vpow2.f32 %v5742_v57 }
 0x379   :  { %v4753_v7 = vadd.f32 %v13902_v52, %v4585_v5  ;;  %v5003_v15 = vadd.f32 %v4971_v22, %v13904_v35  ;;  %v13908_v22 = vld [vmem:[#allocation149_spill] sm:$0xff] }
 0x37a   :  { %v5823_v34 = vmul.f32 1.6732632, %v6453_v2  ;;  %v4888_v0 = vpop.permute.xlu1 %4887  ;;  %v5552_v28 = vpop.permute.xlu0 %5551 }
 0x37b   :  { %v6647_v20 = vpop.eup %6646  ;;  %v4969_v23 = vadd.f32 %v4888_v0, %v4753_v7  ;;  %v13911_v7 = vld [vmem:[#allocation172_spill] sm:$0xff] }
 0x37c   :  { %v5855_v19 = vsel %vm5695_vm1, %v11609_v25, %v5823_v34  ;;  %v6454_v58 = vadd.f32 -1.0, %v6647_v20  ;;  %3030 = vrot.lane.b32.xlu1 %v13905_v17, %s6757_s10  ;;  %3050 = vrot.lane.b32.xlu0 %v13906_v24, %s6757_s10  ;;  %v5980_v25 = vsel %vm3450_vm3, %v5886_v31, -inf  ;;  %v13913_v34 = vld [vmem:[#allocation230_spill] sm:$0xff]  ;;  %v13916_v17 = vld [vmem:[#allocation231_spill] sm:$0xff] }
 0x37d   :  { %v5887_v38 = vmul.f32 1.050701, %v5855_v19  ;;  %v5001_v30 = vadd.f32 %v4969_v23, %v13907_v42  ;;  %v13914_v23 = vld [vmem:[#allocation198_spill] sm:$0xff]  ;;  %v13918_v42 = vld [vmem:[#allocation81_spill] sm:$0xff] }
 0x37e   :  { %v5824_v46 = vmul.f32 1.6732632, %v6454_v58  ;;  %v5166_v33 = vpop.permute.xlu1 %5165  ;;  %v4512_v43 = vpop.permute.xlu0 %4511  ;;  %v13915_v19 = vld [vmem:[#allocation150_spill] sm:$0xff] }
 0x37f   :  { %v5981_v55 = vsel %vm3450_vm3, %v5887_v38, -inf  ;;  %v5248_v61 = vadd.f32 %v5166_v33, %v5000_v18  ;;  %v4589_v2 = vadd.f32 %v4512_v43, %v11128_v6  ;;  %v2748_v18 = vadd.f32 %v13912_v32, %v13911_v7  ;;  %v13917_v38 = vld [vmem:[#allocation184_spill] sm:$0xff]  ;;  %v13923_v7 = vld [vmem:[#allocation53_spill] sm:$0xff] }
 0x380   :  { %v5982_v5 = vmax.f32 %v5980_v25, %v5981_v55  ;;  %v5856_v48 = vsel %vm5696_vm4, %v11626_v59, %v5824_v46  ;;  %3048 = vrot.lane.b32.xlu1 %v13908_v22, %s6757_s10  ;;  %2690 = vrot.lane.b32.xlu0 %v13909_v36, %s6757_s10  ;;  %v2750_v46 = vadd.f32 %v13918_v42, %v13917_v38  ;;  %v13920_v55 = vld [vmem:[#allocation47_spill] sm:$0xff]  ;;  %v13921_v22 = vld [vmem:[#allocation125_spill] sm:$0xff]  ;;  %v13929_v38 = vld [vmem:[#allocation26_spill] sm:$0xff] }
 0x381   :  { %v5888_v62 = vmul.f32 1.050701, %v5856_v48  ;;  %v5416_v52 = vadd.f32 %v13910_v10, %v5248_v61  ;;  %v4757_v0 = vadd.f32 %v13913_v34, %v4589_v2  ;;  %v11716_v61 = vadd.f32 %v13920_v55, %v2748_v18  ;;  %v13924_v18 = vld [vmem:[#allocation135_spill] sm:$0xff] }
 0x382   :  { %v5168_v8 = vpop.permute.xlu1 %5167  ;;  %v4896_v6 = vpop.permute.xlu0 %4895  ;;  %v13930_v42 = vrot.slane %v13929_v38, 5 }
 0x383   :  { %v5932_v59 = vsel %vm5912_vm10, %v5888_v62, -inf  ;;  %v5249_v35 = vadd.f32 %v5168_v8, %v5001_v30  ;;  %v4973_v31 = vadd.f32 %v4896_v6, %v4757_v0  ;;  %v13919_v30 = vld [vmem:[#allocation260_spill] sm:$0xff]  ;;  %v6649_v6 = vpop.eup %6648 }
 0x384   :  { %v5983_v20 = vsel %vm3450_vm3, %v5932_v59, -inf  ;;  %2684 = vrot.lane.b32.xlu1 %v13914_v23, %s6757_s10  ;;  %3044 = vrot.lane.b32.xlu0 %v13915_v19, %s6757_s10  ;;  %v13925_v59 = vld [vmem:[#allocation246_spill] sm:$0xff]  ;;  %v13928_v19 = vld [vmem:[#allocation99_spill] sm:$0xff]  ;;  %v6456_v55 = vadd.f32 -1.0, %v6649_v6 }
 0x385   :  { %v11709_v58 = vmax.f32 %v5982_v5, %v5983_v20  ;;  %v5417_v24 = vadd.f32 %v13916_v17, %v5249_v35  ;;  %v5005_v25 = vadd.f32 %v4973_v31, %v13919_v30  ;;  %v13922_v5 = vld [vmem:[#allocation238_spill] sm:$0xff]  ;;  %v13927_v20 = vld [vmem:[#allocation168_spill] sm:$0xff] }
 0x386   :  { %v5550_v33 = vpop.permute.xlu1 %5549  ;;  %v5172_v57 = vpop.permute.xlu0 %5171  ;;  %v13926_v35 = vld [vmem:[#allocation242_spill] sm:$0xff] }
 0x387   :  { %v5633_v43 = vadd.f32 %v5552_v28, %v5417_v24  ;;  %v5632_v48 = vadd.f32 %v5550_v33, %v5416_v52  ;;  %v5251_v2 = vadd.f32 %v5172_v57, %v5003_v15  ;;  %v11730_v28 = vadd.f32 %v13924_v18, %v2750_v46 }
 0x388   :  { %3038 = vrot.lane.b32.xlu1 %v13921_v22, %s6757_s10  ;;  %3058 = vrot.lane.b32.xlu0 %v13922_v5, %s6757_s10  ;;  %v13936_v22 = vld [vmem:[#allocation253_spill] sm:$0xff] }
 0x389   :  { %v11723_v36 = vadd.f32 %v13807_v21, %v5633_v43  ;;  %v11726_v62 = vadd.f32 %v13807_v21, %v5632_v48  ;;  %v5419_v32 = vadd.f32 %v13923_v7, %v5251_v2  ;;  %v13934_v43 = vld [vmem:[#allocation36_spill] sm:$0xff]  ;;  %v13935_v48 = vld [vmem:[#allocation153_spill] sm:$0xff] }
 0x38a   :  { %v4510_v10 = vpop.permute.xlu1 %4509  ;;  %v5176_v52 = vpop.permute.xlu0 %5175  ;;  %v2751_v57 = vadd.f32 %v13935_v48, %v13934_v43  ;;  %v13945_v48 = vld [vmem:[#allocation94_spill] sm:$0xff] }
 0x38b   :  { %v5746_v15 = vmul.f32 1.442695, %v11723_v36  ;;  %v5744_v8 = vmul.f32 1.442695, %v11726_v62  ;;  %v4588_v34 = vadd.f32 %v4510_v10, %v11368_v4  ;;  %v5253_v0 = vadd.f32 %v5176_v52, %v5005_v25  ;;  %v13931_v4 = vld [vmem:[#allocation30_spill] sm:$0xff]  ;;  %v13933_v25 = vld [vmem:[#allocation236_spill] sm:$0xff] }
 0x38c   :  { %3056 = vrot.lane.b32.xlu1 %v13925_v59, %s6757_s10  ;;  %3046 = vrot.lane.b32.xlu0 %v13926_v35, %s6757_s10  ;;  %v13932_v46 = vrot.slane %v13931_v4, 5  ;;  %v13938_v52 = vld [vmem:[#allocation68_spill] sm:$0xff]  ;;  %v13940_v59 = vld [vmem:[#allocation35_spill] sm:$0xff]  ;;  %vm5700_vm5 = vcmp.gt.f32.partialorder %v11723_v36, 0.0  ;;  %vm5699_vm6 = vcmp.gt.f32.partialorder %v11726_v62, 0.0 }
 0x38d   :  { %6650 = vpow2.f32 %v5746_v15  ;;  %v4756_v31 = vadd.f32 %v13927_v20, %v4588_v34  ;;  %v11741_v17 = vadd.f32 %v13928_v19, %v5253_v0  ;;  %v13937_v15 = vld [vmem:[#allocation252_spill] sm:$0xff]  ;;  %v13939_v0 = vld [vmem:[#allocation46_spill] sm:$0xff]  ;;  %v13941_v20 = vld [vmem:[#allocation17_spill] sm:$0xff] }
 0x38e   :  { %6652 = vpow2.f32 %v5744_v8  ;;  %v4894_v23 = vpop.permute.xlu1 %4893  ;;  %v5558_v24 = vpop.permute.xlu0 %5557  ;;  %v2621_v33 = vsel %vm384_vm0, %v13932_v46, %v13930_v42  ;;  %v5826_v8 = vmul.f32 1.6732632, %v6456_v55  ;;  %v2754_v35 = vadd.f32 %v13940_v59, %v13939_v0 }
 0x38f   :  { %v4972_v30 = vadd.f32 %v4894_v23, %v4756_v31  ;;  %vm5698_vm0 = vcmp.gt.f32.partialorder %v11678_v44, 0.0 }
 0x390   :  { %2692 = vrot.lane.b32.xlu1 %v2621_v33, %s6757_s10  ;;  %3064 = vrot.lane.b32.xlu0 %v13933_v25, %s6757_s10  ;;  %v13944_v25 = vld [vmem:[#allocation159_spill] sm:$0xff]  ;;  %v5858_v55 = vsel %vm5698_vm0, %v11678_v44, %v5826_v8  ;;  %vm6074_vm0 = vcmask 1045509  }
 0x391   :  { %v5004_v5 = vadd.f32 %v4972_v30, %v13936_v22  ;;  %v13943_v30 = vld [vmem:[#allocation227_spill] sm:$0xff]  ;;  %v5890_v44 = vmul.f32 1.050701, %v5858_v55 }
 0x392   :  { %v5556_v2 = vpop.permute.xlu1 %5555  ;;  %v4518_v7 = vpop.permute.xlu0 %4517  ;;  %v13946_v22 = vld [vmem:[#allocation267_spill] sm:$0xff] }
 0x393   :  { %v5635_v10 = vadd.f32 %v5556_v2, %v5419_v32  ;;  %v4592_v18 = vadd.f32 %v4518_v7, %v11396_v50  ;;  %v13942_v32 = vld [vmem:[#allocation178_spill] sm:$0xff]  ;;  %v13947_v7 = vld [vmem:[#allocation163_spill] sm:$0xff] }
 0x394   :  { %3052 = vrot.lane.b32.xlu1 %v13937_v15, %s6757_s10  ;;  %3054 = vrot.lane.b32.xlu0 %v13938_v52, %s6757_s10  ;;  %v11766_v23 = vadd.f32 %v13942_v32, %v2751_v57  ;;  %v5961_v15 = vrot.slane %v11550_v39, 4  ;;  %v13950_v32 = vld [vmem:[#allocation128_spill] sm:$0xff] }
 0x395   :  { %v11760_v34 = vadd.f32 %v13807_v21, %v5635_v10  ;;  %v4760_v31 = vadd.f32 %v13941_v20, %v4592_v18  ;;  %v11779_v18 = vadd.f32 %v13947_v7, %v2754_v35  ;;  %v13949_v20 = vld [vmem:[#allocation176_spill] sm:$0xff]  ;;  %v13954_v7 = vld [vmem:[#allocation58_spill] sm:$0xff] }
 0x396   :  { %v4516_v6 = vpop.permute.xlu1 %4515  ;;  %v4902_v42 = vpop.permute.xlu0 %4901 }
 0x397   :  { %v6651_v50 = vpop.eup %6650  ;;  %v5750_v19 = vmul.f32 1.442695, %v11760_v34  ;;  %v4591_v38 = vadd.f32 %v4516_v6, %v11399_v54  ;;  %v4976_v33 = vadd.f32 %v4902_v42, %v4760_v31  ;;  %v13948_v6 = vld [vmem:[#allocation158_spill] sm:$0xff]  ;;  %v5974_v42 = vrot.slane %v11650_v11, 4 }
 0x398   :  { %v6653_v4 = vpop.eup %6652  ;;  %v6458_v46 = vadd.f32 -1.0, %v6651_v50  ;;  %3066 = vrot.lane.b32.xlu1 %v13943_v30, %s6757_s10  ;;  %3072 = vrot.lane.b32.xlu0 %v13944_v25, %s6757_s10  ;;  %vm5702_vm7 = vcmp.gt.f32.partialorder %v11760_v34, 0.0 }
 0x399   :  { %v6457_v43 = vadd.f32 -1.0, %v6653_v4  ;;  %6654 = vpow2.f32 %v5750_v19  ;;  %v4759_v57 = vadd.f32 %v13945_v48, %v4591_v38  ;;  %v5008_v10 = vadd.f32 %v4976_v33, %v13946_v22  ;;  %v13951_v19 = vld [vmem:[#allocation208_spill] sm:$0xff]  ;;  %v13953_v22 = vld [vmem:[#allocation130_spill] sm:$0xff] }
 0x39a   :  { %v5828_v2 = vmul.f32 1.6732632, %v6458_v46  ;;  %v5174_v54 = vpop.permute.xlu1 %5173  ;;  %v11783_v59 = vpop.permute.xlu0 %5563  ;;  %v5962_v33 = vmax.f32 %v11550_v39, %v5961_v15 }
 0x39b   :  { %v5827_v52 = vmul.f32 1.6732632, %v6457_v43  ;;  %v5252_v0 = vadd.f32 %v5174_v54, %v5004_v5  ;;  %v13952_v5 = vld [vmem:[#allocation217_spill] sm:$0xff] }
 0x39c   :  { %v5860_v8 = vsel %vm5700_vm5, %v11723_v36, %v5828_v2  ;;  %3060 = vrot.lane.b32.xlu1 %v13948_v6, %s6757_s10  ;;  %3062 = vrot.lane.b32.xlu0 %v13949_v20, %s6757_s10  ;;  %v2755_v38 = vadd.f32 %v13952_v5, %v13951_v19  ;;  %v5987_v36 = vrot.slane %v11709_v58, 4  ;;  %v6100_v5 = vld [vmem:[%s12368_s3] sm:$0xff] }
 0x39d   :  { %v5892_v35 = vmul.f32 1.050701, %v5860_v8  ;;  %v5859_v31 = vsel %vm5699_vm6, %v11726_v62, %v5827_v52  ;;  %v5420_v50 = vadd.f32 %v13950_v32, %v5252_v0  ;;  %v5993_v62 = vsel %vm3450_vm3, %v5890_v44, -inf  ;;  %v13956_v8 = vld [vmem:[#allocation170_spill] sm:$0xff] }
 0x39e   :  { %v5891_v4 = vmul.f32 1.050701, %v5859_v31  ;;  %v4900_v46 = vpop.permute.xlu1 %4899  ;;  %v4524_v43 = vpop.permute.xlu0 %4523  ;;  %v5975_v52 = vmax.f32 %v11650_v11, %v5974_v42  ;;  %v5988_v0 = vmax.f32 %v11709_v58, %v5987_v36  ;;  %v6101_v11 = vld [vmem:[%s12368_s3 + $0x8] sm:$0xff]  ;;  %v5963_v58 = vrot.slane %v5962_v33, 2  ;;  %v13959_v36 = vld [vmem:[#allocation182_spill] sm:$0xff] }
 0x39f   :  { %v5936_v30 = vsel %vm5912_vm10, %v5892_v35, -inf  ;;  %v5636_v25 = vadd.f32 %v5558_v24, %v5420_v50  ;;  %v4975_v55 = vadd.f32 %v4900_v46, %v4759_v57  ;;  %v4595_v54 = vadd.f32 %v4524_v43, %v11423_v37  ;;  %v13955_v24 = vld [vmem:[#allocation93_spill] sm:$0xff]  ;;  %v13957_v37 = vld [vmem:[#allocation211_spill] sm:$0xff] }
 0x3a0   :  { %v5994_v48 = vsel %vm3450_vm3, %v5891_v4, -inf  ;;  %v5996_v2 = vsel %vm3450_vm3, %v5936_v30, -inf  ;;  %3074 = vrot.lane.b32.xlu1 %v13953_v22, %s6757_s10  ;;  %3070 = vrot.lane.b32.xlu0 %v13954_v7, %s6757_s10  ;;  %v11816_v20 = vadd.f32 %v13957_v37, %v2755_v38  ;;  %v13958_v38 = vld [vmem:[#allocation156_spill] sm:$0xff]  ;;  %v6580_v4 = vpack.c.bf16 %v6101_v11, %v6100_v5  ;;  %v13963_v5 = vld [vmem:[#allocation97_spill] sm:$0xff] }
 0x3a1   :  { %v5995_v39 = vmax.f32 %v5993_v62, %v5994_v48  ;;  %v11809_v15 = vadd.f32 %v13807_v21, %v5636_v25  ;;  %v5007_v57 = vadd.f32 %v4975_v55, %v13955_v24  ;;  %v4763_v6 = vadd.f32 %v13956_v8, %v4595_v54 }
 0x3a2   :  { %v5560_v44 = vpop.permute.xlu1 %5559  ;;  %v5182_v19 = vpop.permute.xlu0 %5181  ;;  %v6758_v25 = vmov 0.0|0.0   ;;  %v5976_v55 = vrot.slane %v5975_v52, 2  ;;  %v5989_v43 = vrot.slane %v5988_v0, 2 }
 0x3a3   :  { %v6655_v35 = vpop.eup %6654  ;;  %v5997_v31 = vmax.f32 %v5995_v39, %v5996_v2  ;;  %v5752_v32 = vmul.f32 1.442695, %v11809_v15  ;;  %v5637_v50 = vadd.f32 %v5560_v44, %v11741_v17  ;;  %v5256_v42 = vadd.f32 %v5182_v19, %v5008_v10  ;;  %6579 = vmatprep.subr.bf16.mxu1 %v6758_v25  ;;  %v13960_v10 = vld [vmem:[#allocation132_spill] sm:$0xff]  ;;  %v13961_v44 = vld [vmem:[#allocation185_spill] sm:$0xff] }
 0x3a4   :  { %3068 = vrot.lane.b32.xlu1 %v13958_v38, %s6757_s10  ;;  %3078 = vrot.lane.b32.xlu0 %v13959_v36, %s6757_s10  ;;  %v6460_v17 = vadd.f32 -1.0, %v6655_v35  ;;  %v5964_v39 = vmax.f32 %v5962_v33, %v5963_v58  ;;  %v13962_v35 = vld [vmem:[#allocation14_spill] sm:$0xff]  ;;  %v5990_v19 = vmax.f32 %v5988_v0, %v5989_v43  ;;  %v13964_v58 = vld [vmem:[#allocation271_spill] sm:$0xff]  ;;  %vm5703_vm8 = vcmp.gt.f32.partialorder %v11809_v15, 0.0 }
 0x3a5   :  { %v6000_v46 = vrot.slane %v5997_v31, 4  ;;  %6656 = vpow2.f32 %v5752_v32  ;;  %v11831_v30 = vadd.f32 %v13807_v21, %v5637_v50  ;;  %v11835_v48 = vadd.f32 %v13960_v10, %v5256_v42  ;;  %6581 = vmatpush3.bf16.msra.mxu1 %v6580_v4 }
 0x3a6   :  { %v4520_v62 = vpop.permute.xlu1 %4519  ;;  %v4908_v7 = vpop.permute.xlu0 %4907  ;;  %6582 = vmatprep.subr.bf16.mxu1 %v6758_v25  ;;  %v5830_v37 = vmul.f32 1.6732632, %v6460_v17  ;;  %v5977_v50 = vmax.f32 %v5975_v52, %v5976_v55  ;;  %v5965_v38 = vrot.slane %v5964_v39, 1 }
 0x3a7   :  { %v6001_v2 = vmax.f32 %v5997_v31, %v6000_v46  ;;  %v5754_v54 = vmul.f32 1.442695, %v11831_v30  ;;  %v4593_v22 = vadd.f32 %v4520_v62, %v11466_v16  ;;  %v4979_v24 = vadd.f32 %v4908_v7, %v4763_v6  ;;  %v13965_v7 = vld [vmem:[#allocation143_spill] sm:$0xff] }
 0x3a8   :  { %3076 = vrot.lane.b32.xlu1 %v13961_v44, %s6757_s10  ;;  %v5862_v6 = vsel %vm5702_vm7, %v11760_v34, %v5830_v37  ;;  %v5978_v4 = vrot.slane %v5977_v50, 1  ;;  %v5991_v46 = vrot.slane %v5990_v19, 1  ;;  %v13966_v37 = vld [vmem:[#allocation116_spill] sm:$0xff]  ;;  %vm5704_vm9 = vcmp.gt.f32.partialorder %v11831_v30, 0.0 }
 0x3a9   :  { %v6002_v8 = vrot.slane %v6001_v2, 2  ;;  %6658 = vpow2.f32 %v5754_v54  ;;  %v4761_v32 = vadd.f32 %v13962_v35, %v4593_v22  ;;  %v5011_v11 = vadd.f32 %v4979_v24, %v13963_v5 }
 0x3aa   :  { %v4904_v31 = vpop.permute.xlu1 %4903  ;;  %v5568_v16 = vpop.permute.xlu0 %5567  ;;  %v5894_v0 = vmul.f32 1.050701, %v5862_v6  ;;  %v5966_v54 = vmax.f32 %v5964_v39, %v5965_v38  ;;  %v5979_v44 = vmax.f32 %v5977_v50, %v5978_v4  ;;  %v13967_v6 = vld [vmem:[#allocation190_spill] sm:$0xff] }
 0x3ab   :  { %v4977_v42 = vadd.f32 %v4904_v31, %v4761_v32  ;;  %v6003_v33 = vmax.f32 %v6001_v2, %v6002_v8  ;;  %v5992_v2 = vmax.f32 %v5990_v19, %v5991_v46 }
 0x3ad   :  { %v5009_v36 = vadd.f32 %v4977_v42, %v13964_v58  ;;  %v6004_v22 = vrot.slane %v6003_v33, 1 }
 0x3ae   :  { %v5180_v17 = vpop.permute.xlu1 %5179  ;;  %v4528_v52 = vpop.permute.xlu0 %4527 }
 0x3af   :  { %v6657_v62 = vpop.eup %6656  ;;  %v5255_v10 = vadd.f32 %v5180_v17, %v5007_v57  ;;  %v4597_v43 = vadd.f32 %v4528_v52, %v11480_v26  ;;  %v6006_v26 = vsel %vm3450_vm3, %v5894_v0, -inf  ;;  %v6005_v4 = vmax.f32 %v6003_v33, %v6004_v22  ;;  %v6102_v0 = vld [vmem:[%s12368_s3 + $0x10] sm:$0xff]  ;;  %v6103_v33 = vld [vmem:[%s12368_s3 + $0x18] sm:$0xff] }
 0x3b0   :  { %v6461_v55 = vadd.f32 -1.0, %v6657_v62  ;;  %v13968_v62 = vld [vmem:[#allocation169_spill] sm:$0xff] }
 0x3b1   :  { %v5423_v24 = vadd.f32 %v13965_v7, %v5255_v10  ;;  %v4765_v35 = vadd.f32 %v13966_v37, %v4597_v43 }
 0x3b2   :  { %v5831_v8 = vmul.f32 1.6732632, %v6461_v55  ;;  %v5184_v34 = vpop.permute.xlu1 %5183  ;;  %v4912_v5 = vpop.permute.xlu0 %4911 }
 0x3b3   :  { %v6659_v32 = vpop.eup %6658  ;;  %v5639_v57 = vadd.f32 %v11783_v59, %v5423_v24  ;;  %v5257_v31 = vadd.f32 %v5184_v34, %v5009_v36  ;;  %v4981_v50 = vadd.f32 %v4912_v5, %v4765_v35  ;;  %v13969_v35 = vld [vmem:[#allocation112_spill] sm:$0xff] }
 0x3b4   :  { %v5863_v39 = vsel %vm5703_vm8, %v11809_v15, %v5831_v8  ;;  %v6462_v42 = vadd.f32 -1.0, %v6659_v32  ;;  %v6089_v8 = vsel %vm6066_vm2, %v5979_v44, %v5966_v54 }
 0x3b5   :  { %v5895_v19 = vmul.f32 1.050701, %v5863_v39  ;;  %v11856_v38 = vadd.f32 %v13807_v21, %v5639_v57  ;;  %v5425_v58 = vadd.f32 %v13967_v6, %v5257_v31  ;;  %v5013_v10 = vadd.f32 %v4981_v50, %v13968_v62  ;;  %v13971_v6 = vld [vmem:[#allocation147_spill] sm:$0xff] }
 0x3b6   :  { %v5832_v46 = vmul.f32 1.6732632, %v6462_v42  ;;  %v5566_v17 = vpop.permute.xlu1 %5565  ;;  %v5188_v52 = vpop.permute.xlu0 %5187  ;;  %v6090_v57 = vsel %vm6068_vm11, %v5992_v2, %v6089_v8  ;;  %v13970_v42 = vld [vmem:[#allocation32_spill] sm:$0xff] }
 0x3b7   :  { %v6007_v59 = vsel %vm3450_vm3, %v5895_v19, -inf  ;;  %v5758_v36 = vmul.f32 1.442695, %v11856_v38  ;;  %v5641_v15 = vadd.f32 %v5568_v16, %v5425_v58  ;;  %v5640_v22 = vadd.f32 %v5566_v17, %v11835_v48  ;;  %v13973_v8 = vld [vmem:[#allocation256_spill] sm:$0xff] }
 0x3b8   :  { %v5864_v55 = vsel %vm5704_vm9, %v11831_v30, %v5832_v46  ;;  %v6008_v43 = vmax.f32 %v6006_v26, %v6007_v59  ;;  %v5259_v7 = vadd.f32 %v5188_v52, %v5011_v11  ;;  %v6583_v30 = vpack.c.bf16 %v6103_v33, %v6102_v0  ;;  %v13972_v59 = vld [vmem:[#allocation100_spill] sm:$0xff] }
 0x3b9   :  { %v5896_v24 = vmul.f32 1.050701, %v5864_v55  ;;  %6660 = vpow2.f32 %v5758_v36  ;;  %v11873_v16 = vadd.f32 %v13807_v21, %v5641_v15  ;;  %v11877_v34 = vadd.f32 %v13807_v21, %v5640_v22 }
 0x3ba   :  { %v4526_v37 = vpop.permute.xlu1 %4525  ;;  %v5427_v32 = vadd.f32 %v13969_v35, %v5259_v7  ;;  %v5192_v5 = vpop.permute.xlu0 %5191  ;;  %6584 = vmatpush3.bf16.msra.mxu1 %v6583_v30  ;;  %v6091_v2 = vsel %vm6070_vm12, %v6005_v4, %v6090_v57  ;;  %vm5706_vm13 = vcmp.gt.f32.partialorder %v11856_v38, 0.0 }
 0x3bb   :  { %v5940_v48 = vsel %vm5912_vm10, %v5896_v24, -inf  ;;  %v5762_v11 = vmul.f32 1.442695, %v11873_v16  ;;  %v4596_v31 = vadd.f32 %v4526_v37, %v11546_v3  ;;  %v5760_v54 = vmul.f32 1.442695, %v11877_v34  ;;  %6585 = vmatprep.subr.bf16.mxu1 %v6758_v25 }
 0x3bc   :  { %v6009_v26 = vsel %vm3450_vm3, %v5940_v48, -inf  ;;  %v5261_v44 = vadd.f32 %v5192_v5, %v5013_v10  ;;  %vm5708_vm15 = vcmp.gt.f32.partialorder %v11873_v16, 0.0  ;;  %vm5707_vm1 = vcmp.gt.f32.partialorder %v11877_v34, 0.0 }
 0x3bd   :  { %v6010_v39 = vmax.f32 %v6008_v43, %v6009_v26  ;;  %6662 = vpow2.f32 %v5762_v11  ;;  %v4764_v50 = vadd.f32 %v13970_v42, %v4596_v31 }
 0x3be   :  { %6664 = vpow2.f32 %v5760_v54  ;;  %v4910_v19 = vpop.permute.xlu1 %4909  ;;  %v11891_v58 = vadd.f32 %v13971_v6, %v5261_v44  ;;  %v5574_v17 = vpop.permute.xlu0 %5573  ;;  %v13974_v54 = vld [vmem:[#allocation24_spill] sm:$0xff] }
 0x3bf   :  { %v6013_v3 = vrot.slane %v6010_v39, 4  ;;  %v4980_v46 = vadd.f32 %v4910_v19, %v4764_v50  ;;  %v13975_v50 = vld [vmem:[#allocation109_spill] sm:$0xff] }
 0x3c1   :  { %v6014_v62 = vmax.f32 %v6010_v39, %v6013_v3  ;;  %v5012_v10 = vadd.f32 %v4980_v46, %v13972_v59 }
 0x3c2   :  { %v5572_v36 = vpop.permute.xlu1 %5571  ;;  %v4534_v33 = vpop.permute.xlu0 %4533 }
 0x3c3   :  { %v6661_v15 = vpop.eup %6660  ;;  %v6015_v52 = vrot.slane %v6014_v62, 2  ;;  %v5643_v0 = vadd.f32 %v5572_v36, %v5427_v32  ;;  %v4600_v4 = vadd.f32 %v4534_v33, %v11559_v56 }
 0x3c4   :  { %v6464_v55 = vadd.f32 -1.0, %v6661_v15 }
 0x3c5   :  { %v6016_v43 = vmax.f32 %v6014_v62, %v6015_v52  ;;  %v11896_v22 = vadd.f32 %v13807_v21, %v5643_v0  ;;  %v4768_v37 = vadd.f32 %v13973_v8, %v4600_v4  ;;  %v13976_v0 = vld [vmem:[#allocation84_spill] sm:$0xff] }
 0x3c6   :  { %v5834_v7 = vmul.f32 1.6732632, %v6464_v55  ;;  %v4532_v24 = vpop.permute.xlu1 %4531  ;;  %v4918_v48 = vpop.permute.xlu0 %4917 }
 0x3c7   :  { %v6663_v35 = vpop.eup %6662  ;;  %v5766_v57 = vmul.f32 1.442695, %v11896_v22  ;;  %v4599_v30 = vadd.f32 %v4532_v24, %v11562_v47  ;;  %v6017_v11 = vrot.slane %v6016_v43, 1  ;;  %v4984_v56 = vadd.f32 %v4918_v48, %v4768_v37 }
 0x3c8   :  { %v6665_v32 = vpop.eup %6664  ;;  %v6466_v31 = vadd.f32 -1.0, %v6663_v35  ;;  %v5866_v5 = vsel %vm5706_vm13, %v11856_v38, %v5834_v7  ;;  %vm5710_vm4 = vcmp.gt.f32.partialorder %v11896_v22, 0.0 }
 0x3c9   :  { %v6465_v26 = vadd.f32 -1.0, %v6665_v32  ;;  %v4767_v44 = vadd.f32 %v13974_v54, %v4599_v30  ;;  %6666 = vpow2.f32 %v5766_v57  ;;  %v5016_v19 = vadd.f32 %v4984_v56, %v13975_v50  ;;  %v6105_v57 = vld [vmem:[%s12368_s3 + $0x28] sm:$0xff]  ;;  %v6107_v56 = vld [vmem:[%s12368_s3 + $0x38] sm:$0xff] }
 0x3ca   :  { %v5836_v39 = vmul.f32 1.6732632, %v6466_v31  ;;  %v5190_v42 = vpop.permute.xlu1 %5189  ;;  %v6018_v6 = vmax.f32 %v6016_v43, %v6017_v11  ;;  %v4536_v46 = vpop.permute.xlu0 %4535  ;;  %v5898_v62 = vmul.f32 1.050701, %v5866_v5  ;;  %v13977_v43 = vld [vmem:[#allocation13_spill] sm:$0xff]  ;;  %v13978_v11 = vld [vmem:[#allocation124_spill] sm:$0xff] }
 0x3cb   :  { %v5835_v47 = vmul.f32 1.6732632, %v6465_v26  ;;  %v5260_v3 = vadd.f32 %v5190_v42, %v5012_v10  ;;  %v4601_v59 = vadd.f32 %v4536_v46, %v11599_v53  ;;  %v13979_v26 = vld [vmem:[#allocation133_spill] sm:$0xff] }
 0x3cc   :  { %v5868_v38 = vsel %vm5708_vm15, %v11873_v16, %v5836_v39  ;;  %v11910_v36 = vsel %vm6072_vm14, %v6018_v6, %v6091_v2  ;;  %v6019_v53 = vsel %vm3450_vm3, %v5898_v62, -inf }
 0x3cd   :  { %v5900_v15 = vmul.f32 1.050701, %v5868_v38  ;;  %v5867_v52 = vsel %vm5707_vm1, %v11877_v34, %v5835_v47  ;;  %v5428_v33 = vadd.f32 %v13976_v0, %v5260_v3  ;;  %v4769_v7 = vadd.f32 %v13977_v43, %v4601_v59  ;;  %v6104_v34 = vld [vmem:[%s12368_s3 + $0x20] sm:$0xff]  ;;  %v6109_v3 = vld [vmem:[%s12368_s3 + $0x48] sm:$0xff]  ;;  %v6111_v43 = vld [vmem:[%s12368_s3 + $0x58] sm:$0xff] }
 0x3ce   :  { %v5899_v55 = vmul.f32 1.050701, %v5867_v52  ;;  %v4916_v4 = vpop.permute.xlu1 %4915  ;;  %v4920_v16 = vpop.permute.xlu0 %4919  ;;  %v6586_v31 = vpack.c.bf16 %v6105_v57, %v6104_v34  ;;  %v6108_v47 = vld [vmem:[%s12368_s3 + $0x40] sm:$0xff] }
 0x3cf   :  { %v5944_v10 = vsel %vm5912_vm10, %v5900_v15, -inf  ;;  %v5644_v24 = vadd.f32 %v5574_v17, %v5428_v33  ;;  %v4983_v8 = vadd.f32 %v4916_v4, %v4767_v44  ;;  %v4985_v35 = vadd.f32 %v4920_v16, %v4769_v7  ;;  %v6106_v17 = vld [vmem:[%s12368_s3 + $0x30] sm:$0xff] }
 0x3d0   :  { %v6020_v2 = vsel %vm3450_vm3, %v5899_v55, -inf  ;;  %v6022_v37 = vsel %vm3450_vm3, %v5944_v10, -inf  ;;  %6587 = vmatpush3.bf16.msra.mxu1 %v6586_v31  ;;  %v6589_v6 = vpack.c.bf16 %v6107_v56, %v6106_v17  ;;  %v6592_v59 = vpack.c.bf16 %v6109_v3, %v6108_v47  ;;  %v6110_v4 = vld [vmem:[%s12368_s3 + $0x50] sm:$0xff]  ;;  %v13982_v31 = vld [vmem:[#allocation261_spill] sm:$0xff] }
 0x3d1   :  { %v6021_v30 = vmax.f32 %v6019_v53, %v6020_v2  ;;  %v11930_v48 = vadd.f32 %v13807_v21, %v5644_v24  ;;  %v5015_v32 = vadd.f32 %v4983_v8, %v13978_v11  ;;  %v5017_v54 = vadd.f32 %v4985_v35, %v13979_v26  ;;  %6588 = vmatprep.subr.bf16.mxu1 %v6758_v25  ;;  %v13980_v24 = vld [vmem:[#allocation102_spill] sm:$0xff]  ;;  %v6113_v11 = vld [vmem:[%s12368_s3 + $0x68] sm:$0xff] }
 0x3d2   :  { %v5576_v5 = vpop.permute.xlu1 %5575  ;;  %v5580_v50 = vpop.permute.xlu0 %5579  ;;  %v13981_v53 = vld [vmem:[#allocation70_spill] sm:$0xff] }
 0x3d3   :  { %v6023_v44 = vmax.f32 %v6021_v30, %v6022_v37  ;;  %v5768_v39 = vmul.f32 1.442695, %v11930_v48  ;;  %v5645_v42 = vadd.f32 %v5576_v5, %v11891_v58  ;;  %v6667_v46 = vpop.eup %6666  ;;  %v6595_v37 = vpack.c.bf16 %v6111_v43, %v6110_v4 }
 0x3d4   :  { %v6468_v52 = vadd.f32 -1.0, %v6667_v46  ;;  %6590 = vmatpush3.bf16.msra.mxu1 %v6589_v6  ;;  %vm5711_vm5 = vcmp.gt.f32.partialorder %v11930_v48, 0.0 }
 0x3d5   :  { %v6026_v62 = vrot.slane %v6023_v44, 4  ;;  %6668 = vpow2.f32 %v5768_v39  ;;  %v11947_v38 = vadd.f32 %v13807_v21, %v5645_v42  ;;  %6591 = vmatprep.subr.bf16.mxu1 %v6758_v25 }
 0x3d6   :  { %v5196_v58 = vpop.permute.xlu1 %5195  ;;  %v5198_v55 = vpop.permute.xlu0 %5197  ;;  %v5838_v35 = vmul.f32 1.6732632, %v6468_v52 }
 0x3d7   :  { %v6027_v15 = vmax.f32 %v6023_v44, %v6026_v62  ;;  %v5770_v0 = vmul.f32 1.442695, %v11947_v38  ;;  %v5263_v33 = vadd.f32 %v5196_v58, %v5015_v32  ;;  %v5264_v7 = vadd.f32 %v5198_v55, %v5016_v19  ;;  %v6112_v19 = vld [vmem:[%s12368_s3 + $0x60] sm:$0xff]  ;;  %v6114_v58 = vld [vmem:[%s12368_s3 + $0x70] sm:$0xff] }
 0x3d8   :  { %6593 = vmatpush3.bf16.msra.mxu1 %v6592_v59  ;;  %v5870_v39 = vsel %vm5710_vm4, %v11896_v22, %v5838_v35  ;;  %v6115_v22 = vld [vmem:[%s12368_s3 + $0x78] sm:$0xff]  ;;  %v13984_v35 = vld [vmem:[#allocation165_spill] sm:$0xff]  ;;  %vm5712_vm6 = vcmp.gt.f32.partialorder %v11947_v38, 0.0 }
 0x3d9   :  { %v6028_v10 = vrot.slane %v6027_v15, 2  ;;  %6670 = vpow2.f32 %v5770_v0  ;;  %v5431_v8 = vadd.f32 %v13980_v24, %v5263_v33  ;;  %v5432_v2 = vadd.f32 %v13981_v53, %v5264_v7  ;;  %6594 = vmatprep.subr.bf16.mxu1 %v6758_v25  ;;  %v11990_v0 = vld [vmem:[%s12367_s2] ss:$0 sm:$0xff] }
 0x3da   :  { %v5200_v16 = vpop.permute.xlu1 %5199  ;;  %v5584_v17 = vpop.permute.xlu0 %5583  ;;  %v5902_v52 = vmul.f32 1.050701, %v5870_v39  ;;  %v6601_v24 = vpack.c.bf16 %v6115_v22, %v6114_v58 }
 0x3db   :  { %v5647_v34 = vadd.f32 %v5580_v50, %v5431_v8  ;;  %v5265_v57 = vadd.f32 %v5200_v16, %v5017_v54  ;;  %v6029_v30 = vmax.f32 %v6027_v15, %v6028_v10  ;;  %v6598_v54 = vpack.c.bf16 %v6113_v11, %v6112_v19 }
 0x3dc   :  { %6596 = vmatpush3.bf16.msra.mxu1 %v6595_v37 }
 0x3dd   :  { %v11967_v32 = vadd.f32 %v13807_v21, %v5647_v34  ;;  %v5433_v56 = vadd.f32 %v13982_v31, %v5265_v57  ;;  %v6030_v5 = vrot.slane %v6029_v30, 1  ;;  %6597 = vmatprep.subr.bf16.mxu1 %v6758_v25  ;;  %v6032_v57 = vsel %vm3450_vm3, %v5902_v52, -inf }
 0x3de   :  { %v5582_v26 = vpop.permute.xlu1 %5581  ;;  %v3041_v47 = vpop.permute.xlu0 %3040 }
 0x3df   :  { %v6669_v44 = vpop.eup %6668  ;;  %v5774_v42 = vmul.f32 1.442695, %v11967_v32  ;;  %v5649_v50 = vadd.f32 %v5584_v17, %v5433_v56  ;;  %v5648_v6 = vadd.f32 %v5582_v26, %v5432_v2  ;;  %v3124_v46 = vadd.f32 %v3041_v47, %v11379_v13 }
 0x3e0   :  { %v6469_v3 = vadd.f32 -1.0, %v6669_v44  ;;  %v6031_v62 = vmax.f32 %v6029_v30, %v6030_v5  ;;  %6599 = vmatpush3.bf16.msra.mxu1 %v6598_v54  ;;  %v13985_v5 = vld [vmem:[#allocation251_spill] sm:$0xff]  ;;  %v13986_v54 = vld [vmem:[#allocation189_spill] sm:$0xff]  ;;  %vm5714_vm7 = vcmp.gt.f32.partialorder %v11967_v32, 0.0 }
 0x3e1   :  { %6672 = vpow2.f32 %v5774_v42  ;;  %v11982_v59 = vadd.f32 %v13807_v21, %v5649_v50  ;;  %v11985_v15 = vadd.f32 %v13807_v21, %v5648_v6  ;;  %v11993_v33 = vadd.f32 %v11990_v0, %v3124_v46  ;;  %6600 = vmatprep.subr.bf16.mxu1 %v6758_v25 }
 0x3e2   :  { %v5839_v13 = vmul.f32 1.6732632, %v6469_v3  ;;  %v3029_v55 = vpop.permute.xlu1 %3028  ;;  %v11997_v4 = vsel %vm6074_vm0, %v6031_v62, %v11910_v36  ;;  %v2677_v10 = vpop.permute.xlu0 %2676  ;;  %v13983_v36 = vld [vmem:[#allocation12_spill] sm:$0xff] }
 0x3e3   :  { %v6671_v43 = vpop.eup %6670  ;;  %v5778_v21 = vmul.f32 1.442695, %v11982_v59  ;;  %v5776_v7 = vmul.f32 1.442695, %v11985_v15  ;;  %v3238_v53 = vmul.f32 1.442695, %v11993_v33  ;;  %v3118_v37 = vadd.f32 %v3029_v55, %v13983_v36 }
 0x3e4   :  { %v5871_v8 = vsel %vm5711_vm5, %v11930_v48, %v5839_v13  ;;  %v6470_v16 = vadd.f32 -1.0, %v6671_v43  ;;  %v2749_v34 = vadd.f32 %v2677_v10, %v13984_v35  ;;  %6602 = vmatpush3.bf16.msra.mxu1 %v6601_v24  ;;  %v13987_v13 = vld [vmem:[#allocation154_spill] sm:$0xff]  ;;  %vm5716_vm8 = vcmp.gt.f32.partialorder %v11982_v59, 0.0 }
 0x3e5   :  { %v5903_v2 = vmul.f32 1.050701, %v5871_v8  ;;  %6674 = vpow2.f32 %v5778_v21  ;;  %v12011_v19 = vadd.f32 %v11990_v0, %v3118_v37  ;;  %vm5715_vm9 = vcmp.gt.f32.partialorder %v11985_v15, 0.0 }
 0x3e6   :  { %v5840_v17 = vmul.f32 1.6732632, %v6470_v16  ;;  %6676 = vpow2.f32 %v5776_v7  ;;  %v3043_v30 = vpop.permute.xlu1 %3042  ;;  %v3023_v11 = vpop.permute.xlu0 %3022  ;;  %v12017_v44 = vadd.f32 %v13986_v54, %v2749_v34  ;;  %vm3194_vm13 = vcmp.gt.f32.partialorder %v11993_v33, 0.0 }
 0x3e7   :  { %v6033_v48 = vsel %vm3450_vm3, %v5903_v2, -inf  ;;  %6678 = vpow2.f32 %v3238_v53  ;;  %v3125_v25 = vadd.f32 %v3043_v30, %v11461_v12  ;;  %v3115_v26 = vadd.f32 %v3023_v11, %v13985_v5  ;;  %v13988_v53 = vld [vmem:[#allocation194_spill] sm:$0xff] }
 0x3e8   :  { %v5872_v31 = vsel %vm5712_vm6, %v11947_v38, %v5840_v17  ;;  %v6034_v56 = vmax.f32 %v6032_v57, %v6033_v48  ;;  %v3226_v42 = vmul.f32 1.442695, %v12011_v19  ;;  %v12047_v30 = vadd.s32 24, %v11483_v63 }
 0x3e9   :  { %v5904_v39 = vmul.f32 1.050701, %v5872_v31  ;;  %v12021_v50 = vadd.f32 %v11990_v0, %v3125_v25  ;;  %v12024_v6 = vadd.f32 %v11990_v0, %v3115_v26  ;;  %vm3188_vm1 = vcmp.gt.f32.partialorder %v12011_v19, 0.0 }
 0x3ea   :  { %v2683_v12 = vpop.permute.xlu1 %2682  ;;  %6680 = vpow2.f32 %v3226_v42  ;;  %v3037_v46 = vpop.permute.xlu0 %3036  ;;  %vm3409_vm15 = vcmp.lt.s32.totalorder %v12047_v30, 25 }
 0x3eb   :  { %v6673_v47 = vpop.eup %6672  ;;  %v5948_v38 = vsel %vm5912_vm10, %v5904_v39, -inf  ;;  %v3240_v3 = vmul.f32 1.442695, %v12021_v50  ;;  %v3220_v22 = vmul.f32 1.442695, %v12024_v6  ;;  %v2752_v55 = vadd.f32 %v2683_v12, %v13987_v13 }
 0x3ec   :  { %v6035_v62 = vsel %vm3450_vm3, %v5948_v38, -inf  ;;  %v6472_v58 = vadd.f32 -1.0, %v6673_v47  ;;  %v3122_v43 = vadd.f32 %v3037_v46, %v11472_v41  ;;  %vm3185_vm4 = vcmp.gt.f32.partialorder %v12024_v6, 0.0 }
 0x3ed   :  { %v12031_v52 = vmax.f32 %v6034_v56, %v6035_v62  ;;  %6682 = vpow2.f32 %v3240_v3  ;;  %v12041_v2 = vadd.f32 %v13988_v53, %v2752_v55 }
 0x3ee   :  { %v5842_v21 = vmul.f32 1.6732632, %v6472_v58  ;;  %6684 = vpow2.f32 %v3220_v22  ;;  %v3031_v7 = vpop.permute.xlu1 %3030  ;;  %v12037_v24 = vadd.f32 %v11990_v0, %v3122_v43  ;;  %v3051_v16 = vpop.permute.xlu0 %3050 }
 0x3ef   :  { %v6675_v10 = vpop.eup %6674  ;;  %v3119_v8 = vadd.f32 %v3031_v7, %v11388_v29  ;;  %v3129_v41 = vadd.f32 %v3051_v16, %v11630_v27 }
 0x3f0   :  { %v6677_v36 = vpop.eup %6676  ;;  %v5874_v37 = vsel %vm5714_vm7, %v11967_v32, %v5842_v21  ;;  %v6474_v35 = vadd.f32 -1.0, %v6675_v10  ;;  %v3234_v25 = vmul.f32 1.442695, %v12037_v24  ;;  %vm3192_vm5 = vcmp.gt.f32.partialorder %v12037_v24, 0.0 }
 0x3f1   :  { %v6679_v34 = vpop.eup %6678  ;;  %v5906_v57 = vmul.f32 1.050701, %v5874_v37  ;;  %v6473_v17 = vadd.f32 -1.0, %v6677_v36  ;;  %v12051_v11 = vadd.f32 %v11990_v0, %v3119_v8  ;;  %v12055_v27 = vadd.f32 %v11990_v0, %v3129_v41 }
 0x3f2   :  { %v5844_v48 = vmul.f32 1.6732632, %v6474_v35  ;;  %v6424_v29 = vadd.f32 -1.0, %v6679_v34  ;;  %v3049_v31 = vpop.permute.xlu1 %3048  ;;  %v12058_v5 = vpop.permute.xlu0 %2690  ;;  %6686 = vpow2.f32 %v3234_v25 }
 0x3f3   :  { %v5843_v32 = vmul.f32 1.6732632, %v6473_v17  ;;  %v3128_v56 = vadd.f32 %v3049_v31, %v11595_v14  ;;  %v6045_v12 = vsel %vm3450_vm3, %v5906_v57, -inf  ;;  %v3228_v47 = vmul.f32 1.442695, %v12051_v11  ;;  %v13989_v31 = vld [vmem:[#allocation247_spill] sm:$0xff] }
 0x3f4   :  { %v5876_v63 = vsel %vm5716_vm8, %v11982_v59, %v5844_v48  ;;  %v3322_v26 = vmul.f32 1.6732632, %v6424_v29  ;;  %v6681_v54 = vpop.eup %6680  ;;  %v3248_v59 = vmul.f32 1.442695, %v12055_v27  ;;  %vm3189_vm6 = vcmp.gt.f32.partialorder %v12051_v11, 0.0 }
 0x3f5   :  { %v5908_v39 = vmul.f32 1.050701, %v5876_v63  ;;  %v5875_v42 = vsel %vm5715_vm9, %v11985_v15, %v5843_v32  ;;  %v6418_v3 = vadd.f32 -1.0, %v6681_v54  ;;  %6688 = vpow2.f32 %v3228_v47  ;;  %v13990_v63 = vld [vmem:[#allocation213_spill] sm:$0xff] }
 0x3f6   :  { %v5907_v38 = vmul.f32 1.050701, %v5875_v42  ;;  %v3354_v14 = vsel %vm3194_vm13, %v11993_v33, %v3322_v26  ;;  %v12068_v46 = vpop.permute.xlu1 %2684  ;;  %v12073_v15 = vadd.f32 %v11990_v0, %v3128_v56  ;;  %v3045_v13 = vpop.permute.xlu0 %3044  ;;  %6690 = vpow2.f32 %v3248_v59  ;;  %v13991_v26 = vld [vmem:[#allocation114_spill] sm:$0xff] }
 0x3f7   :  { %v6683_v62 = vpop.eup %6682  ;;  %v5952_v58 = vsel %vm5912_vm10, %v5908_v39, -inf  ;;  %v3386_v22 = vmul.f32 1.050701, %v3354_v14  ;;  %v3316_v21 = vmul.f32 1.6732632, %v6418_v3  ;;  %vm3195_vm10 = vcmp.gt.f32.partialorder %v12021_v50, 0.0 }
 0x3f8   :  { %v6685_v55 = vpop.eup %6684  ;;  %v6048_v43 = vsel %vm3450_vm3, %v5952_v58, -inf  ;;  %v6046_v33 = vsel %vm3450_vm3, %v5907_v38, -inf  ;;  %v6425_v7 = vadd.f32 -1.0, %v6683_v62  ;;  %v3246_v53 = vmul.f32 1.442695, %v12073_v15 }
 0x3f9   :  { %v6047_v10 = vmax.f32 %v6045_v12, %v6046_v33  ;;  %v6415_v8 = vadd.f32 -1.0, %v6685_v55  ;;  %v3348_v60 = vsel %vm3188_vm1, %v12011_v19, %v3316_v21  ;;  %v12085_v57 = vsel %vm3450_vm3, %v3386_v22, -inf }
 0x3fa   :  { %v3323_v16 = vmul.f32 1.6732632, %v6425_v7  ;;  %v3039_v36 = vpop.permute.xlu1 %3038  ;;  %v3380_v35 = vmul.f32 1.050701, %v3348_v60  ;;  %v3059_v34 = vpop.permute.xlu0 %3058  ;;  %6692 = vpow2.f32 %v3246_v53  ;;  %v3126_v19 = vadd.f32 %v3045_v13, %v11571_v40 }
 0x3fb   :  { %v12081_v37 = vmax.f32 %v6047_v10, %v6048_v43  ;;  %v3313_v41 = vmul.f32 1.6732632, %v6415_v8  ;;  %v3123_v32 = vadd.f32 %v3039_v36, %v13989_v31  ;;  %v13992_v54 = vmax.f32 %v13990_v63, %v13991_v26  ;;  %v13993_v43 = vld [vmem:[#allocation43_spill] sm:$0xff]  ;;  %v13994_v31 = vld [vmem:[#allocation292_spill] sm:$0xff] }
 0x3fc   :  { %v3355_v17 = vsel %vm3195_vm10, %v12021_v50, %v3323_v16  ;;  %v3467_v48 = vsel %vm3450_vm3, %v3380_v35, -inf  ;;  %v6687_v56 = vpop.eup %6686  ;;  %v12096_v12 = vadd.f32 %v11990_v0, %v3126_v19  ;;  %v3133_v50 = vadd.f32 %v3059_v34, %v11686_v51 }
 0x3fd   :  { %v3387_v29 = vmul.f32 1.050701, %v3355_v17  ;;  %v3345_v25 = vsel %vm3185_vm4, %v12024_v6, %v3313_v41  ;;  %v3468_v39 = vmax.f32 %v13992_v54, %v3467_v48  ;;  %v6422_v38 = vadd.f32 -1.0, %v6687_v56 }
 0x3fe   :  { %v3377_v42 = vmul.f32 1.050701, %v3345_v25  ;;  %v3057_v47 = vpop.permute.xlu1 %3056  ;;  %v12103_v6 = vadd.f32 %v11990_v0, %v3123_v32  ;;  %v3047_v3 = vpop.permute.xlu0 %3046  ;;  %v3242_v58 = vmul.f32 1.442695, %v12096_v12  ;;  %v12116_v21 = vadd.f32 %v11990_v0, %v3133_v50  ;;  %v13995_v32 = vld [vmem:[#allocation5_spill] sm:$0xff] }
 0x3ff   :  { %v12100_v40 = vsel %vm3450_vm3, %v3387_v29, -inf  ;;  %v3132_v14 = vadd.f32 %v3057_v47, %v11673_v1  ;;  %v6689_v51 = vpop.eup %6688  ;;  %v3320_v13 = vmul.f32 1.6732632, %v6422_v38  ;;  %v3127_v60 = vadd.f32 %v3047_v3, %v11556_v9 }
 0x400   :  { %v3492_v59 = vmax.f32 %v12085_v57, %v12100_v40  ;;  %v3421_v62 = vsel %vm3409_vm15, %v3377_v42, -inf  ;;  %v3236_v55 = vmul.f32 1.442695, %v12103_v6  ;;  %v6419_v1 = vadd.f32 -1.0, %v6689_v51  ;;  %v6691_v7 = vpop.eup %6690 }
 0x401   :  { %v3456_v22 = vsel %vm3450_vm3, %v3421_v62, -inf  ;;  %6694 = vpow2.f32 %v3242_v58  ;;  %v3352_v10 = vsel %vm3192_vm5, %v12037_v24, %v3320_v13  ;;  %v12120_v8 = vadd.f32 %v11990_v0, %v3132_v14 }
 0x402   :  { %v3457_v33 = vmax.f32 %v13993_v43, %v3456_v22  ;;  %6696 = vpow2.f32 %v3236_v55  ;;  %v12123_v16 = vpop.permute.xlu1 %2692  ;;  %v3384_v36 = vmul.f32 1.050701, %v3352_v10  ;;  %v3317_v35 = vmul.f32 1.6732632, %v6419_v1  ;;  %v3065_v34 = vpop.permute.xlu0 %3064 }
 0x403   :  { %v6429_v41 = vadd.f32 -1.0, %v6691_v7  ;;  %v6039_v17 = vrot.slane %v12031_v52, 4  ;;  %v3256_v19 = vmul.f32 1.442695, %v12116_v21  ;;  %v3254_v24 = vmul.f32 1.442695, %v12120_v8 }
 0x404   :  { %v3458_v53 = vrot.slane %v3457_v33, 4  ;;  %v6693_v48 = vpop.eup %6692  ;;  %v3480_v29 = vsel %vm3450_vm3, %v3384_v36, -inf  ;;  %v3349_v9 = vsel %vm3189_vm6, %v12051_v11, %v3317_v35  ;;  %vm3199_vm7 = vcmp.gt.f32.partialorder %v12055_v27, 0.0 }
 0x405   :  { %v3327_v25 = vmul.f32 1.6732632, %v6429_v41  ;;  %v13996_v56 = vmax.f32 %v13994_v31, %v13995_v32  ;;  %v3381_v26 = vmul.f32 1.050701, %v3349_v9  ;;  %v6428_v54 = vadd.f32 -1.0, %v6693_v48 }
 0x406   :  { %6698 = vpow2.f32 %v3256_v19  ;;  %v3459_v42 = vmax.f32 %v3457_v33, %v3458_v53  ;;  %v12139_v47 = vadd.f32 %v11990_v0, %v3127_v60  ;;  %v12142_v11 = vmax.f32 %v12031_v52, %v6039_v17  ;;  %v3053_v3 = vpop.permute.xlu1 %3052 }
 0x407   :  { %v12135_v63 = vmax.f32 %v13996_v56, %v3480_v29  ;;  %v3359_v50 = vsel %vm3199_vm7, %v12055_v27, %v3327_v25  ;;  %6700 = vpow2.f32 %v3254_v24  ;;  %v3425_v38 = vsel %vm3409_vm15, %v3381_v26, -inf  ;;  %v3055_v27 = vpop.permute.xlu0 %3054 }
 0x408   :  { %v3326_v14 = vmul.f32 1.6732632, %v6428_v54  ;;  %v3469_v62 = vsel %vm3450_vm3, %v3425_v38, -inf  ;;  %v3391_v58 = vmul.f32 1.050701, %v3359_v50  ;;  %vm3198_vm8 = vcmp.gt.f32.partialorder %v12073_v15, 0.0 }
 0x409   :  { %v3244_v51 = vmul.f32 1.442695, %v12139_v47  ;;  %v3470_v22 = vmax.f32 %v3468_v39, %v3469_v62  ;;  %vm3196_vm9 = vcmp.gt.f32.partialorder %v12096_v12, 0.0  ;;  %v3136_v52 = vadd.f32 %v3065_v34, %v11730_v28 }
 0x40a   :  { %v3358_v13 = vsel %vm3198_vm8, %v12073_v15, %v3326_v14  ;;  %v3460_v43 = vrot.slane %v3459_v42, 2  ;;  %v3130_v1 = vadd.f32 %v3053_v3, %v11648_v45  ;;  %v3131_v39 = vadd.f32 %v3055_v27, %v11633_v49 }
 0x40b   :  { %v6695_v55 = vpop.eup %6694  ;;  %v3390_v33 = vmul.f32 1.050701, %v3358_v13  ;;  %6702 = vpow2.f32 %v3244_v51  ;;  %v3471_v10 = vrot.slane %v3470_v22, 4  ;;  %v12154_v53 = vadd.f32 %v11990_v0, %v3136_v52 }
 0x40c   :  { %v6697_v7 = vpop.eup %6696  ;;  %v6426_v60 = vadd.f32 -1.0, %v6695_v55  ;;  %v12158_v15 = vsel %vm3450_vm3, %v3391_v58, -inf  ;;  %v12164_v35 = vadd.f32 %v11990_v0, %v3130_v1  ;;  %vm3193_vm13 = vcmp.gt.f32.partialorder %v12103_v6, 0.0  ;;  %v3073_v55 = vpop.permute.xlu0 %3072 }
 0x40d   :  { %v12161_v36 = vsel %vm3450_vm3, %v3390_v33, -inf  ;;  %v6423_v28 = vadd.f32 -1.0, %v6697_v7  ;;  %v3472_v41 = vmax.f32 %v3470_v22, %v3471_v10  ;;  %v3461_v17 = vmax.f32 %v3459_v42, %v3460_v43 }
 0x40e   :  { %v3505_v45 = vmax.f32 %v12161_v36, %v12158_v15  ;;  %v3324_v34 = vmul.f32 1.6732632, %v6426_v60  ;;  %vm3203_vm1 = vcmp.gt.f32.partialorder %v12116_v21, 0.0  ;;  %v12171_v49 = vadd.f32 %v11990_v0, %v3131_v39  ;;  %v14001_v15 = vld [vmem:[#allocation148_spill] sm:$0xff] }
 0x40f   :  { %v3321_v19 = vmul.f32 1.6732632, %v6423_v28  ;;  %vm3202_vm10 = vcmp.gt.f32.partialorder %v12120_v8, 0.0  ;;  %v3262_v29 = vmul.f32 1.442695, %v12154_v53  ;;  %vm6076_vm4 = vcmask 1046534  }
 0x410   :  { %v6699_v24 = vpop.eup %6698  ;;  %v3356_v48 = vsel %vm3196_vm9, %v12096_v12, %v3324_v34  ;;  %v3250_v9 = vmul.f32 1.442695, %v12164_v35  ;;  %v6041_v26 = vrot.slane %v12142_v11, 2  ;;  %v3473_v54 = vrot.slane %v3472_v41, 2  ;;  %v3067_v12 = vpop.permute.xlu1 %3066 }
 0x411   :  { %v6701_v25 = vpop.eup %6700  ;;  %v3388_v31 = vmul.f32 1.050701, %v3356_v48  ;;  %v3353_v32 = vsel %vm3193_vm13, %v12103_v6, %v3321_v19  ;;  %v6433_v56 = vadd.f32 -1.0, %v6699_v24  ;;  %vm3197_vm5 = vcmp.gt.f32.partialorder %v12139_v47, 0.0 }
 0x412   :  { %v3385_v42 = vmul.f32 1.050701, %v3353_v32  ;;  %v6432_v50 = vadd.f32 -1.0, %v6701_v25  ;;  %6704 = vpow2.f32 %v3250_v9  ;;  %v3462_v38 = vrot.slane %v3461_v17, 1 }
 0x413   :  { %v3493_v14 = vsel %vm3450_vm3, %v3388_v31, -inf  ;;  %v3331_v3 = vmul.f32 1.6732632, %v6433_v56  ;;  %v3252_v62 = vmul.f32 1.442695, %v12171_v49  ;;  %6706 = vpow2.f32 %v3262_v29  ;;  %v13998_v56 = vld [vmem:[#allocation142_spill] sm:$0xff] }
 0x414   :  { %v3494_v6 = vmax.f32 %v3492_v59, %v3493_v14  ;;  %v3429_v58 = vsel %vm3409_vm15, %v3385_v42, -inf  ;;  %v3330_v51 = vmul.f32 1.6732632, %v6432_v50  ;;  %v6042_v52 = vmax.f32 %v12142_v11, %v6041_v26  ;;  %v13999_v42 = vld [vmem:[#allocation64_spill] sm:$0xff] }
 0x415   :  { %v6703_v27 = vpop.eup %6702  ;;  %v3482_v22 = vsel %vm3450_vm3, %v3429_v58, -inf  ;;  %v3363_v13 = vsel %vm3203_vm1, %v12116_v21, %v3331_v3  ;;  %6708 = vpow2.f32 %v3252_v62  ;;  %v3474_v43 = vmax.f32 %v3472_v41, %v3473_v54 }
 0x416   :  { %v3483_v57 = vmax.f32 %v12135_v63, %v3482_v22  ;;  %v3395_v40 = vmul.f32 1.050701, %v3363_v13  ;;  %v3362_v59 = vsel %vm3202_vm10, %v12120_v8, %v3330_v51  ;;  %v6427_v1 = vadd.f32 -1.0, %v6703_v27  ;;  %v3061_v63 = vpop.permute.xlu1 %3060 }
 0x417   :  { %v3394_v33 = vmul.f32 1.050701, %v3362_v59  ;;  %v6043_v7 = vrot.slane %v6042_v52, 1  ;;  %v6052_v10 = vrot.slane %v12081_v37, 4  ;;  %vm6078_vm6 = vcmask 1047559  }
 0x418   :  { %v3484_v60 = vrot.slane %v3483_v57, 4  ;;  %v12200_v21 = vsel %vm3450_vm3, %v3395_v40, -inf  ;;  %v3137_v11 = vadd.f32 %v3067_v12, %v11766_v23  ;;  %v3140_v39 = vadd.f32 %v3073_v55, %v11779_v18  ;;  %v13997_v23 = vld [vmem:[#allocation129_spill] sm:$0xff] }
 0x419   :  { %v12205_v28 = vsel %vm3450_vm3, %v3394_v33, -inf  ;;  %v3325_v41 = vmul.f32 1.6732632, %v6427_v1  ;;  %v6044_v8 = vmax.f32 %v6042_v52, %v6043_v7  ;;  %v6053_v34 = vmax.f32 %v12081_v37, %v6052_v10 }
 0x41a   :  { %v3485_v19 = vmax.f32 %v3483_v57, %v3484_v60  ;;  %v3518_v24 = vmax.f32 %v12205_v28, %v12200_v21  ;;  %v12211_v48 = vadd.f32 %v11990_v0, %v3137_v11  ;;  %v12214_v29 = vadd.f32 %v11990_v0, %v3140_v39 }
 0x41b   :  { %v12218_v18 = vadd.f32 %v12058_v5, %v13997_v23  ;;  %v3357_v9 = vsel %vm3197_vm5, %v12139_v47, %v3325_v41  ;;  %v6054_v25 = vrot.slane %v6053_v34, 2  ;;  %v6094_v37 = vsel %vm6076_vm4, %v6044_v8, %v11997_v4  ;;  %v3063_v5 = vpop.permute.xlu0 %3062 }
 0x41c   :  { %v6705_v31 = vpop.eup %6704  ;;  %v12225_v32 = vmax.f32 %v3461_v17, %v3462_v38  ;;  %v2753_v26 = vadd.f32 %v12068_v46, %v13998_v56  ;;  %v3389_v54 = vmul.f32 1.050701, %v3357_v9  ;;  %v2757_v50 = vadd.f32 %v12123_v16, %v13999_v42  ;;  %v3075_v46 = vpop.permute.xlu1 %3074 }
 0x41d   :  { %v3475_v12 = vrot.slane %v3474_v43, 1  ;;  %v6430_v14 = vadd.f32 -1.0, %v6705_v31  ;;  %v6055_v3 = vmax.f32 %v6053_v34, %v6054_v25  ;;  %v3264_v47 = vmul.f32 1.442695, %v12211_v48  ;;  %v6707_v62 = vpop.eup %6706 }
 0x41e   :  { %v3486_v58 = vrot.slane %v3485_v19, 2  ;;  %v3433_v4 = vsel %vm3409_vm15, %v3389_v54, -inf  ;;  %v3270_v17 = vmul.f32 1.442695, %v12214_v29  ;;  %v3134_v38 = vadd.f32 %v3061_v63, %v11716_v61 }
 0x41f   :  { %v6709_v51 = vpop.eup %6708  ;;  %v3495_v27 = vsel %vm3450_vm3, %v3433_v4, -inf  ;;  %v3328_v16 = vmul.f32 1.6732632, %v6430_v14  ;;  %v6056_v22 = vrot.slane %v6055_v3, 1  ;;  %6710 = vpow2.f32 %v3264_v47  ;;  %v3071_v7 = vpop.permute.xlu0 %3070 }
 0x420   :  { %v3496_v13 = vmax.f32 %v3494_v6, %v3495_v27  ;;  %vm3206_vm7 = vcmp.gt.f32.partialorder %v12154_v53, 0.0  ;;  %vm3200_vm8 = vcmp.gt.f32.partialorder %v12164_v35, 0.0  ;;  %vm3201_vm9 = vcmp.gt.f32.partialorder %v12171_v49, 0.0  ;;  %v3069_v41 = vpop.permute.xlu1 %3068 }
 0x421   :  { %v6431_v52 = vadd.f32 -1.0, %v6709_v51  ;;  %v6436_v55 = vadd.f32 -1.0, %v6707_v62  ;;  %v3360_v57 = vsel %vm3200_vm8, %v12164_v35, %v3328_v16  ;;  %v6057_v40 = vmax.f32 %v6055_v3, %v6056_v22 }
 0x422   :  { %6712 = vpow2.f32 %v3270_v17  ;;  %v12241_v61 = vmax.f32 %v3474_v43, %v3475_v12  ;;  %v3497_v59 = vrot.slane %v3496_v13, 4  ;;  %v3392_v33 = vmul.f32 1.050701, %v3360_v57 }
 0x423   :  { %v3329_v1 = vmul.f32 1.6732632, %v6431_v52  ;;  %v3487_v10 = vmax.f32 %v3485_v19, %v3486_v58  ;;  %v6095_v6 = vsel %vm6078_vm6, %v6057_v40, %v6094_v37  ;;  %v12245_v60 = vadd.f32 %v11990_v0, %v3134_v38 }
 0x424   :  { %v3135_v11 = vadd.f32 %v3063_v5, %v12017_v44  ;;  %v3498_v39 = vmax.f32 %v3496_v13, %v3497_v59  ;;  %v3506_v63 = vsel %vm3450_vm3, %v3392_v33, -inf  ;;  %6096 = vrot.lane.b32.xlu1 %v6095_v6, %s6757_s10  ;;  %v3141_v43 = vadd.f32 %v3075_v46, %v11816_v20  ;;  %v3079_v5 = vpop.permute.xlu0 %3078  ;;  %v3077_v40 = vpop.permute.xlu1 %3076  ;;  %v14002_v59 = vld [vmem:[#allocation174_spill] sm:$0xff]  ;;  %s6760_s10 = smov [#allocation2]  }
 0x425   :  { %v3361_v35 = vsel %vm3201_vm9, %v12171_v49, %v3329_v1  ;;  %v3334_v8 = vmul.f32 1.6732632, %v6436_v55  ;;  %v3507_v34 = vmax.f32 %v3505_v45, %v3506_v63  ;;  %v3258_v44 = vmul.f32 1.442695, %v12245_v60  ;;  %v14000_v49 = vld [vmem:[#allocation48_spill] sm:$0xff]  ;;  %s6201_s21 = sshll.u32 %s6760_s10, 4  ;;  %s6202_s21 = int_to_ptr.vmem [resolvable:$true] %s6201_s21 }
 0x426   :  { %v3393_v19 = vmul.f32 1.050701, %v3361_v35  ;;  %v3499_v23 = vrot.slane %v3498_v39, 2  ;;  %v12259_v9 = vadd.f32 %v11990_v0, %v3135_v11  ;;  %v12262_v25 = vadd.f32 %v11990_v0, %v3141_v43  ;;  %s6730_s22 = scalar_lea.vmem %s6202_s21, 128  ;;  %p6735_p1 = scmp.lt.s32.totalorder %s6202_s21, %s6202_s21 }
 0x427   :  { %v2922_v37 = vadd.f32 %v14000_v49, %v2753_v26  ;;  %6714 = vpow2.f32 %v3258_v44  ;;  %v3138_v31 = vadd.f32 %v3069_v41, %v12041_v2  ;;  %v2926_v36 = vadd.f32 %v14001_v15, %v2757_v50  ;;  %p6731_p0 = scmp.ne.s32.totalorder %s6202_s21, %s6730_s22  ;;  %p6736_p2 = scmp.lt.s32.totalorder %s6730_s22, %s6730_s22 }
 0x428   :  { %v3437_v20 = vsel %vm3409_vm15, %v3393_v19, -inf  ;;  %v3488_v45 = vrot.slane %v3487_v10, 1  ;;  %v3500_v56 = vmax.f32 %v3498_v39, %v3499_v23  ;;  %v3260_v42 = vmul.f32 1.442695, %v12259_v9 }
 0x429   :  { %v3508_v54 = vsel %vm3450_vm3, %v3437_v20, -inf  ;;  %v6711_v12 = vpop.eup %6710  ;;  %v3366_v26 = vsel %vm3206_vm7, %v12154_v53, %v3334_v8  ;;  %v3272_v3 = vmul.f32 1.442695, %v12262_v25  ;;  %v3139_v47 = vadd.f32 %v3071_v7, %v2922_v37  ;;  %p6737_p3 = por %p6736_p2, %p6735_p1 }
 0x42a   :  { %v3509_v14 = vmax.f32 %v3507_v34, %v3508_v54  ;;  %v3501_v62 = vrot.slane %v3500_v56, 1  ;;  %v6437_v2 = vadd.f32 -1.0, %v6711_v12  ;;  %6716 = vpow2.f32 %v3260_v42 }
 0x42b   :  { %v12276_v50 = vadd.f32 %v11990_v0, %v3138_v31  ;;  %6718 = vpow2.f32 %v3272_v3  ;;  %v12279_v17 = vadd.f32 %v11990_v0, %v3139_v47  ;;  %v3143_v38 = vadd.f32 %v3079_v5, %v2926_v36  ;;  %p6738_p4 = pnand %p6737_p3, %p6731_p0 }
 0x42c   :  { %v6713_v58 = vpop.eup %6712  ;;  %v3510_v4 = vrot.slane %v3509_v14, 4  ;;  %v3489_v46 = vmax.f32 %v3487_v10, %v3488_v45  ;;  %v3398_v51 = vmul.f32 1.050701, %v3366_v26  ;;  %vm3207_vm13 = vcmp.gt.f32.partialorder %v12211_v48, 0.0 }
 0x42d   :  { %v3335_v53 = vmul.f32 1.6732632, %v6437_v2  ;;  %v6440_v16 = vadd.f32 -1.0, %v6713_v58  ;;  %v3268_v22 = vmul.f32 1.442695, %v12279_v17  ;;  %v3502_v52 = vmax.f32 %v3500_v56, %v3501_v62 }
 0x42e   :  { %v3511_v27 = vmax.f32 %v3509_v14, %v3510_v4  ;;  %v3266_v13 = vmul.f32 1.442695, %v12276_v50  ;;  %v12286_v57 = vadd.f32 %v11990_v0, %v3143_v38  ;;  %v2925_v33 = vadd.f32 %v14002_v59, %v12218_v18 }
 0x42f   :  { %v3367_v55 = vsel %vm3207_vm13, %v12211_v48, %v3335_v53  ;;  %6720 = vpow2.f32 %v3268_v22  ;;  %v6067_v10 = vsel %vm6066_vm2, %v12241_v61, %v12225_v32  ;;  %v12294_v6 = vsel %vm3450_vm3, %v3398_v51, -inf }
 0x430   :  { %v3512_v1 = vrot.slane %v3511_v27, 2  ;;  %v3399_v7 = vmul.f32 1.050701, %v3367_v55  ;;  %6722 = vpow2.f32 %v3266_v13  ;;  %v3276_v48 = vmul.f32 1.442695, %v12286_v57 }
 0x431   :  { %v6715_v11 = vpop.eup %6714  ;;  %v3338_v35 = vmul.f32 1.6732632, %v6440_v16  ;;  %v3142_v18 = vadd.f32 %v3077_v40, %v2925_v33  ;;  %v6069_v32 = vsel %vm6068_vm11, %v3489_v46, %v6067_v10  ;;  %vm3210_vm2 = vcmp.gt.f32.partialorder %v12214_v29, 0.0 }
 0x432   :  { %v3513_v39 = vmax.f32 %v3511_v27, %v3512_v1  ;;  %v12298_v63 = vsel %vm3450_vm3, %v3399_v7, -inf  ;;  %v6434_v41 = vadd.f32 -1.0, %v6715_v11  ;;  %6724 = vpow2.f32 %v3276_v48 }
 0x433   :  { %v3531_v43 = vmax.f32 %v12294_v6, %v12298_v63  ;;  %v12304_v61 = vadd.f32 %v11990_v0, %v3142_v18  ;;  %v6071_v34 = vsel %vm6070_vm12, %v3502_v52, %v6069_v32  ;;  %vm3204_vm1 = vcmp.gt.f32.partialorder %v12245_v60, 0.0 }
 0x434   :  { %v3514_v8 = vrot.slane %v3513_v39, 1  ;;  %v6717_v19 = vpop.eup %6716  ;;  %v3332_v44 = vmul.f32 1.6732632, %v6434_v41  ;;  %v3370_v49 = vsel %vm3210_vm2, %v12214_v29, %v3338_v35  ;;  %vm6759_vm11 = vmmov 0  }
 0x435   :  { %v6719_v23 = vpop.eup %6718  ;;  %v6435_v37 = vadd.f32 -1.0, %v6717_v19  ;;  %v3274_v20 = vmul.f32 1.442695, %v12304_v61  ;;  %v14003_v15 = vmov 0.0   ;;  %v3402_v42 = vmul.f32 1.050701, %v3370_v49 }
 0x436   :  { %v3515_v31 = vmax.f32 %v3513_v39, %v3514_v8  ;;  %6526 = vmatprep.mubr.msk.f32.mxu1 %vm6759_vm11, %v14003_v15  ;;  %v3364_v0 = vsel %vm3204_vm1, %v12245_v60, %v3332_v44  ;;  %v6441_v36 = vadd.f32 -1.0, %v6719_v23  ;;  %vm3205_vm12 = vcmp.gt.f32.partialorder %v12259_v9, 0.0 }
 0x437   :  { %v3396_v45 = vmul.f32 1.050701, %v3364_v0  ;;  %v3333_v56 = vmul.f32 1.6732632, %v6435_v37  ;;  %6726 = vpow2.f32 %v3274_v20  ;;  %vm3211_vm10 = vcmp.gt.f32.partialorder %v12262_v25, 0.0 }
 0x438   :  { %v6073_v54 = vsel %vm6072_vm14, %v3515_v31, %v6071_v34  ;;  %v3339_v5 = vmul.f32 1.6732632, %v6441_v36  ;;  %v3542_v38 = vsel %vm3450_vm3, %v3402_v42, -inf  ;;  %vm3209_vm14 = vcmp.gt.f32.partialorder %v12279_v17, 0.0 }
 0x439   :  { %v6721_v29 = vpop.eup %6720  ;;  %v3519_v12 = vsel %vm3450_vm3, %v3396_v45, -inf  ;;  %v3365_v26 = vsel %vm3205_vm12, %v12259_v9, %v3333_v56  ;;  %vm3208_vm5 = vcmp.gt.f32.partialorder %v12276_v50, 0.0  ;;  %vm3213_vm7 = vcmp.gt.f32.partialorder %v12286_v57, 0.0 }
 0x43a   :  { %v6723_v14 = vpop.eup %6722  ;;  %v3520_v60 = vmax.f32 %v3518_v24, %v3519_v12  ;;  %v3397_v3 = vmul.f32 1.050701, %v3365_v26  ;;  %v3371_v47 = vsel %vm3211_vm10, %v12262_v25, %v3339_v5  ;;  %v6439_v62 = vadd.f32 -1.0, %v6721_v29 }
 0x43b   :  { %v3403_v2 = vmul.f32 1.050701, %v3371_v47  ;;  %v6438_v58 = vadd.f32 -1.0, %v6723_v14  ;;  %vm3212_vm8 = vcmp.gt.f32.partialorder %v12304_v61, 0.0 }
 0x43c   :  { %v6725_v4 = vpop.eup %6724  ;;  %v3441_v46 = vsel %vm3409_vm15, %v3397_v3, -inf  ;;  %v3337_v9 = vmul.f32 1.6732632, %v6439_v62 }
 0x43d   :  { %v3521_v51 = vsel %vm3450_vm3, %v3441_v46, -inf  ;;  %v3543_v21 = vsel %vm3450_vm3, %v3403_v2, -inf  ;;  %v3336_v28 = vmul.f32 1.6732632, %v6438_v58  ;;  %v6443_v24 = vadd.f32 -1.0, %v6725_v4 }
 0x43e   :  { %v3522_v53 = vmax.f32 %v3520_v60, %v3521_v51  ;;  %v3544_v25 = vmax.f32 %v3542_v38, %v3543_v21  ;;  %v3369_v27 = vsel %vm3209_vm14, %v12279_v17, %v3337_v9 }
 0x43f   :  { %v3401_v16 = vmul.f32 1.050701, %v3369_v27  ;;  %v3368_v22 = vsel %vm3208_vm5, %v12276_v50, %v3336_v28  ;;  %v3341_v13 = vmul.f32 1.6732632, %v6443_v24 }
 0x440   :  { %v3523_v52 = vrot.slane %v3522_v53, 4  ;;  %v3400_v55 = vmul.f32 1.050701, %v3368_v22 }
 0x441   :  { %v6727_v40 = vpop.eup %6726  ;;  %v3445_v59 = vsel %vm3409_vm15, %v3401_v16, -inf  ;;  %v3373_v7 = vsel %vm3213_vm7, %v12286_v57, %v3341_v13 }
 0x442   :  { %v3524_v33 = vmax.f32 %v3522_v53, %v3523_v52  ;;  %v3532_v1 = vsel %vm3450_vm3, %v3400_v55, -inf  ;;  %v6442_v10 = vadd.f32 -1.0, %v6727_v40  ;;  %v3534_v48 = vsel %vm3450_vm3, %v3445_v59, -inf }
 0x443   :  { %v3533_v17 = vmax.f32 %v3531_v43, %v3532_v1  ;;  %v3405_v39 = vmul.f32 1.050701, %v3373_v7 }
 0x444   :  { %v3525_v50 = vrot.slane %v3524_v33, 2  ;;  %v3340_v35 = vmul.f32 1.6732632, %v6442_v10 }
 0x445   :  { %v3535_v11 = vmax.f32 %v3533_v17, %v3534_v48  ;;  %v3449_v6 = vsel %vm3409_vm15, %v3405_v39, -inf }
 0x446   :  { %v3526_v18 = vmax.f32 %v3524_v33, %v3525_v50  ;;  %v3372_v32 = vsel %vm3212_vm8, %v12304_v61, %v3340_v35  ;;  %v3547_v23 = vsel %vm3450_vm3, %v3449_v6, -inf }
 0x447   :  { %v3536_v41 = vrot.slane %v3535_v11, 4  ;;  %v3404_v8 = vmul.f32 1.050701, %v3372_v32 }
 0x448   :  { %v3527_v34 = vrot.slane %v3526_v18, 1 }
 0x449   :  { %v3537_v57 = vmax.f32 %v3535_v11, %v3536_v41  ;;  %v3545_v63 = vsel %vm3450_vm3, %v3404_v8, -inf }
 0x44a   :  { %v3528_v43 = vmax.f32 %v3526_v18, %v3527_v34  ;;  %v3546_v19 = vmax.f32 %v3544_v25, %v3545_v63 }
 0x44b   :  { %v3538_v44 = vrot.slane %v3537_v57, 2 }
 0x44c   :  { %v6075_v49 = vsel %vm6074_vm0, %v3528_v43, %v6073_v54  ;;  %v3548_v37 = vmax.f32 %v3546_v19, %v3547_v23  ;;  %v6476_v54 = vld [vmem:[%s12369_s4] ss:$0 sm:$0xff]  ;;  %vm6193_vm0 = vcmask 130048  }
 0x44d   :  { %v3539_v20 = vmax.f32 %v3537_v57, %v3538_v44 }
 0x44e   :  { %v3549_v31 = vrot.slane %v3548_v37, 4 }
 0x44f   :  { %v3540_v15 = vrot.slane %v3539_v20, 1 }
 0x450   :  { %v3550_v0 = vmax.f32 %v3548_v37, %v3549_v31 }
 0x451   :  { %v3541_v61 = vmax.f32 %v3539_v20, %v3540_v15 }
 0x452   :  { %v3551_v36 = vrot.slane %v3550_v0, 2 }
 0x453   :  { %v6077_v45 = vsel %vm6076_vm4, %v3541_v61, %v6075_v49 }
 0x454   :  { %v3552_v30 = vmax.f32 %v3550_v0, %v3551_v36 }
 0x456   :  { %v3553_v56 = vrot.slane %v3552_v30, 1 }
 0x458   :  { %v3554_v42 = vmax.f32 %v3552_v30, %v3553_v56 }
 0x45a   :  { %v6079_v5 = vsel %vm6078_vm6, %v3554_v42, %v6077_v45 }
 0x496   :  { %v6097_v29 = vpop.permute.xlu1 %6096 }
 0x497   :  { %v6099_v12 = vsel %vm3450_vm3, %v6079_v5, %v6097_v29 }
 0x498   :  { %6527 = vmatmul.mubr.f32.vlgmr.msra.gmra.mrb[158].mxu1 %v6099_v12 }
 0x56b   :  { %v6189_v26 = vpop.f32.mrb[158].mxu1 }
 0x56c   :  { %v6190_v14 = vadd.f32 %v6476_v54, %v6189_v26  ;;  %v6528_v60 = vpop.f32.mrb[159].mxu1 }
 0x56e   :  { %6194 = vst.msk [vmem:[#allocation2] sm:$0xff] %vm6193_vm0, %v6190_v14 }
 0x56f   :  { %6741 = shalt.err (!%p6738_p4)
}
 0x570   :  { %s6742_s25 = scalar_lea.hbm %s12370_s5, 128 }
 0x571   :  { %p6743_p5 = scmp.ne.s32.totalorder %s12370_s5, %s6742_s25  ;;  %p6746_p6 = scmp.lt.u32.totalorder %s6742_s25, %s12370_s5 }
 0x573   :  { %p6748_p7 = pnand %p6746_p6, %p6743_p5 }
 0x575   :  { %6751 = shalt.err (!%p6748_p7)
}
 0x576   :  { %6204 = dma.vmem_to_hbm [thread:$0]  %s6202_s21, 128, %s12370_s5, [#allocation3]  }
 0x577   :  { %6752 = dma.done.wait [#allocation3], 128  }
 0x578   :  { %6753 = vsyncadd [#allocation3], 4294967168 }
 0x579   :  { %6208 = vsyncpa [#allocation3], 1 }

</bundles_post_ra>
